<compile_context>
chip_gen: v7x
topology: tpu7x:2x2x1
jax: 0.10.0
libtpu: 0.0.40
codegen_flags: <defaults>
</compile_context>

<pallas_src>
import jax
import jax.numpy as jnp
from jax.experimental import pallas as pl
from jax.experimental.pallas import tpu as pltpu

LANE = 128     # TPU lane width: channel axis padded to this
SUBLANE = 8    # f32 sublane granule: padded row width is a multiple of this
LEAD = 8       # leading guard rows in the flat layout (keeps the dy=0,dx=0 tap offset >= 0)
TRAIL = 8      # trailing guard rows (keeps the dy=2,dx=2 tap end in bounds)


def _round_up(x, m):
    return (x + m - 1) // m * m


# ------------------------- fused Pallas kernel -------------------------

def fused_vgg_block_kernel(x_ref, w1_ref, b1_ref, w2_ref, b2_ref, w3_ref, b3_ref,
                           o_ref, act_ref, slab_ref):
    """3x (conv3x3 'same' + ReLU) + maxpool2x2 for one batch element, all in VMEM.

    x_ref   : (rows, Cp) f32   flattened, halo/channel/guard padded input (wrapper-built)
    w*_ref  : (9*Cp, Cp) bf16  tap-major (dy*3+dx, then c_in) packed weights
    b*_ref  : (1, Cp)    f32   zero-padded bias
    o_ref   : (Ho, Wo, Cp) f32 pooled output (channel-padded; wrapper slices to Cout)
    act_ref : (rows, Cp) f32   ping-pong padded activation, same flat layout as x
    slab_ref: (M, 9*Cp)  bf16  im2col slab (LHS of the single big-K matmul per layer)
    """
    Ho, Wo, Cp = o_ref.shape
    H, W = 2 * Ho, 2 * Wo
    M, KC = slab_ref.shape            # M = H * Wp, KC = 9 * Cp
    Wp = M // H                       # padded row width (multiple of 8)
    rows = act_ref.shape[0]           # LEAD + (H + 2) * Wp + TRAIL

    # Per-iteration invariants (cheap, and safe when the "parallel" batch axis is split
    # across cores): guard + halo rows of the ping-pong activation must read as zero
    # before layers 2/3 consume them.  Halo/pad columns are handled by the masked store.
    act_ref[0:LEAD + Wp, :] = jnp.zeros((LEAD + Wp, Cp), act_ref.dtype)
    act_ref[LEAD + (H + 1) * Wp:rows, :] = jnp.zeros(
        (rows - LEAD - (H + 1) * Wp, Cp), act_ref.dtype)

    def conv_relu(src_ref, w_ref, b_ref):
        # Big-K im2col: in the flat padded layout every 3x3 tap is a CONTIGUOUS
        # row-range of the source at a static offset (no 2-D window relayouts).
        # Cast to bf16 exactly once, at the slab store.
        for dy in range(3):
            for dx in range(3):
                tap = dy * 3 + dx
                off = LEAD + dy * Wp + (dx - 1)
                slab_ref[:, tap * Cp:(tap + 1) * Cp] = (
                    src_ref[off:off + M, :].astype(slab_ref.dtype))
        # One (M, 9*Cp) x (9*Cp, Cp) MXU matmul per layer, f32 accumulation; bias +
        # ReLU on the single result (no per-tap accumulate sweeps / live accumulator).
        h = jnp.dot(slab_ref[...], w_ref[...], preferred_element_type=jnp.float32)
        return jnp.maximum(h + b_ref[...], 0.0)                  # (M, Cp) f32

    def store_act(h):
        # Zero the halo / pad columns of each padded row, then ONE full-width,
        # sublane-aligned store into the interior rows: this re-establishes the
        # padded-layout invariant for the next layer without re-zeroing the scratch.
        col = jax.lax.broadcasted_iota(jnp.int32, (H, Wp, Cp), 1).reshape(M, Cp)
        keep = (col >= 1) & (col <= W)
        act_ref[LEAD + Wp:LEAD + Wp + M, :] = jnp.where(keep, h, 0.0)

    store_act(conv_relu(x_ref, w1_ref, b1_ref))      # conv1 + ReLU : padded input -> act
    store_act(conv_relu(act_ref, w2_ref, b2_ref))    # conv2 + ReLU : act -> act
    h = conv_relu(act_ref, w3_ref, b3_ref)           # conv3 + ReLU feeds the fused pool

    # Fused 2x2 maxpool epilogue (tiny: Ho*Wo*Cp f32 = 32 KiB at these shapes).
    hv = h.reshape(Ho, 2, Wp, Cp)                    # free split: Wp is a sublane multiple
    rmax = jnp.maximum(hv[:, 0], hv[:, 1])           # pool the row pairs
    core = rmax[:, 1:W + 1, :]                       # drop halo / pad columns (once)
    cv = core.reshape(Ho, Wo, 2, Cp)
    o_ref[...] = jnp.maximum(cv[:, :, 0, :], cv[:, :, 1, :]).astype(o_ref.dtype)


# ------------------------- wrapper -------------------------

def _pack_conv_weight(w_oihw, cp):
    """(O, I, 3, 3) PyTorch layout -> (9*Cp, Cp) bf16, tap-major (dy*3+dx), padded."""
    O, I, kh, kw = w_oihw.shape
    w = jnp.transpose(w_oihw, (2, 3, 1, 0)).reshape(kh * kw, I, O)   # (9, I, O)
    w = jnp.pad(w, ((0, 0), (0, cp - I), (0, cp - O)))
    return w.reshape(kh * kw * cp, cp).astype(jnp.bfloat16)


def _pack_bias(b, cp):
    return jnp.pad(b, (0, cp - b.shape[0])).reshape(1, cp).astype(jnp.float32)


def conv_block_3layer(x_nchw, params):
    """Forward pass of ConvBlock3layer. Input/output are NCHW like PyTorch."""
    B, Cin, H, W = x_nchw.shape
    assert H % 2 == 0 and W % 2 == 0
    Cout = params["w1"].shape[0]
    Cp = _round_up(max(Cin, Cout), LANE)
    Wp = _round_up(W + 2, SUBLANE)
    Ho, Wo = H // 2, W // 2
    M = H * Wp
    rows = LEAD + (H + 2) * Wp + TRAIL

    # NCHW -> NHWC, add the 1-pixel conv halo, pad the row width to Wp and the channels
    # to Cp (lane-dense input DMA, no in-kernel padding), flatten (H+2, Wp) and add the
    # LEAD/TRAIL guard rows used by the flat im2col tap offsets.
    x = jnp.transpose(x_nchw, (0, 2, 3, 1)).astype(jnp.float32)
    x = jnp.pad(x, ((0, 0), (1, 1), (1, Wp - 1 - W), (0, Cp - Cin)))
    x = x.reshape(B, (H + 2) * Wp, Cp)
    x = jnp.pad(x, ((0, 0), (LEAD, TRAIL), (0, 0)))

    w1 = _pack_conv_weight(params["w1"], Cp)
    w2 = _pack_conv_weight(params["w2"], Cp)
    w3 = _pack_conv_weight(params["w3"], Cp)
    b1 = _pack_bias(params["b1"], Cp)
    b2 = _pack_bias(params["b2"], Cp)
    b3 = _pack_bias(params["b3"], Cp)

    def const_spec(shape):
        return pl.BlockSpec(shape, lambda b: (0,) * len(shape))

    out_padded = pl.pallas_call(
        fused_vgg_block_kernel,
        out_shape=jax.ShapeDtypeStruct((B, Ho, Wo, Cp), jnp.float32),
        grid=(B,),
        in_specs=[
            pl.BlockSpec((None, rows, Cp), lambda b: (b, 0, 0)),
            const_spec((9 * Cp, Cp)), const_spec((1, Cp)),
            const_spec((9 * Cp, Cp)), const_spec((1, Cp)),
            const_spec((9 * Cp, Cp)), const_spec((1, Cp)),
        ],
        out_specs=pl.BlockSpec((None, Ho, Wo, Cp), lambda b: (b, 0, 0, 0)),
        scratch_shapes=[
            pltpu.VMEM((rows, Cp), jnp.float32),       # ping-pong padded activation (flat)
            pltpu.VMEM((M, 9 * Cp), jnp.bfloat16),     # bf16 im2col slab (big-K matmul LHS)
        ],
        compiler_params=pltpu.CompilerParams(
            dimension_semantics=("parallel",),         # batch axis across cores on v7x
            vmem_limit_bytes=32 * 1024 * 1024,
        ),
    )(x, w1, b1, w2, b2, w3, b3)

    out = out_padded[..., :Cout]                       # drop channel padding
    return jnp.transpose(out, (0, 3, 1, 2))            # NHWC -> NCHW


# ------------------------- plain-JAX reference (for verification) -------------------------

def ref_forward(x_nchw, params):
    def conv(x, w, b):
        y = jax.lax.conv_general_dilated(
            x, w, window_strides=(1, 1), padding="SAME",
            dimension_numbers=("NCHW", "OIHW", "NCHW"))
        return jax.nn.relu(y + b[None, :, None, None])

    x = conv(x_nchw, params["w1"], params["b1"])
    x = conv(x, params["w2"], params["b2"])
    x = conv(x, params["w3"], params["b3"])
    B, C, H, W = x.shape
    return x.reshape(B, C, H // 2, 2, W // 2, 2).max(axis=(3, 5))


# ------------------------- main -------------------------

if __name__ == "__main__":
    B, Cin, Cout, H, W = 2, 4, 8, 16, 16

    key = jax.random.PRNGKey(0)
    kx, k1, k2, k3, kb1, kb2, kb3 = jax.random.split(key, 7)

    # Deterministic synthetic parameters (PyTorch Conv2d weight layout: O, I, kh, kw).
    params = {
        "w1": 0.1 * jax.random.normal(k1, (Cout, Cin, 3, 3), jnp.float32),
        "b1": 0.1 * jax.random.normal(kb1, (Cout,), jnp.float32),
        "w2": 0.1 * jax.random.normal(k2, (Cout, Cout, 3, 3), jnp.float32),
        "b2": 0.1 * jax.random.normal(kb2, (Cout,), jnp.float32),
        "w3": 0.1 * jax.random.normal(k3, (Cout, Cout, 3, 3), jnp.float32),
        "b3": 0.1 * jax.random.normal(kb3, (Cout,), jnp.float32),
    }

    x = jax.random.normal(kx, (B, Cin, H, W), jnp.float32)   # NCHW, like PyTorch

    out = jax.block_until_ready(conv_block_3layer(x, params))
    assert out.shape == (B, Cout, H // 2, W // 2), out.shape

    ref = jax.block_until_ready(ref_forward(x, params))
    # bf16 MXU operands (f32 accumulation) over 3 stacked convs -> bf16-level tolerance.
    err = float(jnp.max(jnp.abs(out - ref)))
    assert jnp.allclose(out, ref, atol=3e-2, rtol=3e-2), err

    print("KERNEL_OK")
</pallas_src>

<mosaic_0001>
module attributes {stable_mosaic.version = 11 : i64} {
  func.func @fused_vgg_block_kernel(%arg0: i32, %arg1: memref<1x448x128xf32, #tpu.memory_space<vmem>>, %arg2: memref<1152x128xbf16, #tpu.memory_space<vmem>>, %arg3: memref<1x128xf32, #tpu.memory_space<vmem>>, %arg4: memref<1152x128xbf16, #tpu.memory_space<vmem>>, %arg5: memref<1x128xf32, #tpu.memory_space<vmem>>, %arg6: memref<1152x128xbf16, #tpu.memory_space<vmem>>, %arg7: memref<1x128xf32, #tpu.memory_space<vmem>>, %arg8: memref<1x8x8x128xf32, #tpu.memory_space<vmem>>, %arg9: memref<448x128xf32, #tpu.memory_space<vmem>>, %arg10: memref<384x1152xbf16, #tpu.memory_space<vmem>>) attributes {dimension_semantics = [#tpu.dimension_semantics<parallel>], iteration_bounds = array<i64: 2>, scalar_prefetch = 0 : i64, scratch_operands = 2 : i64, tpu.core_type = #tpu.core_type<tc>, window_params = [{transform_indices = @transform_0, window_bounds = array<i64: 1, 448, 128>}, {pipeline_mode = #tpu.pipeline_mode<synchronous>, transform_indices = @transform_1, window_bounds = array<i64: 1152, 128>}, {pipeline_mode = #tpu.pipeline_mode<synchronous>, transform_indices = @transform_2, window_bounds = array<i64: 1, 128>}, {pipeline_mode = #tpu.pipeline_mode<synchronous>, transform_indices = @transform_3, window_bounds = array<i64: 1152, 128>}, {pipeline_mode = #tpu.pipeline_mode<synchronous>, transform_indices = @transform_4, window_bounds = array<i64: 1, 128>}, {pipeline_mode = #tpu.pipeline_mode<synchronous>, transform_indices = @transform_5, window_bounds = array<i64: 1152, 128>}, {pipeline_mode = #tpu.pipeline_mode<synchronous>, transform_indices = @transform_6, window_bounds = array<i64: 1, 128>}, {transform_indices = @transform_7, window_bounds = array<i64: 1, 8, 8, 128>}]} {
    %cst = arith.constant 0.000000e+00 : f32
    %0 = vector.broadcast %cst : f32 to vector<32x128xf32>
    %c0 = arith.constant 0 : index
    %c0_0 = arith.constant 0 : index
    %1 = vector.load %arg9[%c0, %c0_0] : memref<448x128xf32, #tpu.memory_space<vmem>>, vector<32x128xf32>
    tpu.vector_store %arg9[%c0, %c0_0], %0 {strides = array<i32>} : memref<448x128xf32, #tpu.memory_space<vmem>>, vector<32x128xf32>,
    %cst_1 = arith.constant 0.000000e+00 : f32
    %2 = vector.broadcast %cst_1 : f32 to vector<32x128xf32>
    %c416 = arith.constant 416 : index
    %c0_2 = arith.constant 0 : index
    %3 = vector.load %arg9[%c416, %c0_2] : memref<448x128xf32, #tpu.memory_space<vmem>>, vector<32x128xf32>
    tpu.vector_store %arg9[%c416, %c0_2], %2 {strides = array<i32>} : memref<448x128xf32, #tpu.memory_space<vmem>>, vector<32x128xf32>,
    %c0_3 = arith.constant 0 : index
    %c7 = arith.constant 7 : index
    %c0_4 = arith.constant 0 : index
    %4 = vector.load %arg1[%c0_3, %c7, %c0_4] : memref<1x448x128xf32, #tpu.memory_space<vmem>>, vector<1x384x128xf32>
    %5 = vector.shape_cast %4 : vector<1x384x128xf32> to vector<384x128xf32>
    %6 = arith.truncf %5 : vector<384x128xf32> to vector<384x128xbf16>
    %c0_5 = arith.constant 0 : index
    %c0_6 = arith.constant 0 : index
    %7 = vector.load %arg10[%c0_5, %c0_6] : memref<384x1152xbf16, #tpu.memory_space<vmem>>, vector<384x128xbf16>
    tpu.vector_store %arg10[%c0_5, %c0_6], %6 {strides = array<i32>} : memref<384x1152xbf16, #tpu.memory_space<vmem>>, vector<384x128xbf16>,
    %c0_7 = arith.constant 0 : index
    %c8 = arith.constant 8 : index
    %c0_8 = arith.constant 0 : index
    %8 = vector.load %arg1[%c0_7, %c8, %c0_8] : memref<1x448x128xf32, #tpu.memory_space<vmem>>, vector<1x384x128xf32>
    %9 = vector.shape_cast %8 : vector<1x384x128xf32> to vector<384x128xf32>
    %10 = arith.truncf %9 : vector<384x128xf32> to vector<384x128xbf16>
    %c0_9 = arith.constant 0 : index
    %c128 = arith.constant 128 : index
    %11 = vector.load %arg10[%c0_9, %c128] : memref<384x1152xbf16, #tpu.memory_space<vmem>>, vector<384x128xbf16>
    tpu.vector_store %arg10[%c0_9, %c128], %10 {strides = array<i32>} : memref<384x1152xbf16, #tpu.memory_space<vmem>>, vector<384x128xbf16>,
    %c0_10 = arith.constant 0 : index
    %c9 = arith.constant 9 : index
    %c0_11 = arith.constant 0 : index
    %12 = vector.load %arg1[%c0_10, %c9, %c0_11] : memref<1x448x128xf32, #tpu.memory_space<vmem>>, vector<1x384x128xf32>
    %13 = vector.shape_cast %12 : vector<1x384x128xf32> to vector<384x128xf32>
    %14 = arith.truncf %13 : vector<384x128xf32> to vector<384x128xbf16>
    %c0_12 = arith.constant 0 : index
    %c256 = arith.constant 256 : index
    %15 = vector.load %arg10[%c0_12, %c256] : memref<384x1152xbf16, #tpu.memory_space<vmem>>, vector<384x128xbf16>
    tpu.vector_store %arg10[%c0_12, %c256], %14 {strides = array<i32>} : memref<384x1152xbf16, #tpu.memory_space<vmem>>, vector<384x128xbf16>,
    %c0_13 = arith.constant 0 : index
    %c31 = arith.constant 31 : index
    %c0_14 = arith.constant 0 : index
    %16 = vector.load %arg1[%c0_13, %c31, %c0_14] : memref<1x448x128xf32, #tpu.memory_space<vmem>>, vector<1x384x128xf32>
    %17 = vector.shape_cast %16 : vector<1x384x128xf32> to vector<384x128xf32>
    %18 = arith.truncf %17 : vector<384x128xf32> to vector<384x128xbf16>
    %c0_15 = arith.constant 0 : index
    %c384 = arith.constant 384 : index
    %19 = vector.load %arg10[%c0_15, %c384] : memref<384x1152xbf16, #tpu.memory_space<vmem>>, vector<384x128xbf16>
    tpu.vector_store %arg10[%c0_15, %c384], %18 {strides = array<i32>} : memref<384x1152xbf16, #tpu.memory_space<vmem>>, vector<384x128xbf16>,
    %c0_16 = arith.constant 0 : index
    %c32 = arith.constant 32 : index
    %c0_17 = arith.constant 0 : index
    %20 = vector.load %arg1[%c0_16, %c32, %c0_17] : memref<1x448x128xf32, #tpu.memory_space<vmem>>, vector<1x384x128xf32>
    %21 = vector.shape_cast %20 : vector<1x384x128xf32> to vector<384x128xf32>
    %22 = arith.truncf %21 : vector<384x128xf32> to vector<384x128xbf16>
    %c0_18 = arith.constant 0 : index
    %c512 = arith.constant 512 : index
    %23 = vector.load %arg10[%c0_18, %c512] : memref<384x1152xbf16, #tpu.memory_space<vmem>>, vector<384x128xbf16>
    tpu.vector_store %arg10[%c0_18, %c512], %22 {strides = array<i32>} : memref<384x1152xbf16, #tpu.memory_space<vmem>>, vector<384x128xbf16>,
    %c0_19 = arith.constant 0 : index
    %c33 = arith.constant 33 : index
    %c0_20 = arith.constant 0 : index
    %24 = vector.load %arg1[%c0_19, %c33, %c0_20] : memref<1x448x128xf32, #tpu.memory_space<vmem>>, vector<1x384x128xf32>
    %25 = vector.shape_cast %24 : vector<1x384x128xf32> to vector<384x128xf32>
    %26 = arith.truncf %25 : vector<384x128xf32> to vector<384x128xbf16>
    %c0_21 = arith.constant 0 : index
    %c640 = arith.constant 640 : index
    %27 = vector.load %arg10[%c0_21, %c640] : memref<384x1152xbf16, #tpu.memory_space<vmem>>, vector<384x128xbf16>
    tpu.vector_store %arg10[%c0_21, %c640], %26 {strides = array<i32>} : memref<384x1152xbf16, #tpu.memory_space<vmem>>, vector<384x128xbf16>,
    %c0_22 = arith.constant 0 : index
    %c55 = arith.constant 55 : index
    %c0_23 = arith.constant 0 : index
    %28 = vector.load %arg1[%c0_22, %c55, %c0_23] : memref<1x448x128xf32, #tpu.memory_space<vmem>>, vector<1x384x128xf32>
    %29 = vector.shape_cast %28 : vector<1x384x128xf32> to vector<384x128xf32>
    %30 = arith.truncf %29 : vector<384x128xf32> to vector<384x128xbf16>
    %c0_24 = arith.constant 0 : index
    %c768 = arith.constant 768 : index
    %31 = vector.load %arg10[%c0_24, %c768] : memref<384x1152xbf16, #tpu.memory_space<vmem>>, vector<384x128xbf16>
    tpu.vector_store %arg10[%c0_24, %c768], %30 {strides = array<i32>} : memref<384x1152xbf16, #tpu.memory_space<vmem>>, vector<384x128xbf16>,
    %c0_25 = arith.constant 0 : index
    %c56 = arith.constant 56 : index
    %c0_26 = arith.constant 0 : index
    %32 = vector.load %arg1[%c0_25, %c56, %c0_26] : memref<1x448x128xf32, #tpu.memory_space<vmem>>, vector<1x384x128xf32>
    %33 = vector.shape_cast %32 : vector<1x384x128xf32> to vector<384x128xf32>
    %34 = arith.truncf %33 : vector<384x128xf32> to vector<384x128xbf16>
    %c0_27 = arith.constant 0 : index
    %c896 = arith.constant 896 : index
    %35 = vector.load %arg10[%c0_27, %c896] : memref<384x1152xbf16, #tpu.memory_space<vmem>>, vector<384x128xbf16>
    tpu.vector_store %arg10[%c0_27, %c896], %34 {strides = array<i32>} : memref<384x1152xbf16, #tpu.memory_space<vmem>>, vector<384x128xbf16>,
    %c0_28 = arith.constant 0 : index
    %c57 = arith.constant 57 : index
    %c0_29 = arith.constant 0 : index
    %36 = vector.load %arg1[%c0_28, %c57, %c0_29] : memref<1x448x128xf32, #tpu.memory_space<vmem>>, vector<1x384x128xf32>
    %37 = vector.shape_cast %36 : vector<1x384x128xf32> to vector<384x128xf32>
    %38 = arith.truncf %37 : vector<384x128xf32> to vector<384x128xbf16>
    %c0_30 = arith.constant 0 : index
    %c1024 = arith.constant 1024 : index
    %39 = vector.load %arg10[%c0_30, %c1024] : memref<384x1152xbf16, #tpu.memory_space<vmem>>, vector<384x128xbf16>
    tpu.vector_store %arg10[%c0_30, %c1024], %38 {strides = array<i32>} : memref<384x1152xbf16, #tpu.memory_space<vmem>>, vector<384x128xbf16>,
    %c0_31 = arith.constant 0 : index
    %c0_32 = arith.constant 0 : index
    %40 = vector.load %arg10[%c0_31, %c0_32] : memref<384x1152xbf16, #tpu.memory_space<vmem>>, vector<384x1152xbf16>
    %c0_33 = arith.constant 0 : index
    %c0_34 = arith.constant 0 : index
    %41 = vector.load %arg2[%c0_33, %c0_34] : memref<1152x128xbf16, #tpu.memory_space<vmem>>, vector<1152x128xbf16>
    %cst_35 = arith.constant dense<0.000000e+00> : vector<384x128xf32>
    %42 = tpu.matmul %40, %41, %cst_35 {dimension_numbers = #tpu.dot_dimension_numbers<[1], [0], [0], [1], [0, 0, 1, 1], [], []>} : vector<384x1152xbf16>, vector<1152x128xbf16>, vector<384x128xf32> -> vector<384x128xf32>
    %c0_36 = arith.constant 0 : index
    %c0_37 = arith.constant 0 : index
    %43 = vector.load %arg3[%c0_36, %c0_37] : memref<1x128xf32, #tpu.memory_space<vmem>>, vector<1x128xf32>
    %44 = vector.broadcast %43 : vector<1x128xf32> to vector<384x128xf32>
    %45 = arith.addf %42, %44 : vector<384x128xf32>
    %cst_38 = arith.constant 0.000000e+00 : f32
    %46 = vector.broadcast %cst_38 : f32 to vector<384x128xf32>
    %47 = arith.maximumf %45, %46 : vector<384x128xf32>
    %48 = tpu.iota {dimensions = array<i32: 1>} : vector<16x24x128xi32>
    %49 = vector.shape_cast %48 : vector<16x24x128xi32> to vector<384x128xi32>
    %c1_i32 = arith.constant 1 : i32
    %50 = vector.broadcast %c1_i32 : i32 to vector<384x128xi32>
    %51 = arith.cmpi sge, %49, %50 : vector<384x128xi32>
    %c16_i32 = arith.constant 16 : i32
    %52 = vector.broadcast %c16_i32 : i32 to vector<384x128xi32>
    %53 = arith.cmpi sle, %49, %52 : vector<384x128xi32>
    %54 = arith.andi %51, %53 : vector<384x128xi1>
    %cst_39 = arith.constant 0.000000e+00 : f32
    %55 = vector.broadcast %cst_39 : f32 to vector<384x128xf32>
    %56 = arith.select %54, %47, %55 : vector<384x128xi1>, vector<384x128xf32>
    %c32_40 = arith.constant 32 : index
    %c0_41 = arith.constant 0 : index
    %57 = vector.load %arg9[%c32_40, %c0_41] : memref<448x128xf32, #tpu.memory_space<vmem>>, vector<384x128xf32>
    tpu.vector_store %arg9[%c32_40, %c0_41], %56 {strides = array<i32>} : memref<448x128xf32, #tpu.memory_space<vmem>>, vector<384x128xf32>,
    %c7_42 = arith.constant 7 : index
    %c0_43 = arith.constant 0 : index
    %58 = vector.load %arg9[%c7_42, %c0_43] : memref<448x128xf32, #tpu.memory_space<vmem>>, vector<384x128xf32>
    %59 = arith.truncf %58 : vector<384x128xf32> to vector<384x128xbf16>
    %c0_44 = arith.constant 0 : index
    %c0_45 = arith.constant 0 : index
    %60 = vector.load %arg10[%c0_44, %c0_45] : memref<384x1152xbf16, #tpu.memory_space<vmem>>, vector<384x128xbf16>
    tpu.vector_store %arg10[%c0_44, %c0_45], %59 {strides = array<i32>} : memref<384x1152xbf16, #tpu.memory_space<vmem>>, vector<384x128xbf16>,
    %c8_46 = arith.constant 8 : index
    %c0_47 = arith.constant 0 : index
    %61 = vector.load %arg9[%c8_46, %c0_47] : memref<448x128xf32, #tpu.memory_space<vmem>>, vector<384x128xf32>
    %62 = arith.truncf %61 : vector<384x128xf32> to vector<384x128xbf16>
    %c0_48 = arith.constant 0 : index
    %c128_49 = arith.constant 128 : index
    %63 = vector.load %arg10[%c0_48, %c128_49] : memref<384x1152xbf16, #tpu.memory_space<vmem>>, vector<384x128xbf16>
    tpu.vector_store %arg10[%c0_48, %c128_49], %62 {strides = array<i32>} : memref<384x1152xbf16, #tpu.memory_space<vmem>>, vector<384x128xbf16>,
    %c9_50 = arith.constant 9 : index
    %c0_51 = arith.constant 0 : index
    %64 = vector.load %arg9[%c9_50, %c0_51] : memref<448x128xf32, #tpu.memory_space<vmem>>, vector<384x128xf32>
    %65 = arith.truncf %64 : vector<384x128xf32> to vector<384x128xbf16>
    %c0_52 = arith.constant 0 : index
    %c256_53 = arith.constant 256 : index
    %66 = vector.load %arg10[%c0_52, %c256_53] : memref<384x1152xbf16, #tpu.memory_space<vmem>>, vector<384x128xbf16>
    tpu.vector_store %arg10[%c0_52, %c256_53], %65 {strides = array<i32>} : memref<384x1152xbf16, #tpu.memory_space<vmem>>, vector<384x128xbf16>,
    %c31_54 = arith.constant 31 : index
    %c0_55 = arith.constant 0 : index
    %67 = vector.load %arg9[%c31_54, %c0_55] : memref<448x128xf32, #tpu.memory_space<vmem>>, vector<384x128xf32>
    %68 = arith.truncf %67 : vector<384x128xf32> to vector<384x128xbf16>
    %c0_56 = arith.constant 0 : index
    %c384_57 = arith.constant 384 : index
    %69 = vector.load %arg10[%c0_56, %c384_57] : memref<384x1152xbf16, #tpu.memory_space<vmem>>, vector<384x128xbf16>
    tpu.vector_store %arg10[%c0_56, %c384_57], %68 {strides = array<i32>} : memref<384x1152xbf16, #tpu.memory_space<vmem>>, vector<384x128xbf16>,
    %c32_58 = arith.constant 32 : index
    %c0_59 = arith.constant 0 : index
    %70 = vector.load %arg9[%c32_58, %c0_59] : memref<448x128xf32, #tpu.memory_space<vmem>>, vector<384x128xf32>
    %71 = arith.truncf %70 : vector<384x128xf32> to vector<384x128xbf16>
    %c0_60 = arith.constant 0 : index
    %c512_61 = arith.constant 512 : index
    %72 = vector.load %arg10[%c0_60, %c512_61] : memref<384x1152xbf16, #tpu.memory_space<vmem>>, vector<384x128xbf16>
    tpu.vector_store %arg10[%c0_60, %c512_61], %71 {strides = array<i32>} : memref<384x1152xbf16, #tpu.memory_space<vmem>>, vector<384x128xbf16>,
    %c33_62 = arith.constant 33 : index
    %c0_63 = arith.constant 0 : index
    %73 = vector.load %arg9[%c33_62, %c0_63] : memref<448x128xf32, #tpu.memory_space<vmem>>, vector<384x128xf32>
    %74 = arith.truncf %73 : vector<384x128xf32> to vector<384x128xbf16>
    %c0_64 = arith.constant 0 : index
    %c640_65 = arith.constant 640 : index
    %75 = vector.load %arg10[%c0_64, %c640_65] : memref<384x1152xbf16, #tpu.memory_space<vmem>>, vector<384x128xbf16>
    tpu.vector_store %arg10[%c0_64, %c640_65], %74 {strides = array<i32>} : memref<384x1152xbf16, #tpu.memory_space<vmem>>, vector<384x128xbf16>,
    %c55_66 = arith.constant 55 : index
    %c0_67 = arith.constant 0 : index
    %76 = vector.load %arg9[%c55_66, %c0_67] : memref<448x128xf32, #tpu.memory_space<vmem>>, vector<384x128xf32>
    %77 = arith.truncf %76 : vector<384x128xf32> to vector<384x128xbf16>
    %c0_68 = arith.constant 0 : index
    %c768_69 = arith.constant 768 : index
    %78 = vector.load %arg10[%c0_68, %c768_69] : memref<384x1152xbf16, #tpu.memory_space<vmem>>, vector<384x128xbf16>
    tpu.vector_store %arg10[%c0_68, %c768_69], %77 {strides = array<i32>} : memref<384x1152xbf16, #tpu.memory_space<vmem>>, vector<384x128xbf16>,
    %c56_70 = arith.constant 56 : index
    %c0_71 = arith.constant 0 : index
    %79 = vector.load %arg9[%c56_70, %c0_71] : memref<448x128xf32, #tpu.memory_space<vmem>>, vector<384x128xf32>
    %80 = arith.truncf %79 : vector<384x128xf32> to vector<384x128xbf16>
    %c0_72 = arith.constant 0 : index
    %c896_73 = arith.constant 896 : index
    %81 = vector.load %arg10[%c0_72, %c896_73] : memref<384x1152xbf16, #tpu.memory_space<vmem>>, vector<384x128xbf16>
    tpu.vector_store %arg10[%c0_72, %c896_73], %80 {strides = array<i32>} : memref<384x1152xbf16, #tpu.memory_space<vmem>>, vector<384x128xbf16>,
    %c57_74 = arith.constant 57 : index
    %c0_75 = arith.constant 0 : index
    %82 = vector.load %arg9[%c57_74, %c0_75] : memref<448x128xf32, #tpu.memory_space<vmem>>, vector<384x128xf32>
    %83 = arith.truncf %82 : vector<384x128xf32> to vector<384x128xbf16>
    %c0_76 = arith.constant 0 : index
    %c1024_77 = arith.constant 1024 : index
    %84 = vector.load %arg10[%c0_76, %c1024_77] : memref<384x1152xbf16, #tpu.memory_space<vmem>>, vector<384x128xbf16>
    tpu.vector_store %arg10[%c0_76, %c1024_77], %83 {strides = array<i32>} : memref<384x1152xbf16, #tpu.memory_space<vmem>>, vector<384x128xbf16>,
    %c0_78 = arith.constant 0 : index
    %c0_79 = arith.constant 0 : index
    %85 = vector.load %arg10[%c0_78, %c0_79] : memref<384x1152xbf16, #tpu.memory_space<vmem>>, vector<384x1152xbf16>
    %c0_80 = arith.constant 0 : index
    %c0_81 = arith.constant 0 : index
    %86 = vector.load %arg4[%c0_80, %c0_81] : memref<1152x128xbf16, #tpu.memory_space<vmem>>, vector<1152x128xbf16>
    %cst_82 = arith.constant dense<0.000000e+00> : vector<384x128xf32>
    %87 = tpu.matmul %85, %86, %cst_82 {dimension_numbers = #tpu.dot_dimension_numbers<[1], [0], [0], [1], [0, 0, 1, 1], [], []>} : vector<384x1152xbf16>, vector<1152x128xbf16>, vector<384x128xf32> -> vector<384x128xf32>
    %c0_83 = arith.constant 0 : index
    %c0_84 = arith.constant 0 : index
    %88 = vector.load %arg5[%c0_83, %c0_84] : memref<1x128xf32, #tpu.memory_space<vmem>>, vector<1x128xf32>
    %89 = vector.broadcast %88 : vector<1x128xf32> to vector<384x128xf32>
    %90 = arith.addf %87, %89 : vector<384x128xf32>
    %cst_85 = arith.constant 0.000000e+00 : f32
    %91 = vector.broadcast %cst_85 : f32 to vector<384x128xf32>
    %92 = arith.maximumf %90, %91 : vector<384x128xf32>
    %93 = tpu.iota {dimensions = array<i32: 1>} : vector<16x24x128xi32>
    %94 = vector.shape_cast %93 : vector<16x24x128xi32> to vector<384x128xi32>
    %c1_i32_86 = arith.constant 1 : i32
    %95 = vector.broadcast %c1_i32_86 : i32 to vector<384x128xi32>
    %96 = arith.cmpi sge, %94, %95 : vector<384x128xi32>
    %c16_i32_87 = arith.constant 16 : i32
    %97 = vector.broadcast %c16_i32_87 : i32 to vector<384x128xi32>
    %98 = arith.cmpi sle, %94, %97 : vector<384x128xi32>
    %99 = arith.andi %96, %98 : vector<384x128xi1>
    %cst_88 = arith.constant 0.000000e+00 : f32
    %100 = vector.broadcast %cst_88 : f32 to vector<384x128xf32>
    %101 = arith.select %99, %92, %100 : vector<384x128xi1>, vector<384x128xf32>
    %c32_89 = arith.constant 32 : index
    %c0_90 = arith.constant 0 : index
    %102 = vector.load %arg9[%c32_89, %c0_90] : memref<448x128xf32, #tpu.memory_space<vmem>>, vector<384x128xf32>
    tpu.vector_store %arg9[%c32_89, %c0_90], %101 {strides = array<i32>} : memref<448x128xf32, #tpu.memory_space<vmem>>, vector<384x128xf32>,
    %c7_91 = arith.constant 7 : index
    %c0_92 = arith.constant 0 : index
    %103 = vector.load %arg9[%c7_91, %c0_92] : memref<448x128xf32, #tpu.memory_space<vmem>>, vector<384x128xf32>
    %104 = arith.truncf %103 : vector<384x128xf32> to vector<384x128xbf16>
    %c0_93 = arith.constant 0 : index
    %c0_94 = arith.constant 0 : index
    %105 = vector.load %arg10[%c0_93, %c0_94] : memref<384x1152xbf16, #tpu.memory_space<vmem>>, vector<384x128xbf16>
    tpu.vector_store %arg10[%c0_93, %c0_94], %104 {strides = array<i32>} : memref<384x1152xbf16, #tpu.memory_space<vmem>>, vector<384x128xbf16>,
    %c8_95 = arith.constant 8 : index
    %c0_96 = arith.constant 0 : index
    %106 = vector.load %arg9[%c8_95, %c0_96] : memref<448x128xf32, #tpu.memory_space<vmem>>, vector<384x128xf32>
    %107 = arith.truncf %106 : vector<384x128xf32> to vector<384x128xbf16>
    %c0_97 = arith.constant 0 : index
    %c128_98 = arith.constant 128 : index
    %108 = vector.load %arg10[%c0_97, %c128_98] : memref<384x1152xbf16, #tpu.memory_space<vmem>>, vector<384x128xbf16>
    tpu.vector_store %arg10[%c0_97, %c128_98], %107 {strides = array<i32>} : memref<384x1152xbf16, #tpu.memory_space<vmem>>, vector<384x128xbf16>,
    %c9_99 = arith.constant 9 : index
    %c0_100 = arith.constant 0 : index
    %109 = vector.load %arg9[%c9_99, %c0_100] : memref<448x128xf32, #tpu.memory_space<vmem>>, vector<384x128xf32>
    %110 = arith.truncf %109 : vector<384x128xf32> to vector<384x128xbf16>
    %c0_101 = arith.constant 0 : index
    %c256_102 = arith.constant 256 : index
    %111 = vector.load %arg10[%c0_101, %c256_102] : memref<384x1152xbf16, #tpu.memory_space<vmem>>, vector<384x128xbf16>
    tpu.vector_store %arg10[%c0_101, %c256_102], %110 {strides = array<i32>} : memref<384x1152xbf16, #tpu.memory_space<vmem>>, vector<384x128xbf16>,
    %c31_103 = arith.constant 31 : index
    %c0_104 = arith.constant 0 : index
    %112 = vector.load %arg9[%c31_103, %c0_104] : memref<448x128xf32, #tpu.memory_space<vmem>>, vector<384x128xf32>
    %113 = arith.truncf %112 : vector<384x128xf32> to vector<384x128xbf16>
    %c0_105 = arith.constant 0 : index
    %c384_106 = arith.constant 384 : index
    %114 = vector.load %arg10[%c0_105, %c384_106] : memref<384x1152xbf16, #tpu.memory_space<vmem>>, vector<384x128xbf16>
    tpu.vector_store %arg10[%c0_105, %c384_106], %113 {strides = array<i32>} : memref<384x1152xbf16, #tpu.memory_space<vmem>>, vector<384x128xbf16>,
    %c32_107 = arith.constant 32 : index
    %c0_108 = arith.constant 0 : index
    %115 = vector.load %arg9[%c32_107, %c0_108] : memref<448x128xf32, #tpu.memory_space<vmem>>, vector<384x128xf32>
    %116 = arith.truncf %115 : vector<384x128xf32> to vector<384x128xbf16>
    %c0_109 = arith.constant 0 : index
    %c512_110 = arith.constant 512 : index
    %117 = vector.load %arg10[%c0_109, %c512_110] : memref<384x1152xbf16, #tpu.memory_space<vmem>>, vector<384x128xbf16>
    tpu.vector_store %arg10[%c0_109, %c512_110], %116 {strides = array<i32>} : memref<384x1152xbf16, #tpu.memory_space<vmem>>, vector<384x128xbf16>,
    %c33_111 = arith.constant 33 : index
    %c0_112 = arith.constant 0 : index
    %118 = vector.load %arg9[%c33_111, %c0_112] : memref<448x128xf32, #tpu.memory_space<vmem>>, vector<384x128xf32>
    %119 = arith.truncf %118 : vector<384x128xf32> to vector<384x128xbf16>
    %c0_113 = arith.constant 0 : index
    %c640_114 = arith.constant 640 : index
    %120 = vector.load %arg10[%c0_113, %c640_114] : memref<384x1152xbf16, #tpu.memory_space<vmem>>, vector<384x128xbf16>
    tpu.vector_store %arg10[%c0_113, %c640_114], %119 {strides = array<i32>} : memref<384x1152xbf16, #tpu.memory_space<vmem>>, vector<384x128xbf16>,
    %c55_115 = arith.constant 55 : index
    %c0_116 = arith.constant 0 : index
    %121 = vector.load %arg9[%c55_115, %c0_116] : memref<448x128xf32, #tpu.memory_space<vmem>>, vector<384x128xf32>
    %122 = arith.truncf %121 : vector<384x128xf32> to vector<384x128xbf16>
    %c0_117 = arith.constant 0 : index
    %c768_118 = arith.constant 768 : index
    %123 = vector.load %arg10[%c0_117, %c768_118] : memref<384x1152xbf16, #tpu.memory_space<vmem>>, vector<384x128xbf16>
    tpu.vector_store %arg10[%c0_117, %c768_118], %122 {strides = array<i32>} : memref<384x1152xbf16, #tpu.memory_space<vmem>>, vector<384x128xbf16>,
    %c56_119 = arith.constant 56 : index
    %c0_120 = arith.constant 0 : index
    %124 = vector.load %arg9[%c56_119, %c0_120] : memref<448x128xf32, #tpu.memory_space<vmem>>, vector<384x128xf32>
    %125 = arith.truncf %124 : vector<384x128xf32> to vector<384x128xbf16>
    %c0_121 = arith.constant 0 : index
    %c896_122 = arith.constant 896 : index
    %126 = vector.load %arg10[%c0_121, %c896_122] : memref<384x1152xbf16, #tpu.memory_space<vmem>>, vector<384x128xbf16>
    tpu.vector_store %arg10[%c0_121, %c896_122], %125 {strides = array<i32>} : memref<384x1152xbf16, #tpu.memory_space<vmem>>, vector<384x128xbf16>,
    %c57_123 = arith.constant 57 : index
    %c0_124 = arith.constant 0 : index
    %127 = vector.load %arg9[%c57_123, %c0_124] : memref<448x128xf32, #tpu.memory_space<vmem>>, vector<384x128xf32>
    %128 = arith.truncf %127 : vector<384x128xf32> to vector<384x128xbf16>
    %c0_125 = arith.constant 0 : index
    %c1024_126 = arith.constant 1024 : index
    %129 = vector.load %arg10[%c0_125, %c1024_126] : memref<384x1152xbf16, #tpu.memory_space<vmem>>, vector<384x128xbf16>
    tpu.vector_store %arg10[%c0_125, %c1024_126], %128 {strides = array<i32>} : memref<384x1152xbf16, #tpu.memory_space<vmem>>, vector<384x128xbf16>,
    %c0_127 = arith.constant 0 : index
    %c0_128 = arith.constant 0 : index
    %130 = vector.load %arg10[%c0_127, %c0_128] : memref<384x1152xbf16, #tpu.memory_space<vmem>>, vector<384x1152xbf16>
    %c0_129 = arith.constant 0 : index
    %c0_130 = arith.constant 0 : index
    %131 = vector.load %arg6[%c0_129, %c0_130] : memref<1152x128xbf16, #tpu.memory_space<vmem>>, vector<1152x128xbf16>
    %cst_131 = arith.constant dense<0.000000e+00> : vector<384x128xf32>
    %132 = tpu.matmul %130, %131, %cst_131 {dimension_numbers = #tpu.dot_dimension_numbers<[1], [0], [0], [1], [0, 0, 1, 1], [], []>} : vector<384x1152xbf16>, vector<1152x128xbf16>, vector<384x128xf32> -> vector<384x128xf32>
    %c0_132 = arith.constant 0 : index
    %c0_133 = arith.constant 0 : index
    %133 = vector.load %arg7[%c0_132, %c0_133] : memref<1x128xf32, #tpu.memory_space<vmem>>, vector<1x128xf32>
    %134 = vector.broadcast %133 : vector<1x128xf32> to vector<384x128xf32>
    %135 = arith.addf %132, %134 : vector<384x128xf32>
    %cst_134 = arith.constant 0.000000e+00 : f32
    %136 = vector.broadcast %cst_134 : f32 to vector<384x128xf32>
    %137 = arith.maximumf %135, %136 : vector<384x128xf32>
    %138 = vector.shape_cast %137 : vector<384x128xf32> to vector<8x2x24x128xf32>
    %139 = vector.extract_strided_slice %138 {offsets = [0, 0, 0, 0], sizes = [8, 1, 24, 128], strides = [1, 1, 1, 1]} : vector<8x2x24x128xf32> to vector<8x1x24x128xf32>
    %140 = vector.shape_cast %139 : vector<8x1x24x128xf32> to vector<8x24x128xf32>
    %141 = vector.extract_strided_slice %138 {offsets = [0, 1, 0, 0], sizes = [8, 1, 24, 128], strides = [1, 1, 1, 1]} : vector<8x2x24x128xf32> to vector<8x1x24x128xf32>
    %142 = vector.shape_cast %141 : vector<8x1x24x128xf32> to vector<8x24x128xf32>
    %143 = arith.maximumf %140, %142 : vector<8x24x128xf32>
    %144 = vector.extract_strided_slice %143 {offsets = [0, 1, 0], sizes = [8, 16, 128], strides = [1, 1, 1]} : vector<8x24x128xf32> to vector<8x16x128xf32>
    %145 = vector.shape_cast %144 : vector<8x16x128xf32> to vector<8x8x2x128xf32>
    %146 = vector.extract_strided_slice %145 {offsets = [0, 0, 0, 0], sizes = [8, 8, 1, 128], strides = [1, 1, 1, 1]} : vector<8x8x2x128xf32> to vector<8x8x1x128xf32>
    %147 = vector.shape_cast %146 : vector<8x8x1x128xf32> to vector<8x8x128xf32>
    %148 = vector.extract_strided_slice %145 {offsets = [0, 0, 1, 0], sizes = [8, 8, 1, 128], strides = [1, 1, 1, 1]} : vector<8x8x2x128xf32> to vector<8x8x1x128xf32>
    %149 = vector.shape_cast %148 : vector<8x8x1x128xf32> to vector<8x8x128xf32>
    %150 = arith.maximumf %147, %149 : vector<8x8x128xf32>
    %c0_135 = arith.constant 0 : index
    %c0_136 = arith.constant 0 : index
    %c0_137 = arith.constant 0 : index
    %c0_138 = arith.constant 0 : index
    %151 = vector.load %arg8[%c0_135, %c0_136, %c0_137, %c0_138] : memref<1x8x8x128xf32, #tpu.memory_space<vmem>>, vector<1x8x8x128xf32>
    %152 = vector.shape_cast %151 : vector<1x8x8x128xf32> to vector<8x8x128xf32>
    %153 = vector.shape_cast %150 : vector<8x8x128xf32> to vector<1x8x8x128xf32>
    tpu.vector_store %arg8[%c0_135, %c0_136, %c0_137, %c0_138], %153 {strides = array<i32>} : memref<1x8x8x128xf32, #tpu.memory_space<vmem>>, vector<1x8x8x128xf32>,
    return
  }
  func.func @transform_0(%arg0: i32) -> (i32, i32, i32) {
    %c0_i32 = arith.constant 0 : i32
    %c0_i32_0 = arith.constant 0 : i32
    %c0_i32_1 = arith.constant 0 : i32
    return %arg0, %c0_i32, %c0_i32_0 : i32, i32, i32
  }
  func.func @transform_1(%arg0: i32) -> (i32, i32) {
    %c0_i32 = arith.constant 0 : i32
    %c0_i32_0 = arith.constant 0 : i32
    %c0_i32_1 = arith.constant 0 : i32
    return %c0_i32, %c0_i32_0 : i32, i32
  }
  func.func @transform_2(%arg0: i32) -> (i32, i32) {
    %c0_i32 = arith.constant 0 : i32
    %c0_i32_0 = arith.constant 0 : i32
    %c0_i32_1 = arith.constant 0 : i32
    return %c0_i32, %c0_i32_0 : i32, i32
  }
  func.func @transform_3(%arg0: i32) -> (i32, i32) {
    %c0_i32 = arith.constant 0 : i32
    %c0_i32_0 = arith.constant 0 : i32
    %c0_i32_1 = arith.constant 0 : i32
    return %c0_i32, %c0_i32_0 : i32, i32
  }
  func.func @transform_4(%arg0: i32) -> (i32, i32) {
    %c0_i32 = arith.constant 0 : i32
    %c0_i32_0 = arith.constant 0 : i32
    %c0_i32_1 = arith.constant 0 : i32
    return %c0_i32, %c0_i32_0 : i32, i32
  }
  func.func @transform_5(%arg0: i32) -> (i32, i32) {
    %c0_i32 = arith.constant 0 : i32
    %c0_i32_0 = arith.constant 0 : i32
    %c0_i32_1 = arith.constant 0 : i32
    return %c0_i32, %c0_i32_0 : i32, i32
  }
  func.func @transform_6(%arg0: i32) -> (i32, i32) {
    %c0_i32 = arith.constant 0 : i32
    %c0_i32_0 = arith.constant 0 : i32
    %c0_i32_1 = arith.constant 0 : i32
    return %c0_i32, %c0_i32_0 : i32, i32
  }
  func.func @transform_7(%arg0: i32) -> (i32, i32, i32, i32) {
    %c0_i32 = arith.constant 0 : i32
    %c0_i32_0 = arith.constant 0 : i32
    %c0_i32_1 = arith.constant 0 : i32
    %c0_i32_2 = arith.constant 0 : i32
    return %arg0, %c0_i32, %c0_i32_0, %c0_i32_1 : i32, i32, i32, i32
  }
}

</mosaic_0001>

<bundles_post_ra>
// kernel: tpu_custom_call.1
= control target key start
LH: loop header
LB: loop body
LE: loop exit
PB: predicated region body
PF: predicated region fallthrough
CT: control target
= control target key end

     0   :  { %12 = vsyncpa [#allocation5], 0  ;;  %s16379_s0 = inlined_call_operand.hbm [shape: f32[2,448,128], index: 0, kind: input, shape index: {}]   ;;  %s16380_s1 = inlined_call_operand.hbm [shape: bf16[1152,128], index: 1, kind: input, shape index: {}]   ;;  %s16381_s2 = inlined_call_operand.vmem [shape: f32[1,128], index: 2, kind: input, shape index: {}]   ;;  %s16382_s3 = inlined_call_operand.hbm [shape: bf16[1152,128], index: 3, kind: input, shape index: {}]   ;;  %s16383_s4 = inlined_call_operand.vmem [shape: f32[1,128], index: 4, kind: input, shape index: {}]   ;;  %s16384_s5 = inlined_call_operand.hbm [shape: bf16[1152,128], index: 5, kind: input, shape index: {}]   ;;  %s16385_s6 = inlined_call_operand.vmem [shape: f32[1,128], index: 6, kind: input, shape index: {}]   ;;  %s16386_s7 = inlined_call_operand.hbm [shape: f32[2,8,8,128], index: 7, kind: output, shape index: {}]  }
   0x1   :  { %14 = vsyncpa [#allocation5 + $0x1], 0 }
   0x2   :  { %15 = vsyncpa [#allocation8], 0 }
   0x3   :  { %16 = vsyncpa [#allocation11], 0 }
   0x4   :  { %17 = vsyncpa [#allocation6], 0 }
   0x5   :  { %19 = vsyncpa [#allocation6 + $0x1], 0  ;;  %s12809_s24 = smov 0   ;;  %s12811_s25 = smov 0  }
   0x6   :  { %s12813_s26 = smov 0   ;;  %s12815_s27 = smov 0  }
   0x7 LB: > { %s12830_s28 = sadd.s32 4294967295, %s12751_s27   ;;  %s10478_s29 = sadd.s32 4294967294, %s12751_s27   ;;  %s12751_s27 = sphi %s12815_s27, %s16815_s27   ;;  %s12747_s26 = sphi %s12813_s26, %s16814_s26   ;;  %s12743_s25 = sphi %s12811_s25, %s16813_s25   ;;  %s12739_s24 = sphi %s12809_s24, %s16812_s24  }
   0x8   : > { %p45_p0 = scmp.ne.s32.totalorder %s12743_s25, %s12739_s24  ;;  %p16387_p1 = scmp.eq.s32.totalorder %s12830_s28, 0 }
   0x9   : > { %p201_p3 = scmp.eq.s32.totalorder %s10478_s29, 1  ;;  %p10479_p5 = scmp.ge.s32.totalorder %s12751_s27, 1 }
   0xa   : > { %p12839_p4 = por %p16387_p1, %p45_p0  ;;  %p208_p7 = scmp.lt.s32.totalorder %s12751_s27, 3 }
   0xb   : > { %p12844_p6 = por %p201_p3, %p45_p0  ;;  %s12753_s10 = smov [#allocation7]  }
   0xc   : > { %s16479_s30 = scalar_select %p12839_p4, 1, 0 }
   0xd   : > { %s16480_s8 = scalar_select %p12844_p6, 1, 0 }
   0xe   : > { %p12849_p8 = pnand %p10479_p5, %p208_p7  ;;  %s220_s11 = sshll.u32 %s12753_s10, 4  ;;  %s12853_s11 = int_to_ptr.vmem [resolvable:$true] %s220_s11 }
   0xf   : > { %16481 = sst [smem:[#allocation17_spill]] %s16480_s8  ;;  %s12754_s13 = smov [#allocation9]  }
  0x10   : > { %s16482_s9 = scalar_select %p12849_p8, 1, 0 }
  0x11   : > { %p12086_p9 = pneg %p12849_p8  ;;  %s236_s14 = sshll.u32 %s12754_s13, 4  ;;  %s12864_s14 = int_to_ptr.vmem [resolvable:$true] %s236_s14 }
  0x12   : > { %s12755_s15 = smov [#allocation10]   ;;  %s12563_s19 = scalar_lea.hbm %s16380_s1, 9216 }
  0x13   : > { %p12860_p11 = pnand %p12086_p9, %p16387_p1  ;;  %s12866_s16 = sshll.u32 %s12755_s15, 4  ;;  %s253_s16 = int_to_ptr.vmem [resolvable:$true] %s12866_s16 }
  0x14   : > { %p12564_p12 = scmp.ne.s32.totalorder %s16380_s1, %s12563_s19  ;;  %p12570_p5 = scmp.lt.u32.totalorder %s12563_s19, %s16380_s1 }
  0x15   : > { %p12876_p13 = pneg %p12860_p11 }
  0x17   : > { %p12566_p0 = pnand %p12876_p13, %p12564_p12 }
  0x19   : > { %p12567_p3 = pneg %p12566_p0 }
  0x1b   : > { %p12572_p7 = pnand %p12570_p5, %p12567_p3 }
  0x1d   : > { %12575 = shalt.err (!%p12572_p7)
}
  0x1e   : > { %s12576_s10 = scalar_lea.vmem %s12853_s11, 9216  ;;  %p12584_p2 = scmp.lt.s32.totalorder %s12853_s11, %s12853_s11 }
  0x1f   : > { %p12577_p9 = scmp.ne.s32.totalorder %s12853_s11, %s12576_s10  ;;  %p12585_p6 = scmp.lt.s32.totalorder %s12576_s10, %s12576_s10 }
  0x21   : > { %p12579_p10 = pnand %p12577_p9, %p12876_p13  ;;  %p12586_p12 = por %p12585_p6, %p12584_p2 }
  0x23   : > { %p12580_p1 = pneg %p12579_p10 }
  0x25   : > { %p12587_p0 = pnand %p12586_p12, %p12580_p1 }
  0x27   : > { %12590 = shalt.err (!%p12587_p0)
}
  0x28   : > { %s12756_s13 = smov 64   ;;  %s12757_s15 = smov 4  }
  0x29   : > { %12089 = dma.hbm_to_vmem [thread:$0]  (!%p12860_p11), %s16380_s1, 9216, %s12853_s11, [#allocation8], %s12756_s13, %s12756_s13, %s12757_s15  }
  0x2a   : > { %s12591_s21 = scalar_lea.hbm %s16382_s3, 9216 }
  0x2b   : > { %p12592_p1 = scmp.ne.s32.totalorder %s16382_s3, %s12591_s21  ;;  %p12598_p10 = scmp.lt.u32.totalorder %s12591_s21, %s16382_s3 }
  0x2d   : > { %p12594_p2 = pnand %p12592_p1, %p12876_p13 }
  0x2f   : > { %p12595_p6 = pneg %p12594_p2 }
  0x31   : > { %p12600_p3 = pnand %p12598_p10, %p12595_p6 }
  0x33   : > { %12603 = shalt.err (!%p12600_p3)
}
  0x34   : > { %s12604_s11 = scalar_lea.vmem %s12864_s14, 9216  ;;  %p12612_p12 = scmp.lt.s32.totalorder %s12864_s14, %s12864_s14 }
  0x35   : > { %p12605_p5 = scmp.ne.s32.totalorder %s12864_s14, %s12604_s11  ;;  %p12613_p0 = scmp.lt.s32.totalorder %s12604_s11, %s12604_s11 }
  0x37   : > { %p12607_p7 = pnand %p12605_p5, %p12876_p13  ;;  %p12614_p1 = por %p12613_p0, %p12612_p12 }
  0x39   : > { %p12608_p9 = pneg %p12607_p7 }
  0x3b   : > { %p12615_p2 = pnand %p12614_p1, %p12608_p9 }
  0x3d   : > { %12618 = shalt.err (!%p12615_p2)
}
  0x3e   : > { %12092 = dma.hbm_to_vmem [thread:$0]  (!%p12860_p11), %s16382_s3, 9216, %s12864_s14, [#allocation8], %s12756_s13, %s12756_s13, %s12757_s15  }
  0x3f   : > { %s12619_s20 = scalar_lea.hbm %s16384_s5, 9216 }
  0x40   : > { %p12620_p6 = scmp.ne.s32.totalorder %s16384_s5, %s12619_s20  ;;  %p12626_p5 = scmp.lt.u32.totalorder %s12619_s20, %s16384_s5 }
  0x42   : > { %p12622_p10 = pnand %p12620_p6, %p12876_p13 }
  0x44   : > { %p12623_p3 = pneg %p12622_p10 }
  0x46   : > { %p12628_p7 = pnand %p12626_p5, %p12623_p3 }
  0x48   : > { %12631 = shalt.err (!%p12628_p7)
}
  0x49   : > { %s12632_s11 = scalar_lea.vmem %s253_s16, 9216  ;;  %p12640_p1 = scmp.lt.s32.totalorder %s253_s16, %s253_s16 }
  0x4a   : > { %p12633_p9 = scmp.ne.s32.totalorder %s253_s16, %s12632_s11  ;;  %p12641_p2 = scmp.lt.s32.totalorder %s12632_s11, %s12632_s11 }
  0x4c   : > { %p12635_p12 = pnand %p12633_p9, %p12876_p13  ;;  %p12642_p4 = por %p12641_p2, %p12640_p1 }
  0x4e   : > { %p12636_p0 = pneg %p12635_p12 }
  0x50   : > { %p12643_p8 = pnand %p12642_p4, %p12636_p0 }
  0x52   : > { %12646 = shalt.err (!%p12643_p8)
}
  0x53   : > { %12095 = dma.hbm_to_vmem [thread:$0]  (!%p12860_p11), %s16384_s5, 9216, %s253_s16, [#allocation11], %s12756_s13, %s12756_s13, %s12757_s15  }
  0x54   : > { %s12949_s22 = sadd.s32 1, %s12751_s27   ;;  %s32_s17 = sadd.s32 1, %s12747_s26 }
  0x55   : > { %s29_s12 = ssub.s32 %s12751_s27, %s12949_s22  ;;  %p39_p8 = scmp.ne.s32.totalorder %s12747_s26, %s12743_s25 }
  0x56   : > { %p30_p4 = scmp.eq.s32.totalorder %s29_s12, 0  ;;  %p40_p13 = scmp.eq.s32.totalorder %s12751_s27, 0 }
  0x57   : > { %p12107_p6 = scmp.lt.s32.totalorder %s12751_s27, 2  ;;  %p16485_p3 = scmp.eq.s32.totalorder %s12830_s28, 1 }
  0x58   : > { %s12959_s18 = scalar_select %p30_p4, %s12747_s26, %s32_s17  }
  0x59   : > { %p41_p10 = por %p40_p13, %p39_p8  ;;  %p12963_p5 = por %p16485_p3, %p39_p8 }
  0x5a   : > { %s269_s20 = sand.u32 1, %s12747_s26   ;;  %s12068_s21 = smul.u32 7168, %s12751_s27 }
  0x5b   : > { %s12067_s16 = smul.u32 448, %s269_s20  ;;  %p12974_p11 = pnand %p12107_p6, %p41_p10 }
  0x5c   : > { %s12972_s23 = scalar_lea.hbm %s16379_s0, %s12068_s21  ;;  %s12980_s14 = scalar_lea.sflag [#allocation5], %s269_s20 }
  0x5d   : > { %s273_s10 = scalar_lea.vmem [#allocation4], %s12067_s16  ;;  %s12647_s8 = scalar_lea.hbm %s12972_s23, 7168 }
  0x5e   : > { %s280_s11 = sshll.u32 %s273_s10, 4  ;;  %p12648_p7 = scmp.ne.s32.totalorder %s12972_s23, %s12647_s8  ;;  %s12978_s11 = int_to_ptr.vmem [resolvable:$true] %s280_s11 }
  0x5f   : > { %p12649_p9 = pneg %p12974_p11  ;;  %s12652_s21 = scalar_lea.hbm %s16379_s0, 14336 }
  0x60   : > { %p12653_p1 = scmp.lt.u32.totalorder %s12972_s23, %s16379_s0  ;;  %p12654_p2 = scmp.lt.u32.totalorder %s12652_s21, %s12647_s8 }
  0x61   : > { %p12650_p12 = pnand %p12649_p9, %p12648_p7  ;;  %p12656_p8 = scmp.lt.u32.totalorder %s12647_s8, %s12972_s23 }
  0x62   : > { %p12655_p4 = por %p12654_p2, %p12653_p1 }
  0x63   : > { %p12651_p0 = pneg %p12650_p12 }
  0x64   : > { %p12657_p13 = por %p12656_p8, %p12655_p4 }
  0x66   : > { %p12658_p6 = pnand %p12657_p13, %p12651_p0 }
  0x68   : > { %12661 = shalt.err (!%p12658_p6)
}
  0x69   : > { %s12662_s20 = scalar_lea.vmem %s12978_s11, 7168  ;;  %s12758_s16 = smov [#allocation4]  }
  0x6a   : > { %p12663_p10 = scmp.ne.s32.totalorder %s12978_s11, %s12662_s20  ;;  %s12667_s10 = sshll.u32 %s12758_s16, 4  ;;  %s12668_s10 = int_to_ptr.vmem [resolvable:$false] %s12667_s10 }
  0x6b   : > { %s12669_s12 = scalar_lea.vmem %s12668_s10, 14336  ;;  %p12670_p12 = scmp.lt.s32.totalorder %s12978_s11, %s12668_s10 }
  0x6c   : > { %p12665_p3 = pnand %p12663_p10, %p12649_p9  ;;  %p12671_p1 = scmp.lt.s32.totalorder %s12669_s12, %s12662_s20 }
  0x6e   : > { %p12666_p7 = pneg %p12665_p3  ;;  %p12672_p2 = por %p12671_p1, %p12670_p12 }
  0x70   : > { %p12673_p4 = pnand %p12672_p2, %p12666_p7 }
  0x72   : > { %12676 = shalt.err (!%p12673_p4)
}
  0x73   : > { %s12759_s8 = smov 128   ;;  %s12760_s17 = smov 8  }
  0x74   : > { %12099 = dma.hbm_to_vmem [thread:$0]  (!%p12974_p11), %s12972_s23, 7168, %s12978_s11, %s12980_s14, %s12759_s8, %s12759_s8, %s12760_s17  }
  0x75   : > { %p16488_p9 = scmp.ne.s32.totalorder %s16482_s9, 0 }
  0x77   : > { %292 = sbr.rel (%p16488_p9) target bundleno = 2634 (0xa4a), region = 48 }
  0x7e   : > { %s13011_s21 = sand.u32 1, %s12743_s25   ;;  %p16489_p0 = scmp.ne.s32.totalorder %s16479_s30, 0 }
  0x7f   : > { %s12069_s13 = smul.u32 448, %s13011_s21  ;;  %s295_s15 = scalar_lea.sflag [#allocation5], %s13011_s21 }
  0x81   : > { %s13015_s20 = scalar_lea.vmem [#allocation4], %s12069_s13 }
  0x82   : > { %12722 = dma.done.wait (%p16489_p0), %s295_s15, 7168  }
  0x83   : > { %12724 = vsyncadd (%p16489_p0), %s295_s15, 4294960128  ;;  %p16490_p11 = scmp.eq.s32.totalorder %s12830_s28, 0 }
  0x85   : > { %12726 = dma.done.wait (%p16490_p11), [#allocation8], 18432   ;;  %p16491_p8 = pmov %p16490_p11 }
  0x87   : > { %12728 = vsyncadd (%p16491_p8), [#allocation8], 4294948864  ;;  %p16492_p13 = pmov %p16491_p8 }
  0x88   : > { %p16493_p6 = pmov %p16491_p8 }
  0x89   : > { %12730 = dma.done.wait (%p16492_p13), [#allocation11], 9216  }
  0x8a   : > { %12732 = vsyncadd (%p16493_p6), [#allocation11], 4294958080  ;;  %v16391_v0 = vmov 0   ;;  %v12156_v1 = vld [vmem:[#allocation7] sm:$0xff]   ;;  %v12157_v2 = vld [vmem:[#allocation7 + $0x8] sm:$0xff]   ;;  %vm12764_vm1 = vmmov 1  }
  0x8b   : > { %2013 = vmatprep.subr.bf16.mxu0 %v16391_v0  ;;  %v12158_v3 = vld [vmem:[#allocation7 + $0x10] sm:$0xff]   ;;  %v12159_v4 = vld [vmem:[#allocation7 + $0x18] sm:$0xff]   ;;  %v12160_v5 = vld [vmem:[#allocation7 + $0x20] sm:$0xff]   ;;  %vm9439_vm7 = vcmask 1040384   ;;  %vm9440_vm8 = vcmask 1042434   ;;  %vm9442_vm10 = vcmask 1044484  }
  0x8c   : > { %2014 = vmatpush1.bf16.msra.mxu0 %v12156_v1  ;;  %v446_v6 = vld [vmem:[%s13015_s20 + $0x8] sm:$0xff]  ;;  %v447_v7 = vld [vmem:[%s13015_s20 + $0x10] sm:$0xff]  ;;  %v12163_v11 = vld [vmem:[#allocation7 + $0x38] sm:$0xff]   ;;  %vm9444_vm11 = vcmask 1046534   ;;  %vm10286_vm14 = vcmask 1041409   ;;  %vm10289_vm15 = vcmask 1043459  }
  0x8d   : > { %2015 = vmatprep.subr.bf16.mxu0 %v16391_v0  ;;  %v494_v8 = vpack.c.bf16 %v447_v7, %v446_v6  ;;  %v12161_v9 = vld [vmem:[#allocation7 + $0x28] sm:$0xff]   ;;  %v12162_v10 = vld [vmem:[#allocation7 + $0x30] sm:$0xff]   ;;  %v12164_v12 = vld [vmem:[#allocation7 + $0x40] sm:$0xff]   ;;  %s10489_s17 = sshll.u32 %s13011_s21, 6  ;;  %s10786_s30 = sshll.u32 %s12830_s28, 10 }
  0x8e   : > { %v12165_v13 = vld [vmem:[#allocation7 + $0x48] sm:$0xff]   ;;  %v12166_v14 = vld [vmem:[#allocation7 + $0x50] sm:$0xff]   ;;  %v12167_v15 = vld [vmem:[#allocation7 + $0x58] sm:$0xff]   ;;  %s15961_s13 = scalar_lea.vmem [#allocation12], %s10489_s17  ;;  %s16330_s11 = scalar_lea.hbm %s16386_s7, %s10786_s30 }
  0x8f   : > { %2045 = vmatprep.mubr.bf16.mxu0 %v494_v8  ;;  %v12168_v16 = vld [vmem:[#allocation7 + $0x60] sm:$0xff]   ;;  %v12169_v17 = vld [vmem:[#allocation7 + $0x68] sm:$0xff]   ;;  %v12170_v18 = vld [vmem:[#allocation7 + $0x70] sm:$0xff]   ;;  %s10376_s9 = sshll.u32 %s15961_s13, 4  ;;  %s10363_s28 = scalar_lea.sflag [#allocation6], %s13011_s21  ;;  %s16332_s9 = int_to_ptr.vmem [resolvable:$true] %s10376_s9 }
  0x90   : > { %2016 = vmatpush1.bf16.msra.mxu0 %v12157_v2  ;;  %v12171_v19 = vld [vmem:[#allocation7 + $0x78] sm:$0xff]   ;;  %v350_v20 = vld [vmem:[%s13015_s20 + $0x7] sm:$0xff]  ;;  %v351_v21 = vld [vmem:[%s13015_s20 + $0xf] sm:$0xff]  ;;  %s12677_s14 = scalar_lea.vmem %s16332_s9, 1024  ;;  %s12766_s16 = smov [#allocation12]  }
  0x91   : > { %2017 = vmatprep.subr.bf16.mxu0 %v16391_v0  ;;  %v448_v22 = vld [vmem:[%s13015_s20 + $0x18] sm:$0xff]  ;;  %v449_v23 = vld [vmem:[%s13015_s20 + $0x20] sm:$0xff]  ;;  %v398_v25 = vpack.c.bf16 %v351_v21, %v350_v20  ;;  %v12173_v29 = vld [vmem:[#allocation7 + $0x88] sm:$0xff]   ;;  %p12678_p10 = scmp.ne.s32.totalorder %s16332_s9, %s12677_s14  ;;  %s12681_s10 = sshll.u32 %s12766_s16, 4  ;;  %s12682_s10 = int_to_ptr.vmem [resolvable:$false] %s12681_s10 }
  0x92   : > { %v12172_v24 = vld [vmem:[#allocation7 + $0x80] sm:$0xff]   ;;  %v495_v26 = vpack.c.bf16 %v449_v23, %v448_v22  ;;  %v352_v27 = vld [vmem:[%s13015_s20 + $0x17] sm:$0xff]  ;;  %v450_v30 = vld [vmem:[%s13015_s20 + $0x28] sm:$0xff]  ;;  %s12683_s12 = scalar_lea.vmem %s12682_s10, 2048  ;;  %p12684_p12 = scmp.lt.s32.totalorder %s16332_s9, %s12682_s10 }
  0x93   : > { %v353_v28 = vld [vmem:[%s13015_s20 + $0x1f] sm:$0xff]  ;;  %v451_v31 = vld [vmem:[%s13015_s20 + $0x30] sm:$0xff]  ;;  %v354_v35 = vld [vmem:[%s13015_s20 + $0x27] sm:$0xff]  ;;  %p12679_p3 = pnand %p12678_p10, %p12963_p5  ;;  %p12685_p1 = scmp.lt.s32.totalorder %s12683_s12, %s12677_s14 }
  0x94   : > { %2018 = vmatpush1.bf16.msra.mxu0 %v12158_v3  ;;  %v12174_v32 = vld [vmem:[#allocation7 + $0x90] sm:$0xff]   ;;  %v399_v33 = vpack.c.bf16 %v353_v28, %v352_v27  ;;  %v496_v34 = vpack.c.bf16 %v451_v31, %v450_v30  ;;  %v452_v37 = vld [vmem:[%s13015_s20 + $0x38] sm:$0xff]  ;;  %v453_v38 = vld [vmem:[%s13015_s20 + $0x40] sm:$0xff] }
  0x95   : > { %2019 = vmatprep.subr.bf16.mxu0 %v16391_v0  ;;  %v355_v36 = vld [vmem:[%s13015_s20 + $0x2f] sm:$0xff]  ;;  %v12175_v39 = vld [vmem:[#allocation7 + $0x98] sm:$0xff]   ;;  %v12176_v40 = vld [vmem:[#allocation7 + $0xa0] sm:$0xff]   ;;  %v497_v42 = vpack.c.bf16 %v453_v38, %v452_v37  ;;  %p12680_p7 = pneg %p12679_p3  ;;  %p12686_p2 = por %p12685_p1, %p12684_p12 }
  0x96   : > { %v400_v41 = vpack.c.bf16 %v355_v36, %v354_v35  ;;  %v13065_v43 = vld [vmem:[%s13015_s20 + $0x37] sm:$0xff]  ;;  %v13068_v44 = vld [vmem:[%s13015_s20 + $0x3f] sm:$0xff]  ;;  %v454_v45 = vld [vmem:[%s13015_s20 + $0x48] sm:$0xff] }
  0x97   : > { %v455_v46 = vld [vmem:[%s13015_s20 + $0x50] sm:$0xff]  ;;  %v12177_v47 = vld [vmem:[#allocation7 + $0xa8] sm:$0xff]   ;;  %v401_v49 = vpack.c.bf16 %v13068_v44, %v13065_v43  ;;  %v456_v53 = vld [vmem:[%s13015_s20 + $0x58] sm:$0xff]  ;;  %p12687_p4 = pnand %p12686_p2, %p12680_p7 }
  0x98   : > { %2020 = vmatpush1.bf16.msra.mxu0 %v12159_v4  ;;  %v12178_v48 = vld [vmem:[#allocation7 + $0xb0] sm:$0xff]   ;;  %v498_v50 = vpack.c.bf16 %v455_v46, %v454_v45  ;;  %v13077_v51 = vld [vmem:[%s13015_s20 + $0x47] sm:$0xff]  ;;  %v12179_v55 = vld [vmem:[#allocation7 + $0xb8] sm:$0xff]  }
  0x99   : > { %2021 = vmatprep.subr.bf16.mxu0 %v16391_v0  ;;  %v13080_v52 = vld [vmem:[%s13015_s20 + $0x4f] sm:$0xff]  ;;  %v457_v54 = vld [vmem:[%s13015_s20 + $0x60] sm:$0xff]  ;;  %v13089_v59 = vld [vmem:[%s13015_s20 + $0x57] sm:$0xff] }
  0x9a   : > { %v12180_v56 = vld [vmem:[#allocation7 + $0xc0] sm:$0xff]   ;;  %v402_v57 = vpack.c.bf16 %v13080_v52, %v13077_v51  ;;  %v499_v58 = vpack.c.bf16 %v457_v54, %v456_v53  ;;  %v458_v61 = vld [vmem:[%s13015_s20 + $0x68] sm:$0xff]  ;;  %v459_v62 = vld [vmem:[%s13015_s20 + $0x70] sm:$0xff] }
  0x9b   : > { %v13092_v60 = vld [vmem:[%s13015_s20 + $0x5f] sm:$0xff]  ;;  %v12181_v63 = vld [vmem:[#allocation7 + $0xc8] sm:$0xff]   ;;  %v12182_v1 = vld [vmem:[#allocation7 + $0xd0] sm:$0xff]   ;;  %v500_v3 = vpack.c.bf16 %v459_v62, %v458_v61 }
  0x9c   : > { %2022 = vmatpush1.bf16.msra.mxu0 %v12160_v5  ;;  %v403_v2 = vpack.c.bf16 %v13092_v60, %v13089_v59  ;;  %v13101_v4 = vld [vmem:[%s13015_s20 + $0x67] sm:$0xff]  ;;  %v13104_v5 = vld [vmem:[%s13015_s20 + $0x6f] sm:$0xff]  ;;  %v460_v6 = vld [vmem:[%s13015_s20 + $0x78] sm:$0xff] }
  0x9d   : > { %2023 = vmatprep.subr.bf16.mxu0 %v16391_v0  ;;  %v461_v7 = vld [vmem:[%s13015_s20 + $0x80] sm:$0xff]  ;;  %v12183_v8 = vld [vmem:[#allocation7 + $0xd8] sm:$0xff]   ;;  %v13128_v21 = vld [vmem:[%s13015_s20 + $0x8f] sm:$0xff] }
  0x9e   : > { %v13125_v20 = vld [vmem:[%s13015_s20 + $0x87] sm:$0xff]  ;;  %v464_v22 = vld [vmem:[%s13015_s20 + $0x98] sm:$0xff]  ;;  %v467_v30 = vld [vmem:[%s13015_s20 + $0xb0] sm:$0xff] }
  0x9f   : > { %v465_v23 = vld [vmem:[%s13015_s20 + $0xa0] sm:$0xff]  ;;  %v13137_v27 = vld [vmem:[%s13015_s20 + $0x97] sm:$0xff]  ;;  %vm9441_vm9 = vmor %vm9439_vm7, %vm9440_vm8 }
  0xa0   : > { %2024 = vmatpush1.bf16.msra.mxu0 %v12161_v9  ;;  %v12184_v9 = vld [vmem:[#allocation7 + $0xe0] sm:$0xff]   ;;  %v468_v35 = vld [vmem:[%s13015_s20 + $0xb8] sm:$0xff]  ;;  %vm9443_vm12 = vmor %vm9441_vm9, %vm9442_vm10 }
  0xa1   : > { %2025 = vmatprep.subr.bf16.mxu0 %v16391_v0  ;;  %v13140_v28 = vld [vmem:[%s13015_s20 + $0x9f] sm:$0xff]  ;;  %vm15905_vm13 = vmor %vm9443_vm12, %vm9444_vm11 }
  0xa2   : > { %v407_v31 = vpack.c.bf16 %v13140_v28, %v13137_v27  ;;  %v469_v36 = vld [vmem:[%s13015_s20 + $0xc0] sm:$0xff] }
  0xa3   : > { %v505_v38 = vpack.c.bf16 %v469_v36, %v468_v35  ;;  %v13230_v35 = vld [vmem:[%s13015_s20 + $0x12f] sm:$0xff]  ;;  %v484_v36 = vld [vmem:[%s13015_s20 + $0x138] sm:$0xff] }
  0xa4   : > { %2026 = vmatpush1.bf16.msra.mxu0 %v12162_v10  ;;  %v404_v10 = vpack.c.bf16 %v13104_v5, %v13101_v4 }
  0xa5   : > { %2027 = vmatprep.subr.bf16.mxu0 %v16391_v0 }
  0xa8   : > { %2028 = vmatpush1.bf16.msra.mxu0 %v12163_v11  ;;  %v501_v11 = vpack.c.bf16 %v461_v7, %v460_v6 }
  0xa9   : > { %2029 = vmatprep.subr.bf16.mxu0 %v16391_v0 }
  0xac   : > { %2030 = vmatpush1.bf16.msra.mxu0 %v12164_v12  ;;  %v13113_v12 = vld [vmem:[%s13015_s20 + $0x77] sm:$0xff] }
  0xad   : > { %2031 = vmatprep.subr.bf16.mxu0 %v16391_v0 }
  0xb0   : > { %2032 = vmatpush1.bf16.msra.mxu0 %v12165_v13  ;;  %v13116_v13 = vld [vmem:[%s13015_s20 + $0x7f] sm:$0xff] }
  0xb1   : > { %2033 = vmatprep.subr.bf16.mxu0 %v16391_v0 }
  0xb4   : > { %2034 = vmatpush1.bf16.msra.mxu0 %v12166_v14  ;;  %v462_v14 = vld [vmem:[%s13015_s20 + $0x88] sm:$0xff] }
  0xb5   : > { %2035 = vmatprep.subr.bf16.mxu0 %v16391_v0 }
  0xb8   : > { %2036 = vmatpush1.bf16.msra.mxu0 %v12167_v15  ;;  %v463_v15 = vld [vmem:[%s13015_s20 + $0x90] sm:$0xff] }
  0xb9   : > { %2037 = vmatprep.subr.bf16.mxu0 %v16391_v0 }
  0xbc   : > { %2038 = vmatpush1.bf16.msra.mxu0 %v12168_v16  ;;  %v12185_v16 = vld [vmem:[#allocation7 + $0xe8] sm:$0xff]  }
  0xbd   : > { %2039 = vmatprep.subr.bf16.mxu0 %v16391_v0 }
  0xc0   : > { %2040 = vmatpush1.bf16.msra.mxu0 %v12169_v17  ;;  %v12186_v17 = vld [vmem:[#allocation7 + $0xf0] sm:$0xff]  }
  0xc1   : > { %2041 = vmatprep.subr.bf16.mxu0 %v16391_v0 }
  0xc4   : > { %2042 = vmatpush1.bf16.msra.mxu0 %v12170_v18  ;;  %v405_v18 = vpack.c.bf16 %v13116_v13, %v13113_v12 }
  0xc5   : > { %2043 = vmatprep.subr.bf16.mxu0 %v16391_v0 }
  0xc8   : > { %2044 = vmatpush1.bf16.msra.mxu0 %v12171_v19  ;;  %v502_v19 = vpack.c.bf16 %v463_v15, %v462_v14 }
  0xc9   : > { %2238 = vmatprep.subr.bf16.mxu0 %v16391_v0 }
  0xcb   : > { %2046 = vmatmul.mubr.bf16.vlgmr.msra.gmra.mrb[0].mxu0 %v398_v25  ;;  %v406_v25 = vpack.c.bf16 %v13128_v21, %v13125_v20 }
  0xcc   : > { %2239 = vmatpush1.bf16.msra.mxu0 %v12172_v24  ;;  %2053 = vmatprep.mubr.bf16.mxu0 %v495_v26  ;;  %v12187_v24 = vld [vmem:[#allocation7 + $0xf8] sm:$0xff]   ;;  %v503_v26 = vpack.c.bf16 %v465_v23, %v464_v22 }
  0xcd   : > { %2240 = vmatprep.subr.bf16.mxu0 %v16391_v0 }
  0xd0   : > { %2241 = vmatpush1.bf16.msra.mxu0 %v12173_v29  ;;  %v466_v29 = vld [vmem:[%s13015_s20 + $0xa8] sm:$0xff] }
  0xd1   : > { %2242 = vmatprep.subr.bf16.mxu0 %v16391_v0 }
  0xd3   : > { %2054 = vmatmul.mubr.bf16.gmra.mrb[4].mxu0 %v399_v33  ;;  %v13147_v33 = vld [vmem:[%s13015_s20 + $0xa7] sm:$0xff] }
  0xd4   : > { %2061 = vmatprep.mubr.bf16.mxu0 %v496_v34  ;;  %2243 = vmatpush1.bf16.msra.mxu0 %v12174_v32  ;;  %v504_v32 = vpack.c.bf16 %v467_v30, %v466_v29  ;;  %v13150_v34 = vld [vmem:[%s13015_s20 + $0xaf] sm:$0xff] }
  0xd5   : > { %2244 = vmatprep.subr.bf16.mxu0 %v16391_v0  ;;  %v408_v37 = vpack.c.bf16 %v13150_v34, %v13147_v33  ;;  %v483_v29 = vld [vmem:[%s13015_s20 + $0x130] sm:$0xff] }
  0xd8   : > { %2245 = vmatpush1.bf16.msra.mxu0 %v12175_v39  ;;  %v13157_v39 = vld [vmem:[%s13015_s20 + $0xb7] sm:$0xff] }
  0xd9   : > { %2246 = vmatprep.subr.bf16.mxu0 %v16391_v0 }
  0xdb   : > { %2062 = vmatmul.mubr.bf16.gmra.mrb[8].mxu0 %v400_v41  ;;  %v470_v41 = vld [vmem:[%s13015_s20 + $0xc8] sm:$0xff] }
  0xdc   : > { %2069 = vmatprep.mubr.bf16.mxu0 %v497_v42  ;;  %2247 = vmatpush1.bf16.msra.mxu0 %v12176_v40  ;;  %v13160_v40 = vld [vmem:[%s13015_s20 + $0xbf] sm:$0xff]  ;;  %v471_v42 = vld [vmem:[%s13015_s20 + $0xd0] sm:$0xff] }
  0xdd   : > { %2248 = vmatprep.subr.bf16.mxu0 %v16391_v0  ;;  %v409_v45 = vpack.c.bf16 %v13160_v40, %v13157_v39  ;;  %v506_v46 = vpack.c.bf16 %v471_v42, %v470_v41  ;;  %v13237_v42 = vld [vmem:[%s13015_s20 + $0x137] sm:$0xff] }
  0xe0   : > { %2249 = vmatpush1.bf16.msra.mxu0 %v12177_v47  ;;  %v13167_v47 = vld [vmem:[%s13015_s20 + $0xc7] sm:$0xff] }
  0xe1   : > { %2250 = vmatprep.subr.bf16.mxu0 %v16391_v0 }
  0xe3   : > { %2070 = vmatmul.mubr.bf16.gmra.mrb[12].mxu0 %v401_v49  ;;  %v472_v49 = vld [vmem:[%s13015_s20 + $0xd8] sm:$0xff] }
  0xe4   : > { %2077 = vmatprep.mubr.bf16.mxu0 %v498_v50  ;;  %2251 = vmatpush1.bf16.msra.mxu0 %v12178_v48  ;;  %v13170_v48 = vld [vmem:[%s13015_s20 + $0xcf] sm:$0xff]  ;;  %v473_v50 = vld [vmem:[%s13015_s20 + $0xe0] sm:$0xff] }
  0xe5   : > { %2252 = vmatprep.subr.bf16.mxu0 %v16391_v0  ;;  %v410_v53 = vpack.c.bf16 %v13170_v48, %v13167_v47  ;;  %v507_v54 = vpack.c.bf16 %v473_v50, %v472_v49  ;;  %v487_v49 = vld [vmem:[%s13015_s20 + $0x150] sm:$0xff] }
  0xe8   : > { %2253 = vmatpush1.bf16.msra.mxu0 %v12179_v55  ;;  %v13177_v55 = vld [vmem:[%s13015_s20 + $0xd7] sm:$0xff] }
  0xe9   : > { %2254 = vmatprep.subr.bf16.mxu0 %v16391_v0 }
  0xeb   : > { %2078 = vmatmul.mubr.bf16.gmra.mrb[16].mxu0 %v402_v57  ;;  %v474_v57 = vld [vmem:[%s13015_s20 + $0xe8] sm:$0xff] }
  0xec   : > { %2085 = vmatprep.mubr.bf16.mxu0 %v499_v58  ;;  %2255 = vmatpush1.bf16.msra.mxu0 %v12180_v56  ;;  %v13180_v56 = vld [vmem:[%s13015_s20 + $0xdf] sm:$0xff]  ;;  %v475_v58 = vld [vmem:[%s13015_s20 + $0xf0] sm:$0xff] }
  0xed   : > { %2256 = vmatprep.subr.bf16.mxu0 %v16391_v0  ;;  %v411_v61 = vpack.c.bf16 %v13180_v56, %v13177_v55  ;;  %v508_v62 = vpack.c.bf16 %v475_v58, %v474_v57  ;;  %v13250_v57 = vld [vmem:[%s13015_s20 + $0x14f] sm:$0xff]  ;;  %v488_v58 = vld [vmem:[%s13015_s20 + $0x158] sm:$0xff] }
  0xf0   : > { %2257 = vmatpush1.bf16.msra.mxu0 %v12181_v63  ;;  %v13187_v63 = vld [vmem:[%s13015_s20 + $0xe7] sm:$0xff] }
  0xf1   : > { %2258 = vmatprep.subr.bf16.mxu0 %v16391_v0 }
  0xf3   : > { %2086 = vmatmul.mubr.bf16.gmra.mrb[20].mxu0 %v403_v2  ;;  %v476_v2 = vld [vmem:[%s13015_s20 + $0xf8] sm:$0xff] }
  0xf4   : > { %2093 = vmatprep.mubr.bf16.mxu0 %v500_v3  ;;  %2259 = vmatpush1.bf16.msra.mxu0 %v12182_v1  ;;  %v13190_v1 = vld [vmem:[%s13015_s20 + $0xef] sm:$0xff]  ;;  %v477_v3 = vld [vmem:[%s13015_s20 + $0x100] sm:$0xff] }
  0xf5   : > { %2260 = vmatprep.subr.bf16.mxu0 %v16391_v0  ;;  %v412_v6 = vpack.c.bf16 %v13190_v1, %v13187_v63  ;;  %v509_v7 = vpack.c.bf16 %v477_v3, %v476_v2  ;;  %v13257_v3 = vld [vmem:[%s13015_s20 + $0x157] sm:$0xff] }
  0xf8   : > { %2261 = vmatpush1.bf16.msra.mxu0 %v12183_v8  ;;  %v13197_v8 = vld [vmem:[%s13015_s20 + $0xf7] sm:$0xff] }
  0xf9   : > { %2262 = vmatprep.subr.bf16.mxu0 %v16391_v0 }
  0xfb   : > { %2094 = vmatmul.mubr.bf16.gmra.mrb[24].mxu0 %v404_v10  ;;  %v478_v10 = vld [vmem:[%s13015_s20 + $0x108] sm:$0xff] }
  0xfc   : > { %2101 = vmatprep.mubr.bf16.mxu0 %v501_v11  ;;  %2263 = vmatpush1.bf16.msra.mxu0 %v12184_v9  ;;  %v13200_v9 = vld [vmem:[%s13015_s20 + $0xff] sm:$0xff]  ;;  %v479_v11 = vld [vmem:[%s13015_s20 + $0x110] sm:$0xff] }
  0xfd   : > { %2264 = vmatprep.subr.bf16.mxu0 %v16391_v0  ;;  %v413_v14 = vpack.c.bf16 %v13200_v9, %v13197_v8  ;;  %v510_v15 = vpack.c.bf16 %v479_v11, %v478_v10  ;;  %v491_v10 = vld [vmem:[%s13015_s20 + $0x170] sm:$0xff] }
 0x100   : > { %2265 = vmatpush1.bf16.msra.mxu0 %v12185_v16  ;;  %v13207_v16 = vld [vmem:[%s13015_s20 + $0x107] sm:$0xff] }
 0x101   : > { %2266 = vmatprep.subr.bf16.mxu0 %v16391_v0 }
 0x103   : > { %2102 = vmatmul.mubr.bf16.gmra.mrb[28].mxu0 %v405_v18  ;;  %v480_v18 = vld [vmem:[%s13015_s20 + $0x118] sm:$0xff] }
 0x104   : > { %2109 = vmatprep.mubr.bf16.mxu0 %v502_v19  ;;  %2267 = vmatpush1.bf16.msra.mxu0 %v12186_v17  ;;  %v13210_v17 = vld [vmem:[%s13015_s20 + $0x10f] sm:$0xff]  ;;  %v481_v19 = vld [vmem:[%s13015_s20 + $0x120] sm:$0xff] }
 0x105   : > { %2268 = vmatprep.subr.bf16.mxu0 %v16391_v0  ;;  %v414_v22 = vpack.c.bf16 %v13210_v17, %v13207_v16  ;;  %v511_v23 = vpack.c.bf16 %v481_v19, %v480_v18  ;;  %v13270_v18 = vld [vmem:[%s13015_s20 + $0x16f] sm:$0xff]  ;;  %v492_v19 = vld [vmem:[%s13015_s20 + $0x178] sm:$0xff] }
 0x108   : > { %2269 = vmatpush1.bf16.msra.mxu0 %v12187_v24  ;;  %v13217_v24 = vld [vmem:[%s13015_s20 + $0x117] sm:$0xff] }
 0x109   : > { %2463 = vmatprep.subr.bf16.mxu0 %v16391_v0 }
 0x10b   : > { %2110 = vmatmul.mubr.bf16.gmra.mrb[32].mxu0 %v406_v25  ;;  %v13220_v25 = vld [vmem:[%s13015_s20 + $0x11f] sm:$0xff] }
 0x10c   : > { %2117 = vmatprep.mubr.bf16.mxu0 %v503_v26  ;;  %v482_v26 = vld [vmem:[%s13015_s20 + $0x128] sm:$0xff]  ;;  %v415_v30 = vpack.c.bf16 %v13220_v25, %v13217_v24 }
 0x113   : > { %2118 = vmatmul.mubr.bf16.gmra.mrb[36].mxu0 %v407_v31  ;;  %v512_v31 = vpack.c.bf16 %v483_v29, %v482_v26  ;;  %v13277_v29 = vld [vmem:[%s13015_s20 + $0x177] sm:$0xff] }
 0x114   : > { %2125 = vmatprep.mubr.bf16.mxu0 %v504_v32  ;;  %v13227_v32 = vld [vmem:[%s13015_s20 + $0x127] sm:$0xff] }
 0x11b   : > { %2126 = vmatmul.mubr.bf16.gmra.mrb[40].mxu0 %v408_v37  ;;  %v485_v37 = vld [vmem:[%s13015_s20 + $0x140] sm:$0xff] }
 0x11c   : > { %2133 = vmatprep.mubr.bf16.mxu0 %v505_v38  ;;  %v416_v38 = vpack.c.bf16 %v13230_v35, %v13227_v32  ;;  %v513_v41 = vpack.c.bf16 %v485_v37, %v484_v36  ;;  %v12372_v36 = vld [vmem:[%s13015_s20 + $0x1f] sm:$0xff]  ;;  %v12373_v37 = vld [vmem:[%s13015_s20 + $0x27] sm:$0xff] }
 0x123   : > { %2134 = vmatmul.mubr.bf16.gmra.mrb[44].mxu0 %v409_v45  ;;  %v13240_v45 = vld [vmem:[%s13015_s20 + $0x13f] sm:$0xff] }
 0x124   : > { %2141 = vmatprep.mubr.bf16.mxu0 %v506_v46  ;;  %v486_v46 = vld [vmem:[%s13015_s20 + $0x148] sm:$0xff]  ;;  %v417_v50 = vpack.c.bf16 %v13240_v45, %v13237_v42 }
 0x12b   : > { %2142 = vmatmul.mubr.bf16.gmra.mrb[48].mxu0 %v410_v53  ;;  %v514_v53 = vpack.c.bf16 %v487_v49, %v486_v46  ;;  %v543_v46 = vld [vmem:[%s13015_s20 + $0x11] sm:$0xff] }
 0x12c   : > { %2149 = vmatprep.mubr.bf16.mxu0 %v507_v54  ;;  %v13247_v54 = vld [vmem:[%s13015_s20 + $0x147] sm:$0xff] }
 0x133   : > { %2150 = vmatmul.mubr.bf16.gmra.mrb[52].mxu0 %v411_v61  ;;  %v489_v61 = vld [vmem:[%s13015_s20 + $0x160] sm:$0xff] }
 0x134   : > { %2157 = vmatprep.mubr.bf16.mxu0 %v508_v62  ;;  %v418_v62 = vpack.c.bf16 %v13250_v57, %v13247_v54  ;;  %v515_v2 = vpack.c.bf16 %v489_v61, %v488_v58  ;;  %v544_v61 = vld [vmem:[%s13015_s20 + $0x19] sm:$0xff] }
 0x13b   : > { %2158 = vmatmul.mubr.bf16.gmra.mrb[56].mxu0 %v412_v6  ;;  %v13260_v6 = vld [vmem:[%s13015_s20 + $0x15f] sm:$0xff] }
 0x13c   : > { %2165 = vmatprep.mubr.bf16.mxu0 %v509_v7  ;;  %v490_v7 = vld [vmem:[%s13015_s20 + $0x168] sm:$0xff]  ;;  %v419_v11 = vpack.c.bf16 %v13260_v6, %v13257_v3 }
 0x143   : > { %2166 = vmatmul.mubr.bf16.gmra.mrb[60].mxu0 %v413_v14  ;;  %v516_v14 = vpack.c.bf16 %v491_v10, %v490_v7  ;;  %v688_v10 = vpack.c.bf16 %v13077_v51, %v13068_v44  ;;  %v689_v44 = vpack.c.bf16 %v13089_v59, %v13080_v52  ;;  %v12192_v51 = vld [vmem:[#allocation7 + $0x120] sm:$0xff]   ;;  %v690_v52 = vpack.c.bf16 %v13101_v4, %v13092_v60  ;;  %v12194_v59 = vld [vmem:[#allocation7 + $0x130] sm:$0xff]  }
 0x144   : > { %2173 = vmatprep.mubr.bf16.mxu0 %v510_v15  ;;  %v13267_v15 = vld [vmem:[%s13015_s20 + $0x167] sm:$0xff]  ;;  %v691_v60 = vpack.c.bf16 %v13113_v12, %v13104_v5  ;;  %v692_v5 = vpack.c.bf16 %v13125_v20, %v13116_v13  ;;  %v12198_v12 = vld [vmem:[#allocation7 + $0x150] sm:$0xff]   ;;  %v693_v13 = vpack.c.bf16 %v13137_v27, %v13128_v21  ;;  %v694_v21 = vpack.c.bf16 %v13147_v33, %v13140_v28 }
 0x145   : > { %v12196_v4 = vld [vmem:[#allocation7 + $0x140] sm:$0xff]   ;;  %v12202_v27 = vld [vmem:[#allocation7 + $0x170] sm:$0xff]   ;;  %v695_v33 = vpack.c.bf16 %v13157_v39, %v13150_v34 }
 0x146   : > { %v12200_v20 = vld [vmem:[#allocation7 + $0x160] sm:$0xff]   ;;  %v13394_v34 = vld [vmem:[%s13015_s20 + $0xa9] sm:$0xff]  ;;  %v13397_v39 = vld [vmem:[%s13015_s20 + $0xb1] sm:$0xff] }
 0x14b   : > { %2174 = vmatmul.mubr.bf16.gmra.mrb[64].mxu0 %v414_v22  ;;  %v493_v22 = vld [vmem:[%s13015_s20 + $0x180] sm:$0xff] }
 0x14c   : > { %2181 = vmatprep.mubr.bf16.mxu0 %v511_v23  ;;  %v420_v23 = vpack.c.bf16 %v13270_v18, %v13267_v15  ;;  %v517_v26 = vpack.c.bf16 %v493_v22, %v492_v19  ;;  %v12191_v19 = vld [vmem:[#allocation7 + $0x118] sm:$0xff]  }
 0x153   : > { %2182 = vmatmul.mubr.bf16.gmra.mrb[68].mxu0 %v415_v30  ;;  %v13280_v30 = vld [vmem:[%s13015_s20 + $0x17f] sm:$0xff] }
 0x154   : > { %2189 = vmatprep.mubr.bf16.mxu0 %v512_v31  ;;  %v421_v31 = vpack.c.bf16 %v13280_v30, %v13277_v29 }
 0x15b   : > { %2190 = vmatmul.mubr.bf16.gmra.mrb[72].mxu0 %v416_v38  ;;  %v686_v38 = vpack.c.bf16 %v12373_v37, %v12372_v36  ;;  %v13324_v37 = vld [vmem:[%s13015_s20 + $0x49] sm:$0xff] }
 0x15c   : > { %2197 = vmatprep.mubr.bf16.mxu0 %v513_v41  ;;  %v542_v41 = vld [vmem:[%s13015_s20 + $0x9] sm:$0xff] }
 0x15d   : > { %v590_v49 = vpack.c.bf16 %v543_v46, %v542_v41  ;;  %v12195_v41 = vld [vmem:[#allocation7 + $0x138] sm:$0xff]  }
 0x163   : > { %2198 = vmatmul.mubr.bf16.gmra.mrb[76].mxu0 %v417_v50  ;;  %v12188_v50 = vld [vmem:[#allocation7 + $0x100] sm:$0xff]  }
 0x164   : > { %2205 = vmatprep.mubr.bf16.mxu0 %v514_v53  ;;  %v12374_v53 = vld [vmem:[%s13015_s20 + $0x2f] sm:$0xff] }
 0x165   : > { %v687_v58 = vpack.c.bf16 %v13065_v43, %v12374_v53  ;;  %v13300_v43 = vld [vmem:[%s13015_s20 + $0x29] sm:$0xff] }
 0x166   : > { %v12197_v53 = vld [vmem:[#allocation7 + $0x148] sm:$0xff]  }
 0x16b   : > { %2206 = vmatmul.mubr.bf16.gmra.mrb[80].mxu0 %v418_v62  ;;  %v13292_v62 = vld [vmem:[%s13015_s20 + $0x21] sm:$0xff] }
 0x16c   : > { %2213 = vmatprep.mubr.bf16.mxu0 %v515_v2  ;;  %v12189_v2 = vld [vmem:[#allocation7 + $0x108] sm:$0xff]   ;;  %v591_v7 = vpack.c.bf16 %v13292_v62, %v544_v61 }
 0x16d   : > { %v13348_v61 = vld [vmem:[%s13015_s20 + $0x69] sm:$0xff] }
 0x173   : > { %2214 = vmatmul.mubr.bf16.gmra.mrb[84].mxu0 %v419_v11  ;;  %v12190_v11 = vld [vmem:[#allocation7 + $0x110] sm:$0xff]  }
 0x174   : > { %2221 = vmatprep.mubr.bf16.mxu0 %v516_v14  ;;  %v13303_v14 = vld [vmem:[%s13015_s20 + $0x31] sm:$0xff] }
 0x175   : > { %v592_v22 = vpack.c.bf16 %v13303_v14, %v13300_v43 }
 0x17b   : > { %2222 = vmatmul.mubr.bf16.gmra.mrb[88].mxu0 %v420_v23  ;;  %v13312_v23 = vld [vmem:[%s13015_s20 + $0x39] sm:$0xff] }
 0x17c   : > { %2229 = vmatprep.mubr.bf16.mxu0 %v517_v26  ;;  %v13315_v26 = vld [vmem:[%s13015_s20 + $0x41] sm:$0xff] }
 0x17d   : > { %v593_v36 = vpack.c.bf16 %v13315_v26, %v13312_v23 }
 0x183   : > { %2230 = vmatmul.mubr.bf16.gmra.mrb[92].mxu0 %v421_v31  ;;  %v12193_v31 = vld [vmem:[#allocation7 + $0x128] sm:$0xff]  }
 0x184   : > { %2270 = vmatprep.mubr.bf16.mxu0 %v686_v38  ;;  %v13327_v38 = vld [vmem:[%s13015_s20 + $0x51] sm:$0xff] }
 0x185   : > { %v594_v46 = vpack.c.bf16 %v13327_v38, %v13324_v37 }
 0x18b   : > { %2271 = vmatmul.mubr.bf16.vlgmr.msra.gmra.mrb[0].mxu0 %v590_v49  ;;  %v13336_v49 = vld [vmem:[%s13015_s20 + $0x59] sm:$0xff] }
 0x18c   : > { %2464 = vmatpush1.bf16.msra.mxu0 %v12188_v50  ;;  %2278 = vmatprep.mubr.bf16.mxu0 %v687_v58  ;;  %v13339_v50 = vld [vmem:[%s13015_s20 + $0x61] sm:$0xff] }
 0x18d   : > { %2465 = vmatprep.subr.bf16.mxu0 %v16391_v0  ;;  %v595_v58 = vpack.c.bf16 %v13339_v50, %v13336_v49 }
 0x190   : > { %2466 = vmatpush1.bf16.msra.mxu0 %v12189_v2  ;;  %v13351_v2 = vld [vmem:[%s13015_s20 + $0x71] sm:$0xff] }
 0x191   : > { %2467 = vmatprep.subr.bf16.mxu0 %v16391_v0 }
 0x193   : > { %2279 = vmatmul.mubr.bf16.gmra.mrb[4].mxu0 %v591_v7  ;;  %v12199_v7 = vld [vmem:[#allocation7 + $0x158] sm:$0xff]  }
 0x194   : > { %2286 = vmatprep.mubr.bf16.mxu0 %v688_v10  ;;  %2468 = vmatpush1.bf16.msra.mxu0 %v12190_v11  ;;  %v596_v10 = vpack.c.bf16 %v13351_v2, %v13348_v61  ;;  %v13360_v11 = vld [vmem:[%s13015_s20 + $0x79] sm:$0xff] }
 0x195   : > { %2469 = vmatprep.subr.bf16.mxu0 %v16391_v0 }
 0x198   : > { %2470 = vmatpush1.bf16.msra.mxu0 %v12191_v19  ;;  %v13363_v19 = vld [vmem:[%s13015_s20 + $0x81] sm:$0xff] }
 0x199   : > { %2471 = vmatprep.subr.bf16.mxu0 %v16391_v0 }
 0x19b   : > { %2287 = vmatmul.mubr.bf16.gmra.mrb[8].mxu0 %v592_v22  ;;  %v12201_v22 = vld [vmem:[#allocation7 + $0x168] sm:$0xff]  }
 0x19c   : > { %2294 = vmatprep.mubr.bf16.mxu0 %v689_v44  ;;  %2472 = vmatpush1.bf16.msra.mxu0 %v12192_v51  ;;  %v597_v44 = vpack.c.bf16 %v13363_v19, %v13360_v11  ;;  %v13372_v51 = vld [vmem:[%s13015_s20 + $0x89] sm:$0xff] }
 0x19d   : > { %2473 = vmatprep.subr.bf16.mxu0 %v16391_v0 }
 0x1a0   : > { %2474 = vmatpush1.bf16.msra.mxu0 %v12193_v31  ;;  %v13375_v31 = vld [vmem:[%s13015_s20 + $0x91] sm:$0xff] }
 0x1a1   : > { %2475 = vmatprep.subr.bf16.mxu0 %v16391_v0  ;;  %v598_v28 = vpack.c.bf16 %v13375_v31, %v13372_v51 }
 0x1a3   : > { %2295 = vmatmul.mubr.bf16.gmra.mrb[12].mxu0 %v593_v36  ;;  %v12203_v36 = vld [vmem:[#allocation7 + $0x178] sm:$0xff]  }
 0x1a4   : > { %2302 = vmatprep.mubr.bf16.mxu0 %v690_v52  ;;  %2476 = vmatpush1.bf16.msra.mxu0 %v12194_v59  ;;  %v13384_v52 = vld [vmem:[%s13015_s20 + $0x99] sm:$0xff]  ;;  %v13387_v59 = vld [vmem:[%s13015_s20 + $0xa1] sm:$0xff] }
 0x1a5   : > { %2477 = vmatprep.subr.bf16.mxu0 %v16391_v0 }
 0x1a8   : > { %2478 = vmatpush1.bf16.msra.mxu0 %v12195_v41  ;;  %v599_v41 = vpack.c.bf16 %v13387_v59, %v13384_v52 }
 0x1a9   : > { %2479 = vmatprep.subr.bf16.mxu0 %v16391_v0 }
 0x1ab   : > { %2303 = vmatmul.mubr.bf16.gmra.mrb[16].mxu0 %v594_v46  ;;  %v696_v46 = vpack.c.bf16 %v13167_v47, %v13160_v40  ;;  %v13407_v40 = vld [vmem:[%s13015_s20 + $0xc1] sm:$0xff] }
 0x1ac   : > { %2310 = vmatprep.mubr.bf16.mxu0 %v691_v60  ;;  %2480 = vmatpush1.bf16.msra.mxu0 %v12196_v4  ;;  %v600_v60 = vpack.c.bf16 %v13397_v39, %v13394_v34  ;;  %v697_v4 = vpack.c.bf16 %v13177_v55, %v13170_v48  ;;  %v13417_v48 = vld [vmem:[%s13015_s20 + $0xd1] sm:$0xff] }
 0x1ad   : > { %2481 = vmatprep.subr.bf16.mxu0 %v16391_v0 }
 0x1b0   : > { %2482 = vmatpush1.bf16.msra.mxu0 %v12197_v53  ;;  %v13404_v53 = vld [vmem:[%s13015_s20 + $0xb9] sm:$0xff] }
 0x1b1   : > { %2483 = vmatprep.subr.bf16.mxu0 %v16391_v0  ;;  %v601_v47 = vpack.c.bf16 %v13407_v40, %v13404_v53 }
 0x1b3   : > { %2311 = vmatmul.mubr.bf16.gmra.mrb[20].mxu0 %v595_v58  ;;  %v698_v58 = vpack.c.bf16 %v13187_v63, %v13180_v56  ;;  %v13427_v56 = vld [vmem:[%s13015_s20 + $0xe1] sm:$0xff] }
 0x1b4   : > { %2318 = vmatprep.mubr.bf16.mxu0 %v692_v5  ;;  %2484 = vmatpush1.bf16.msra.mxu0 %v12198_v12  ;;  %v13414_v5 = vld [vmem:[%s13015_s20 + $0xc9] sm:$0xff]  ;;  %v699_v12 = vpack.c.bf16 %v13197_v8, %v13190_v1  ;;  %v13437_v1 = vld [vmem:[%s13015_s20 + $0xf1] sm:$0xff] }
 0x1b5   : > { %2485 = vmatprep.subr.bf16.mxu0 %v16391_v0  ;;  %v602_v55 = vpack.c.bf16 %v13417_v48, %v13414_v5 }
 0x1b8   : > { %2486 = vmatpush1.bf16.msra.mxu0 %v12199_v7  ;;  %v13424_v7 = vld [vmem:[%s13015_s20 + $0xd9] sm:$0xff] }
 0x1b9   : > { %2487 = vmatprep.subr.bf16.mxu0 %v16391_v0  ;;  %v603_v63 = vpack.c.bf16 %v13427_v56, %v13424_v7 }
 0x1bb   : > { %2319 = vmatmul.mubr.bf16.gmra.mrb[24].mxu0 %v596_v10  ;;  %v700_v10 = vpack.c.bf16 %v13207_v16, %v13200_v9  ;;  %v13447_v9 = vld [vmem:[%s13015_s20 + $0x101] sm:$0xff] }
 0x1bc   : > { %2326 = vmatprep.mubr.bf16.mxu0 %v693_v13  ;;  %2488 = vmatpush1.bf16.msra.mxu0 %v12200_v20  ;;  %v13434_v13 = vld [vmem:[%s13015_s20 + $0xe9] sm:$0xff]  ;;  %v701_v20 = vpack.c.bf16 %v13217_v24, %v13210_v17  ;;  %v13457_v17 = vld [vmem:[%s13015_s20 + $0x111] sm:$0xff] }
 0x1bd   : > { %2489 = vmatprep.subr.bf16.mxu0 %v16391_v0  ;;  %v604_v8 = vpack.c.bf16 %v13437_v1, %v13434_v13 }
 0x1c0   : > { %2490 = vmatpush1.bf16.msra.mxu0 %v12201_v22  ;;  %v13444_v22 = vld [vmem:[%s13015_s20 + $0xf9] sm:$0xff] }
 0x1c1   : > { %2491 = vmatprep.subr.bf16.mxu0 %v16391_v0  ;;  %v605_v16 = vpack.c.bf16 %v13447_v9, %v13444_v22 }
 0x1c3   : > { %2327 = vmatmul.mubr.bf16.gmra.mrb[28].mxu0 %v597_v44  ;;  %v702_v44 = vpack.c.bf16 %v13227_v32, %v13220_v25  ;;  %v13467_v25 = vld [vmem:[%s13015_s20 + $0x121] sm:$0xff] }
 0x1c4   : > { %2334 = vmatprep.mubr.bf16.mxu0 %v694_v21  ;;  %2492 = vmatpush1.bf16.msra.mxu0 %v12202_v27  ;;  %v13454_v21 = vld [vmem:[%s13015_s20 + $0x109] sm:$0xff]  ;;  %v703_v27 = vpack.c.bf16 %v13237_v42, %v13230_v35  ;;  %v13477_v35 = vld [vmem:[%s13015_s20 + $0x131] sm:$0xff] }
 0x1c5   : > { %2493 = vmatprep.subr.bf16.mxu0 %v16391_v0  ;;  %v606_v24 = vpack.c.bf16 %v13457_v17, %v13454_v21 }
 0x1c8   : > { %2494 = vmatpush1.bf16.msra.mxu0 %v12203_v36  ;;  %v13464_v36 = vld [vmem:[%s13015_s20 + $0x119] sm:$0xff] }
 0x1c9   : > { %2688 = vmatprep.subr.bf16.mxu0 %v16391_v0  ;;  %v607_v32 = vpack.c.bf16 %v13467_v25, %v13464_v36 }
 0x1cb   : > { %2335 = vmatmul.mubr.bf16.gmra.mrb[32].mxu0 %v598_v28  ;;  %v704_v28 = vpack.c.bf16 %v13247_v54, %v13240_v45  ;;  %v13487_v45 = vld [vmem:[%s13015_s20 + $0x141] sm:$0xff] }
 0x1cc   : > { %2342 = vmatprep.mubr.bf16.mxu0 %v695_v33  ;;  %v13474_v33 = vld [vmem:[%s13015_s20 + $0x129] sm:$0xff] }
 0x1cd   : > { %v608_v42 = vpack.c.bf16 %v13477_v35, %v13474_v33 }
 0x1d3   : > { %2343 = vmatmul.mubr.bf16.gmra.mrb[36].mxu0 %v599_v41  ;;  %v705_v41 = vpack.c.bf16 %v13257_v3, %v13250_v57  ;;  %v13494_v57 = vld [vmem:[%s13015_s20 + $0x149] sm:$0xff]  ;;  %v13497_v3 = vld [vmem:[%s13015_s20 + $0x151] sm:$0xff] }
 0x1d4   : > { %2350 = vmatprep.mubr.bf16.mxu0 %v696_v46  ;;  %v13484_v46 = vld [vmem:[%s13015_s20 + $0x139] sm:$0xff] }
 0x1d5   : > { %v609_v54 = vpack.c.bf16 %v13487_v45, %v13484_v46 }
 0x1db   : > { %2351 = vmatmul.mubr.bf16.gmra.mrb[40].mxu0 %v600_v60  ;;  %v706_v60 = vpack.c.bf16 %v13267_v15, %v13260_v6  ;;  %v13504_v6 = vld [vmem:[%s13015_s20 + $0x159] sm:$0xff]  ;;  %v13507_v15 = vld [vmem:[%s13015_s20 + $0x161] sm:$0xff] }
 0x1dc   : > { %2358 = vmatprep.mubr.bf16.mxu0 %v697_v4  ;;  %v610_v4 = vpack.c.bf16 %v13497_v3, %v13494_v57 }
 0x1e3   : > { %2359 = vmatmul.mubr.bf16.gmra.mrb[44].mxu0 %v601_v47  ;;  %v707_v47 = vpack.c.bf16 %v13277_v29, %v13270_v18  ;;  %v13517_v18 = vld [vmem:[%s13015_s20 + $0x171] sm:$0xff] }
 0x1e4   : > { %2366 = vmatprep.mubr.bf16.mxu0 %v698_v58  ;;  %v683_v58 = vld [vmem:[%s13015_s20 + $0x187] sm:$0xff]  ;;  %v684_v29 = vld [vmem:[%s13015_s20 + $0x18f] sm:$0xff] }
 0x1eb   : > { %2367 = vmatmul.mubr.bf16.gmra.mrb[48].mxu0 %v602_v55  ;;  %v611_v55 = vpack.c.bf16 %v13507_v15, %v13504_v6 }
 0x1ec   : > { %2374 = vmatprep.mubr.bf16.mxu0 %v699_v12  ;;  %v708_v12 = vpack.c.bf16 %v683_v58, %v13280_v30  ;;  %v13527_v30 = vld [vmem:[%s13015_s20 + $0x181] sm:$0xff]  ;;  %v12207_v58 = vld [vmem:[#allocation7 + $0x198] sm:$0xff]  }
 0x1f3   : > { %2375 = vmatmul.mubr.bf16.gmra.mrb[52].mxu0 %v603_v63  ;;  %v13514_v63 = vld [vmem:[%s13015_s20 + $0x169] sm:$0xff] }
 0x1f4   : > { %2382 = vmatprep.mubr.bf16.mxu0 %v700_v10  ;;  %v685_v10 = vld [vmem:[%s13015_s20 + $0x197] sm:$0xff] }
 0x1fb   : > { %2383 = vmatmul.mubr.bf16.gmra.mrb[56].mxu0 %v604_v8  ;;  %v612_v8 = vpack.c.bf16 %v13517_v18, %v13514_v63 }
 0x1fc   : > { %2390 = vmatprep.mubr.bf16.mxu0 %v701_v20  ;;  %v709_v20 = vpack.c.bf16 %v685_v10, %v684_v29  ;;  %v13562_v29 = vld [vmem:[%s13015_s20 + $0x58] sm:$0xff]  ;;  %v12209_v10 = vld [vmem:[#allocation7 + $0x1a8] sm:$0xff]  }
 0x203   : > { %2391 = vmatmul.mubr.bf16.gmra.mrb[60].mxu0 %v605_v16  ;;  %v13524_v16 = vld [vmem:[%s13015_s20 + $0x179] sm:$0xff] }
 0x204   : > { %2398 = vmatprep.mubr.bf16.mxu0 %v702_v44  ;;  %v613_v44 = vpack.c.bf16 %v13527_v30, %v13524_v16 }
 0x20b   : > { %2399 = vmatmul.mubr.bf16.gmra.mrb[64].mxu0 %v606_v24  ;;  %v878_v24 = vpack.c.bf16 %v13300_v43, %v13292_v62  ;;  %v880_v43 = vpack.c.bf16 %v13324_v37, %v13315_v26  ;;  %v881_v26 = vpack.c.bf16 %v13336_v49, %v13327_v38  ;;  %v12208_v37 = vld [vmem:[#allocation7 + $0x1a0] sm:$0xff]   ;;  %v882_v38 = vpack.c.bf16 %v13348_v61, %v13339_v50  ;;  %v12210_v49 = vld [vmem:[#allocation7 + $0x1b0] sm:$0xff]  }
 0x20c   : > { %2406 = vmatprep.mubr.bf16.mxu0 %v703_v27  ;;  %v734_v27 = vld [vmem:[%s13015_s20 + $0x20] sm:$0xff]  ;;  %v883_v50 = vpack.c.bf16 %v13360_v11, %v13351_v2  ;;  %v884_v11 = vpack.c.bf16 %v13372_v51, %v13363_v19  ;;  %v885_v51 = vpack.c.bf16 %v13384_v52, %v13375_v31  ;;  %v886_v52 = vpack.c.bf16 %v13394_v34, %v13387_v59 }
 0x20d   : > { %v12212_v61 = vld [vmem:[#allocation7 + $0x1c0] sm:$0xff]   ;;  %v887_v34 = vpack.c.bf16 %v13404_v53, %v13397_v39  ;;  %v13638_v39 = vld [vmem:[%s13015_s20 + $0xb8] sm:$0xff] }
 0x213   : > { %2407 = vmatmul.mubr.bf16.gmra.mrb[68].mxu0 %v607_v32  ;;  %v735_v32 = vld [vmem:[%s13015_s20 + $0x28] sm:$0xff] }
 0x214   : > { %2414 = vmatprep.mubr.bf16.mxu0 %v704_v28  ;;  %v782_v28 = vpack.c.bf16 %v735_v32, %v734_v27  ;;  %v12218_v32 = vld [vmem:[#allocation7 + $0x200] sm:$0xff]  }
 0x215   : > { %10883 = vmatprep.subr.bf16.mxu1 %v12218_v32 }
 0x216   : > { %10884 = vmatpush3.bf16.msra.mxu1 %v12218_v32  ;;  %v13622_v32 = vld [vmem:[%s13015_s20 + $0xa8] sm:$0xff] }
 0x21b   : > { %2415 = vmatmul.mubr.bf16.gmra.mrb[72].mxu0 %v608_v42  ;;  %v12204_v42 = vld [vmem:[#allocation7 + $0x180] sm:$0xff]  }
 0x21c   : > { %2422 = vmatprep.mubr.bf16.mxu0 %v705_v41  ;;  %v879_v41 = vpack.c.bf16 %v13312_v23, %v13303_v14  ;;  %v13547_v14 = vld [vmem:[%s13015_s20 + $0x40] sm:$0xff]  ;;  %v13550_v23 = vld [vmem:[%s13015_s20 + $0x48] sm:$0xff] }
 0x223   : > { %2423 = vmatmul.mubr.bf16.gmra.mrb[76].mxu0 %v609_v54  ;;  %v736_v54 = vld [vmem:[%s13015_s20 + $0x30] sm:$0xff] }
 0x224   : > { %2430 = vmatprep.mubr.bf16.mxu0 %v706_v60  ;;  %v13539_v60 = vld [vmem:[%s13015_s20 + $0x38] sm:$0xff] }
 0x225   : > { %v783_v62 = vpack.c.bf16 %v13539_v60, %v736_v54  ;;  %v12213_v54 = vld [vmem:[#allocation7 + $0x1c8] sm:$0xff]  }
 0x22b   : > { %2431 = vmatmul.mubr.bf16.gmra.mrb[80].mxu0 %v610_v4  ;;  %v12205_v4 = vld [vmem:[#allocation7 + $0x188] sm:$0xff]  }
 0x22c   : > { %2438 = vmatprep.mubr.bf16.mxu0 %v707_v47  ;;  %v12206_v47 = vld [vmem:[#allocation7 + $0x190] sm:$0xff]  }
 0x233   : > { %2439 = vmatmul.mubr.bf16.gmra.mrb[84].mxu0 %v611_v55  ;;  %v784_v55 = vpack.c.bf16 %v13550_v23, %v13547_v14 }
 0x234   : > { %2446 = vmatprep.mubr.bf16.mxu0 %v708_v12  ;;  %v13559_v12 = vld [vmem:[%s13015_s20 + $0x50] sm:$0xff] }
 0x23b   : > { %2447 = vmatmul.mubr.bf16.gmra.mrb[88].mxu0 %v612_v8  ;;  %v785_v8 = vpack.c.bf16 %v13562_v29, %v13559_v12 }
 0x23c   : > { %2454 = vmatprep.mubr.bf16.mxu0 %v709_v20  ;;  %v13571_v20 = vld [vmem:[%s13015_s20 + $0x60] sm:$0xff] }
 0x243   : > { %2455 = vmatmul.mubr.bf16.gmra.mrb[92].mxu0 %v613_v44  ;;  %v13574_v44 = vld [vmem:[%s13015_s20 + $0x68] sm:$0xff] }
 0x244   : > { %2495 = vmatprep.mubr.bf16.mxu0 %v878_v24  ;;  %v12211_v24 = vld [vmem:[#allocation7 + $0x1b8] sm:$0xff]   ;;  %v786_v27 = vpack.c.bf16 %v13574_v44, %v13571_v20 }
 0x24b   : > { %2496 = vmatmul.mubr.bf16.vlgmr.msra.gmra.mrb[0].mxu0 %v782_v28  ;;  %v12219_v28 = vld [vmem:[#allocation7 + $0x208] sm:$0xff]  }
 0x24c   : > { %2689 = vmatpush1.bf16.msra.mxu0 %v12204_v42  ;;  %2503 = vmatprep.mubr.bf16.mxu0 %v879_v41  ;;  %v13583_v42 = vld [vmem:[%s13015_s20 + $0x70] sm:$0xff]  ;;  %v13586_v41 = vld [vmem:[%s13015_s20 + $0x78] sm:$0xff] }
 0x24d   : > { %2690 = vmatprep.subr.bf16.mxu0 %v16391_v0  ;;  %v787_v2 = vpack.c.bf16 %v13586_v41, %v13583_v42  ;;  %10885 = vmatprep.subr.bf16.mxu1 %v12219_v28 }
 0x24e   : > { %10886 = vmatpush3.bf16.msra.mxu1 %v12219_v28  ;;  %v12224_v28 = vld [vmem:[#allocation7 + $0x1f8] sm:$0xff]  }
 0x250   : > { %2691 = vmatpush1.bf16.msra.mxu0 %v12205_v4  ;;  %v12214_v4 = vld [vmem:[#allocation7 + $0x1d0] sm:$0xff]  }
 0x251   : > { %2692 = vmatprep.subr.bf16.mxu0 %v16391_v0 }
 0x253   : > { %2504 = vmatmul.mubr.bf16.gmra.mrb[4].mxu0 %v783_v62  ;;  %v12221_v62 = vld [vmem:[#allocation7 + $0x210] sm:$0xff]  }
 0x254   : > { %2511 = vmatprep.mubr.bf16.mxu0 %v880_v43  ;;  %2693 = vmatpush1.bf16.msra.mxu0 %v12206_v47  ;;  %v12222_v43 = vld [vmem:[#allocation7 + $0x218] sm:$0xff]   ;;  %v13595_v47 = vld [vmem:[%s13015_s20 + $0x80] sm:$0xff] }
 0x255   : > { %2694 = vmatprep.subr.bf16.mxu0 %v16391_v0  ;;  %10887 = vmatprep.subr.bf16.mxu1 %v12221_v62 }
 0x256   : > { %10888 = vmatpush3.bf16.msra.mxu1 %v12221_v62  ;;  %v1121_v62 = vld [vmem:[%s13015_s20 + $0x51] sm:$0xff] }
 0x257   : > { %10889 = vmatprep.subr.bf16.mxu1 %v12222_v43 }
 0x258   : > { %2695 = vmatpush1.bf16.msra.mxu0 %v12207_v58  ;;  %v13598_v58 = vld [vmem:[%s13015_s20 + $0x88] sm:$0xff] }
 0x259   : > { %2696 = vmatprep.subr.bf16.mxu0 %v16391_v0  ;;  %v788_v19 = vpack.c.bf16 %v13598_v58, %v13595_v47 }
 0x25a   : > { %10890 = vmatpush3.bf16.msra.mxu1 %v12222_v43 }
 0x25b   : > { %2512 = vmatmul.mubr.bf16.gmra.mrb[8].mxu0 %v784_v55  ;;  %v12215_v55 = vld [vmem:[#allocation7 + $0x1d8] sm:$0xff]  }
 0x25c   : > { %2519 = vmatprep.mubr.bf16.mxu0 %v881_v26  ;;  %2697 = vmatpush1.bf16.msra.mxu0 %v12208_v37  ;;  %v12216_v26 = vld [vmem:[#allocation7 + $0x1e0] sm:$0xff]  }
 0x25d   : > { %2698 = vmatprep.subr.bf16.mxu0 %v16391_v0  ;;  %v12223_v37 = vld [vmem:[#allocation7 + $0x220] sm:$0xff]  }
 0x25e   : > { %10891 = vmatprep.subr.bf16.mxu1 %v12223_v37 }
 0x25f   : > { %10892 = vmatpush3.bf16.msra.mxu1 %v12223_v37 }
 0x260   : > { %2699 = vmatpush1.bf16.msra.mxu0 %v12209_v10  ;;  %v12225_v10 = vld [vmem:[#allocation7 + $0x228] sm:$0xff]  }
 0x261   : > { %2700 = vmatprep.subr.bf16.mxu0 %v16391_v0  ;;  %10893 = vmatprep.subr.bf16.mxu1 %v12225_v10 }
 0x263   : > { %2520 = vmatmul.mubr.bf16.gmra.mrb[12].mxu0 %v785_v8  ;;  %v13607_v8 = vld [vmem:[%s13015_s20 + $0x90] sm:$0xff]  ;;  %10894 = vmatpush3.bf16.msra.mxu1 %v12225_v10  ;;  %v889_v10 = vpack.c.bf16 %v13424_v7, %v13417_v48  ;;  %v890_v7 = vpack.c.bf16 %v13434_v13, %v13427_v56 }
 0x264   : > { %2527 = vmatprep.mubr.bf16.mxu0 %v882_v38  ;;  %2701 = vmatpush1.bf16.msra.mxu0 %v12210_v49  ;;  %v13610_v38 = vld [vmem:[%s13015_s20 + $0x98] sm:$0xff]  ;;  %v12217_v49 = vld [vmem:[#allocation7 + $0x1e8] sm:$0xff]  }
 0x265   : > { %2702 = vmatprep.subr.bf16.mxu0 %v16391_v0  ;;  %v789_v31 = vpack.c.bf16 %v13610_v38, %v13607_v8  ;;  %v1128_v56 = vld [vmem:[%s13015_s20 + $0x89] sm:$0xff]  ;;  %v1129_v13 = vld [vmem:[%s13015_s20 + $0x91] sm:$0xff] }
 0x268   : > { %2703 = vmatpush1.bf16.msra.mxu0 %v12211_v24  ;;  %v12220_v24 = vld [vmem:[#allocation7 + $0x1f0] sm:$0xff]  }
 0x269   : > { %2704 = vmatprep.subr.bf16.mxu0 %v16391_v0 }
 0x26b   : > { %2528 = vmatmul.mubr.bf16.gmra.mrb[16].mxu0 %v786_v27  ;;  %v12226_v27 = vld [vmem:[#allocation7 + $0x230] sm:$0xff]  }
 0x26c   : > { %2535 = vmatprep.mubr.bf16.mxu0 %v883_v50  ;;  %2705 = vmatpush1.bf16.msra.mxu0 %v12212_v61  ;;  %v12227_v50 = vld [vmem:[#allocation7 + $0x238] sm:$0xff]   ;;  %v13619_v61 = vld [vmem:[%s13015_s20 + $0xa0] sm:$0xff] }
 0x26d   : > { %2706 = vmatprep.subr.bf16.mxu0 %v16391_v0  ;;  %10895 = vmatprep.subr.bf16.mxu1 %v12226_v27  ;;  %v790_v59 = vpack.c.bf16 %v13622_v32, %v13619_v61 }
 0x26e   : > { %10896 = vmatpush3.bf16.msra.mxu1 %v12226_v27  ;;  %v13660_v27 = vld [vmem:[%s13015_s20 + $0xd0] sm:$0xff] }
 0x26f   : > { %10897 = vmatprep.subr.bf16.mxu1 %v12227_v50 }
 0x270   : > { %2707 = vmatpush1.bf16.msra.mxu0 %v12213_v54  ;;  %v1118_v54 = vld [vmem:[%s13015_s20 + $0x39] sm:$0xff] }
 0x271   : > { %2708 = vmatprep.subr.bf16.mxu0 %v16391_v0 }
 0x272   : > { %10898 = vmatpush3.bf16.msra.mxu1 %v12227_v50  ;;  %v13663_v50 = vld [vmem:[%s13015_s20 + $0xd8] sm:$0xff] }
 0x273   : > { %2536 = vmatmul.mubr.bf16.gmra.mrb[20].mxu0 %v787_v2  ;;  %v1119_v2 = vld [vmem:[%s13015_s20 + $0x41] sm:$0xff]  ;;  %11075 = vmatprep.subr.bf16.mxu1 %v16391_v0  ;;  %v793_v48 = vpack.c.bf16 %v13663_v50, %v13660_v27 }
 0x274   : > { %2543 = vmatprep.mubr.bf16.mxu0 %v884_v11  ;;  %2709 = vmatpush1.bf16.msra.mxu0 %v12214_v4  ;;  %v1166_v11 = vpack.c.bf16 %v1119_v2, %v1118_v54  ;;  %v1120_v4 = vld [vmem:[%s13015_s20 + $0x49] sm:$0xff]  ;;  %v891_v54 = vpack.c.bf16 %v13444_v22, %v13437_v1  ;;  %v1126_v2 = vld [vmem:[%s13015_s20 + $0x79] sm:$0xff]  ;;  %v892_v22 = vpack.c.bf16 %v13454_v21, %v13447_v9  ;;  %v1133_v21 = vld [vmem:[%s13015_s20 + $0xb1] sm:$0xff] }
 0x275   : > { %2710 = vmatprep.subr.bf16.mxu0 %v16391_v0  ;;  %v1167_v43 = vpack.c.bf16 %v1121_v62, %v1120_v4  ;;  %v1171_v62 = vpack.c.bf16 %v1129_v13, %v1128_v56  ;;  %v1132_v9 = vld [vmem:[%s13015_s20 + $0xa9] sm:$0xff] }
 0x276   : > { %10899 = vmatprep.mubr.bf16.mxu1 %v1166_v11  ;;  %v1127_v11 = vld [vmem:[%s13015_s20 + $0x81] sm:$0xff] }
 0x277   : > { %10900 = vmatmul.mubr.bf16.vlgmr.msra.gmra.mrb[0].mxu1 %v1167_v43  ;;  %v1170_v4 = vpack.c.bf16 %v1127_v11, %v1126_v2  ;;  %v13684_v43 = vld [vmem:[%s13015_s20 + $0xf0] sm:$0xff]  ;;  %v895_v2 = vpack.c.bf16 %v13484_v46, %v13477_v35  ;;  %v1134_v11 = vld [vmem:[%s13015_s20 + $0xb9] sm:$0xff]  ;;  %v896_v46 = vpack.c.bf16 %v13494_v57, %v13487_v45 }
 0x278   : > { %2711 = vmatpush1.bf16.msra.mxu0 %v12215_v55  ;;  %v13635_v55 = vld [vmem:[%s13015_s20 + $0xb0] sm:$0xff] }
 0x279   : > { %2712 = vmatprep.subr.bf16.mxu0 %v16391_v0  ;;  %v791_v53 = vpack.c.bf16 %v13638_v39, %v13635_v55  ;;  %v1140_v45 = vld [vmem:[%s13015_s20 + $0xe9] sm:$0xff]  ;;  %v1141_v57 = vld [vmem:[%s13015_s20 + $0xf1] sm:$0xff] }
 0x27b   : > { %2544 = vmatmul.mubr.bf16.gmra.mrb[24].mxu0 %v788_v19  ;;  %v888_v19 = vpack.c.bf16 %v13414_v5, %v13407_v40  ;;  %v1124_v40 = vld [vmem:[%s13015_s20 + $0x69] sm:$0xff]  ;;  %v1125_v5 = vld [vmem:[%s13015_s20 + $0x71] sm:$0xff] }
 0x27c   : > { %2551 = vmatprep.mubr.bf16.mxu0 %v885_v51  ;;  %2713 = vmatpush1.bf16.msra.mxu0 %v12216_v26  ;;  %v13646_v51 = vld [vmem:[%s13015_s20 + $0xc0] sm:$0xff]  ;;  %v13649_v26 = vld [vmem:[%s13015_s20 + $0xc8] sm:$0xff] }
 0x27d   : > { %2714 = vmatprep.subr.bf16.mxu0 %v16391_v0  ;;  %v792_v37 = vpack.c.bf16 %v13649_v26, %v13646_v51 }
 0x280   : > { %2715 = vmatpush1.bf16.msra.mxu0 %v12217_v49  ;;  %v1122_v49 = vld [vmem:[%s13015_s20 + $0x59] sm:$0xff] }
 0x281   : > { %2716 = vmatprep.subr.bf16.mxu0 %v16391_v0 }
 0x283   : > { %2552 = vmatmul.mubr.bf16.gmra.mrb[28].mxu0 %v789_v31  ;;  %v1123_v31 = vld [vmem:[%s13015_s20 + $0x61] sm:$0xff] }
 0x284   : > { %2559 = vmatprep.mubr.bf16.mxu0 %v886_v52  ;;  %2717 = vmatpush1.bf16.msra.mxu0 %v12220_v24  ;;  %v1168_v52 = vpack.c.bf16 %v1123_v31, %v1122_v49  ;;  %v1169_v24 = vpack.c.bf16 %v1125_v5, %v1124_v40  ;;  %v893_v49 = vpack.c.bf16 %v13464_v36, %v13457_v17  ;;  %v1130_v31 = vld [vmem:[%s13015_s20 + $0x99] sm:$0xff] }
 0x285   : > { %2718 = vmatprep.subr.bf16.mxu0 %v16391_v0  ;;  %v1173_v5 = vpack.c.bf16 %v1133_v21, %v1132_v9  ;;  %v894_v36 = vpack.c.bf16 %v13474_v33, %v13467_v25  ;;  %v1136_v25 = vld [vmem:[%s13015_s20 + $0xc9] sm:$0xff]  ;;  %v1137_v33 = vld [vmem:[%s13015_s20 + $0xd1] sm:$0xff]  ;;  %v1177_v21 = vpack.c.bf16 %v1141_v57, %v1140_v45  ;;  %v1147_v57 = vld [vmem:[%s13015_s20 + $0x121] sm:$0xff] }
 0x286   : > { %10903 = vmatprep.mubr.bf16.mxu1 %v1168_v52  ;;  %v1131_v52 = vld [vmem:[%s13015_s20 + $0xa1] sm:$0xff]  ;;  %v1175_v13 = vpack.c.bf16 %v1137_v33, %v1136_v25 }
 0x287   : > { %10904 = vmatmul.mubr.bf16.gmra.mrb[4].mxu1 %v1169_v24  ;;  %v1172_v40 = vpack.c.bf16 %v1131_v52, %v1130_v31  ;;  %v13708_v24 = vld [vmem:[%s13015_s20 + $0x110] sm:$0xff]  ;;  %v897_v31 = vpack.c.bf16 %v13504_v6, %v13497_v3  ;;  %v1138_v52 = vld [vmem:[%s13015_s20 + $0xd9] sm:$0xff]  ;;  %v898_v6 = vpack.c.bf16 %v13514_v63, %v13507_v15 }
 0x288   : > { %2719 = vmatpush1.bf16.msra.mxu0 %v12224_v28  ;;  %v13670_v28 = vld [vmem:[%s13015_s20 + $0xe0] sm:$0xff]  ;;  %10907 = vmatprep.mubr.bf16.mxu1 %v1170_v4  ;;  %v1144_v15 = vld [vmem:[%s13015_s20 + $0x109] sm:$0xff]  ;;  %v1145_v63 = vld [vmem:[%s13015_s20 + $0x111] sm:$0xff] }
 0x289   : > { %4958 = vmatprep.subr.bf16.mxu0 %v16391_v0  ;;  %v1135_v4 = vld [vmem:[%s13015_s20 + $0xc1] sm:$0xff]  ;;  %v1179_v33 = vpack.c.bf16 %v1145_v63, %v1144_v15  ;;  %v926_v15 = vld [vmem:[%s13015_s20 + $0x37] sm:$0xff] }
 0x28a   : > { %v1174_v56 = vpack.c.bf16 %v1135_v4, %v1134_v11  ;;  %v899_v11 = vpack.c.bf16 %v13524_v16, %v13517_v18  ;;  %v1142_v4 = vld [vmem:[%s13015_s20 + $0xf9] sm:$0xff]  ;;  %v13786_v18 = vld [vmem:[%s13015_s20 + $0x189] sm:$0xff] }
 0x28b   : > { %2560 = vmatmul.mubr.bf16.gmra.mrb[32].mxu0 %v790_v59  ;;  %v13673_v59 = vld [vmem:[%s13015_s20 + $0xe8] sm:$0xff]  ;;  %v1150_v63 = vld [vmem:[%s13015_s20 + $0x139] sm:$0xff] }
 0x28c   : > { %2567 = vmatprep.mubr.bf16.mxu0 %v887_v34  ;;  %v794_v34 = vpack.c.bf16 %v13673_v59, %v13670_v28 }
 0x28f   : > { %10908 = vmatmul.mubr.bf16.gmra.mrb[8].mxu1 %v1171_v62  ;;  %v13732_v62 = vld [vmem:[%s13015_s20 + $0x130] sm:$0xff] }
 0x290   : > { %10911 = vmatprep.mubr.bf16.mxu1 %v1172_v40  ;;  %v1139_v40 = vld [vmem:[%s13015_s20 + $0xe1] sm:$0xff] }
 0x291   : > { %v1176_v9 = vpack.c.bf16 %v1139_v40, %v1138_v52  ;;  %v13799_v52 = vld [vmem:[%s13015_s20 + $0x191] sm:$0xff]  ;;  %v13802_v40 = vld [vmem:[%s13015_s20 + $0x199] sm:$0xff] }
 0x292   : > { %v901_v45 = vpack.c.bf16 %v13802_v40, %v13799_v52 }
 0x293   : > { %2568 = vmatmul.mubr.bf16.gmra.mrb[36].mxu0 %v791_v53  ;;  %v13687_v53 = vld [vmem:[%s13015_s20 + $0xf8] sm:$0xff] }
 0x294   : > { %2575 = vmatprep.mubr.bf16.mxu0 %v888_v19  ;;  %v795_v1 = vpack.c.bf16 %v13687_v53, %v13684_v43  ;;  %v13694_v19 = vld [vmem:[%s13015_s20 + $0x100] sm:$0xff] }
 0x297   : > { %10912 = vmatmul.mubr.bf16.gmra.mrb[12].mxu1 %v1173_v5  ;;  %v13756_v5 = vld [vmem:[%s13015_s20 + $0x150] sm:$0xff] }
 0x298   : > { %10915 = vmatprep.mubr.bf16.mxu1 %v1174_v56  ;;  %v1143_v56 = vld [vmem:[%s13015_s20 + $0x101] sm:$0xff] }
 0x299   : > { %v1178_v25 = vpack.c.bf16 %v1143_v56, %v1142_v4  ;;  %v13816_v4 = vld [vmem:[%s13015_s20 + $0x198] sm:$0xff] }
 0x29b   : > { %2576 = vmatmul.mubr.bf16.gmra.mrb[40].mxu0 %v792_v37  ;;  %v13697_v37 = vld [vmem:[%s13015_s20 + $0x108] sm:$0xff] }
 0x29c   : > { %2583 = vmatprep.mubr.bf16.mxu0 %v889_v10  ;;  %v796_v10 = vpack.c.bf16 %v13697_v37, %v13694_v19 }
 0x29f   : > { %10916 = vmatmul.mubr.bf16.gmra.mrb[16].mxu1 %v1175_v13  ;;  %v13780_v13 = vld [vmem:[%s13015_s20 + $0x170] sm:$0xff] }
 0x2a0   : > { %10919 = vmatprep.mubr.bf16.mxu1 %v1176_v9 }
 0x2a3   : > { %2584 = vmatmul.mubr.bf16.gmra.mrb[44].mxu0 %v793_v48  ;;  %v13711_v48 = vld [vmem:[%s13015_s20 + $0x118] sm:$0xff] }
 0x2a4   : > { %2591 = vmatprep.mubr.bf16.mxu0 %v890_v7  ;;  %v797_v17 = vpack.c.bf16 %v13711_v48, %v13708_v24  ;;  %v13718_v7 = vld [vmem:[%s13015_s20 + $0x120] sm:$0xff] }
 0x2a7   : > { %10920 = vmatmul.mubr.bf16.gmra.mrb[20].mxu1 %v1177_v21 }
 0x2a8   : > { %10923 = vmatprep.mubr.bf16.mxu1 %v1178_v25  ;;  %v1070_v25 = vpack.c.bf16 %v13547_v14, %v13539_v60  ;;  %v12228_v60 = vld [vmem:[#allocation9] sm:$0xff]  }
 0x2a9   : > { %v928_v14 = vld [vmem:[%s13015_s20 + $0x47] sm:$0xff] }
 0x2ab   : > { %2592 = vmatmul.mubr.bf16.gmra.mrb[48].mxu0 %v794_v34  ;;  %v13721_v34 = vld [vmem:[%s13015_s20 + $0x128] sm:$0xff] }
 0x2ac   : > { %2599 = vmatprep.mubr.bf16.mxu0 %v891_v54  ;;  %v798_v54 = vpack.c.bf16 %v13721_v34, %v13718_v7 }
 0x2af   : > { %10924 = vmatmul.mubr.bf16.gmra.mrb[24].mxu1 %v1179_v33  ;;  %v1151_v33 = vld [vmem:[%s13015_s20 + $0x141] sm:$0xff] }
 0x2b3   : > { %2600 = vmatmul.mubr.bf16.gmra.mrb[52].mxu0 %v795_v1  ;;  %v13735_v1 = vld [vmem:[%s13015_s20 + $0x138] sm:$0xff] }
 0x2b4   : > { %2607 = vmatprep.mubr.bf16.mxu0 %v892_v22  ;;  %v799_v35 = vpack.c.bf16 %v13735_v1, %v13732_v62  ;;  %v13742_v22 = vld [vmem:[%s13015_s20 + $0x140] sm:$0xff] }
 0x2bb   : > { %2608 = vmatmul.mubr.bf16.gmra.mrb[56].mxu0 %v796_v10  ;;  %v13745_v10 = vld [vmem:[%s13015_s20 + $0x148] sm:$0xff] }
 0x2bc   : > { %2615 = vmatprep.mubr.bf16.mxu0 %v893_v49  ;;  %v800_v49 = vpack.c.bf16 %v13745_v10, %v13742_v22 }
 0x2c3   : > { %2616 = vmatmul.mubr.bf16.gmra.mrb[60].mxu0 %v797_v17  ;;  %v13759_v17 = vld [vmem:[%s13015_s20 + $0x158] sm:$0xff] }
 0x2c4   : > { %2623 = vmatprep.mubr.bf16.mxu0 %v894_v36  ;;  %v801_v3 = vpack.c.bf16 %v13759_v17, %v13756_v5  ;;  %v13766_v36 = vld [vmem:[%s13015_s20 + $0x160] sm:$0xff] }
 0x2cb   : > { %2624 = vmatmul.mubr.bf16.gmra.mrb[64].mxu0 %v798_v54  ;;  %v13769_v54 = vld [vmem:[%s13015_s20 + $0x168] sm:$0xff] }
 0x2cc   : > { %2631 = vmatprep.mubr.bf16.mxu0 %v895_v2  ;;  %v802_v2 = vpack.c.bf16 %v13769_v54, %v13766_v36 }
 0x2d3   : > { %2632 = vmatmul.mubr.bf16.gmra.mrb[68].mxu0 %v799_v35  ;;  %v13783_v35 = vld [vmem:[%s13015_s20 + $0x178] sm:$0xff] }
 0x2d4   : > { %2639 = vmatprep.mubr.bf16.mxu0 %v896_v46  ;;  %v803_v16 = vpack.c.bf16 %v13783_v35, %v13780_v13  ;;  %v900_v46 = vpack.c.bf16 %v13786_v18, %v13527_v30  ;;  %v1146_v30 = vld [vmem:[%s13015_s20 + $0x119] sm:$0xff] }
 0x2d5   : > { %v1180_v21 = vpack.c.bf16 %v1147_v57, %v1146_v30 }
 0x2d7   : > { %10927 = vmatprep.mubr.bf16.mxu1 %v1180_v21  ;;  %v1071_v21 = vpack.c.bf16 %v13559_v12, %v13550_v23  ;;  %v12230_v23 = vld [vmem:[#allocation9 + $0x10] sm:$0xff]  }
 0x2d8   : > { %v930_v12 = vld [vmem:[%s13015_s20 + $0x57] sm:$0xff] }
 0x2db   : > { %2640 = vmatmul.mubr.bf16.gmra.mrb[72].mxu0 %v800_v49  ;;  %v13793_v49 = vld [vmem:[%s13015_s20 + $0x180] sm:$0xff] }
 0x2dc   : > { %2647 = vmatprep.mubr.bf16.mxu0 %v897_v31  ;;  %v13796_v31 = vld [vmem:[%s13015_s20 + $0x188] sm:$0xff] }
 0x2dd   : > { %v804_v9 = vpack.c.bf16 %v13796_v31, %v13793_v49 }
 0x2e3   : > { %2648 = vmatmul.mubr.bf16.gmra.mrb[76].mxu0 %v801_v3  ;;  %v1148_v3 = vld [vmem:[%s13015_s20 + $0x129] sm:$0xff] }
 0x2e4   : > { %2655 = vmatprep.mubr.bf16.mxu0 %v898_v6  ;;  %v1149_v6 = vld [vmem:[%s13015_s20 + $0x131] sm:$0xff] }
 0x2eb   : > { %2656 = vmatmul.mubr.bf16.gmra.mrb[80].mxu0 %v802_v2  ;;  %v1181_v2 = vpack.c.bf16 %v1149_v6, %v1148_v3  ;;  %v929_v3 = vld [vmem:[%s13015_s20 + $0x4f] sm:$0xff] }
 0x2ec   : > { %2663 = vmatprep.mubr.bf16.mxu0 %v899_v11  ;;  %v13813_v11 = vld [vmem:[%s13015_s20 + $0x190] sm:$0xff]  ;;  %v12229_v6 = vld [vmem:[#allocation9 + $0x8] sm:$0xff]  }
 0x2ed   : > { %10928 = vmatmul.mubr.bf16.gmra.mrb[28].mxu1 %v1181_v2  ;;  %v805_v56 = vpack.c.bf16 %v13816_v4, %v13813_v11  ;;  %v975_v2 = vpack.c.bf16 %v929_v3, %v928_v14  ;;  %v12232_v14 = vld [vmem:[#allocation9 + $0x20] sm:$0xff]  }
 0x2ee   : > { %v1158_v3 = vld [vmem:[%s13015_s20 + $0x179] sm:$0xff] }
 0x2f3   : > { %2664 = vmatmul.mubr.bf16.gmra.mrb[84].mxu0 %v803_v16  ;;  %v927_v16 = vld [vmem:[%s13015_s20 + $0x3f] sm:$0xff] }
 0x2f4   : > { %2671 = vmatprep.mubr.bf16.mxu0 %v900_v46  ;;  %v1182_v46 = vpack.c.bf16 %v1151_v33, %v1150_v63  ;;  %v974_v57 = vpack.c.bf16 %v927_v16, %v926_v15  ;;  %v12231_v15 = vld [vmem:[#allocation9 + $0x18] sm:$0xff]   ;;  %v1155_v33 = vld [vmem:[%s13015_s20 + $0x161] sm:$0xff] }
 0x2f5   : > { %v1154_v63 = vld [vmem:[%s13015_s20 + $0x159] sm:$0xff] }
 0x2f6   : > { %10931 = vmatprep.mubr.bf16.mxu1 %v1182_v46  ;;  %v1184_v16 = vpack.c.bf16 %v1155_v33, %v1154_v63  ;;  %v1157_v46 = vld [vmem:[%s13015_s20 + $0x171] sm:$0xff]  ;;  %v1163_v63 = vld [vmem:[%s13015_s20 + $0x1a1] sm:$0xff]  ;;  %v1164_v33 = vld [vmem:[%s13015_s20 + $0x1a9] sm:$0xff] }
 0x2fb   : > { %2672 = vmatmul.mubr.bf16.gmra.mrb[88].mxu0 %v804_v9  ;;  %v1152_v9 = vld [vmem:[%s13015_s20 + $0x149] sm:$0xff] }
 0x2fc   : > { %2679 = vmatprep.mubr.bf16.mxu0 %v901_v45  ;;  %v1153_v45 = vld [vmem:[%s13015_s20 + $0x151] sm:$0xff] }
 0x2fd   : > { %v1183_v30 = vpack.c.bf16 %v1153_v45, %v1152_v9  ;;  %v1073_v9 = vpack.c.bf16 %v13583_v42, %v13574_v44  ;;  %v1159_v44 = vld [vmem:[%s13015_s20 + $0x181] sm:$0xff]  ;;  %v934_v42 = vld [vmem:[%s13015_s20 + $0x77] sm:$0xff] }
 0x2ff   : > { %10932 = vmatmul.mubr.bf16.gmra.mrb[32].mxu1 %v1183_v30  ;;  %v932_v30 = vld [vmem:[%s13015_s20 + $0x67] sm:$0xff] }
 0x300   : > { %10935 = vmatprep.mubr.bf16.mxu1 %v1184_v16  ;;  %v1165_v16 = vld [vmem:[%s13015_s20 + $0x1b1] sm:$0xff] }
 0x303   : > { %2680 = vmatmul.mubr.bf16.gmra.mrb[92].mxu0 %v805_v56  ;;  %v1072_v56 = vpack.c.bf16 %v13571_v20, %v13562_v29  ;;  %v1156_v20 = vld [vmem:[%s13015_s20 + $0x169] sm:$0xff] }
 0x304   : > { %2720 = vmatprep.mubr.bf16.mxu0 %v1070_v25  ;;  %v931_v25 = vld [vmem:[%s13015_s20 + $0x5f] sm:$0xff]  ;;  %v1185_v45 = vpack.c.bf16 %v1157_v46, %v1156_v20  ;;  %v940_v46 = vld [vmem:[%s13015_s20 + $0xa7] sm:$0xff] }
 0x305   : > { %v976_v29 = vpack.c.bf16 %v931_v25, %v930_v12  ;;  %v936_v12 = vld [vmem:[%s13015_s20 + $0x87] sm:$0xff]  ;;  %v937_v25 = vld [vmem:[%s13015_s20 + $0x8f] sm:$0xff] }
 0x307   : > { %10936 = vmatmul.mubr.bf16.gmra.mrb[36].mxu1 %v1185_v45  ;;  %v1078_v45 = vpack.c.bf16 %v13646_v51, %v13638_v39  ;;  %v944_v39 = vld [vmem:[%s13015_s20 + $0xc7] sm:$0xff]  ;;  %v945_v51 = vld [vmem:[%s13015_s20 + $0xcf] sm:$0xff] }
 0x30b   : > { %2721 = vmatmul.mubr.bf16.vlgmr.msra.gmra.mrb[0].mxu0 %v974_v57  ;;  %v933_v57 = vld [vmem:[%s13015_s20 + $0x6f] sm:$0xff] }
 0x30c   : > { %2728 = vmatprep.mubr.bf16.mxu0 %v1071_v21  ;;  %4959 = vmatpush1.bf16.msra.mxu0 %v12228_v60  ;;  %v977_v21 = vpack.c.bf16 %v933_v57, %v932_v30  ;;  %v1074_v60 = vpack.c.bf16 %v13595_v47, %v13586_v41  ;;  %v1075_v47 = vpack.c.bf16 %v13607_v8, %v13598_v58  ;;  %v939_v58 = vld [vmem:[%s13015_s20 + $0x9f] sm:$0xff]  ;;  %v942_v57 = vld [vmem:[%s13015_s20 + $0xb7] sm:$0xff] }
 0x30d   : > { %4960 = vmatprep.subr.bf16.mxu0 %v16391_v0  ;;  %v1188_v8 = vpack.c.bf16 %v1163_v63, %v13802_v40  ;;  %v12235_v30 = vld [vmem:[#allocation9 + $0x38] sm:$0xff]  }
 0x310   : > { %4961 = vmatpush1.bf16.msra.mxu0 %v12229_v6  ;;  %v935_v6 = vld [vmem:[%s13015_s20 + $0x7f] sm:$0xff] }
 0x311   : > { %4962 = vmatprep.subr.bf16.mxu0 %v16391_v0  ;;  %v978_v41 = vpack.c.bf16 %v935_v6, %v934_v42  ;;  %v1080_v42 = vpack.c.bf16 %v13670_v28, %v13663_v50  ;;  %v947_v6 = vld [vmem:[%s13015_s20 + $0xdf] sm:$0xff]  ;;  %v12241_v50 = vld [vmem:[#allocation9 + $0x68] sm:$0xff]  }
 0x312   : > { %v948_v28 = vld [vmem:[%s13015_s20 + $0xe7] sm:$0xff] }
 0x313   : > { %2729 = vmatmul.mubr.bf16.gmra.mrb[4].mxu0 %v975_v2  ;;  %v1186_v2 = vpack.c.bf16 %v1159_v44, %v1158_v3  ;;  %v12238_v3 = vld [vmem:[#allocation9 + $0x50] sm:$0xff]   ;;  %v983_v44 = vpack.c.bf16 %v945_v51, %v944_v39  ;;  %v1087_v39 = vpack.c.bf16 %v13756_v5, %v13745_v10  ;;  %v960_v51 = vld [vmem:[%s13015_s20 + $0x147] sm:$0xff]  ;;  %v963_v5 = vld [vmem:[%s13015_s20 + $0x15f] sm:$0xff] }
 0x314   : > { %2736 = vmatprep.mubr.bf16.mxu0 %v1072_v56  ;;  %4963 = vmatpush1.bf16.msra.mxu0 %v12230_v23  ;;  %v1187_v56 = vpack.c.bf16 %v13799_v52, %v13786_v18  ;;  %v12233_v23 = vld [vmem:[#allocation9 + $0x28] sm:$0xff]   ;;  %v979_v18 = vpack.c.bf16 %v937_v25, %v936_v12  ;;  %v1076_v52 = vpack.c.bf16 %v13619_v61, %v13610_v38  ;;  %v12234_v61 = vld [vmem:[#allocation9 + $0x30] sm:$0xff]  }
 0x315   : > { %4964 = vmatprep.subr.bf16.mxu0 %v16391_v0  ;;  %10939 = vmatprep.mubr.bf16.mxu1 %v1186_v2  ;;  %v1077_v38 = vpack.c.bf16 %v13635_v55, %v13622_v32  ;;  %v12236_v32 = vld [vmem:[#allocation9 + $0x40] sm:$0xff]   ;;  %v1082_v12 = vpack.c.bf16 %v13694_v19, %v13687_v53  ;;  %v1083_v19 = vpack.c.bf16 %v13708_v24, %v13697_v37  ;;  %v954_v37 = vld [vmem:[%s13015_s20 + $0x117] sm:$0xff] }
 0x316   : > { %10940 = vmatmul.mubr.bf16.gmra.mrb[40].mxu1 %v1187_v56  ;;  %v12240_v2 = vld [vmem:[#allocation9 + $0x60] sm:$0xff]   ;;  %v962_v10 = vld [vmem:[%s13015_s20 + $0x157] sm:$0xff] }
 0x317   : > { %10943 = vmatprep.mubr.bf16.mxu1 %v1188_v8  ;;  %v951_v8 = vld [vmem:[%s13015_s20 + $0xff] sm:$0xff] }
 0x318   : > { %4965 = vmatpush1.bf16.msra.mxu0 %v12231_v15  ;;  %v938_v15 = vld [vmem:[%s13015_s20 + $0x97] sm:$0xff]  ;;  %v955_v24 = vld [vmem:[%s13015_s20 + $0x11f] sm:$0xff] }
 0x319   : > { %4966 = vmatprep.subr.bf16.mxu0 %v16391_v0  ;;  %v980_v20 = vpack.c.bf16 %v939_v58, %v938_v15  ;;  %v12243_v15 = vld [vmem:[#allocation9 + $0x78] sm:$0xff]  }
 0x31a   : > { %v950_v58 = vld [vmem:[%s13015_s20 + $0xf7] sm:$0xff] }
 0x31b   : > { %2737 = vmatmul.mubr.bf16.gmra.mrb[8].mxu0 %v976_v29  ;;  %v1189_v29 = vpack.c.bf16 %v1165_v16, %v1164_v33  ;;  %v986_v53 = vpack.c.bf16 %v951_v8, %v950_v58  ;;  %v952_v33 = vld [vmem:[%s13015_s20 + $0x107] sm:$0xff]  ;;  %v953_v16 = vld [vmem:[%s13015_s20 + $0x10f] sm:$0xff] }
 0x31c   : > { %2744 = vmatprep.mubr.bf16.mxu0 %v1073_v9  ;;  %4967 = vmatpush1.bf16.msra.mxu0 %v12232_v14  ;;  %v941_v9 = vld [vmem:[%s13015_s20 + $0xaf] sm:$0xff]  ;;  %v968_v58 = vld [vmem:[%s13015_s20 + $0x187] sm:$0xff] }
 0x31d   : > { %4968 = vmatprep.subr.bf16.mxu0 %v16391_v0  ;;  %v981_v40 = vpack.c.bf16 %v941_v9, %v940_v46  ;;  %v12237_v14 = vld [vmem:[#allocation9 + $0x48] sm:$0xff]  }
 0x31e   : > { %10944 = vmatmul.mubr.bf16.gmra.mrb[44].mxu1 %v1189_v29  ;;  %v987_v29 = vpack.c.bf16 %v953_v16, %v952_v33  ;;  %v969_v8 = vld [vmem:[%s13015_s20 + $0x18f] sm:$0xff] }
 0x31f   : > { %v995_v33 = vpack.c.bf16 %v969_v8, %v968_v58 }
 0x320   : > { %4969 = vmatpush1.bf16.msra.mxu0 %v12233_v23  ;;  %v12762_v23 = vmov 0.0  }
 0x321   : > { %4970 = vmatprep.subr.bf16.mxu0 %v16391_v0  ;;  %343 = vst [vmem:[#allocation2 + $0x8] sm:$0xff] %v12762_v23  ;;  %344 = vst [vmem:[#allocation2 + $0x10] sm:$0xff] %v12762_v23 }
 0x322   : > { %342 = vst [vmem:[#allocation2] sm:$0xff] %v12762_v23  ;;  %345 = vst [vmem:[#allocation2 + $0x18] sm:$0xff] %v12762_v23 }
 0x323   : > { %2745 = vmatmul.mubr.bf16.gmra.mrb[12].mxu0 %v977_v21  ;;  %v943_v21 = vld [vmem:[%s13015_s20 + $0xbf] sm:$0xff]  ;;  %346 = vst [vmem:[#allocation2 + $0x1a0] sm:$0xff] %v12762_v23  ;;  %347 = vst [vmem:[#allocation2 + $0x1a8] sm:$0xff] %v12762_v23 }
 0x324   : > { %2752 = vmatprep.mubr.bf16.mxu0 %v1074_v60  ;;  %4971 = vmatpush1.bf16.msra.mxu0 %v12234_v61  ;;  %v982_v55 = vpack.c.bf16 %v943_v21, %v942_v57  ;;  %v1079_v60 = vpack.c.bf16 %v13660_v27, %v13649_v26  ;;  %v12239_v26 = vld [vmem:[#allocation9 + $0x58] sm:$0xff]   ;;  %348 = vst [vmem:[#allocation2 + $0x1b0] sm:$0xff] %v12762_v23  ;;  %349 = vst [vmem:[#allocation2 + $0x1b8] sm:$0xff] %v12762_v23 }
 0x325   : > { %4972 = vmatprep.subr.bf16.mxu0 %v16391_v0  ;;  %v946_v27 = vld [vmem:[%s13015_s20 + $0xd7] sm:$0xff]  ;;  %v1086_v21 = vpack.c.bf16 %v13742_v22, %v13735_v1  ;;  %v961_v1 = vld [vmem:[%s13015_s20 + $0x14f] sm:$0xff] }
 0x326   : > { %v984_v56 = vpack.c.bf16 %v947_v6, %v946_v27  ;;  %v991_v22 = vpack.c.bf16 %v961_v1, %v960_v51  ;;  %v992_v6 = vpack.c.bf16 %v963_v5, %v962_v10  ;;  %v12763_v10 = vmov 0.0|0.0  }
 0x328   : > { %4973 = vmatpush1.bf16.msra.mxu0 %v12235_v30  ;;  %v956_v30 = vld [vmem:[%s13015_s20 + $0x127] sm:$0xff] }
 0x329   : > { %4974 = vmatprep.subr.bf16.mxu0 %v16391_v0  ;;  %v3295_v5 = vld [vmem:[#allocation2 + $0x7] sm:$0xff] }
 0x32b   : > { %2753 = vmatmul.mubr.bf16.gmra.mrb[16].mxu0 %v978_v41  ;;  %v1081_v41 = vpack.c.bf16 %v13684_v43, %v13673_v59  ;;  %v12242_v59 = vld [vmem:[#allocation9 + $0x70] sm:$0xff]  }
 0x32c   : > { %2760 = vmatprep.mubr.bf16.mxu0 %v1075_v47  ;;  %4975 = vmatpush1.bf16.msra.mxu0 %v12236_v32  ;;  %v949_v47 = vld [vmem:[%s13015_s20 + $0xef] sm:$0xff] }
 0x32d   : > { %4976 = vmatprep.subr.bf16.mxu0 %v16391_v0  ;;  %v985_v43 = vpack.c.bf16 %v949_v47, %v948_v28  ;;  %v1090_v28 = vpack.c.bf16 %v13793_v49, %v13783_v35  ;;  %v13980_v47 = vld [vmem:[#allocation9 + $0x88] sm:$0xff]   ;;  %v13992_v35 = vld [vmem:[#allocation9 + $0x90] sm:$0xff]  }
 0x330   : > { %4977 = vmatpush1.bf16.msra.mxu0 %v12237_v14 }
 0x331   : > { %4978 = vmatprep.subr.bf16.mxu0 %v16391_v0 }
 0x333   : > { %2761 = vmatmul.mubr.bf16.gmra.mrb[20].mxu0 %v979_v18 }
 0x334   : > { %2768 = vmatprep.mubr.bf16.mxu0 %v1076_v52  ;;  %4979 = vmatpush1.bf16.msra.mxu0 %v12238_v3 }
 0x335   : > { %4980 = vmatprep.subr.bf16.mxu0 %v16391_v0 }
 0x338   : > { %4981 = vmatpush1.bf16.msra.mxu0 %v12239_v26 }
 0x339   : > { %4982 = vmatprep.subr.bf16.mxu0 %v16391_v0 }
 0x33b   : > { %2769 = vmatmul.mubr.bf16.gmra.mrb[24].mxu0 %v980_v20 }
 0x33c   : > { %2776 = vmatprep.mubr.bf16.mxu0 %v1077_v38  ;;  %4983 = vmatpush1.bf16.msra.mxu0 %v12240_v2  ;;  %v1084_v38 = vpack.c.bf16 %v13718_v7, %v13711_v48  ;;  %v957_v48 = vld [vmem:[%s13015_s20 + $0x12f] sm:$0xff]  ;;  %v13968_v2 = vld [vmem:[#allocation9 + $0x80] sm:$0xff]  }
 0x33d   : > { %4984 = vmatprep.subr.bf16.mxu0 %v16391_v0  ;;  %v989_v7 = vpack.c.bf16 %v957_v48, %v956_v30  ;;  %11091 = vmatpush1.bf16.msra.mxu1 %v13968_v2 }
 0x33e   : > { %11076 = vmatprep.subr.bf16.mxu1 %v16391_v0 }
 0x340   : > { %4985 = vmatpush1.bf16.msra.mxu0 %v12241_v50 }
 0x341   : > { %4986 = vmatprep.subr.bf16.mxu0 %v16391_v0  ;;  %11092 = vmatpush1.bf16.msra.mxu1 %v13980_v47 }
 0x342   : > { %11077 = vmatprep.subr.bf16.mxu1 %v16391_v0 }
 0x343   : > { %2777 = vmatmul.mubr.bf16.gmra.mrb[28].mxu0 %v981_v40  ;;  %v988_v40 = vpack.c.bf16 %v955_v24, %v954_v37  ;;  %v970_v24 = vld [vmem:[%s13015_s20 + $0x197] sm:$0xff] }
 0x344   : > { %2784 = vmatprep.mubr.bf16.mxu0 %v1078_v45  ;;  %4987 = vmatpush1.bf16.msra.mxu0 %v12242_v59  ;;  %v1085_v45 = vpack.c.bf16 %v13732_v62, %v13721_v34  ;;  %v958_v34 = vld [vmem:[%s13015_s20 + $0x137] sm:$0xff]  ;;  %v959_v62 = vld [vmem:[%s13015_s20 + $0x13f] sm:$0xff] }
 0x345   : > { %4988 = vmatprep.subr.bf16.mxu0 %v16391_v0  ;;  %v990_v14 = vpack.c.bf16 %v959_v62, %v958_v34  ;;  %11093 = vmatpush1.bf16.msra.mxu1 %v13992_v35  ;;  %v973_v34 = vld [vmem:[%s13015_s20 + $0x1af] sm:$0xff] }
 0x346   : > { %11078 = vmatprep.subr.bf16.mxu1 %v16391_v0 }
 0x348   : > { %4989 = vmatpush1.bf16.msra.mxu0 %v12243_v15  ;;  %v1091_v15 = vpack.c.bf16 %v13813_v11, %v13796_v31  ;;  %v14007_v31 = vld [vmem:[#allocation9 + $0xa0] sm:$0xff]  }
 0x349   : > { %5183 = vmatprep.subr.bf16.mxu0 %v16391_v0 }
 0x34a   : > { %v13908_v25 = vpop.f32.mrb[0].mxu1 }
 0x34b   : > { %2785 = vmatmul.mubr.bf16.gmra.mrb[32].mxu0 %v982_v55  ;;  %v13910_v18 = vpop.f32.mrb[1].mxu1 }
 0x34c   : > { %2792 = vmatprep.mubr.bf16.mxu0 %v1079_v60  ;;  %v13913_v52 = vpop.f32.mrb[2].mxu1 }
 0x34d   : > { %v13915_v63 = vpop.f32.mrb[3].mxu1 }
 0x353   : > { %2793 = vmatmul.mubr.bf16.gmra.mrb[36].mxu0 %v983_v44  ;;  %v1088_v44 = vpack.c.bf16 %v13766_v36, %v13759_v17  ;;  %v964_v17 = vld [vmem:[%s13015_s20 + $0x167] sm:$0xff]  ;;  %v965_v36 = vld [vmem:[%s13015_s20 + $0x16f] sm:$0xff] }
 0x354   : > { %2800 = vmatprep.mubr.bf16.mxu0 %v1080_v42 }
 0x35a   : > { %v13924_v20 = vpop.f32.mrb[4].mxu1 }
 0x35b   : > { %2801 = vmatmul.mubr.bf16.gmra.mrb[40].mxu0 %v984_v56  ;;  %v13928_v61 = vpop.f32.mrb[5].mxu1  ;;  %v1089_v56 = vpack.c.bf16 %v13780_v13, %v13769_v54 }
 0x35c   : > { %2808 = vmatprep.mubr.bf16.mxu0 %v1081_v41  ;;  %v13930_v46 = vpop.f32.mrb[6].mxu1  ;;  %v993_v41 = vpack.c.bf16 %v965_v36, %v964_v17  ;;  %v14038_v17 = vld [vmem:[#allocation9 + $0xc0] sm:$0xff]  }
 0x35d   : > { %v13932_v9 = vpop.f32.mrb[7].mxu1 }
 0x362   : > { %v13940_v57 = vpop.f32.mrb[8].mxu1 }
 0x363   : > { %2809 = vmatmul.mubr.bf16.gmra.mrb[44].mxu0 %v985_v43  ;;  %v13944_v32 = vpop.f32.mrb[9].mxu1  ;;  %v966_v43 = vld [vmem:[%s13015_s20 + $0x177] sm:$0xff] }
 0x364   : > { %2816 = vmatprep.mubr.bf16.mxu0 %v1082_v12  ;;  %v13946_v55 = vpop.f32.mrb[10].mxu1  ;;  %v967_v12 = vld [vmem:[%s13015_s20 + $0x17f] sm:$0xff] }
 0x365   : > { %v13948_v60 = vpop.f32.mrb[11].mxu1  ;;  %v994_v49 = vpack.c.bf16 %v967_v12, %v966_v43 }
 0x36a   : > { %v13956_v3 = vpop.f32.mrb[12].mxu1 }
 0x36b   : > { %2817 = vmatmul.mubr.bf16.gmra.mrb[48].mxu0 %v986_v53  ;;  %v13960_v42 = vpop.f32.mrb[13].mxu1  ;;  %v1067_v53 = vld [vmem:[%s13015_s20 + $0x1a0] sm:$0xff] }
 0x36c   : > { %2824 = vmatprep.mubr.bf16.mxu0 %v1083_v19  ;;  %v13962_v26 = vpop.f32.mrb[14].mxu1  ;;  %v14001_v19 = vld [vmem:[#allocation9 + $0x98] sm:$0xff]  }
 0x36d   : > { %v13964_v27 = vpop.f32.mrb[15].mxu1  ;;  %11094 = vmatpush1.bf16.msra.mxu1 %v14001_v19 }
 0x36e   : > { %11079 = vmatprep.subr.bf16.mxu1 %v16391_v0 }
 0x371   : > { %11095 = vmatpush1.bf16.msra.mxu1 %v14007_v31 }
 0x372   : > { %v13976_v50 = vpop.f32.mrb[16].mxu1  ;;  %11080 = vmatprep.subr.bf16.mxu1 %v16391_v0 }
 0x373   : > { %2825 = vmatmul.mubr.bf16.gmra.mrb[52].mxu0 %v987_v29  ;;  %v13982_v59 = vpop.f32.mrb[17].mxu1  ;;  %v1092_v29 = vpack.c.bf16 %v1067_v53, %v13816_v4  ;;  %v1068_v4 = vld [vmem:[%s13015_s20 + $0x1a8] sm:$0xff]  ;;  %v14079_v53 = vld [vmem:[#allocation9 + $0xd8] sm:$0xff]  }
 0x374   : > { %2832 = vmatprep.mubr.bf16.mxu0 %v1084_v38  ;;  %v13984_v54 = vpop.f32.mrb[18].mxu1 }
 0x375   : > { %v13987_v13 = vpop.f32.mrb[19].mxu1 }
 0x37a   : > { %v14003_v16 = vpop.f32.mrb[20].mxu1 }
 0x37b   : > { %2833 = vmatmul.mubr.bf16.gmra.mrb[56].mxu0 %v988_v40  ;;  %v14009_v11 = vpop.f32.mrb[21].mxu1  ;;  %v971_v40 = vld [vmem:[%s13015_s20 + $0x19f] sm:$0xff] }
 0x37c   : > { %2840 = vmatprep.mubr.bf16.mxu0 %v1085_v45  ;;  %v14012_v38 = vpop.f32.mrb[22].mxu1  ;;  %v1069_v45 = vld [vmem:[%s13015_s20 + $0x1b0] sm:$0xff]  ;;  %v996_v30 = vpack.c.bf16 %v971_v40, %v970_v24 }
 0x37d   : > { %v14014_v37 = vpop.f32.mrb[23].mxu1  ;;  %v1093_v48 = vpack.c.bf16 %v1069_v45, %v1068_v4 }
 0x383   : > { %2841 = vmatmul.mubr.bf16.gmra.mrb[60].mxu0 %v989_v7  ;;  %v12249_v7 = vld [vmem:[#allocation9 + $0xa8] sm:$0xff]  }
 0x384   : > { %2848 = vmatprep.mubr.bf16.mxu0 %v1086_v21  ;;  %11096 = vmatpush1.bf16.msra.mxu1 %v12249_v7  ;;  %v972_v21 = vld [vmem:[%s13015_s20 + $0x1a7] sm:$0xff] }
 0x385   : > { %11081 = vmatprep.subr.bf16.mxu1 %v16391_v0  ;;  %v997_v62 = vpack.c.bf16 %v973_v34, %v972_v21 }
 0x38b   : > { %2849 = vmatmul.mubr.bf16.gmra.mrb[64].mxu0 %v990_v14  ;;  %v14025_v14 = vpop.f32.mrb[24].mxu1 }
 0x38c   : > { %2856 = vmatprep.mubr.bf16.mxu0 %v1087_v39  ;;  %v12250_v39 = vld [vmem:[#allocation9 + $0xb0] sm:$0xff]   ;;  %v14027_v51 = vpop.f32.mrb[25].mxu1 }
 0x38d   : > { %v14029_v1 = vpop.f32.mrb[26].mxu1  ;;  %11097 = vmatpush1.bf16.msra.mxu1 %v12250_v39 }
 0x38e   : > { %11082 = vmatprep.subr.bf16.mxu1 %v16391_v0 }
 0x393   : > { %2857 = vmatmul.mubr.bf16.gmra.mrb[68].mxu0 %v991_v22  ;;  %v14031_v22 = vld [vmem:[#allocation9 + $0xb8] sm:$0xff]  }
 0x394   : > { %2864 = vmatprep.mubr.bf16.mxu0 %v1088_v44  ;;  %v14033_v44 = vpop.f32.mrb[27].mxu1  ;;  %11098 = vmatpush1.bf16.msra.mxu1 %v14031_v22 }
 0x395   : > { %11083 = vmatprep.subr.bf16.mxu1 %v16391_v0 }
 0x398   : > { %11099 = vmatpush1.bf16.msra.mxu1 %v14038_v17 }
 0x399   : > { %11084 = vmatprep.subr.bf16.mxu1 %v16391_v0 }
 0x39b   : > { %2865 = vmatmul.mubr.bf16.gmra.mrb[72].mxu0 %v992_v6  ;;  %v3296_v6 = vld [vmem:[#allocation2 + $0xf] sm:$0xff] }
 0x39c   : > { %2872 = vmatprep.mubr.bf16.mxu0 %v1089_v56  ;;  %v3343_v56 = vpack.c.bf16 %v3296_v6, %v3295_v5  ;;  %v16496_v6 = vmov 0 }
 0x3a3   : > { %2873 = vmatmul.mubr.bf16.gmra.mrb[76].mxu0 %v993_v41  ;;  %v14047_v41 = vld [vmem:[#allocation9 + $0xc8] sm:$0xff]  }
 0x3a4   : > { %2880 = vmatprep.mubr.bf16.mxu0 %v1090_v28  ;;  %11100 = vmatpush1.bf16.msra.mxu1 %v14047_v41 }
 0x3a5   : > { %11085 = vmatprep.subr.bf16.mxu1 %v16391_v0 }
 0x3ab   : > { %2881 = vmatmul.mubr.bf16.gmra.mrb[80].mxu0 %v994_v49  ;;  %v14069_v49 = vld [vmem:[%s16381_s2] ss:$0 sm:$0xff] }
 0x3ac   : > { %2888 = vmatprep.mubr.bf16.mxu0 %v1091_v15 }
 0x3b3   : > { %2889 = vmatmul.mubr.bf16.gmra.mrb[84].mxu0 %v995_v33 }
 0x3b4   : > { %2896 = vmatprep.mubr.bf16.mxu0 %v1092_v29 }
 0x3bb   : > { %2897 = vmatmul.mubr.bf16.gmra.mrb[88].mxu0 %v996_v30 }
 0x3bc   : > { %2904 = vmatprep.mubr.bf16.mxu0 %v1093_v48 }
 0x3c0   : > { %v14044_v36 = vpop.f32.mrb[28].mxu1 }
 0x3c1   : > { %v14049_v28 = vpop.f32.mrb[29].mxu1 }
 0x3c2   : > { %v14052_v43 = vpop.f32.mrb[30].mxu1 }
 0x3c3   : > { %2905 = vmatmul.mubr.bf16.gmra.mrb[92].mxu0 %v997_v62  ;;  %v14055_v12 = vpop.f32.mrb[31].mxu1 }
 0x3c4   : > { %4990 = vmatprep.mubr.bf16.mxu0 %v12763_v10  ;;  %v14103_v10 = vld [vmem:[#allocation9 + $0xe8] sm:$0xff]  }
 0x3cb   : > { %4991 = vmatmul.mubr.bf16.vlgmr.msra.gmra.mrb[96].mxu0 %v3343_v56 }
 0x3cc   : > { %5184 = vmatpush1.bf16.msra.mxu0 %v13968_v2  ;;  %v14059_v2 = vld [vmem:[#allocation9 + $0xd0] sm:$0xff]  }
 0x3cd   : > { %5185 = vmatprep.subr.bf16.mxu0 %v16391_v0  ;;  %11101 = vmatpush1.bf16.msra.mxu1 %v14059_v2 }
 0x3ce   : > { %11086 = vmatprep.subr.bf16.mxu1 %v16391_v0 }
 0x3d0   : > { %5186 = vmatpush1.bf16.msra.mxu0 %v13980_v47  ;;  %v3186_v47 = vlaneseq }
 0x3d1   : > { %5187 = vmatprep.subr.bf16.mxu0 %v16391_v0  ;;  %11102 = vmatpush1.bf16.msra.mxu1 %v14079_v53 }
 0x3d2   : > { %v14071_v15 = vpop.f32.mrb[32].mxu1  ;;  %v14077_v8 = vshrl.u32 %v3186_v47, 7  ;;  %11087 = vmatprep.subr.bf16.mxu1 %v16391_v0 }
 0x3d4   : > { %5188 = vmatpush1.bf16.msra.mxu0 %v13992_v35  ;;  %v14074_v35 = vpop.f32.mrb[33].mxu1  ;;  %16494 = vst [vmem:[#allocation18_spill] sm:$0xff] %v14077_v8  ;;  %vm3190_vm0 = vcmp.ge.s32.totalorder %v14077_v8, 1  ;;  %v14101_v62 = vadd.s32 16, %v14077_v8 }
 0x3d5   : > { %5189 = vmatprep.subr.bf16.mxu0 %v16391_v0  ;;  %vm14109_vm2 = vmpackc.low %vm3190_vm0, %vm12764_vm1 }
 0x3d6   : > { %16495 = vst [vmem:[#allocation19_spill] sm:$0xff] %v14101_v62  ;;  %v16497_v6 = vsel %vm14109_vm2, 4294967295, %v16496_v6  ;;  %vm3195_vm3 = vcmp.le.s32.totalorder %v14101_v62, 16  ;;  %vm14171_vm5 = vmpackc.low %vm12764_vm1, %vm3190_vm0 }
 0x3d7   : > { %16498 = vst [vmem:[#allocation20_spill] sm:$0xff] %v16497_v6  ;;  %vm14151_vm4 = vmpackc.low %vm3195_vm3, %vm12764_vm1  ;;  %vm10295_vm1 = vcmask 1047559  }
 0x3d8   : > { %5190 = vmatpush1.bf16.msra.mxu0 %v14001_v19  ;;  %v14081_v19 = vpop.f32.mrb[34].mxu1  ;;  %vm14199_vm6 = vmpackc.low %vm3190_vm0, %vm3195_vm3 }
 0x3d9   : > { %5191 = vmatprep.subr.bf16.mxu0 %v16391_v0  ;;  %v14084_v24 = vpop.f32.mrb[35].mxu1 }
 0x3dc   : > { %5192 = vmatpush1.bf16.msra.mxu0 %v14007_v31  ;;  %v14087_v31 = vld [vmem:[#allocation9 + $0xe0] sm:$0xff]  }
 0x3dd   : > { %5193 = vmatprep.subr.bf16.mxu0 %v16391_v0  ;;  %11103 = vmatpush1.bf16.msra.mxu1 %v14087_v31 }
 0x3de   : > { %v2722_v58 = vpop.f32.mrb[0].mxu0  ;;  %11088 = vmatprep.subr.bf16.mxu1 %v16391_v0 }
 0x3df   : > { %v2724_v33 = vpop.f32.mrb[1].mxu0  ;;  %v11107_v29 = vadd.f32 %v14069_v49, %v2722_v58 }
 0x3e0   : > { %v2725_v40 = vpop.f32.mrb[2].mxu0  ;;  %5194 = vmatpush1.bf16.msra.mxu0 %v12249_v7 }
 0x3e1   : > { %v2948_v4 = vadd.f32 %v11107_v29, %v13910_v18  ;;  %v2727_v45 = vpop.f32.mrb[3].mxu0  ;;  %v11108_v30 = vadd.f32 %v14069_v49, %v2725_v40  ;;  %5195 = vmatprep.subr.bf16.mxu0 %v16391_v0  ;;  %11104 = vmatpush1.bf16.msra.mxu1 %v14103_v10  ;;  %v14122_v29 = vld [vmem:[#allocation9 + $0xf0] sm:$0xff]  }
 0x3e2   : > { %11089 = vmatprep.subr.bf16.mxu1 %v16391_v0 }
 0x3e3   : > { %v3138_v48 = vmax.f32 %v2948_v4, 0.0  ;;  %v2951_v21 = vadd.f32 %v11108_v30, %v13915_v63  ;;  %v3297_v4 = vld [vmem:[#allocation2 + $0x17] sm:$0xff] }
 0x3e4   : > { %5196 = vmatpush1.bf16.msra.mxu0 %v12250_v39 }
 0x3e5   : > { %v3199_v7 = vsel %vm3190_vm0, %v3138_v48, 0.0  ;;  %v3139_v34 = vmax.f32 %v2951_v21, 0.0  ;;  %5197 = vmatprep.subr.bf16.mxu0 %v16391_v0  ;;  %v12426_v56 = vpack.c.bf16 %v3138_v48, %v12762_v23  ;;  %11105 = vmatpush1.bf16.msra.mxu1 %v14122_v29 }
 0x3e6   : > { %3247 = vst [vmem:[#allocation2 + $0x20] sm:$0xff] %v3199_v7  ;;  %v2730_v18 = vpop.f32.mrb[4].mxu0  ;;  %11090 = vmatprep.subr.bf16.mxu1 %v16391_v0  ;;  %v14133_v7 = vld [vmem:[#allocation9 + $0xf8] sm:$0xff]  }
 0x3e7   : > { %3248 = vst [vmem:[#allocation2 + $0x28] sm:$0xff] %v3139_v34  ;;  %v11109_v63 = vadd.f32 %v14069_v49, %v2730_v18  ;;  %v2732_v5 = vpop.f32.mrb[5].mxu0  ;;  %12427 = vmatprep.mubr.msk.bf16.mxu0 %vm14109_vm2, %v12426_v56 }
 0x3e8   : > { %v2733_v39 = vpop.f32.mrb[6].mxu0  ;;  %5198 = vmatpush1.bf16.msra.mxu0 %v14031_v22  ;;  %v14130_v22 = vpop.f32.mrb[36].mxu1 }
 0x3e9   : > { %v2956_v47 = vadd.f32 %v11109_v63, %v13908_v25  ;;  %v11110_v58 = vadd.f32 %v14069_v49, %v2733_v39  ;;  %v2735_v33 = vpop.f32.mrb[7].mxu0  ;;  %5199 = vmatprep.subr.bf16.mxu0 %v16391_v0  ;;  %11106 = vmatpush1.bf16.msra.mxu1 %v14133_v7 }
 0x3ea   : > { %5408 = vmatprep.subr.bf16.mxu1 %v16391_v0 }
 0x3eb   : > { %v3140_v23 = vmax.f32 %v2956_v47, 0.0  ;;  %v2959_v40 = vadd.f32 %v11110_v58, %v13913_v52  ;;  %v14135_v52 = vpop.f32.mrb[37].mxu1 }
 0x3ec   : > { %5200 = vmatpush1.bf16.msra.mxu0 %v14038_v17  ;;  %v14141_v39 = vpop.f32.mrb[38].mxu1 }
 0x3ed   : > { %v3201_v25 = vsel %vm3195_vm3, %v3140_v23, 0.0  ;;  %v3141_v45 = vmax.f32 %v2959_v40, 0.0  ;;  %v3298_v30 = vld [vmem:[#allocation2 + $0x1f] sm:$0xff]  ;;  %5201 = vmatprep.subr.bf16.mxu0 %v16391_v0  ;;  %v14144_v17 = vpop.f32.mrb[39].mxu1  ;;  %v16499_v40 = vmov 0 }
 0x3ee   : > { %3249 = vst [vmem:[#allocation2 + $0x30] sm:$0xff] %v3201_v25  ;;  %v2738_v48 = vpop.f32.mrb[8].mxu0  ;;  %v3344_v21 = vpack.c.bf16 %v3298_v30, %v3297_v4  ;;  %v16500_v40 = vsel %vm14151_vm4, 4294967295, %v16499_v40  ;;  %v12429_v4 = vpack.c.bf16 %v3140_v23, %v3139_v34 }
 0x3ef   : > { %v3202_v18 = vsel %vm3190_vm0, %v3141_v45, 0.0  ;;  %v2740_v63 = vpop.f32.mrb[9].mxu0  ;;  %v11111_v5 = vadd.f32 %v14069_v49, %v2738_v48  ;;  %16501 = vst [vmem:[#allocation21_spill] sm:$0xff] %v16500_v40  ;;  %v3299_v48 = vld [vmem:[#allocation2 + $0x27] sm:$0xff] }
 0x3f0   : > { %3250 = vst [vmem:[#allocation2 + $0x38] sm:$0xff] %v3202_v18  ;;  %v2741_v56 = vpop.f32.mrb[10].mxu0  ;;  %4999 = vmatmul.mubr.bf16.gmra.mrb[100].mxu0 %v3344_v21 }
 0x3f1   : > { %v2964_v47 = vadd.f32 %v11111_v5, %v13928_v61  ;;  %v2743_v58 = vpop.f32.mrb[11].mxu0  ;;  %v11112_v33 = vadd.f32 %v14069_v49, %v2741_v56  ;;  %12430 = vmatprep.mubr.msk.bf16.mxu0 %vm14151_vm4, %v12429_v4  ;;  %5202 = vmatpush1.bf16.msra.mxu0 %v14047_v41 }
 0x3f2   : > { %5203 = vmatprep.subr.bf16.mxu0 %v16391_v0 }
 0x3f3   : > { %v3142_v25 = vmax.f32 %v2964_v47, 0.0  ;;  %v2967_v61 = vadd.f32 %v11112_v33, %v13932_v9 }
 0x3f5   : > { %3251 = vst [vmem:[#allocation2 + $0x40] sm:$0xff] %v3142_v25  ;;  %v3143_v30 = vmax.f32 %v2967_v61, 0.0  ;;  %v3300_v21 = vld [vmem:[#allocation2 + $0x2f] sm:$0xff]  ;;  %5204 = vmatpush1.bf16.msra.mxu0 %v14059_v2  ;;  %v16502_v2 = vmov 0  ;;  %v12432_v58 = vpack.c.bf16 %v3142_v25, %v3141_v45 }
 0x3f6   : > { %v2746_v18 = vpop.f32.mrb[12].mxu0  ;;  %v3345_v63 = vpack.c.bf16 %v3300_v21, %v3299_v48  ;;  %5205 = vmatprep.subr.bf16.mxu0 %v16391_v0  ;;  %v16503_v2 = vsel %vm14171_vm5, 4294967295, %v16502_v2  ;;  %v14180_v48 = vpop.f32.mrb[40].mxu1 }
 0x3f7   : > { %v3204_v34 = vsel %vm3195_vm3, %v3143_v30, 0.0  ;;  %v11113_v23 = vadd.f32 %v14069_v49, %v2746_v18  ;;  %v2748_v5 = vpop.f32.mrb[13].mxu0  ;;  %16504 = vst [vmem:[#allocation22_spill] sm:$0xff] %v16503_v2  ;;  %v14184_v45 = vpop.f32.mrb[41].mxu1 }
 0x3f8   : > { %3252 = vst [vmem:[#allocation2 + $0x48] sm:$0xff] %v3204_v34  ;;  %v2749_v9 = vpop.f32.mrb[14].mxu0  ;;  %5007 = vmatmul.mubr.bf16.gmra.mrb[104].mxu0 %v3345_v63  ;;  %v14186_v34 = vpop.f32.mrb[42].mxu1 }
 0x3f9   : > { %v2972_v41 = vadd.f32 %v11113_v23, %v13924_v20  ;;  %v11114_v56 = vadd.f32 %v14069_v49, %v2749_v9  ;;  %v2751_v47 = vpop.f32.mrb[15].mxu0  ;;  %12433 = vmatprep.mubr.msk.bf16.mxu0 %vm14171_vm5, %v12432_v58  ;;  %5206 = vmatpush1.bf16.msra.mxu0 %v14079_v53  ;;  %v3301_v20 = vld [vmem:[#allocation2 + $0x37] sm:$0xff]  ;;  %v14190_v23 = vpop.f32.mrb[43].mxu1 }
 0x3fa   : > { %5207 = vmatprep.subr.bf16.mxu0 %v16391_v0 }
 0x3fb   : > { %v3144_v33 = vmax.f32 %v2972_v41, 0.0  ;;  %v2975_v4 = vadd.f32 %v11114_v56, %v13930_v46 }
 0x3fc   : > { %v3302_v61 = vld [vmem:[#allocation2 + $0x3f] sm:$0xff] }
 0x3fd   : > { %v3205_v21 = vsel %vm3190_vm0, %v3144_v33, 0.0  ;;  %v3145_v18 = vmax.f32 %v2975_v4, 0.0  ;;  %v3346_v63 = vpack.c.bf16 %v3302_v61, %v3301_v20  ;;  %5208 = vmatpush1.bf16.msra.mxu0 %v14087_v31  ;;  %v16505_v31 = vmov 0 }
 0x3fe   : > { %3253 = vst [vmem:[#allocation2 + $0x50] sm:$0xff] %v3205_v21  ;;  %v2754_v25 = vpop.f32.mrb[16].mxu0  ;;  %5209 = vmatprep.subr.bf16.mxu0 %v16391_v0  ;;  %v16506_v31 = vsel %vm14199_vm6, 4294967295, %v16505_v31  ;;  %v12435_v47 = vpack.c.bf16 %v3144_v33, %v3143_v30 }
 0x3ff   : > { %3254 = vst [vmem:[#allocation2 + $0x58] sm:$0xff] %v3145_v18  ;;  %v2756_v46 = vpop.f32.mrb[17].mxu0  ;;  %v11115_v53 = vadd.f32 %v14069_v49, %v2754_v25  ;;  %16507 = vst [vmem:[#allocation23_spill] sm:$0xff] %v16506_v31  ;;  %v3303_v61 = vld [vmem:[#allocation2 + $0x47] sm:$0xff] }
 0x400   : > { %v2757_v5 = vpop.f32.mrb[18].mxu0  ;;  %5015 = vmatmul.mubr.bf16.gmra.mrb[108].mxu0 %v3346_v63 }
 0x401   : > { %v2980_v9 = vadd.f32 %v11115_v53, %v13944_v32  ;;  %v2759_v41 = vpop.f32.mrb[19].mxu0  ;;  %v11116_v56 = vadd.f32 %v14069_v49, %v2757_v5  ;;  %12436 = vmatprep.mubr.msk.bf16.mxu0 %vm14199_vm6, %v12435_v47  ;;  %5210 = vmatpush1.bf16.msra.mxu0 %v14103_v10 }
 0x402   : > { %5211 = vmatprep.subr.bf16.mxu0 %v16391_v0 }
 0x403   : > { %v3146_v58 = vmax.f32 %v2980_v9, 0.0  ;;  %v2983_v32 = vadd.f32 %v11116_v56, %v13948_v60 }
 0x405   : > { %v3207_v4 = vsel %vm3195_vm3, %v3146_v58, 0.0  ;;  %v3147_v20 = vmax.f32 %v2983_v32, 0.0  ;;  %v3304_v21 = vld [vmem:[#allocation2 + $0x4f] sm:$0xff]  ;;  %5212 = vmatpush1.bf16.msra.mxu0 %v14122_v29  ;;  %v12438_v9 = vpack.c.bf16 %v3146_v58, %v3145_v18 }
 0x406   : > { %3255 = vst [vmem:[#allocation2 + $0x60] sm:$0xff] %v3207_v4  ;;  %v2762_v63 = vpop.f32.mrb[20].mxu0  ;;  %v3347_v25 = vpack.c.bf16 %v3304_v21, %v3303_v61  ;;  %5213 = vmatprep.subr.bf16.mxu0 %v16391_v0  ;;  %v3305_v47 = vld [vmem:[#allocation2 + $0x57] sm:$0xff]  ;;  %v14221_v4 = vpop.f32.mrb[44].mxu1 }
 0x407   : > { %v3208_v30 = vsel %vm3190_vm0, %v3147_v20, 0.0  ;;  %v11117_v10 = vadd.f32 %v14069_v49, %v2762_v63  ;;  %v2764_v33 = vpop.f32.mrb[21].mxu0  ;;  %v14223_v21 = vpop.f32.mrb[45].mxu1 }
 0x408   : > { %3256 = vst [vmem:[#allocation2 + $0x68] sm:$0xff] %v3208_v30  ;;  %v2765_v60 = vpop.f32.mrb[22].mxu0  ;;  %5023 = vmatmul.mubr.bf16.gmra.mrb[112].mxu0 %v3347_v25 }
 0x409   : > { %v2988_v46 = vadd.f32 %v11117_v10, %v13940_v57  ;;  %v11118_v53 = vadd.f32 %v14069_v49, %v2765_v60  ;;  %v2767_v5 = vpop.f32.mrb[23].mxu0  ;;  %12439 = vmatprep.mubr.msk.bf16.mxu0 %vm14151_vm4, %v12438_v9  ;;  %5214 = vmatpush1.bf16.msra.mxu0 %v14133_v7  ;;  %v14228_v7 = vpop.f32.mrb[46].mxu1 }
 0x40a   : > { %v14230_v25 = vpop.f32.mrb[47].mxu1 }
 0x40b   : > { %v3148_v29 = vmax.f32 %v2988_v46, 0.0  ;;  %v2991_v41 = vadd.f32 %v11118_v53, %v13946_v55 }
 0x40d   : > { %3257 = vst [vmem:[#allocation2 + $0x70] sm:$0xff] %v3148_v29  ;;  %v3149_v56 = vmax.f32 %v2991_v41, 0.0  ;;  %v3306_v32 = vld [vmem:[#allocation2 + $0x5f] sm:$0xff]  ;;  %v12441_v60 = vpack.c.bf16 %v3148_v29, %v3147_v20 }
 0x40e   : > { %v2770_v61 = vpop.f32.mrb[24].mxu0  ;;  %v3348_v57 = vpack.c.bf16 %v3306_v32, %v3305_v47 }
 0x40f   : > { %v3210_v18 = vsel %vm3195_vm3, %v3149_v56, 0.0  ;;  %v2772_v58 = vpop.f32.mrb[25].mxu0  ;;  %v11119_v63 = vadd.f32 %v14069_v49, %v2770_v61  ;;  %v3307_v5 = vld [vmem:[#allocation2 + $0x67] sm:$0xff] }
 0x410   : > { %3258 = vst [vmem:[#allocation2 + $0x78] sm:$0xff] %v3210_v18  ;;  %v2773_v55 = vpop.f32.mrb[26].mxu0  ;;  %5031 = vmatmul.mubr.bf16.gmra.mrb[116].mxu0 %v3348_v57 }
 0x411   : > { %v2996_v30 = vadd.f32 %v11119_v63, %v13960_v42  ;;  %v2775_v10 = vpop.f32.mrb[27].mxu0  ;;  %v11120_v33 = vadd.f32 %v14069_v49, %v2773_v55  ;;  %12442 = vmatprep.mubr.msk.bf16.mxu0 %vm14171_vm5, %v12441_v60 }
 0x413   : > { %v3150_v46 = vmax.f32 %v2996_v30, 0.0  ;;  %v2999_v53 = vadd.f32 %v11120_v33, %v13964_v27 }
 0x414   : > { %v3308_v9 = vld [vmem:[#allocation2 + $0x6f] sm:$0xff] }
 0x415   : > { %v3211_v41 = vsel %vm3190_vm0, %v3150_v46, 0.0  ;;  %v3151_v47 = vmax.f32 %v2999_v53, 0.0  ;;  %v3349_v32 = vpack.c.bf16 %v3308_v9, %v3307_v5  ;;  %v12444_v58 = vpack.c.bf16 %v3150_v46, %v3149_v56 }
 0x416   : > { %3259 = vst [vmem:[#allocation2 + $0x80] sm:$0xff] %v3211_v41  ;;  %v2778_v61 = vpop.f32.mrb[28].mxu0 }
 0x417   : > { %3260 = vst [vmem:[#allocation2 + $0x88] sm:$0xff] %v3151_v47  ;;  %v11121_v42 = vadd.f32 %v14069_v49, %v2778_v61  ;;  %v2780_v57 = vpop.f32.mrb[29].mxu0  ;;  %v3309_v33 = vld [vmem:[#allocation2 + $0x77] sm:$0xff] }
 0x418   : > { %v2781_v20 = vpop.f32.mrb[30].mxu0  ;;  %5039 = vmatmul.mubr.bf16.gmra.mrb[120].mxu0 %v3349_v32 }
 0x419   : > { %v3004_v29 = vadd.f32 %v11121_v42, %v13956_v3  ;;  %v11122_v18 = vadd.f32 %v14069_v49, %v2781_v20  ;;  %v2783_v27 = vpop.f32.mrb[31].mxu0  ;;  %12445 = vmatprep.mubr.msk.bf16.mxu0 %vm14199_vm6, %v12444_v58 }
 0x41b   : > { %v3152_v63 = vmax.f32 %v3004_v29, 0.0  ;;  %v3007_v55 = vadd.f32 %v11122_v18, %v13962_v26 }
 0x41d   : > { %v3213_v30 = vsel %vm3195_vm3, %v3152_v63, 0.0  ;;  %v3153_v10 = vmax.f32 %v3007_v55, 0.0  ;;  %v3310_v60 = vld [vmem:[#allocation2 + $0x7f] sm:$0xff]  ;;  %v12447_v61 = vpack.c.bf16 %v3152_v63, %v3151_v47 }
 0x41e   : > { %3261 = vst [vmem:[#allocation2 + $0x90] sm:$0xff] %v3213_v30  ;;  %v2786_v53 = vpop.f32.mrb[32].mxu0  ;;  %v3350_v5 = vpack.c.bf16 %v3310_v60, %v3309_v33  ;;  %v3311_v29 = vld [vmem:[#allocation2 + $0x87] sm:$0xff] }
 0x41f   : > { %v3214_v3 = vsel %vm3190_vm0, %v3153_v10, 0.0  ;;  %v11123_v56 = vadd.f32 %v14069_v49, %v2786_v53  ;;  %v2788_v46 = vpop.f32.mrb[33].mxu0 }
 0x420   : > { %3262 = vst [vmem:[#allocation2 + $0x98] sm:$0xff] %v3214_v3  ;;  %v2789_v9 = vpop.f32.mrb[34].mxu0  ;;  %5047 = vmatmul.mubr.bf16.gmra.mrb[124].mxu0 %v3350_v5 }
 0x421   : > { %v11124_v26 = vadd.f32 %v14069_v49, %v2789_v9  ;;  %v3012_v41 = vadd.f32 %v11123_v56, %v13982_v59  ;;  %v2791_v32 = vpop.f32.mrb[35].mxu0  ;;  %12448 = vmatprep.mubr.msk.bf16.mxu0 %vm14151_vm4, %v12447_v61 }
 0x423   : > { %v3154_v42 = vmax.f32 %v3012_v41, 0.0  ;;  %v3015_v57 = vadd.f32 %v11124_v26, %v13987_v13 }
 0x425   : > { %3263 = vst [vmem:[#allocation2 + $0xa0] sm:$0xff] %v3154_v42  ;;  %v3155_v20 = vmax.f32 %v3015_v57, 0.0  ;;  %v3312_v18 = vld [vmem:[#allocation2 + $0x8f] sm:$0xff]  ;;  %v12450_v60 = vpack.c.bf16 %v3154_v42, %v3153_v10 }
 0x426   : > { %v2794_v27 = vpop.f32.mrb[36].mxu0  ;;  %v3351_v58 = vpack.c.bf16 %v3312_v18, %v3311_v29 }
 0x427   : > { %v3216_v55 = vsel %vm3195_vm3, %v3155_v20, 0.0  ;;  %v11125_v30 = vadd.f32 %v14069_v49, %v2794_v27  ;;  %v2796_v59 = vpop.f32.mrb[37].mxu0  ;;  %v3313_v3 = vld [vmem:[#allocation2 + $0x97] sm:$0xff] }
 0x428   : > { %3264 = vst [vmem:[#allocation2 + $0xa8] sm:$0xff] %v3216_v55  ;;  %v2797_v47 = vpop.f32.mrb[38].mxu0  ;;  %5055 = vmatmul.mubr.bf16.gmra.mrb[128].mxu0 %v3351_v58 }
 0x429   : > { %v3020_v63 = vadd.f32 %v11125_v30, %v13976_v50  ;;  %v11126_v33 = vadd.f32 %v14069_v49, %v2797_v47  ;;  %v2799_v13 = vpop.f32.mrb[39].mxu0  ;;  %12451 = vmatprep.mubr.msk.bf16.mxu0 %vm14171_vm5, %v12450_v60 }
 0x42b   : > { %v3156_v53 = vmax.f32 %v3020_v63, 0.0  ;;  %v3023_v5 = vadd.f32 %v11126_v33, %v13984_v54 }
 0x42c   : > { %v3314_v56 = vld [vmem:[#allocation2 + $0x9f] sm:$0xff] }
 0x42d   : > { %v3217_v46 = vsel %vm3190_vm0, %v3156_v53, 0.0  ;;  %v3157_v9 = vmax.f32 %v3023_v5, 0.0  ;;  %v3352_v26 = vpack.c.bf16 %v3314_v56, %v3313_v3  ;;  %v12453_v57 = vpack.c.bf16 %v3156_v53, %v3155_v20 }
 0x42e   : > { %3265 = vst [vmem:[#allocation2 + $0xb0] sm:$0xff] %v3217_v46  ;;  %v2802_v41 = vpop.f32.mrb[40].mxu0 }
 0x42f   : > { %3266 = vst [vmem:[#allocation2 + $0xb8] sm:$0xff] %v3157_v9  ;;  %v11127_v50 = vadd.f32 %v14069_v49, %v2802_v41  ;;  %v2804_v32 = vpop.f32.mrb[41].mxu0  ;;  %v3315_v55 = vld [vmem:[#allocation2 + $0xa7] sm:$0xff] }
 0x430   : > { %v2805_v10 = vpop.f32.mrb[42].mxu0  ;;  %5063 = vmatmul.mubr.bf16.gmra.mrb[132].mxu0 %v3352_v26 }
 0x431   : > { %v11128_v61 = vadd.f32 %v14069_v49, %v2805_v10  ;;  %v3028_v42 = vadd.f32 %v11127_v50, %v14009_v11  ;;  %v2807_v54 = vpop.f32.mrb[43].mxu0  ;;  %12454 = vmatprep.mubr.msk.bf16.mxu0 %vm14199_vm6, %v12453_v57 }
 0x433   : > { %v3158_v29 = vmax.f32 %v3028_v42, 0.0  ;;  %v3031_v18 = vadd.f32 %v11128_v61, %v14014_v37 }
 0x435   : > { %v3219_v27 = vsel %vm3195_vm3, %v3158_v29, 0.0  ;;  %v3159_v58 = vmax.f32 %v3031_v18, 0.0  ;;  %v3316_v30 = vld [vmem:[#allocation2 + $0xaf] sm:$0xff]  ;;  %v12456_v53 = vpack.c.bf16 %v3158_v29, %v3157_v9 }
 0x436   : > { %3267 = vst [vmem:[#allocation2 + $0xc0] sm:$0xff] %v3219_v27  ;;  %v2810_v59 = vpop.f32.mrb[44].mxu0  ;;  %v3353_v47 = vpack.c.bf16 %v3316_v30, %v3315_v55  ;;  %v3317_v46 = vld [vmem:[#allocation2 + $0xb7] sm:$0xff] }
 0x437   : > { %v3220_v11 = vsel %vm3190_vm0, %v3159_v58, 0.0  ;;  %v11129_v20 = vadd.f32 %v14069_v49, %v2810_v59  ;;  %v2812_v63 = vpop.f32.mrb[45].mxu0 }
 0x438   : > { %3268 = vst [vmem:[#allocation2 + $0xc8] sm:$0xff] %v3220_v11  ;;  %v2813_v33 = vpop.f32.mrb[46].mxu0  ;;  %5071 = vmatmul.mubr.bf16.gmra.mrb[136].mxu0 %v3353_v47 }
 0x439   : > { %v3036_v37 = vadd.f32 %v11129_v20, %v14003_v16  ;;  %v11130_v13 = vadd.f32 %v14069_v49, %v2813_v33  ;;  %v2815_v60 = vpop.f32.mrb[47].mxu0  ;;  %12457 = vmatprep.mubr.msk.bf16.mxu0 %vm14151_vm4, %v12456_v53 }
 0x43b   : > { %v3160_v5 = vmax.f32 %v3036_v37, 0.0  ;;  %v3039_v3 = vadd.f32 %v11130_v13, %v14012_v38 }
 0x43d   : > { %3269 = vst [vmem:[#allocation2 + $0xd0] sm:$0xff] %v3160_v5  ;;  %v3161_v56 = vmax.f32 %v3039_v3, 0.0  ;;  %v3318_v26 = vld [vmem:[#allocation2 + $0xbf] sm:$0xff]  ;;  %v12459_v54 = vpack.c.bf16 %v3160_v5, %v3159_v58 }
 0x43e   : > { %v2818_v41 = vpop.f32.mrb[48].mxu0  ;;  %v3354_v50 = vpack.c.bf16 %v3318_v26, %v3317_v46 }
 0x43f   : > { %v3222_v32 = vsel %vm3195_vm3, %v3161_v56, 0.0  ;;  %v11131_v16 = vadd.f32 %v14069_v49, %v2818_v41  ;;  %v2820_v10 = vpop.f32.mrb[49].mxu0  ;;  %v3319_v18 = vld [vmem:[#allocation2 + $0xc7] sm:$0xff] }
 0x440   : > { %3270 = vst [vmem:[#allocation2 + $0xd8] sm:$0xff] %v3222_v32  ;;  %v2821_v9 = vpop.f32.mrb[50].mxu0  ;;  %5079 = vmatmul.mubr.bf16.gmra.mrb[140].mxu0 %v3354_v50 }
 0x441   : > { %v11132_v61 = vadd.f32 %v14069_v49, %v2821_v9  ;;  %v3044_v42 = vadd.f32 %v11131_v16, %v14027_v51  ;;  %v2823_v38 = vpop.f32.mrb[51].mxu0  ;;  %12460 = vmatprep.mubr.msk.bf16.mxu0 %vm14171_vm5, %v12459_v54 }
 0x443   : > { %v3162_v57 = vmax.f32 %v3044_v42, 0.0  ;;  %v3047_v29 = vadd.f32 %v11132_v61, %v14033_v44 }
 0x444   : > { %v3320_v27 = vld [vmem:[#allocation2 + $0xcf] sm:$0xff] }
 0x445   : > { %v3223_v55 = vsel %vm3190_vm0, %v3162_v57, 0.0  ;;  %v3163_v30 = vmax.f32 %v3047_v29, 0.0  ;;  %v3355_v59 = vpack.c.bf16 %v3320_v27, %v3319_v18  ;;  %v12462_v33 = vpack.c.bf16 %v3162_v57, %v3161_v56 }
 0x446   : > { %3271 = vst [vmem:[#allocation2 + $0xe0] sm:$0xff] %v3223_v55  ;;  %v2826_v47 = vpop.f32.mrb[52].mxu0 }
 0x447   : > { %3272 = vst [vmem:[#allocation2 + $0xe8] sm:$0xff] %v3163_v30  ;;  %v11133_v51 = vadd.f32 %v14069_v49, %v2826_v47  ;;  %v2828_v11 = vpop.f32.mrb[53].mxu0  ;;  %v3321_v5 = vld [vmem:[#allocation2 + $0xd7] sm:$0xff] }
 0x448   : > { %v2829_v58 = vpop.f32.mrb[54].mxu0  ;;  %5087 = vmatmul.mubr.bf16.gmra.mrb[144].mxu0 %v3355_v59 }
 0x449   : > { %v3052_v20 = vadd.f32 %v11133_v51, %v14025_v14  ;;  %v11134_v63 = vadd.f32 %v14069_v49, %v2829_v58  ;;  %v2831_v44 = vpop.f32.mrb[55].mxu0  ;;  %12463 = vmatprep.mubr.msk.bf16.mxu0 %vm14199_vm6, %v12462_v33 }
 0x44b   : > { %v3164_v37 = vmax.f32 %v3052_v20, 0.0  ;;  %v3055_v13 = vadd.f32 %v11134_v63, %v14029_v1 }
 0x44d   : > { %v3225_v60 = vsel %vm3195_vm3, %v3164_v37, 0.0  ;;  %v3165_v53 = vmax.f32 %v3055_v13, 0.0  ;;  %v3322_v3 = vld [vmem:[#allocation2 + $0xdf] sm:$0xff]  ;;  %v12465_v10 = vpack.c.bf16 %v3164_v37, %v3163_v30 }
 0x44e   : > { %3273 = vst [vmem:[#allocation2 + $0xf0] sm:$0xff] %v3225_v60  ;;  %v2834_v46 = vpop.f32.mrb[56].mxu0  ;;  %v3356_v26 = vpack.c.bf16 %v3322_v3, %v3321_v5  ;;  %v3323_v38 = vld [vmem:[#allocation2 + $0xe7] sm:$0xff] }
 0x44f   : > { %v3226_v14 = vsel %vm3190_vm0, %v3165_v53, 0.0  ;;  %v11135_v56 = vadd.f32 %v14069_v49, %v2834_v46  ;;  %v2836_v41 = vpop.f32.mrb[57].mxu0 }
 0x450   : > { %3274 = vst [vmem:[#allocation2 + $0xf8] sm:$0xff] %v3226_v14  ;;  %v2837_v50 = vpop.f32.mrb[58].mxu0  ;;  %5095 = vmatmul.mubr.bf16.gmra.mrb[148].mxu0 %v3356_v26 }
 0x451   : > { %v11136_v1 = vadd.f32 %v14069_v49, %v2837_v50  ;;  %v3060_v32 = vadd.f32 %v11135_v56, %v14049_v28  ;;  %v2839_v16 = vpop.f32.mrb[59].mxu0  ;;  %12466 = vmatprep.mubr.msk.bf16.mxu0 %vm14151_vm4, %v12465_v10 }
 0x453   : > { %v3166_v9 = vmax.f32 %v3060_v32, 0.0  ;;  %v3063_v61 = vadd.f32 %v11136_v1, %v14055_v12 }
 0x455   : > { %3275 = vst [vmem:[#allocation2 + $0x100] sm:$0xff] %v3166_v9  ;;  %v3167_v42 = vmax.f32 %v3063_v61, 0.0  ;;  %v3324_v54 = vld [vmem:[#allocation2 + $0xef] sm:$0xff]  ;;  %v12468_v47 = vpack.c.bf16 %v3166_v9, %v3165_v53 }
 0x456   : > { %v2842_v57 = vpop.f32.mrb[60].mxu0  ;;  %v3357_v29 = vpack.c.bf16 %v3324_v54, %v3323_v38 }
 0x457   : > { %v3228_v18 = vsel %vm3195_vm3, %v3167_v42, 0.0  ;;  %v11137_v27 = vadd.f32 %v14069_v49, %v2842_v57  ;;  %v2844_v28 = vpop.f32.mrb[61].mxu0  ;;  %v3325_v58 = vld [vmem:[#allocation2 + $0xf7] sm:$0xff] }
 0x458   : > { %3276 = vst [vmem:[#allocation2 + $0x108] sm:$0xff] %v3228_v18  ;;  %v2845_v55 = vpop.f32.mrb[62].mxu0  ;;  %5103 = vmatmul.mubr.bf16.gmra.mrb[152].mxu0 %v3357_v29 }
 0x459   : > { %v3068_v30 = vadd.f32 %v11137_v27, %v14044_v36  ;;  %v11138_v59 = vadd.f32 %v14069_v49, %v2845_v55  ;;  %v2847_v12 = vpop.f32.mrb[63].mxu0  ;;  %12469 = vmatprep.mubr.msk.bf16.mxu0 %vm14171_vm5, %v12468_v47 }
 0x45b   : > { %v3168_v51 = vmax.f32 %v3068_v30, 0.0  ;;  %v3071_v11 = vadd.f32 %v11138_v59, %v14052_v43 }
 0x45c   : > { %v3326_v20 = vld [vmem:[#allocation2 + $0xff] sm:$0xff] }
 0x45d   : > { %v3229_v63 = vsel %vm3190_vm0, %v3168_v51, 0.0  ;;  %v3169_v44 = vmax.f32 %v3071_v11, 0.0  ;;  %v3358_v33 = vpack.c.bf16 %v3326_v20, %v3325_v58  ;;  %v12471_v3 = vpack.c.bf16 %v3168_v51, %v3167_v42 }
 0x45e   : > { %3277 = vst [vmem:[#allocation2 + $0x110] sm:$0xff] %v3229_v63  ;;  %v2850_v37 = vpop.f32.mrb[64].mxu0 }
 0x45f   : > { %3278 = vst [vmem:[#allocation2 + $0x118] sm:$0xff] %v3169_v44  ;;  %v11139_v36 = vadd.f32 %v14069_v49, %v2850_v37  ;;  %v2852_v13 = vpop.f32.mrb[65].mxu0  ;;  %v3327_v41 = vld [vmem:[#allocation2 + $0x107] sm:$0xff] }
 0x460   : > { %v2853_v60 = vpop.f32.mrb[66].mxu0  ;;  %5111 = vmatmul.mubr.bf16.gmra.mrb[156].mxu0 %v3358_v33 }
 0x461   : > { %v3076_v53 = vadd.f32 %v11139_v36, %v14074_v35  ;;  %v11140_v5 = vadd.f32 %v14069_v49, %v2853_v60  ;;  %v2855_v43 = vpop.f32.mrb[67].mxu0  ;;  %12472 = vmatprep.mubr.msk.bf16.mxu0 %vm14199_vm6, %v12471_v3  ;;  %v12261_v60 = vld [vmem:[#allocation9 + $0x108] sm:$0xff]  }
 0x463   : > { %v3170_v46 = vmax.f32 %v3076_v53, 0.0  ;;  %v3079_v26 = vadd.f32 %v11140_v5, %v14084_v24  ;;  %v14343_v5 = vld [vmem:[#allocation9 + $0x200] sm:$0xff]  }
 0x464   : > { %10947 = vmatprep.subr.bf16.mxu0 %v14343_v5 }
 0x465   : > { %v3231_v14 = vsel %vm3195_vm3, %v3170_v46, 0.0  ;;  %v3171_v56 = vmax.f32 %v3079_v26, 0.0  ;;  %v3328_v50 = vld [vmem:[#allocation2 + $0x10f] sm:$0xff]  ;;  %v12474_v38 = vpack.c.bf16 %v3170_v46, %v3169_v44 }
 0x466   : > { %3279 = vst [vmem:[#allocation2 + $0x120] sm:$0xff] %v3231_v14  ;;  %v2858_v1 = vpop.f32.mrb[68].mxu0  ;;  %v3359_v32 = vpack.c.bf16 %v3328_v50, %v3327_v41  ;;  %v3329_v18 = vld [vmem:[#allocation2 + $0x117] sm:$0xff]  ;;  %v3519_v30 = vld [vmem:[#allocation2 + $0x109] sm:$0xff] }
 0x467   : > { %v3232_v35 = vsel %vm3190_vm0, %v3171_v56, 0.0  ;;  %v11141_v16 = vadd.f32 %v14069_v49, %v2858_v1  ;;  %v2860_v10 = vpop.f32.mrb[69].mxu0  ;;  %v3520_v59 = vld [vmem:[#allocation2 + $0x111] sm:$0xff] }
 0x468   : > { %3280 = vst [vmem:[#allocation2 + $0x128] sm:$0xff] %v3232_v35  ;;  %v2861_v9 = vpop.f32.mrb[70].mxu0  ;;  %5119 = vmatmul.mubr.bf16.gmra.mrb[160].mxu0 %v3359_v32  ;;  %v3551_v33 = vpack.c.bf16 %v3520_v59, %v3519_v30  ;;  %v12262_v32 = vld [vmem:[#allocation9 + $0x110] sm:$0xff]  }
 0x469   : > { %v3084_v24 = vadd.f32 %v11141_v16, %v14071_v15  ;;  %v11142_v61 = vadd.f32 %v14069_v49, %v2861_v9  ;;  %v2863_v42 = vpop.f32.mrb[71].mxu0  ;;  %12475 = vmatprep.mubr.msk.bf16.mxu0 %vm14151_vm4, %v12474_v38  ;;  %v12263_v38 = vld [vmem:[#allocation9 + $0x118] sm:$0xff]  }
 0x46b   : > { %v3172_v54 = vmax.f32 %v3084_v24, 0.0  ;;  %v3087_v57 = vadd.f32 %v11142_v61, %v14081_v19  ;;  %v12260_v19 = vld [vmem:[#allocation9 + $0x100] sm:$0xff]  }
 0x46d   : > { %3281 = vst [vmem:[#allocation2 + $0x130] sm:$0xff] %v3172_v54  ;;  %v3173_v29 = vmax.f32 %v3087_v57, 0.0  ;;  %v3330_v27 = vld [vmem:[#allocation2 + $0x11f] sm:$0xff]  ;;  %v12477_v37 = vpack.c.bf16 %v3172_v54, %v3171_v56 }
 0x46e   : > { %v2866_v28 = vpop.f32.mrb[72].mxu0  ;;  %v3360_v55 = vpack.c.bf16 %v3330_v27, %v3329_v18  ;;  %v3521_v1 = vld [vmem:[#allocation2 + $0x119] sm:$0xff] }
 0x46f   : > { %v3234_v15 = vsel %vm3195_vm3, %v3173_v29, 0.0  ;;  %v11143_v12 = vadd.f32 %v14069_v49, %v2866_v28  ;;  %v2868_v47 = vpop.f32.mrb[73].mxu0  ;;  %v3616_v51 = vld [vmem:[#allocation2 + $0x127] sm:$0xff] }
 0x470   : > { %3282 = vst [vmem:[#allocation2 + $0x138] sm:$0xff] %v3234_v15  ;;  %v2869_v11 = vpop.f32.mrb[74].mxu0  ;;  %5127 = vmatmul.mubr.bf16.gmra.mrb[164].mxu0 %v3360_v55  ;;  %v3647_v58 = vpack.c.bf16 %v3616_v51, %v3330_v27  ;;  %v3522_v26 = vld [vmem:[#allocation2 + $0x121] sm:$0xff] }
 0x471   : > { %v3092_v20 = vadd.f32 %v11143_v12, %v14135_v52  ;;  %v11144_v63 = vadd.f32 %v14069_v49, %v2869_v11  ;;  %v2871_v44 = vpop.f32.mrb[75].mxu0  ;;  %12478 = vmatprep.mubr.msk.bf16.mxu0 %vm14171_vm5, %v12477_v37  ;;  %v3552_v9 = vpack.c.bf16 %v3522_v26, %v3521_v1  ;;  %v12264_v47 = vld [vmem:[#allocation9 + $0x120] sm:$0xff]  }
 0x472   : > { %5343 = vmatprep.mubr.bf16.mxu1 %v3647_v58  ;;  %v14598_v31 = vld [vmem:[#allocation2 + $0x120] sm:$0xff] }
 0x473   : > { %v3174_v36 = vmax.f32 %v3092_v20, 0.0  ;;  %v14341_v13 = vadd.f32 %v11144_v63, %v14144_v17  ;;  %5344 = vmatmul.mubr.bf16.vlgmr.msra.gmra.mrb[48].mxu1 %v3551_v33  ;;  %v12265_v33 = vld [vmem:[#allocation9 + $0x128] sm:$0xff]  }
 0x474   : > { %5409 = vmatpush1.bf16.msra.mxu1 %v12260_v19  ;;  %v3332_v53 = vld [vmem:[#allocation2 + $0x12f] sm:$0xff] }
 0x475   : > { %v3235_v52 = vsel %vm3190_vm0, %v3174_v36, 0.0  ;;  %v3175_v43 = vmax.f32 %v14341_v13, 0.0  ;;  %5410 = vmatprep.subr.bf16.mxu1 %v16391_v0  ;;  %v3361_v3 = vpack.c.bf16 %v3332_v53, %v3616_v51  ;;  %v12480_v24 = vpack.c.bf16 %v3174_v36, %v3173_v29  ;;  %v3523_v12 = vld [vmem:[#allocation2 + $0x129] sm:$0xff] }
 0x476   : > { %3283 = vst [vmem:[#allocation2 + $0x140] sm:$0xff] %v3235_v52  ;;  %v2874_v46 = vpop.f32.mrb[76].mxu0 }
 0x477   : > { %3284 = vst [vmem:[#allocation2 + $0x148] sm:$0xff] %v3175_v43  ;;  %v11145_v17 = vadd.f32 %v14069_v49, %v2874_v46  ;;  %v2876_v14 = vpop.f32.mrb[77].mxu0  ;;  %v3618_v56 = vld [vmem:[#allocation2 + $0x137] sm:$0xff] }
 0x478   : > { %v2877_v41 = vpop.f32.mrb[78].mxu0  ;;  %5411 = vmatpush1.bf16.msra.mxu1 %v12261_v60  ;;  %5135 = vmatmul.mubr.bf16.gmra.mrb[168].mxu0 %v3361_v3  ;;  %v3648_v50 = vpack.c.bf16 %v3618_v56, %v3332_v53  ;;  %v3524_v28 = vld [vmem:[#allocation2 + $0x131] sm:$0xff] }
 0x479   : > { %v3100_v35 = vadd.f32 %v11145_v17, %v14130_v22  ;;  %v11146_v16 = vadd.f32 %v14069_v49, %v2877_v41  ;;  %v2879_v10 = vpop.f32.mrb[79].mxu0  ;;  %5412 = vmatprep.subr.bf16.mxu1 %v16391_v0  ;;  %12481 = vmatprep.mubr.msk.bf16.mxu0 %vm14199_vm6, %v12480_v24  ;;  %v3553_v19 = vpack.c.bf16 %v3524_v28, %v3523_v12  ;;  %v12266_v17 = vld [vmem:[#allocation9 + $0x130] sm:$0xff]   ;;  %v12269_v12 = vld [vmem:[#allocation9 + $0x148] sm:$0xff]  }
 0x47a   : > { %5351 = vmatprep.mubr.bf16.mxu1 %v3648_v50 }
 0x47b   : > { %v3176_v61 = vmax.f32 %v3100_v35, 0.0  ;;  %v3103_v42 = vadd.f32 %v11146_v16, %v14141_v39  ;;  %5352 = vmatmul.mubr.bf16.gmra.mrb[52].mxu1 %v3552_v9  ;;  %v12267_v16 = vld [vmem:[#allocation9 + $0x138] sm:$0xff]  }
 0x47c   : > { %5413 = vmatpush1.bf16.msra.mxu1 %v12262_v32 }
 0x47d   : > { %v3237_v22 = vsel %vm3195_vm3, %v3176_v61, 0.0  ;;  %v3177_v54 = vmax.f32 %v3103_v42, 0.0  ;;  %5414 = vmatprep.subr.bf16.mxu1 %v16391_v0  ;;  %v3334_v57 = vld [vmem:[#allocation2 + $0x13f] sm:$0xff]  ;;  %v12483_v20 = vpack.c.bf16 %v3176_v61, %v3175_v43 }
 0x47e   : > { %3285 = vst [vmem:[#allocation2 + $0x150] sm:$0xff] %v3237_v22  ;;  %v2882_v18 = vpop.f32.mrb[80].mxu0  ;;  %v3362_v29 = vpack.c.bf16 %v3334_v57, %v3618_v56  ;;  %v3620_v27 = vld [vmem:[#allocation2 + $0x147] sm:$0xff]  ;;  %v3525_v60 = vld [vmem:[#allocation2 + $0x139] sm:$0xff] }
 0x47f   : > { %v3238_v55 = vsel %vm3190_vm0, %v3177_v54, 0.0  ;;  %v11147_v39 = vadd.f32 %v14069_v49, %v2882_v18  ;;  %v2884_v30 = vpop.f32.mrb[81].mxu0  ;;  %v3649_v59 = vpack.c.bf16 %v3620_v27, %v3334_v57  ;;  %v3526_v53 = vld [vmem:[#allocation2 + $0x141] sm:$0xff]  ;;  %v12375_v42 = vld [vmem:[%s16381_s2] ss:$0 sm:$0xff] }
 0x480   : > { %3286 = vst [vmem:[#allocation2 + $0x158] sm:$0xff] %v3238_v55  ;;  %v2885_v15 = vpop.f32.mrb[82].mxu0  ;;  %5415 = vmatpush1.bf16.msra.mxu1 %v12263_v38  ;;  %5143 = vmatmul.mubr.bf16.gmra.mrb[172].mxu0 %v3362_v29  ;;  %v3554_v50 = vpack.c.bf16 %v3526_v53, %v3525_v60  ;;  %v12268_v29 = vld [vmem:[#allocation9 + $0x140] sm:$0xff]   ;;  %v14625_v8 = vld [vmem:[#allocation2 + $0x148] sm:$0xff] }
 0x481   : > { %v3108_v51 = vadd.f32 %v11147_v39, %v14184_v45  ;;  %v11148_v11 = vadd.f32 %v14069_v49, %v2885_v15  ;;  %v2887_v58 = vpop.f32.mrb[83].mxu0  ;;  %5359 = vmatprep.mubr.bf16.mxu1 %v3649_v59  ;;  %5416 = vmatprep.subr.bf16.mxu1 %v16391_v0  ;;  %v14623_v6 = vld [vmem:[#allocation2 + $0x140] sm:$0xff] }
 0x482   : > { %12484 = vmatprep.mubr.msk.bf16.mxu0 %vm14151_vm4, %v12483_v20 }
 0x483   : > { %v3178_v63 = vmax.f32 %v3108_v51, 0.0  ;;  %v3111_v44 = vadd.f32 %v11148_v11, %v14190_v23  ;;  %5360 = vmatmul.mubr.bf16.gmra.mrb[56].mxu1 %v3553_v19 }
 0x484   : > { %5417 = vmatpush1.bf16.msra.mxu1 %v12264_v47 }
 0x485   : > { %3287 = vst [vmem:[#allocation2 + $0x160] sm:$0xff] %v3178_v63  ;;  %v3179_v37 = vmax.f32 %v3111_v44, 0.0  ;;  %5418 = vmatprep.subr.bf16.mxu1 %v16391_v0  ;;  %v3336_v45 = vld [vmem:[#allocation2 + $0x14f] sm:$0xff]  ;;  %v12486_v1 = vpack.c.bf16 %v3178_v63, %v3177_v54 }
 0x486   : > { %v2890_v36 = vpop.f32.mrb[84].mxu0  ;;  %v3363_v13 = vpack.c.bf16 %v3336_v45, %v3620_v27  ;;  %v14385_v18 = vld [vmem:[#allocation2 + $0x149] sm:$0xff] }
 0x487   : > { %v3240_v52 = vsel %vm3195_vm3, %v3179_v37, 0.0  ;;  %v11149_v43 = vadd.f32 %v14069_v49, %v2890_v36  ;;  %v2892_v3 = vpop.f32.mrb[85].mxu0  ;;  %v3622_v46 = vld [vmem:[#allocation2 + $0x157] sm:$0xff] }
 0x488   : > { %3288 = vst [vmem:[#allocation2 + $0x168] sm:$0xff] %v3240_v52  ;;  %v2893_v23 = vpop.f32.mrb[86].mxu0  ;;  %5419 = vmatpush1.bf16.msra.mxu1 %v12265_v33  ;;  %5151 = vmatmul.mubr.bf16.gmra.mrb[176].mxu0 %v3363_v13  ;;  %v3650_v26 = vpack.c.bf16 %v3622_v46, %v3336_v45  ;;  %v3528_v61 = vld [vmem:[#allocation2 + $0x151] sm:$0xff] }
 0x489   : > { %v3116_v14 = vadd.f32 %v11149_v43, %v14180_v48  ;;  %v11150_v56 = vadd.f32 %v14069_v49, %v2893_v23  ;;  %v2895_v41 = vpop.f32.mrb[87].mxu0  ;;  %5420 = vmatprep.subr.bf16.mxu1 %v16391_v0  ;;  %12487 = vmatprep.mubr.msk.bf16.mxu0 %vm14171_vm5, %v12486_v1  ;;  %v3555_v39 = vpack.c.bf16 %v3528_v61, %v14385_v18  ;;  %v12270_v36 = vld [vmem:[#allocation9 + $0x150] sm:$0xff]   ;;  %v12271_v23 = vld [vmem:[#allocation9 + $0x158] sm:$0xff]  }
 0x48a   : > { %5367 = vmatprep.mubr.bf16.mxu1 %v3650_v26  ;;  %v3583_v26 = vld [vmem:[#allocation2 + $0x1f] sm:$0xff]  ;;  %v3586_v61 = vld [vmem:[#allocation2 + $0x37] sm:$0xff] }
 0x48b   : > { %v3180_v32 = vmax.f32 %v3116_v14, 0.0  ;;  %v3119_v35 = vadd.f32 %v11150_v56, %v14186_v34  ;;  %5368 = vmatmul.mubr.bf16.gmra.mrb[60].mxu1 %v3554_v50 }
 0x48c   : > { %5421 = vmatpush1.bf16.msra.mxu1 %v12266_v17  ;;  %v3338_v10 = vld [vmem:[#allocation2 + $0x15f] sm:$0xff]  ;;  %v3584_v17 = vld [vmem:[#allocation2 + $0x27] sm:$0xff] }
 0x48d   : > { %v3241_v48 = vsel %vm3190_vm0, %v3180_v32, 0.0  ;;  %v3181_v49 = vmax.f32 %v3119_v35, 0.0  ;;  %5422 = vmatprep.subr.bf16.mxu1 %v16391_v0  ;;  %v3364_v9 = vpack.c.bf16 %v3338_v10, %v3622_v46  ;;  %v12489_v30 = vpack.c.bf16 %v3180_v32, %v3179_v37  ;;  %v14398_v45 = vld [vmem:[#allocation2 + $0x159] sm:$0xff] }
 0x48e   : > { %3289 = vst [vmem:[#allocation2 + $0x170] sm:$0xff] %v3241_v48  ;;  %v2898_v24 = vpop.f32.mrb[88].mxu0  ;;  %v3631_v32 = vpack.c.bf16 %v3584_v17, %v3583_v26  ;;  %v3487_v48 = vld [vmem:[#allocation2 + $0x9] sm:$0xff] }
 0x48f   : > { %3290 = vst [vmem:[#allocation2 + $0x178] sm:$0xff] %v3181_v49  ;;  %v11151_v34 = vadd.f32 %v12375_v42, %v2898_v24  ;;  %v2900_v38 = vpop.f32.mrb[89].mxu0  ;;  %v3624_v22 = vld [vmem:[#allocation2 + $0x167] sm:$0xff]  ;;  %v3681_v26 = vld [vmem:[#allocation2 + $0x30] sm:$0xff] }
 0x490   : > { %v2901_v54 = vpop.f32.mrb[90].mxu0  ;;  %5423 = vmatpush1.bf16.msra.mxu1 %v12267_v16  ;;  %5159 = vmatmul.mubr.bf16.gmra.mrb[180].mxu0 %v3364_v9  ;;  %v3651_v57 = vpack.c.bf16 %v3624_v22, %v3338_v10  ;;  %v3530_v20 = vld [vmem:[#allocation2 + $0x161] sm:$0xff]  ;;  %v3776_v38 = vld [vmem:[#allocation2 + $0x29] sm:$0xff] }
 0x491   : > { %v3124_v27 = vadd.f32 %v11151_v34, %v14223_v21  ;;  %v11152_v28 = vadd.f32 %v12375_v42, %v2901_v54  ;;  %v2903_v55 = vpop.f32.mrb[91].mxu0  ;;  %5424 = vmatprep.subr.bf16.mxu1 %v16391_v0  ;;  %12490 = vmatprep.mubr.msk.bf16.mxu0 %vm14199_vm6, %v12489_v30  ;;  %v3556_v52 = vpack.c.bf16 %v3530_v20, %v14398_v45  ;;  %v12272_v16 = vld [vmem:[#allocation9 + $0x160] sm:$0xff]   ;;  %v12273_v9 = vld [vmem:[#allocation9 + $0x168] sm:$0xff]   ;;  %v12278_v17 = vld [vmem:[#allocation9 + $0x190] sm:$0xff]  }
 0x492   : > { %5375 = vmatprep.mubr.bf16.mxu1 %v3651_v57  ;;  %v12274_v55 = vld [vmem:[#allocation9 + $0x170] sm:$0xff]   ;;  %v3775_v30 = vld [vmem:[#allocation2 + $0x21] sm:$0xff] }
 0x493   : > { %v3182_v59 = vmax.f32 %v3124_v27, 0.0  ;;  %v3127_v15 = vadd.f32 %v11152_v28, %v14230_v25  ;;  %5376 = vmatmul.mubr.bf16.gmra.mrb[64].mxu1 %v3555_v39 }
 0x494   : > { %5425 = vmatpush1.bf16.msra.mxu1 %v12268_v29  ;;  %v12284_v29 = vld [vmem:[#allocation9 + $0x208] sm:$0xff]  }
 0x495   : > { %v3243_v21 = vsel %vm3195_vm3, %v3182_v59, 0.0  ;;  %v3183_v47 = vmax.f32 %v3127_v15, 0.0  ;;  %5426 = vmatprep.subr.bf16.mxu1 %v16391_v0  ;;  %v3340_v51 = vld [vmem:[#allocation2 + $0x16f] sm:$0xff]  ;;  %v12492_v43 = vpack.c.bf16 %v3182_v59, %v3181_v49  ;;  %v3823_v59 = vpack.c.bf16 %v3776_v38, %v3775_v30  ;;  %v3489_v15 = vld [vmem:[#allocation2 + $0x19] sm:$0xff] }
 0x496   : > { %3291 = vst [vmem:[#allocation2 + $0x180] sm:$0xff] %v3243_v21  ;;  %v2906_v11 = vpop.f32.mrb[92].mxu0  ;;  %v3365_v58 = vpack.c.bf16 %v3340_v51, %v3624_v22  ;;  %v3626_v19 = vld [vmem:[#allocation2 + $0x177] sm:$0xff]  ;;  %v14407_v41 = vld [vmem:[#allocation2 + $0x169] sm:$0xff] }
 0x497   : > { %v3244_v63 = vsel %vm3190_vm0, %v3183_v47, 0.0  ;;  %v11153_v44 = vadd.f32 %v12375_v42, %v2906_v11  ;;  %v2908_v25 = vpop.f32.mrb[93].mxu0  ;;  %v3652_v33 = vpack.c.bf16 %v3626_v19, %v3340_v51  ;;  %v14409_v50 = vld [vmem:[#allocation2 + $0x171] sm:$0xff]  ;;  %v3588_v47 = vld [vmem:[#allocation2 + $0x47] sm:$0xff]  ;;  %v3536_v51 = vpack.c.bf16 %v3775_v30, %v3489_v15  ;;  %v3587_v11 = vld [vmem:[#allocation2 + $0x3f] sm:$0xff] }
 0x498   : > { %3292 = vst [vmem:[#allocation2 + $0x188] sm:$0xff] %v3244_v63  ;;  %v2909_v37 = vpop.f32.mrb[94].mxu0  ;;  %5427 = vmatpush1.bf16.msra.mxu1 %v12269_v12  ;;  %5167 = vmatmul.mubr.bf16.gmra.mrb[184].mxu0 %v3365_v58  ;;  %v3557_v10 = vpack.c.bf16 %v14409_v50, %v14407_v41  ;;  %v3488_v49 = vld [vmem:[#allocation2 + $0x11] sm:$0xff]  ;;  %v3679_v58 = vld [vmem:[#allocation2 + $0x20] sm:$0xff]  ;;  %v3633_v20 = vpack.c.bf16 %v3588_v47, %v3587_v11 }
 0x499   : > { %v3132_v13 = vadd.f32 %v11153_v44, %v14221_v4  ;;  %v11154_v60 = vadd.f32 %v12375_v42, %v2909_v37  ;;  %v2911_v53 = vpop.f32.mrb[95].mxu0  ;;  %5383 = vmatprep.mubr.bf16.mxu1 %v3652_v33  ;;  %5428 = vmatprep.subr.bf16.mxu1 %v16391_v0  ;;  %v3535_v24 = vpack.c.bf16 %v3488_v49, %v3487_v48  ;;  %v3585_v42 = vld [vmem:[#allocation2 + $0x2f] sm:$0xff]  ;;  %v12275_v21 = vld [vmem:[#allocation9 + $0x178] sm:$0xff]   ;;  %v3596_v11 = vld [vmem:[#allocation2 + $0x87] sm:$0xff] }
 0x49a   : > { %12493 = vmatprep.mubr.msk.bf16.mxu0 %vm14151_vm4, %v12492_v43  ;;  %v3632_v22 = vpack.c.bf16 %v3586_v61, %v3585_v42  ;;  %v12286_v12 = vld [vmem:[#allocation9 + $0x210] sm:$0xff]   ;;  %v3778_v63 = vld [vmem:[#allocation2 + $0x39] sm:$0xff]  ;;  %v12277_v53 = vld [vmem:[#allocation9 + $0x188] sm:$0xff]  }
 0x49b   : > { %v3184_v3 = vmax.f32 %v3132_v13, 0.0  ;;  %v3135_v46 = vadd.f32 %v11154_v60, %v14228_v7  ;;  %5384 = vmatmul.mubr.bf16.gmra.mrb[68].mxu1 %v3556_v52  ;;  %v12288_v44 = vld [vmem:[#allocation9 + $0x218] sm:$0xff]   ;;  %v3589_v13 = vld [vmem:[#allocation2 + $0x4f] sm:$0xff]  ;;  %v12280_v61 = vld [vmem:[#allocation9 + $0x1a0] sm:$0xff]  }
 0x49c   : > { %5429 = vmatpush1.bf16.msra.mxu1 %v12270_v36  ;;  %v3777_v33 = vld [vmem:[#allocation2 + $0x31] sm:$0xff]  ;;  %v12289_v36 = vld [vmem:[#allocation9 + $0x220] sm:$0xff]  }
 0x49d   : > { %3293 = vst [vmem:[#allocation2 + $0x190] sm:$0xff] %v3184_v3  ;;  %v3185_v4 = vmax.f32 %v3135_v46, 0.0  ;;  %5430 = vmatprep.subr.bf16.mxu1 %v16391_v0  ;;  %v3342_v14 = vld [vmem:[#allocation2 + $0x17f] sm:$0xff]  ;;  %v3824_v37 = vpack.c.bf16 %v3778_v63, %v3777_v33  ;;  %v3590_v60 = vld [vmem:[#allocation2 + $0x57] sm:$0xff]  ;;  %v3537_v52 = vpack.c.bf16 %v3777_v33, %v3776_v38  ;;  %v3780_v46 = vld [vmem:[#allocation2 + $0x49] sm:$0xff] }
 0x49e   : > { %v3366_v56 = vpack.c.bf16 %v3342_v14, %v3626_v19  ;;  %v14419_v28 = vld [vmem:[#allocation2 + $0x179] sm:$0xff]  ;;  %v3680_v19 = vld [vmem:[#allocation2 + $0x28] sm:$0xff]  ;;  %v3634_v3 = vpack.c.bf16 %v3590_v60, %v3589_v13  ;;  %v3781_v38 = vld [vmem:[#allocation2 + $0x51] sm:$0xff] }
 0x49f   : > { %v3246_v1 = vsel %vm3195_vm3, %v3185_v4, 0.0  ;;  %v3628_v7 = vld [vmem:[#allocation2 + $0x187] sm:$0xff]  ;;  %v3727_v25 = vpack.c.bf16 %v3680_v19, %v3679_v58  ;;  %v14428_v43 = vld [vmem:[#allocation2 + $0x38] sm:$0xff]  ;;  %v12283_v15 = vld [vmem:[#allocation9 + $0x1b0] sm:$0xff]  }
 0x4a0   : > { %3294 = vst [vmem:[#allocation2 + $0x198] sm:$0xff] %v3246_v1  ;;  %5431 = vmatpush1.bf16.msra.mxu1 %v12271_v23  ;;  %5175 = vmatmul.mubr.bf16.gmra.mrb[188].mxu0 %v3366_v56  ;;  %v3653_v35 = vpack.c.bf16 %v3628_v7, %v3342_v14  ;;  %v14417_v34 = vld [vmem:[#allocation2 + $0x181] sm:$0xff]  ;;  %v3728_v4 = vpack.c.bf16 %v14428_v43, %v3681_v26  ;;  %v12292_v1 = vld [vmem:[#allocation9 + $0x230] sm:$0xff]   ;;  %v12279_v7 = vld [vmem:[#allocation9 + $0x198] sm:$0xff]  }
 0x4a1   : > { %5215 = vmatprep.mubr.bf16.mxu0 %v3631_v32  ;;  %5432 = vmatprep.subr.bf16.mxu1 %v16391_v0  ;;  %v3558_v39 = vpack.c.bf16 %v14417_v34, %v14419_v28  ;;  %v12290_v23 = vld [vmem:[#allocation9 + $0x228] sm:$0xff]   ;;  %v3782_v49 = vld [vmem:[#allocation2 + $0x59] sm:$0xff]  ;;  %v14468_v26 = vld [vmem:[#allocation2 + $0x70] sm:$0xff] }
 0x4a2   : > { %5391 = vmatprep.mubr.bf16.mxu1 %v3653_v35  ;;  %v3779_v14 = vld [vmem:[#allocation2 + $0x41] sm:$0xff]  ;;  %v12285_v58 = vld [vmem:[#allocation9 + $0x1b8] sm:$0xff]  }
 0x4a3   : > { %5392 = vmatmul.mubr.bf16.gmra.mrb[72].mxu1 %v3557_v10  ;;  %v3825_v56 = vpack.c.bf16 %v3780_v46, %v3779_v14  ;;  %v3592_v32 = vld [vmem:[#allocation2 + $0x67] sm:$0xff]  ;;  %v14433_v35 = vpack.c.bf16 %v3779_v14, %v3778_v63  ;;  %v3598_v13 = vld [vmem:[#allocation2 + $0x97] sm:$0xff] }
 0x4a4   : > { %5433 = vmatpush1.bf16.msra.mxu1 %v12272_v16  ;;  %v3629_v54 = vld [vmem:[#allocation2 + $0x18f] sm:$0xff]  ;;  %v3591_v16 = vld [vmem:[#allocation2 + $0x5f] sm:$0xff] }
 0x4a5   : > { %5434 = vmatprep.subr.bf16.mxu1 %v16391_v0  ;;  %v14435_v10 = vld [vmem:[#allocation2 + $0x48] sm:$0xff]  ;;  %v3635_v48 = vpack.c.bf16 %v3592_v32, %v3591_v16  ;;  %v12295_v32 = vld [vmem:[#allocation9 + $0x1d8] sm:$0xff]  }
 0x4a6   : > { %v12291_v60 = vld [vmem:[#allocation9 + $0x1c8] sm:$0xff]   ;;  %v3599_v16 = vld [vmem:[#allocation2 + $0x9f] sm:$0xff] }
 0x4a7   : > { %v3630_v57 = vld [vmem:[#allocation2 + $0x197] sm:$0xff]  ;;  %v3787_v14 = vld [vmem:[#allocation2 + $0x81] sm:$0xff] }
 0x4a8   : > { %5435 = vmatpush1.bf16.msra.mxu1 %v12273_v9  ;;  %5216 = vmatmul.mubr.bf16.vlgmr.msra.gmra.mrb[96].mxu0 %v3535_v24  ;;  %v3654_v27 = vpack.c.bf16 %v3630_v57, %v3629_v54  ;;  %v12293_v9 = vld [vmem:[#allocation9 + $0x238] sm:$0xff]   ;;  %v14438_v24 = vld [vmem:[#allocation2 + $0x40] sm:$0xff]  ;;  %v12281_v57 = vld [vmem:[#allocation9 + $0x1a8] sm:$0xff]  }
 0x4a9   : > { %5223 = vmatprep.mubr.bf16.mxu0 %v3632_v22  ;;  %5436 = vmatprep.subr.bf16.mxu1 %v16391_v0  ;;  %v3729_v42 = vpack.c.bf16 %v14435_v10, %v14438_v24  ;;  %v3826_v22 = vpack.c.bf16 %v3782_v49, %v3781_v38  ;;  %v3594_v54 = vld [vmem:[#allocation2 + $0x77] sm:$0xff] }
 0x4aa   : > { %5399 = vmatprep.mubr.bf16.mxu1 %v3654_v27  ;;  %10948 = vmatpush3.bf16.msra.mxu0 %v14343_v5  ;;  %v12276_v5 = vld [vmem:[#allocation9 + $0x180] sm:$0xff]   ;;  %v3593_v27 = vld [vmem:[#allocation2 + $0x6f] sm:$0xff] }
 0x4ab   : > { %5400 = vmatmul.mubr.bf16.gmra.mrb[76].mxu1 %v3558_v39  ;;  %10949 = vmatprep.subr.bf16.mxu0 %v12284_v29  ;;  %v3686_v39 = vld [vmem:[#allocation2 + $0x58] sm:$0xff]  ;;  %v3636_v30 = vpack.c.bf16 %v3594_v54, %v3593_v27 }
 0x4ac   : > { %5437 = vmatpush1.bf16.msra.mxu1 %v12274_v55  ;;  %5440 = vmatprep.mubr.bf16.mxu1 %v3823_v59  ;;  %v14446_v55 = vld [vmem:[#allocation2 + $0x50] sm:$0xff] }
 0x4ad   : > { %5438 = vmatprep.subr.bf16.mxu1 %v16391_v0  ;;  %v3784_v59 = vld [vmem:[#allocation2 + $0x69] sm:$0xff]  ;;  %v3602_v27 = vld [vmem:[#allocation2 + $0xb7] sm:$0xff] }
 0x4ae   : > { %10950 = vmatpush3.bf16.msra.mxu0 %v12284_v29  ;;  %v14444_v29 = vpack.c.bf16 %v3781_v38, %v3780_v46 }
 0x4af   : > { %10951 = vmatprep.subr.bf16.mxu0 %v12286_v12 }
 0x4b0   : > { %5439 = vmatpush1.bf16.msra.mxu1 %v12275_v21  ;;  %5224 = vmatmul.mubr.bf16.gmra.mrb[100].mxu0 %v3536_v51  ;;  %v3783_v21 = vld [vmem:[#allocation2 + $0x61] sm:$0xff] }
 0x4b1   : > { %5231 = vmatprep.mubr.bf16.mxu0 %v3633_v20  ;;  %5633 = vmatprep.subr.bf16.mxu1 %v16391_v0  ;;  %v3827_v47 = vpack.c.bf16 %v3784_v59, %v3783_v21  ;;  %v3595_v51 = vld [vmem:[#allocation2 + $0x7f] sm:$0xff]  ;;  %v14452_v19 = vpack.c.bf16 %v3783_v21, %v3782_v49  ;;  %v14454_v20 = vld [vmem:[#allocation2 + $0x68] sm:$0xff]  ;;  %v14490_v21 = vld [vmem:[#allocation2 + $0x90] sm:$0xff] }
 0x4b2   : > { %10952 = vmatpush3.bf16.msra.mxu0 %v12286_v12  ;;  %v3730_v12 = vpack.c.bf16 %v3686_v39, %v14446_v55  ;;  %v3637_v63 = vpack.c.bf16 %v3596_v11, %v3595_v51  ;;  %v14478_v49 = vld [vmem:[#allocation2 + $0x88] sm:$0xff] }
 0x4b3   : > { %5441 = vmatmul.mubr.bf16.vlgmr.msra.gmra.mrb[80].mxu1 %v3727_v25  ;;  %10953 = vmatprep.subr.bf16.mxu0 %v12288_v44  ;;  %v12287_v25 = vld [vmem:[#allocation9 + $0x1c0] sm:$0xff]   ;;  %v12297_v39 = vld [vmem:[#allocation9 + $0x1e8] sm:$0xff]  }
 0x4b4   : > { %5448 = vmatprep.mubr.bf16.mxu1 %v3824_v37  ;;  %5634 = vmatpush1.bf16.msra.mxu1 %v12276_v5  ;;  %v14457_v5 = vld [vmem:[#allocation2 + $0x60] sm:$0xff]  ;;  %v3785_v37 = vld [vmem:[#allocation2 + $0x71] sm:$0xff] }
 0x4b5   : > { %5635 = vmatprep.subr.bf16.mxu1 %v16391_v0  ;;  %v3731_v33 = vpack.c.bf16 %v14454_v20, %v14457_v5  ;;  %v3791_v11 = vld [vmem:[#allocation2 + $0xa1] sm:$0xff] }
 0x4b6   : > { %10954 = vmatpush3.bf16.msra.mxu0 %v12288_v44  ;;  %v3786_v44 = vld [vmem:[#allocation2 + $0x79] sm:$0xff] }
 0x4b7   : > { %10955 = vmatprep.subr.bf16.mxu0 %v12289_v36 }
 0x4b8   : > { %5232 = vmatmul.mubr.bf16.gmra.mrb[104].mxu0 %v3537_v52  ;;  %5636 = vmatpush1.bf16.msra.mxu1 %v12277_v53  ;;  %v14463_v53 = vpack.c.bf16 %v3785_v37, %v3784_v59  ;;  %v3597_v52 = vld [vmem:[#allocation2 + $0x8f] sm:$0xff]  ;;  %v14487_v59 = vld [vmem:[#allocation2 + $0x98] sm:$0xff] }
 0x4b9   : > { %5239 = vmatprep.mubr.bf16.mxu0 %v3634_v3  ;;  %5637 = vmatprep.subr.bf16.mxu1 %v16391_v0  ;;  %v14465_v3 = vld [vmem:[#allocation2 + $0x78] sm:$0xff]  ;;  %v3638_v46 = vpack.c.bf16 %v3598_v13, %v3597_v52  ;;  %v3734_v51 = vpack.c.bf16 %v14487_v59, %v14490_v21 }
 0x4ba   : > { %10956 = vmatpush3.bf16.msra.mxu0 %v12289_v36  ;;  %v3828_v36 = vpack.c.bf16 %v3786_v44, %v3785_v37  ;;  %v14498_v37 = vld [vmem:[#allocation2 + $0xa8] sm:$0xff]  ;;  %v3794_v13 = vld [vmem:[#allocation2 + $0xb9] sm:$0xff] }
 0x4bb   : > { %5449 = vmatmul.mubr.bf16.gmra.mrb[84].mxu1 %v3728_v4  ;;  %10957 = vmatprep.subr.bf16.mxu0 %v12290_v23  ;;  %v3732_v4 = vpack.c.bf16 %v14465_v3, %v14468_v26 }
 0x4bc   : > { %5456 = vmatprep.mubr.bf16.mxu1 %v3825_v56  ;;  %5638 = vmatpush1.bf16.msra.mxu1 %v12278_v17  ;;  %v12294_v17 = vld [vmem:[#allocation9 + $0x1d0] sm:$0xff]  }
 0x4bd   : > { %5639 = vmatprep.subr.bf16.mxu1 %v16391_v0 }
 0x4be   : > { %10958 = vmatpush3.bf16.msra.mxu0 %v12290_v23  ;;  %v3788_v23 = vld [vmem:[#allocation2 + $0x89] sm:$0xff] }
 0x4bf   : > { %10959 = vmatprep.subr.bf16.mxu0 %v12292_v1  ;;  %v3829_v56 = vpack.c.bf16 %v3788_v23, %v3787_v14 }
 0x4c0   : > { %5240 = vmatmul.mubr.bf16.gmra.mrb[108].mxu0 %v14433_v35  ;;  %5640 = vmatpush1.bf16.msra.mxu1 %v12279_v7  ;;  %v14474_v7 = vpack.c.bf16 %v3787_v14, %v3786_v44  ;;  %v12299_v44 = vld [vmem:[#allocation9 + $0x1f8] sm:$0xff]   ;;  %v3605_v14 = vld [vmem:[#allocation2 + $0xcf] sm:$0xff] }
 0x4c1   : > { %5247 = vmatprep.mubr.bf16.mxu0 %v3635_v48  ;;  %5641 = vmatprep.subr.bf16.mxu1 %v16391_v0  ;;  %v14476_v48 = vld [vmem:[#allocation2 + $0x80] sm:$0xff] }
 0x4c2   : > { %10960 = vmatpush3.bf16.msra.mxu0 %v12292_v1  ;;  %v3600_v1 = vld [vmem:[#allocation2 + $0xa7] sm:$0xff]  ;;  %v3733_v38 = vpack.c.bf16 %v14478_v49, %v14476_v48 }
 0x4c3   : > { %5457 = vmatmul.mubr.bf16.gmra.mrb[88].mxu1 %v3729_v42  ;;  %10961 = vmatprep.subr.bf16.mxu0 %v12293_v9  ;;  %v12296_v42 = vld [vmem:[#allocation9 + $0x1e0] sm:$0xff]  }
 0x4c4   : > { %5464 = vmatprep.mubr.bf16.mxu1 %v3826_v22  ;;  %5642 = vmatpush1.bf16.msra.mxu1 %v12280_v61  ;;  %v3790_v61 = vld [vmem:[#allocation2 + $0x99] sm:$0xff]  ;;  %v3789_v22 = vld [vmem:[#allocation2 + $0x91] sm:$0xff] }
 0x4c5   : > { %5643 = vmatprep.subr.bf16.mxu1 %v16391_v0  ;;  %v3830_v54 = vpack.c.bf16 %v3790_v61, %v3789_v22 }
 0x4c6   : > { %10962 = vmatpush3.bf16.msra.mxu0 %v12293_v9  ;;  %v3639_v9 = vpack.c.bf16 %v3600_v1, %v3599_v16  ;;  %v14510_v1 = vld [vmem:[#allocation2 + $0xb8] sm:$0xff]  ;;  %v3796_v16 = vld [vmem:[#allocation2 + $0xc9] sm:$0xff] }
 0x4c8   : > { %5248 = vmatmul.mubr.bf16.gmra.mrb[112].mxu0 %v14444_v29  ;;  %5644 = vmatpush1.bf16.msra.mxu1 %v12281_v57  ;;  %v3601_v57 = vld [vmem:[#allocation2 + $0xaf] sm:$0xff] }
 0x4c9   : > { %5255 = vmatprep.mubr.bf16.mxu0 %v3636_v30  ;;  %5645 = vmatprep.subr.bf16.mxu1 %v16391_v0  ;;  %v14485_v30 = vpack.c.bf16 %v3789_v22, %v3788_v23  ;;  %v3608_v22 = vld [vmem:[#allocation2 + $0xe7] sm:$0xff] }
 0x4cb   : > { %5465 = vmatmul.mubr.bf16.gmra.mrb[92].mxu1 %v3730_v12  ;;  %v3792_v12 = vld [vmem:[#allocation2 + $0xa9] sm:$0xff] }
 0x4cc   : > { %5472 = vmatprep.mubr.bf16.mxu1 %v3827_v47  ;;  %5646 = vmatpush1.bf16.msra.mxu1 %v12283_v15  ;;  %v3640_v15 = vpack.c.bf16 %v3602_v27, %v3601_v57  ;;  %v12298_v47 = vld [vmem:[#allocation9 + $0x1f0] sm:$0xff]   ;;  %v14517_v57 = vld [vmem:[#allocation2 + $0xc8] sm:$0xff] }
 0x4cd   : > { %5647 = vmatprep.subr.bf16.mxu1 %v16391_v0 }
 0x4d0   : > { %5256 = vmatmul.mubr.bf16.gmra.mrb[116].mxu0 %v14452_v19  ;;  %5648 = vmatpush1.bf16.msra.mxu1 %v12285_v58  ;;  %v3831_v58 = vpack.c.bf16 %v3792_v12, %v3791_v11 }
 0x4d1   : > { %5263 = vmatprep.mubr.bf16.mxu0 %v3637_v63  ;;  %5649 = vmatprep.subr.bf16.mxu1 %v16391_v0  ;;  %v3604_v63 = vld [vmem:[#allocation2 + $0xc7] sm:$0xff] }
 0x4d3   : > { %5473 = vmatmul.mubr.bf16.gmra.mrb[96].mxu1 %v3731_v33  ;;  %v3603_v33 = vld [vmem:[#allocation2 + $0xbf] sm:$0xff] }
 0x4d4   : > { %5480 = vmatprep.mubr.bf16.mxu1 %v3828_v36  ;;  %5650 = vmatpush1.bf16.msra.mxu1 %v12287_v25  ;;  %v14496_v25 = vpack.c.bf16 %v3791_v11, %v3790_v61  ;;  %v3641_v36 = vpack.c.bf16 %v3604_v63, %v3603_v33  ;;  %v3795_v61 = vld [vmem:[#allocation2 + $0xc1] sm:$0xff]  ;;  %v3610_v11 = vld [vmem:[#allocation2 + $0xf7] sm:$0xff]  ;;  %v3609_v63 = vld [vmem:[#allocation2 + $0xef] sm:$0xff] }
 0x4d5   : > { %5651 = vmatprep.subr.bf16.mxu1 %v16391_v0  ;;  %v3644_v33 = vpack.c.bf16 %v3610_v11, %v3609_v63  ;;  %v14555_v63 = vld [vmem:[#allocation2 + $0x109] sm:$0xff] }
 0x4d8   : > { %5264 = vmatmul.mubr.bf16.gmra.mrb[120].mxu0 %v14463_v53  ;;  %5652 = vmatpush1.bf16.msra.mxu1 %v12291_v60  ;;  %v14501_v60 = vld [vmem:[#allocation2 + $0xa0] sm:$0xff] }
 0x4d9   : > { %5271 = vmatprep.mubr.bf16.mxu0 %v3638_v46  ;;  %5653 = vmatprep.subr.bf16.mxu1 %v16391_v0  ;;  %v3735_v52 = vpack.c.bf16 %v14498_v37, %v14501_v60  ;;  %v3793_v46 = vld [vmem:[#allocation2 + $0xb1] sm:$0xff] }
 0x4da   : > { %v3832_v23 = vpack.c.bf16 %v3794_v13, %v3793_v46 }
 0x4db   : > { %5481 = vmatmul.mubr.bf16.gmra.mrb[100].mxu1 %v3732_v4  ;;  %v14506_v4 = vpack.c.bf16 %v3793_v46, %v3792_v12  ;;  %v3799_v46 = vld [vmem:[#allocation2 + $0xe1] sm:$0xff] }
 0x4dc   : > { %5488 = vmatprep.mubr.bf16.mxu1 %v3829_v56  ;;  %5654 = vmatpush1.bf16.msra.mxu1 %v12294_v17  ;;  %v3606_v17 = vld [vmem:[#allocation2 + $0xd7] sm:$0xff] }
 0x4dd   : > { %5655 = vmatprep.subr.bf16.mxu1 %v16391_v0  ;;  %v14508_v56 = vld [vmem:[#allocation2 + $0xb0] sm:$0xff] }
 0x4e0   : > { %5272 = vmatmul.mubr.bf16.gmra.mrb[124].mxu0 %v14474_v7  ;;  %5656 = vmatpush1.bf16.msra.mxu1 %v12295_v32  ;;  %v3642_v32 = vpack.c.bf16 %v3606_v17, %v3605_v14  ;;  %v3612_v17 = vld [vmem:[#allocation2 + $0x107] sm:$0xff] }
 0x4e1   : > { %5279 = vmatprep.mubr.bf16.mxu0 %v3639_v9  ;;  %5657 = vmatprep.subr.bf16.mxu1 %v16391_v0  ;;  %v3736_v9 = vpack.c.bf16 %v14510_v1, %v14508_v56 }
 0x4e3   : > { %5489 = vmatmul.mubr.bf16.gmra.mrb[104].mxu1 %v3733_v38  ;;  %v3607_v38 = vld [vmem:[#allocation2 + $0xdf] sm:$0xff] }
 0x4e4   : > { %5496 = vmatprep.mubr.bf16.mxu1 %v3830_v54  ;;  %5658 = vmatpush1.bf16.msra.mxu1 %v12296_v42  ;;  %v3833_v42 = vpack.c.bf16 %v3796_v16, %v3795_v61  ;;  %v14515_v54 = vpack.c.bf16 %v3795_v61, %v3794_v13  ;;  %v3643_v27 = vpack.c.bf16 %v3608_v22, %v3607_v38  ;;  %v14529_v13 = vld [vmem:[#allocation2 + $0xd0] sm:$0xff] }
 0x4e5   : > { %5659 = vmatprep.subr.bf16.mxu1 %v16391_v0  ;;  %v3801_v22 = vld [vmem:[#allocation2 + $0xf1] sm:$0xff] }
 0x4e8   : > { %5280 = vmatmul.mubr.bf16.gmra.mrb[128].mxu0 %v14485_v30  ;;  %5660 = vmatpush1.bf16.msra.mxu1 %v12297_v39  ;;  %v3798_v39 = vld [vmem:[#allocation2 + $0xd9] sm:$0xff] }
 0x4e9   : > { %5287 = vmatprep.mubr.bf16.mxu0 %v3640_v15  ;;  %5661 = vmatprep.subr.bf16.mxu1 %v16391_v0  ;;  %v14520_v15 = vld [vmem:[#allocation2 + $0xc0] sm:$0xff]  ;;  %v14533_v14 = vpack.c.bf16 %v3799_v46, %v3798_v39 }
 0x4ea   : > { %v3737_v12 = vpack.c.bf16 %v14517_v57, %v14520_v15 }
 0x4eb   : > { %5497 = vmatmul.mubr.bf16.gmra.mrb[108].mxu1 %v3734_v51 }
 0x4ec   : > { %5504 = vmatprep.mubr.bf16.mxu1 %v3831_v58  ;;  %5662 = vmatpush1.bf16.msra.mxu1 %v12298_v47  ;;  %v3797_v47 = vld [vmem:[#allocation2 + $0xd1] sm:$0xff] }
 0x4ed   : > { %5663 = vmatprep.subr.bf16.mxu1 %v16391_v0  ;;  %v3834_v51 = vpack.c.bf16 %v3798_v39, %v3797_v47  ;;  %v14524_v58 = vpack.c.bf16 %v3797_v47, %v3796_v16  ;;  %v14537_v16 = vld [vmem:[#allocation2 + $0xe0] sm:$0xff]  ;;  %v14545_v39 = vld [vmem:[#allocation2 + $0x10f] sm:$0xff] }
 0x4f0   : > { %5288 = vmatmul.mubr.bf16.gmra.mrb[132].mxu0 %v14496_v25  ;;  %5664 = vmatpush1.bf16.msra.mxu1 %v12299_v44  ;;  %v14526_v44 = vld [vmem:[#allocation2 + $0xd8] sm:$0xff] }
 0x4f1   : > { %5295 = vmatprep.mubr.bf16.mxu0 %v3641_v36  ;;  %7890 = vmatprep.subr.bf16.mxu1 %v16391_v0  ;;  %v3800_v36 = vld [vmem:[#allocation2 + $0xe9] sm:$0xff] }
 0x4f2   : > { %v14549_v47 = vpack.c.bf16 %v3801_v22, %v3800_v36 }
 0x4f3   : > { %5505 = vmatmul.mubr.bf16.gmra.mrb[112].mxu1 %v3735_v52  ;;  %v3738_v52 = vpack.c.bf16 %v14526_v44, %v14529_v13 }
 0x4f4   : > { %5512 = vmatprep.mubr.bf16.mxu1 %v3832_v23  ;;  %v3835_v23 = vpack.c.bf16 %v3800_v36, %v3799_v46  ;;  %v3803_v46 = vld [vmem:[#allocation2 + $0x101] sm:$0xff] }
 0x4f8   : > { %5296 = vmatmul.mubr.bf16.gmra.mrb[136].mxu0 %v14506_v4 }
 0x4f9   : > { %5303 = vmatprep.mubr.bf16.mxu0 %v3642_v32  ;;  %v14535_v32 = vld [vmem:[#allocation2 + $0xff] sm:$0xff] }
 0x4fa   : > { %v3645_v61 = vpack.c.bf16 %v3612_v17, %v14535_v32  ;;  %v14565_v17 = vld [vmem:[#allocation2 + $0x108] sm:$0xff] }
 0x4fb   : > { %5513 = vmatmul.mubr.bf16.gmra.mrb[116].mxu1 %v3736_v9  ;;  %v14539_v9 = vld [vmem:[#allocation2 + $0xe8] sm:$0xff] }
 0x4fc   : > { %5520 = vmatprep.mubr.bf16.mxu1 %v3833_v42  ;;  %v3802_v42 = vld [vmem:[#allocation2 + $0xf9] sm:$0xff]  ;;  %v3739_v38 = vpack.c.bf16 %v14539_v9, %v14537_v16 }
 0x4fd   : > { %v14563_v36 = vpack.c.bf16 %v3803_v46, %v3802_v42 }
 0x500   : > { %5304 = vmatmul.mubr.bf16.gmra.mrb[140].mxu0 %v14515_v54 }
 0x501   : > { %5311 = vmatprep.mubr.bf16.mxu0 %v3643_v27  ;;  %v3836_v27 = vpack.c.bf16 %v3802_v42, %v3801_v22  ;;  %v14579_v42 = vld [vmem:[#allocation2 + $0x110] sm:$0xff] }
 0x503   : > { %5521 = vmatmul.mubr.bf16.gmra.mrb[120].mxu1 %v3737_v12  ;;  %v14547_v12 = vld [vmem:[#allocation2 + $0x117] sm:$0xff] }
 0x504   : > { %5528 = vmatprep.mubr.bf16.mxu1 %v3834_v51  ;;  %v14551_v51 = vld [vmem:[#allocation2 + $0xf8] sm:$0xff]  ;;  %v3646_v11 = vpack.c.bf16 %v14547_v12, %v14545_v39 }
 0x508   : > { %5312 = vmatmul.mubr.bf16.gmra.mrb[144].mxu0 %v14524_v58 }
 0x509   : > { %5319 = vmatprep.mubr.bf16.mxu0 %v3644_v33  ;;  %v14558_v33 = vld [vmem:[#allocation2 + $0xf0] sm:$0xff] }
 0x50b   : > { %5529 = vmatmul.mubr.bf16.gmra.mrb[124].mxu1 %v3738_v52  ;;  %v3740_v52 = vpack.c.bf16 %v14551_v51, %v14558_v33 }
 0x50c   : > { %5536 = vmatprep.mubr.bf16.mxu1 %v3835_v23  ;;  %v3837_v23 = vpack.c.bf16 %v14555_v63, %v3803_v46  ;;  %v14583_v46 = vld [vmem:[#allocation2 + $0x129] sm:$0xff] }
 0x510   : > { %5320 = vmatmul.mubr.bf16.gmra.mrb[148].mxu0 %v14533_v14 }
 0x511   : > { %5327 = vmatprep.mubr.bf16.mxu0 %v3645_v61  ;;  %v14567_v61 = vld [vmem:[#allocation2 + $0x119] sm:$0xff] }
 0x513   : > { %5537 = vmatmul.mubr.bf16.gmra.mrb[128].mxu1 %v3739_v38  ;;  %v14570_v38 = vld [vmem:[#allocation2 + $0x100] sm:$0xff] }
 0x514   : > { %5544 = vmatprep.mubr.bf16.mxu1 %v3836_v27  ;;  %v3741_v22 = vpack.c.bf16 %v14565_v17, %v14570_v38  ;;  %v14575_v27 = vld [vmem:[#allocation2 + $0x111] sm:$0xff] }
 0x518   : > { %5328 = vmatmul.mubr.bf16.gmra.mrb[152].mxu0 %v14549_v47 }
 0x519   : > { %5335 = vmatprep.mubr.bf16.mxu0 %v3646_v11  ;;  %v3838_v11 = vpack.c.bf16 %v14567_v61, %v14575_v27 }
 0x51b   : > { %5545 = vmatmul.mubr.bf16.gmra.mrb[132].mxu1 %v3740_v52  ;;  %v14581_v52 = vld [vmem:[#allocation2 + $0x118] sm:$0xff] }
 0x51c   : > { %5552 = vmatprep.mubr.bf16.mxu1 %v3837_v23  ;;  %v14589_v23 = vld [vmem:[#allocation2 + $0x121] sm:$0xff] }
 0x51d   : > { %v3839_v0 = vpack.c.bf16 %v14583_v46, %v14589_v23 }
 0x520   : > { %5336 = vmatmul.mubr.bf16.gmra.mrb[156].mxu0 %v14563_v36 }
 0x521   : > { %10963 = vmatprep.mubr.bf16.mxu0 %v14433_v35  ;;  %v3742_v35 = vpack.c.bf16 %v14581_v52, %v14579_v42 }
 0x523   : > { %5553 = vmatmul.mubr.bf16.gmra.mrb[136].mxu1 %v3741_v22  ;;  %v14593_v22 = vld [vmem:[#allocation2 + $0x128] sm:$0xff] }
 0x524   : > { %5560 = vmatprep.mubr.bf16.mxu1 %v3838_v11  ;;  %v14595_v11 = vld [vmem:[#allocation2 + $0x139] sm:$0xff] }
 0x528   : > { %10964 = vmatmul.mubr.bf16.vlgmr.msra.gmra.mrb[192].mxu0 %v14444_v29  ;;  %v3743_v29 = vpack.c.bf16 %v14593_v22, %v14598_v31 }
 0x529   : > { %10967 = vmatprep.mubr.bf16.mxu0 %v14452_v19  ;;  %v14603_v19 = vld [vmem:[#allocation2 + $0x131] sm:$0xff] }
 0x52a   : > { %v3840_v2 = vpack.c.bf16 %v14595_v11, %v14603_v19 }
 0x52b   : > { %5561 = vmatmul.mubr.bf16.gmra.mrb[140].mxu1 %v3742_v35  ;;  %v14610_v35 = vld [vmem:[#allocation2 + $0x130] sm:$0xff] }
 0x52c   : > { %5568 = vmatprep.mubr.bf16.mxu1 %v3839_v0  ;;  %v14607_v0 = vld [vmem:[#allocation2 + $0x138] sm:$0xff] }
 0x530   : > { %10968 = vmatmul.mubr.bf16.gmra.mrb[196].mxu0 %v14463_v53  ;;  %v3744_v53 = vpack.c.bf16 %v14607_v0, %v14610_v35 }
 0x531   : > { %10971 = vmatprep.mubr.bf16.mxu0 %v14474_v7  ;;  %v14615_v7 = vld [vmem:[#allocation2 + $0x141] sm:$0xff] }
 0x532   : > { %v3841_v40 = vpack.c.bf16 %v14385_v18, %v14615_v7  ;;  %v14631_v18 = vld [vmem:[#allocation2 + $0x151] sm:$0xff] }
 0x533   : > { %5569 = vmatmul.mubr.bf16.gmra.mrb[48].mxu1 %v3743_v29 }
 0x534   : > { %5576 = vmatprep.mubr.bf16.mxu1 %v3840_v2 }
 0x538   : > { %10972 = vmatmul.mubr.bf16.gmra.mrb[200].mxu0 %v14485_v30 }
 0x539   : > { %10975 = vmatprep.mubr.bf16.mxu0 %v14496_v25  ;;  %v3745_v25 = vpack.c.bf16 %v14625_v8, %v14623_v6 }
 0x53b   : > { %5577 = vmatmul.mubr.bf16.gmra.mrb[52].mxu1 %v3744_v53  ;;  %v14619_v62 = vpop.f32.mrb[160].mxu0 }
 0x53c   : > { %16508 = vst [vmem:[#allocation24_spill] sm:$0xff] %v14619_v62  ;;  %5584 = vmatprep.mubr.bf16.mxu1 %v3841_v40  ;;  %v5122_v2 = vpop.f32.mrb[161].mxu0  ;;  %v3842_v40 = vpack.c.bf16 %v14398_v45, %v14631_v18  ;;  %v14639_v62 = vld [vmem:[#allocation2 + $0x158] sm:$0xff]  ;;  %v3815_v45 = vld [vmem:[#allocation2 + $0x161] sm:$0xff] }
 0x53d   : > { %v14621_v29 = vpop.f32.mrb[162].mxu0 }
 0x53e   : > { %16509 = vst [vmem:[#allocation25_spill] sm:$0xff] %v14621_v29  ;;  %v5125_v30 = vpop.f32.mrb[163].mxu0 }
 0x540   : > { %10976 = vmatmul.mubr.bf16.gmra.mrb[204].mxu0 %v14506_v4  ;;  %v14642_v4 = vld [vmem:[#allocation2 + $0x150] sm:$0xff] }
 0x541   : > { %10979 = vmatprep.mubr.bf16.mxu0 %v14515_v54  ;;  %v3746_v54 = vpack.c.bf16 %v14639_v62, %v14642_v4 }
 0x543   : > { %5585 = vmatmul.mubr.bf16.gmra.mrb[56].mxu1 %v3745_v25  ;;  %v14635_v53 = vpop.f32.mrb[164].mxu0  ;;  %v3843_v25 = vpack.c.bf16 %v14407_v41, %v3815_v45  ;;  %v3844_v41 = vpack.c.bf16 %v14419_v28, %v14409_v50 }
 0x544   : > { %16510 = vst [vmem:[#allocation26_spill] sm:$0xff] %v14635_v53  ;;  %5592 = vmatprep.mubr.bf16.mxu1 %v3842_v40  ;;  %v5130_v2 = vpop.f32.mrb[165].mxu0  ;;  %v14652_v53 = vld [vmem:[#allocation2 + $0x168] sm:$0xff] }
 0x545   : > { %v14637_v30 = vpop.f32.mrb[166].mxu0  ;;  %16514 = vst [vmem:[#allocation30_spill] sm:$0xff] %v14652_v53 }
 0x546   : > { %16511 = vst [vmem:[#allocation27_spill] sm:$0xff] %v14637_v30  ;;  %v5133_v29 = vpop.f32.mrb[167].mxu0 }
 0x548   : > { %10980 = vmatmul.mubr.bf16.gmra.mrb[208].mxu0 %v14524_v58  ;;  %v14655_v58 = vld [vmem:[#allocation2 + $0x160] sm:$0xff] }
 0x549   : > { %10983 = vmatprep.mubr.bf16.mxu0 %v14533_v14  ;;  %v3747_v14 = vpack.c.bf16 %v14652_v53, %v14655_v58  ;;  %v14674_v53 = vld [vmem:[#allocation2 + $0x189] sm:$0xff] }
 0x54a   : > { %v3845_v28 = vpack.c.bf16 %v14674_v53, %v14417_v34  ;;  %v14690_v34 = vld [vmem:[#allocation2 + $0x180] sm:$0xff] }
 0x54b   : > { %5593 = vmatmul.mubr.bf16.gmra.mrb[60].mxu1 %v3746_v54  ;;  %v14648_v40 = vpop.f32.mrb[168].mxu0 }
 0x54c   : > { %16512 = vst [vmem:[#allocation28_spill] sm:$0xff] %v14648_v40  ;;  %5600 = vmatprep.mubr.bf16.mxu1 %v3843_v25  ;;  %v5138_v2 = vpop.f32.mrb[169].mxu0  ;;  %v4125_v40 = vpack.c.bf16 %v14589_v23, %v14567_v61  ;;  %v4126_v61 = vpack.c.bf16 %v14603_v19, %v14583_v46  ;;  %v14686_v23 = vld [vmem:[#allocation2 + $0x188] sm:$0xff] }
 0x54d   : > { %v14650_v29 = vpop.f32.mrb[170].mxu0 }
 0x54e   : > { %16513 = vst [vmem:[#allocation29_spill] sm:$0xff] %v14650_v29  ;;  %v5141_v30 = vpop.f32.mrb[171].mxu0  ;;  %v14668_v29 = vld [vmem:[#allocation2 + $0x170] sm:$0xff] }
 0x550   : > { %10984 = vmatmul.mubr.bf16.gmra.mrb[212].mxu0 %v14549_v47  ;;  %v4124_v47 = vpack.c.bf16 %v14575_v27, %v14555_v63 }
 0x551   : > { %10987 = vmatprep.mubr.bf16.mxu0 %v14563_v36  ;;  %v14670_v36 = vld [vmem:[#allocation2 + $0x178] sm:$0xff] }
 0x552   : > { %v3748_v50 = vpack.c.bf16 %v14670_v36, %v14668_v29 }
 0x553   : > { %5601 = vmatmul.mubr.bf16.gmra.mrb[64].mxu1 %v3747_v14  ;;  %v14662_v54 = vpop.f32.mrb[172].mxu0 }
 0x554   : > { %16515 = vst [vmem:[#allocation31_spill] sm:$0xff] %v14662_v54  ;;  %5608 = vmatprep.mubr.bf16.mxu1 %v3844_v41  ;;  %v5146_v25 = vpop.f32.mrb[173].mxu0  ;;  %v12300_v54 = vld [vmem:[#allocation10] sm:$0xff]  }
 0x555   : > { %v14664_v30 = vpop.f32.mrb[174].mxu0  ;;  %v3821_v25 = vld [vmem:[#allocation2 + $0x191] sm:$0xff] }
 0x556   : > { %16516 = vst [vmem:[#allocation32_spill] sm:$0xff] %v14664_v30  ;;  %v5149_v2 = vpop.f32.mrb[175].mxu0  ;;  %v3871_v30 = vld [vmem:[#allocation2 + $0x37] sm:$0xff] }
 0x557   : > { %v3822_v2 = vld [vmem:[#allocation2 + $0x199] sm:$0xff] }
 0x558   : > { %10988 = vmatmul.mubr.bf16.gmra.mrb[216].mxu0 %v4124_v47  ;;  %v3749_v47 = vpack.c.bf16 %v14686_v23, %v14690_v34 }
 0x559   : > { %10991 = vmatprep.mubr.bf16.mxu0 %v4125_v40  ;;  %v4127_v40 = vpack.c.bf16 %v14615_v7, %v14595_v11  ;;  %v4099_v7 = vld [vmem:[#allocation2 + $0x159] sm:$0xff] }
 0x55b   : > { %5609 = vmatmul.mubr.bf16.gmra.mrb[68].mxu1 %v3748_v50  ;;  %v14680_v14 = vpop.f32.mrb[176].mxu0  ;;  %v3846_v50 = vpack.c.bf16 %v3822_v2, %v3821_v25 }
 0x55c   : > { %16517 = vst [vmem:[#allocation33_spill] sm:$0xff] %v14680_v14  ;;  %5616 = vmatprep.mubr.bf16.mxu1 %v3845_v28  ;;  %v5154_v63 = vpop.f32.mrb[177].mxu0 }
 0x55d   : > { %v14682_v27 = vpop.f32.mrb[178].mxu0  ;;  %v4097_v63 = vld [vmem:[#allocation2 + $0x149] sm:$0xff] }
 0x55e   : > { %16518 = vst [vmem:[#allocation34_spill] sm:$0xff] %v14682_v27  ;;  %v5157_v41 = vpop.f32.mrb[179].mxu0  ;;  %v4128_v11 = vpack.c.bf16 %v14631_v18, %v4097_v63  ;;  %v4129_v27 = vpack.c.bf16 %v3815_v45, %v4099_v7  ;;  %v4104_v63 = vld [vmem:[#allocation2 + $0x181] sm:$0xff]  ;;  %v4103_v7 = vld [vmem:[#allocation2 + $0x179] sm:$0xff] }
 0x55f   : > { %v4131_v14 = vpack.c.bf16 %v4104_v63, %v4103_v7  ;;  %v3873_v7 = vld [vmem:[#allocation2 + $0x47] sm:$0xff] }
 0x560   : > { %10992 = vmatmul.mubr.bf16.gmra.mrb[220].mxu0 %v4126_v61  ;;  %v14699_v61 = vld [vmem:[#allocation2 + $0x198] sm:$0xff] }
 0x561   : > { %10995 = vmatprep.mubr.bf16.mxu0 %v4127_v40  ;;  %v14701_v40 = vld [vmem:[#allocation2 + $0x190] sm:$0xff] }
 0x563   : > { %5617 = vmatmul.mubr.bf16.gmra.mrb[72].mxu1 %v3749_v47  ;;  %v14694_v28 = vpop.f32.mrb[180].mxu0  ;;  %v3750_v47 = vpack.c.bf16 %v14699_v61, %v14701_v40 }
 0x564   : > { %16519 = vst [vmem:[#allocation35_spill] sm:$0xff] %v14694_v28  ;;  %5624 = vmatprep.mubr.bf16.mxu1 %v3846_v50  ;;  %v5162_v46 = vpop.f32.mrb[181].mxu0  ;;  %v4015_v50 = vpack.c.bf16 %v14438_v24, %v14428_v43  ;;  %v4016_v24 = vpack.c.bf16 %v14446_v55, %v14435_v10  ;;  %v12302_v10 = vld [vmem:[#allocation10 + $0x10] sm:$0xff]  }
 0x565   : > { %v14696_v19 = vpop.f32.mrb[182].mxu0 }
 0x566   : > { %16520 = vst [vmem:[#allocation36_spill] sm:$0xff] %v14696_v19  ;;  %v5165_v41 = vpop.f32.mrb[183].mxu0  ;;  %v4102_v19 = vld [vmem:[#allocation2 + $0x171] sm:$0xff] }
 0x567   : > { %v4101_v41 = vld [vmem:[#allocation2 + $0x169] sm:$0xff] }
 0x568   : > { %10996 = vmatmul.mubr.bf16.gmra.mrb[224].mxu0 %v4128_v11  ;;  %v4130_v11 = vpack.c.bf16 %v4102_v19, %v4101_v41  ;;  %v16525_v41 = vmov 0  }
 0x569   : > { %10999 = vmatprep.mubr.bf16.mxu0 %v4129_v27  ;;  %v3872_v27 = vld [vmem:[#allocation2 + $0x3f] sm:$0xff] }
 0x56a   : > { %v3919_v43 = vpack.c.bf16 %v3872_v27, %v3871_v30  ;;  %v3971_v27 = vld [vmem:[#allocation2 + $0x58] sm:$0xff] }
 0x56b   : > { %5625 = vmatmul.mubr.bf16.gmra.mrb[76].mxu1 %v3750_v47  ;;  %v14707_v46 = vpop.f32.mrb[184].mxu0 }
 0x56c   : > { %16521 = vst [vmem:[#allocation37_spill] sm:$0xff] %v14707_v46  ;;  %5665 = vmatprep.mubr.bf16.mxu1 %v4015_v50  ;;  %v5170_v18 = vpop.f32.mrb[185].mxu0 }
 0x56d   : > { %v14709_v28 = vpop.f32.mrb[186].mxu0  ;;  %v4108_v18 = vld [vmem:[#allocation2 + $0x1a1] sm:$0xff] }
 0x56e   : > { %16522 = vst [vmem:[#allocation38_spill] sm:$0xff] %v14709_v28  ;;  %v5173_v45 = vpop.f32.mrb[187].mxu0  ;;  %v4133_v30 = vpack.c.bf16 %v4108_v18, %v3822_v2  ;;  %v3875_v18 = vld [vmem:[#allocation2 + $0x57] sm:$0xff] }
 0x56f   : > { %v12301_v45 = vld [vmem:[#allocation10 + $0x8] sm:$0xff]  }
 0x570   : > { %11000 = vmatmul.mubr.bf16.gmra.mrb[228].mxu0 %v4130_v11  ;;  %v4132_v11 = vpack.c.bf16 %v3821_v25, %v14674_v53  ;;  %v12303_v53 = vld [vmem:[#allocation10 + $0x18] sm:$0xff]  }
 0x571   : > { %11003 = vmatprep.mubr.bf16.mxu0 %v4131_v14  ;;  %v3874_v14 = vld [vmem:[#allocation2 + $0x4f] sm:$0xff] }
 0x572   : > { %v3920_v55 = vpack.c.bf16 %v3874_v14, %v3873_v7 }
 0x573   : > { %5666 = vmatmul.mubr.bf16.vlgmr.msra.gmra.mrb[80].mxu1 %v3919_v43  ;;  %v14713_v47 = vpop.f32.mrb[188].mxu0 }
 0x574   : > { %16523 = vst [vmem:[#allocation39_spill] sm:$0xff] %v14713_v47  ;;  %5673 = vmatprep.mubr.bf16.mxu1 %v4016_v24  ;;  %v5178_v50 = vpop.f32.mrb[189].mxu0  ;;  %7891 = vmatpush1.bf16.msra.mxu1 %v12300_v54  ;;  %v4017_v54 = vpack.c.bf16 %v14457_v5, %v3971_v27  ;;  %v4018_v5 = vpack.c.bf16 %v14468_v26, %v14454_v20  ;;  %v3877_v27 = vld [vmem:[#allocation2 + $0x67] sm:$0xff] }
 0x575   : > { %v14715_v19 = vpop.f32.mrb[190].mxu0  ;;  %7892 = vmatprep.subr.bf16.mxu1 %v16525_v41  ;;  %v3876_v50 = vld [vmem:[#allocation2 + $0x5f] sm:$0xff]  ;;  %v4019_v20 = vpack.c.bf16 %v14476_v48, %v14465_v3  ;;  %v4020_v3 = vpack.c.bf16 %v14490_v21, %v14478_v49  ;;  %v4021_v49 = vpack.c.bf16 %v14501_v60, %v14487_v59  ;;  %v4022_v60 = vpack.c.bf16 %v14508_v56, %v14498_v37 }
 0x576   : > { %16524 = vst [vmem:[#allocation40_spill] sm:$0xff] %v14715_v19  ;;  %v5181_v63 = vpop.f32.mrb[191].mxu0  ;;  %v3916_v19 = vld [vmem:[#allocation2 + $0x19f] sm:$0xff] }
 0x577   : > { %v3921_v63 = vpack.c.bf16 %v3876_v50, %v3875_v18 }
 0x578   : > { %11004 = vmatmul.mubr.bf16.gmra.mrb[232].mxu0 %v4132_v11  ;;  %7893 = vmatpush1.bf16.msra.mxu1 %v12301_v45  ;;  %v12304_v45 = vld [vmem:[#allocation10 + $0x20] sm:$0xff]  }
 0x579   : > { %11007 = vmatprep.mubr.bf16.mxu0 %v4133_v30  ;;  %7894 = vmatprep.subr.bf16.mxu1 %v16525_v41  ;;  %v12305_v30 = vld [vmem:[#allocation10 + $0x28] sm:$0xff]  }
 0x57b   : > { %5674 = vmatmul.mubr.bf16.gmra.mrb[84].mxu1 %v3920_v55  ;;  %v14721_v43 = vpop.f32.mrb[96].mxu0  ;;  %v3878_v55 = vld [vmem:[#allocation2 + $0x6f] sm:$0xff] }
 0x57c   : > { %5681 = vmatprep.mubr.bf16.mxu1 %v4017_v54  ;;  %v5219_v24 = vpop.f32.mrb[97].mxu0  ;;  %7895 = vmatpush1.bf16.msra.mxu1 %v12302_v10  ;;  %v12306_v54 = vld [vmem:[#allocation10 + $0x30] sm:$0xff]  }
 0x57d   : > { %v14723_v25 = vpop.f32.mrb[98].mxu0  ;;  %7896 = vmatprep.subr.bf16.mxu1 %v16525_v41  ;;  %v3922_v24 = vpack.c.bf16 %v3878_v55, %v3877_v27 }
 0x57e   : > { %v5222_v2 = vpop.f32.mrb[99].mxu0 }
 0x57f   : > { %v12307_v2 = vld [vmem:[#allocation10 + $0x38] sm:$0xff]  }
 0x580   : > { %7897 = vmatpush1.bf16.msra.mxu1 %v12303_v53 }
 0x581   : > { %7898 = vmatprep.subr.bf16.mxu1 %v16525_v41 }
 0x583   : > { %5682 = vmatmul.mubr.bf16.gmra.mrb[88].mxu1 %v3921_v63  ;;  %v14729_v11 = vpop.f32.mrb[100].mxu0  ;;  %v3879_v63 = vld [vmem:[#allocation2 + $0x77] sm:$0xff] }
 0x584   : > { %5689 = vmatprep.mubr.bf16.mxu1 %v4018_v5  ;;  %v5227_v14 = vpop.f32.mrb[101].mxu0  ;;  %7899 = vmatpush1.bf16.msra.mxu1 %v12304_v45  ;;  %v3880_v45 = vld [vmem:[#allocation2 + $0x7f] sm:$0xff] }
 0x585   : > { %v14731_v7 = vpop.f32.mrb[102].mxu0  ;;  %7900 = vmatprep.subr.bf16.mxu1 %v16525_v41  ;;  %v12308_v5 = vld [vmem:[#allocation10 + $0x40] sm:$0xff]   ;;  %v3923_v14 = vpack.c.bf16 %v3880_v45, %v3879_v63 }
 0x586   : > { %v5230_v10 = vpop.f32.mrb[103].mxu0 }
 0x587   : > { %v12309_v10 = vld [vmem:[#allocation10 + $0x48] sm:$0xff]  }
 0x588   : > { %7901 = vmatpush1.bf16.msra.mxu1 %v12305_v30 }
 0x589   : > { %7902 = vmatprep.subr.bf16.mxu1 %v16525_v41 }
 0x58b   : > { %5690 = vmatmul.mubr.bf16.gmra.mrb[92].mxu1 %v3922_v24  ;;  %v14737_v26 = vpop.f32.mrb[104].mxu0  ;;  %v3881_v24 = vld [vmem:[#allocation2 + $0x87] sm:$0xff] }
 0x58c   : > { %5697 = vmatprep.mubr.bf16.mxu1 %v4019_v20  ;;  %v5235_v53 = vpop.f32.mrb[105].mxu0  ;;  %7903 = vmatpush1.bf16.msra.mxu1 %v12306_v54  ;;  %v3882_v54 = vld [vmem:[#allocation2 + $0x8f] sm:$0xff] }
 0x58d   : > { %v14739_v50 = vpop.f32.mrb[106].mxu0  ;;  %7904 = vmatprep.subr.bf16.mxu1 %v16525_v41  ;;  %v12310_v20 = vld [vmem:[#allocation10 + $0x50] sm:$0xff]   ;;  %v3924_v53 = vpack.c.bf16 %v3882_v54, %v3881_v24 }
 0x58e   : > { %v5238_v18 = vpop.f32.mrb[107].mxu0 }
 0x58f   : > { %v12311_v18 = vld [vmem:[#allocation10 + $0x58] sm:$0xff]  }
 0x590   : > { %7905 = vmatpush1.bf16.msra.mxu1 %v12307_v2 }
 0x591   : > { %7906 = vmatprep.subr.bf16.mxu1 %v16525_v41 }
 0x593   : > { %5698 = vmatmul.mubr.bf16.gmra.mrb[96].mxu1 %v3923_v14  ;;  %v14745_v48 = vpop.f32.mrb[108].mxu0  ;;  %v4109_v14 = vld [vmem:[#allocation2 + $0x1a9] sm:$0xff] }
 0x594   : > { %5705 = vmatprep.mubr.bf16.mxu1 %v4020_v3  ;;  %v5243_v30 = vpop.f32.mrb[109].mxu0  ;;  %7907 = vmatpush1.bf16.msra.mxu1 %v12308_v5  ;;  %v3884_v5 = vld [vmem:[#allocation2 + $0x9f] sm:$0xff]  ;;  %v4110_v3 = vld [vmem:[#allocation2 + $0x1b1] sm:$0xff] }
 0x595   : > { %v14747_v55 = vpop.f32.mrb[110].mxu0  ;;  %7908 = vmatprep.subr.bf16.mxu1 %v16525_v41  ;;  %v4134_v30 = vpack.c.bf16 %v4110_v3, %v4109_v14  ;;  %v12313_v14 = vld [vmem:[#allocation10 + $0x68] sm:$0xff]  }
 0x596   : > { %v5246_v27 = vpop.f32.mrb[111].mxu0 }
 0x597   : > { %v12312_v27 = vld [vmem:[#allocation10 + $0x60] sm:$0xff]   ;;  %11008 = vmatmul.mubr.bf16.gmra.mrb[236].mxu0 %v4134_v30 }
 0x598   : > { %7909 = vmatpush1.bf16.msra.mxu1 %v12309_v10  ;;  %v3883_v10 = vld [vmem:[#allocation2 + $0x97] sm:$0xff]  ;;  %v3888_v30 = vld [vmem:[#allocation2 + $0xbf] sm:$0xff] }
 0x599   : > { %7910 = vmatprep.subr.bf16.mxu1 %v16525_v41  ;;  %v3925_v59 = vpack.c.bf16 %v3884_v5, %v3883_v10  ;;  %v3887_v10 = vld [vmem:[#allocation2 + $0xb7] sm:$0xff] }
 0x59b   : > { %5706 = vmatmul.mubr.bf16.gmra.mrb[100].mxu1 %v3924_v53  ;;  %v14753_v21 = vpop.f32.mrb[112].mxu0 }
 0x59c   : > { %5713 = vmatprep.mubr.bf16.mxu1 %v4021_v49  ;;  %v5251_v2 = vpop.f32.mrb[113].mxu0  ;;  %7911 = vmatpush1.bf16.msra.mxu1 %v12310_v20  ;;  %v3886_v49 = vld [vmem:[#allocation2 + $0xaf] sm:$0xff] }
 0x59d   : > { %v14755_v45 = vpop.f32.mrb[114].mxu0  ;;  %7912 = vmatprep.subr.bf16.mxu1 %v16525_v41  ;;  %v3885_v2 = vld [vmem:[#allocation2 + $0xa7] sm:$0xff] }
 0x59e   : > { %v5254_v63 = vpop.f32.mrb[115].mxu0 }
 0x59f   : > { %v4023_v63 = vpack.c.bf16 %v14520_v15, %v14510_v1 }
 0x5a0   : > { %7913 = vmatpush1.bf16.msra.mxu1 %v12311_v18  ;;  %v3926_v18 = vpack.c.bf16 %v3886_v49, %v3885_v2  ;;  %v12314_v49 = vld [vmem:[#allocation10 + $0x70] sm:$0xff]   ;;  %v3889_v2 = vld [vmem:[#allocation2 + $0xc7] sm:$0xff] }
 0x5a1   : > { %7914 = vmatprep.subr.bf16.mxu1 %v16525_v41 }
 0x5a3   : > { %5714 = vmatmul.mubr.bf16.gmra.mrb[104].mxu1 %v3925_v59  ;;  %v14761_v54 = vpop.f32.mrb[116].mxu0  ;;  %v4024_v59 = vpack.c.bf16 %v14529_v13, %v14517_v57 }
 0x5a4   : > { %5721 = vmatprep.mubr.bf16.mxu1 %v4022_v60  ;;  %v5259_v24 = vpop.f32.mrb[117].mxu0  ;;  %7915 = vmatpush1.bf16.msra.mxu1 %v12312_v27  ;;  %v3927_v27 = vpack.c.bf16 %v3888_v30, %v3887_v10  ;;  %v3891_v30 = vld [vmem:[#allocation2 + $0xd7] sm:$0xff] }
 0x5a5   : > { %v14763_v20 = vpop.f32.mrb[118].mxu0  ;;  %7916 = vmatprep.subr.bf16.mxu1 %v16525_v41 }
 0x5a6   : > { %v5262_v53 = vpop.f32.mrb[119].mxu0 }
 0x5a7   : > { %v3890_v53 = vld [vmem:[#allocation2 + $0xcf] sm:$0xff] }
 0x5a8   : > { %7917 = vmatpush1.bf16.msra.mxu1 %v12313_v14 }
 0x5a9   : > { %7918 = vmatprep.subr.bf16.mxu1 %v16525_v41 }
 0x5ab   : > { %5722 = vmatmul.mubr.bf16.gmra.mrb[108].mxu1 %v3926_v18  ;;  %v14768_v5 = vpop.f32.mrb[120].mxu0  ;;  %v3928_v18 = vpack.c.bf16 %v3890_v53, %v3889_v2  ;;  %v3893_v53 = vld [vmem:[#allocation2 + $0xe7] sm:$0xff]  ;;  %v4027_v2 = vpack.c.bf16 %v14570_v38, %v14551_v51 }
 0x5ac   : > { %5729 = vmatprep.mubr.bf16.mxu1 %v4023_v63  ;;  %v5267_v37 = vpop.f32.mrb[121].mxu0  ;;  %7919 = vmatpush1.bf16.msra.mxu1 %v12314_v49  ;;  %v4025_v63 = vpack.c.bf16 %v14537_v16, %v14526_v44  ;;  %v12316_v38 = vld [vmem:[#allocation10 + $0x200] sm:$0xff]  }
 0x5ad   : > { %v14770_v56 = vpop.f32.mrb[122].mxu0  ;;  %7920 = vmatprep.subr.bf16.mxu1 %v16525_v41  ;;  %11011 = vmatprep.subr.bf16.mxu0 %v12316_v38 }
 0x5ae   : > { %v5270_v3 = vpop.f32.mrb[123].mxu0  ;;  %11012 = vmatpush3.bf16.msra.mxu0 %v12316_v38 }
 0x5af   : > { %v3892_v3 = vld [vmem:[#allocation2 + $0xdf] sm:$0xff] }
 0x5b0   : > { %v3929_v10 = vpack.c.bf16 %v3892_v3, %v3891_v30  ;;  %v4028_v30 = vpack.c.bf16 %v14579_v42, %v14565_v17  ;;  %v12319_v42 = vld [vmem:[#allocation10 + $0x210] sm:$0xff]  }
 0x5b3   : > { %5730 = vmatmul.mubr.bf16.gmra.mrb[112].mxu1 %v3927_v27  ;;  %v14775_v1 = vpop.f32.mrb[124].mxu0  ;;  %v4026_v27 = vpack.c.bf16 %v14558_v33, %v14539_v9 }
 0x5b4   : > { %5737 = vmatprep.mubr.bf16.mxu1 %v4024_v59  ;;  %v5275_v15 = vpop.f32.mrb[125].mxu0 }
 0x5b5   : > { %v14777_v60 = vpop.f32.mrb[126].mxu0 }
 0x5b6   : > { %v5278_v24 = vpop.f32.mrb[127].mxu0 }
 0x5b7   : > { %v3894_v24 = vld [vmem:[#allocation2 + $0xef] sm:$0xff] }
 0x5b8   : > { %v3930_v49 = vpack.c.bf16 %v3894_v24, %v3893_v53  ;;  %v3897_v24 = vld [vmem:[#allocation2 + $0x107] sm:$0xff]  ;;  %v4029_v53 = vpack.c.bf16 %v14598_v31, %v14581_v52  ;;  %v4030_v31 = vpack.c.bf16 %v14610_v35, %v14593_v22  ;;  %v4031_v22 = vpack.c.bf16 %v14623_v6, %v14607_v0 }
 0x5b9   : > { %v4032_v6 = vpack.c.bf16 %v14642_v4, %v14625_v8 }
 0x5bb   : > { %5738 = vmatmul.mubr.bf16.gmra.mrb[116].mxu1 %v3928_v18  ;;  %v14782_v57 = vpop.f32.mrb[128].mxu0 }
 0x5bc   : > { %5745 = vmatprep.mubr.bf16.mxu1 %v4025_v63  ;;  %v5283_v13 = vpop.f32.mrb[129].mxu0 }
 0x5bd   : > { %v14784_v37 = vpop.f32.mrb[130].mxu0  ;;  %v12315_v13 = vld [vmem:[#allocation10 + $0x78] sm:$0xff]  }
 0x5be   : > { %v5286_v14 = vpop.f32.mrb[131].mxu0  ;;  %7921 = vmatpush1.bf16.msra.mxu1 %v12315_v13  ;;  %v12320_v13 = vld [vmem:[#allocation10 + $0x218] sm:$0xff]  }
 0x5bf   : > { %v3895_v14 = vld [vmem:[#allocation2 + $0xf7] sm:$0xff]  ;;  %8115 = vmatprep.subr.bf16.mxu1 %v16525_v41 }
 0x5c0   : > { %v3931_v3 = vpack.c.bf16 %v14535_v32, %v3895_v14  ;;  %v3932_v32 = vpack.c.bf16 %v14545_v39, %v3897_v24  ;;  %v12322_v14 = vld [vmem:[#allocation10 + $0x220] sm:$0xff]   ;;  %v12324_v24 = vld [vmem:[#allocation10 + $0x230] sm:$0xff]  }
 0x5c3   : > { %5746 = vmatmul.mubr.bf16.gmra.mrb[120].mxu1 %v3929_v10  ;;  %v14788_v59 = vpop.f32.mrb[132].mxu0 }
 0x5c4   : > { %5753 = vmatprep.mubr.bf16.mxu1 %v4026_v27  ;;  %v5291_v15 = vpop.f32.mrb[133].mxu0 }
 0x5c5   : > { %v14790_v44 = vpop.f32.mrb[134].mxu0 }
 0x5c6   : > { %v5294_v16 = vpop.f32.mrb[135].mxu0 }
 0x5c7   : > { %v12318_v16 = vld [vmem:[#allocation10 + $0x208] sm:$0xff]  }
 0x5c8   : > { %11013 = vmatprep.subr.bf16.mxu0 %v12318_v16 }
 0x5c9   : > { %11014 = vmatpush3.bf16.msra.mxu0 %v12318_v16  ;;  %v3901_v16 = vld [vmem:[#allocation2 + $0x127] sm:$0xff] }
 0x5ca   : > { %11015 = vmatprep.subr.bf16.mxu0 %v12319_v42 }
 0x5cb   : > { %5754 = vmatmul.mubr.bf16.gmra.mrb[124].mxu1 %v3930_v49  ;;  %v14794_v18 = vpop.f32.mrb[136].mxu0 }
 0x5cc   : > { %5761 = vmatprep.mubr.bf16.mxu1 %v4027_v2  ;;  %v5299_v63 = vpop.f32.mrb[137].mxu0 }
 0x5cd   : > { %v14796_v9 = vpop.f32.mrb[138].mxu0  ;;  %11016 = vmatpush3.bf16.msra.mxu0 %v12319_v42 }
 0x5ce   : > { %v5302_v33 = vpop.f32.mrb[139].mxu0  ;;  %11017 = vmatprep.subr.bf16.mxu0 %v12320_v13 }
 0x5cf   : > { %v3900_v33 = vld [vmem:[#allocation2 + $0x11f] sm:$0xff] }
 0x5d0   : > { %v3933_v39 = vpack.c.bf16 %v3900_v33, %v14547_v12  ;;  %v3903_v33 = vld [vmem:[#allocation2 + $0x137] sm:$0xff] }
 0x5d1   : > { %11018 = vmatpush3.bf16.msra.mxu0 %v12320_v13 }
 0x5d2   : > { %11019 = vmatprep.subr.bf16.mxu0 %v12322_v14 }
 0x5d3   : > { %5762 = vmatmul.mubr.bf16.gmra.mrb[128].mxu1 %v3931_v3  ;;  %v14802_v51 = vpop.f32.mrb[140].mxu0 }
 0x5d4   : > { %5769 = vmatprep.mubr.bf16.mxu1 %v4028_v30  ;;  %v5307_v10 = vpop.f32.mrb[141].mxu0 }
 0x5d5   : > { %v14804_v27 = vpop.f32.mrb[142].mxu0  ;;  %v3902_v10 = vld [vmem:[#allocation2 + $0x12f] sm:$0xff]  ;;  %11020 = vmatpush3.bf16.msra.mxu0 %v12322_v14 }
 0x5d6   : > { %v5310_v15 = vpop.f32.mrb[143].mxu0  ;;  %v3934_v12 = vpack.c.bf16 %v3902_v10, %v3901_v16 }
 0x5d7   : > { %v12323_v15 = vld [vmem:[#allocation10 + $0x228] sm:$0xff]  }
 0x5d8   : > { %11021 = vmatprep.subr.bf16.mxu0 %v12323_v15 }
 0x5d9   : > { %11022 = vmatpush3.bf16.msra.mxu0 %v12323_v15  ;;  %v4033_v15 = vpack.c.bf16 %v14655_v58, %v14639_v62 }
 0x5da   : > { %11023 = vmatprep.subr.bf16.mxu0 %v12324_v24 }
 0x5db   : > { %5770 = vmatmul.mubr.bf16.gmra.mrb[132].mxu1 %v3932_v32  ;;  %v14809_v17 = vpop.f32.mrb[144].mxu0 }
 0x5dc   : > { %16526 = vst [vmem:[#allocation41_spill] sm:$0xff] %v14809_v17  ;;  %5777 = vmatprep.mubr.bf16.mxu1 %v4029_v53  ;;  %v5315_v49 = vpop.f32.mrb[145].mxu0 }
 0x5dd   : > { %v14811_v2 = vpop.f32.mrb[146].mxu0  ;;  %v3904_v49 = vld [vmem:[#allocation2 + $0x13f] sm:$0xff]  ;;  %11024 = vmatpush3.bf16.msra.mxu0 %v12324_v24  ;;  %v3907_v24 = vld [vmem:[#allocation2 + $0x157] sm:$0xff] }
 0x5de   : > { %16527 = vst [vmem:[#allocation42_spill] sm:$0xff] %v14811_v2  ;;  %v5318_v63 = vpop.f32.mrb[147].mxu0  ;;  %v3935_v13 = vpack.c.bf16 %v3904_v49, %v3903_v33 }
 0x5df   : > { %v12326_v63 = vld [vmem:[#allocation10 + $0x238] sm:$0xff]  }
 0x5e0   : > { %11025 = vmatprep.subr.bf16.mxu0 %v12326_v63 }
 0x5e1   : > { %11026 = vmatpush3.bf16.msra.mxu0 %v12326_v63 }
 0x5e3   : > { %5778 = vmatmul.mubr.bf16.gmra.mrb[136].mxu1 %v3933_v39  ;;  %v14816_v52 = vpop.f32.mrb[148].mxu0 }
 0x5e4   : > { %16528 = vst [vmem:[#allocation43_spill] sm:$0xff] %v14816_v52  ;;  %5785 = vmatprep.mubr.bf16.mxu1 %v4030_v31  ;;  %v5323_v3 = vpop.f32.mrb[149].mxu0  ;;  %v12317_v52 = vld [vmem:[#allocation10 + $0x80] sm:$0xff]  }
 0x5e5   : > { %v14818_v30 = vpop.f32.mrb[150].mxu0  ;;  %v3906_v3 = vld [vmem:[#allocation2 + $0x14f] sm:$0xff] }
 0x5e6   : > { %16529 = vst [vmem:[#allocation44_spill] sm:$0xff] %v14818_v30  ;;  %v5326_v38 = vpop.f32.mrb[151].mxu0 }
 0x5e7   : > { %v3905_v38 = vld [vmem:[#allocation2 + $0x147] sm:$0xff] }
 0x5e8   : > { %v3936_v10 = vpack.c.bf16 %v3906_v3, %v3905_v38 }
 0x5eb   : > { %5786 = vmatmul.mubr.bf16.gmra.mrb[140].mxu1 %v3934_v12  ;;  %v14822_v35 = vpop.f32.mrb[152].mxu0 }
 0x5ec   : > { %16530 = vst [vmem:[#allocation45_spill] sm:$0xff] %v14822_v35  ;;  %5793 = vmatprep.mubr.bf16.mxu1 %v4031_v22  ;;  %v5331_v32 = vpop.f32.mrb[153].mxu0  ;;  %v3908_v22 = vld [vmem:[#allocation2 + $0x15f] sm:$0xff] }
 0x5ed   : > { %v14824_v53 = vpop.f32.mrb[154].mxu0  ;;  %v3937_v32 = vpack.c.bf16 %v3908_v22, %v3907_v24  ;;  %v3911_v22 = vld [vmem:[#allocation2 + $0x177] sm:$0xff] }
 0x5ee   : > { %16531 = vst [vmem:[#allocation46_spill] sm:$0xff] %v14824_v53  ;;  %v5334_v42 = vpop.f32.mrb[155].mxu0 }
 0x5ef   : > { %v16534_v42 = vld [vmem:[#allocation30_spill] sm:$0xff] }
 0x5f0   : > { %v4034_v49 = vpack.c.bf16 %v14668_v29, %v16534_v42 }
 0x5f3   : > { %5794 = vmatmul.mubr.bf16.gmra.mrb[48].mxu1 %v3935_v13  ;;  %v14828_v0 = vpop.f32.mrb[156].mxu0  ;;  %v3910_v13 = vld [vmem:[#allocation2 + $0x16f] sm:$0xff] }
 0x5f4   : > { %16532 = vst [vmem:[#allocation47_spill] sm:$0xff] %v14828_v0  ;;  %5801 = vmatprep.mubr.bf16.mxu1 %v4032_v6  ;;  %v5339_v39 = vpop.f32.mrb[157].mxu0  ;;  %v3909_v6 = vld [vmem:[#allocation2 + $0x167] sm:$0xff] }
 0x5f5   : > { %v14830_v31 = vpop.f32.mrb[158].mxu0  ;;  %v3938_v39 = vpack.c.bf16 %v3910_v13, %v3909_v6  ;;  %v3914_v13 = vld [vmem:[#allocation2 + $0x18f] sm:$0xff]  ;;  %v3913_v6 = vld [vmem:[#allocation2 + $0x187] sm:$0xff] }
 0x5f6   : > { %16533 = vst [vmem:[#allocation48_spill] sm:$0xff] %v14830_v31  ;;  %v5342_v14 = vpop.f32.mrb[159].mxu0 }
 0x5f7   : > { %v4035_v14 = vpack.c.bf16 %v14690_v34, %v14670_v36 }
 0x5fb   : > { %5802 = vmatmul.mubr.bf16.gmra.mrb[52].mxu1 %v3936_v10  ;;  %v14834_v16 = vpop.f32.mrb[192].mxu0 }
 0x5fc   : > { %5809 = vmatprep.mubr.bf16.mxu1 %v4033_v15  ;;  %v14836_v8 = vpop.f32.mrb[193].mxu0  ;;  %v3912_v15 = vld [vmem:[#allocation2 + $0x17f] sm:$0xff] }
 0x5fd   : > { %v14838_v4 = vpop.f32.mrb[194].mxu0  ;;  %v3939_v24 = vpack.c.bf16 %v3912_v15, %v3911_v22 }
 0x5fe   : > { %v14840_v12 = vpop.f32.mrb[195].mxu0 }
 0x603   : > { %5810 = vmatmul.mubr.bf16.gmra.mrb[56].mxu1 %v3937_v32  ;;  %v14844_v63 = vpop.f32.mrb[196].mxu0  ;;  %v4036_v32 = vpack.c.bf16 %v14701_v40, %v14686_v23 }
 0x604   : > { %5817 = vmatprep.mubr.bf16.mxu1 %v4034_v49  ;;  %v14846_v62 = vpop.f32.mrb[197].mxu0 }
 0x605   : > { %v14848_v58 = vpop.f32.mrb[198].mxu0 }
 0x606   : > { %v14850_v33 = vpop.f32.mrb[199].mxu0 }
 0x60b   : > { %5818 = vmatmul.mubr.bf16.gmra.mrb[60].mxu1 %v3938_v39  ;;  %v14854_v3 = vpop.f32.mrb[200].mxu0  ;;  %v3940_v39 = vpack.c.bf16 %v3914_v13, %v3913_v6 }
 0x60c   : > { %5825 = vmatprep.mubr.bf16.mxu1 %v4035_v14  ;;  %v14856_v29 = vpop.f32.mrb[201].mxu0  ;;  %v14872_v14 = vld [vmem:[#allocation2 + $0x8] sm:$0xff] }
 0x60d   : > { %v14858_v38 = vpop.f32.mrb[202].mxu0  ;;  %v4037_v15 = vpack.c.bf16 %v14872_v14, %v14699_v61  ;;  %v4038_v13 = vpack.c.bf16 %v14872_v14, %v14872_v14 }
 0x60e   : > { %v14860_v10 = vpop.f32.mrb[203].mxu0 }
 0x613   : > { %5826 = vmatmul.mubr.bf16.gmra.mrb[64].mxu1 %v3939_v24  ;;  %v14864_v42 = vpop.f32.mrb[204].mxu0 }
 0x614   : > { %5833 = vmatprep.mubr.bf16.mxu1 %v4036_v32  ;;  %v14866_v36 = vpop.f32.mrb[205].mxu0  ;;  %v3915_v32 = vld [vmem:[#allocation2 + $0x197] sm:$0xff] }
 0x615   : > { %v14868_v34 = vpop.f32.mrb[206].mxu0  ;;  %v3941_v6 = vpack.c.bf16 %v3916_v19, %v3915_v32  ;;  %v6227_v19 = vld [vmem:[#allocation2 + $0x7] sm:$0xff]  ;;  %v6228_v32 = vld [vmem:[#allocation2 + $0xf] sm:$0xff] }
 0x616   : > { %v14870_v49 = vpop.f32.mrb[207].mxu0  ;;  %v6275_v30 = vpack.c.bf16 %v6228_v32, %v6227_v19 }
 0x61b   : > { %5834 = vmatmul.mubr.bf16.gmra.mrb[68].mxu1 %v3940_v39  ;;  %v14876_v23 = vpop.f32.mrb[208].mxu0  ;;  %v3917_v39 = vld [vmem:[#allocation2 + $0x1a7] sm:$0xff] }
 0x61c   : > { %5841 = vmatprep.mubr.bf16.mxu1 %v4037_v15  ;;  %v14878_v40 = vpop.f32.mrb[209].mxu0  ;;  %v3918_v15 = vld [vmem:[#allocation2 + $0x1af] sm:$0xff] }
 0x61d   : > { %v14880_v22 = vpop.f32.mrb[210].mxu0  ;;  %v3942_v31 = vpack.c.bf16 %v3918_v15, %v3917_v39  ;;  %v12325_v15 = vld [vmem:[#allocation10 + $0x90] sm:$0xff]  }
 0x61e   : > { %v14882_v24 = vpop.f32.mrb[211].mxu0 }
 0x623   : > { %5842 = vmatmul.mubr.bf16.gmra.mrb[72].mxu1 %v3941_v6  ;;  %v14886_v47 = vpop.f32.mrb[212].mxu0 }
 0x624   : > { %v14888_v61 = vpop.f32.mrb[213].mxu0  ;;  %5849 = vmatprep.mubr.bf16.mxu1 %v4038_v13 }
 0x625   : > { %v14890_v28 = vpop.f32.mrb[214].mxu0 }
 0x626   : > { %16535 = vst [vmem:[#allocation30_spill] sm:$0xff] %v14890_v28  ;;  %v14892_v46 = vpop.f32.mrb[215].mxu0 }
 0x62b   : > { %5850 = vmatmul.mubr.bf16.gmra.mrb[76].mxu1 %v3942_v31  ;;  %v14894_v0 = vpop.f32.mrb[216].mxu0  ;;  %v12321_v31 = vld [vmem:[#allocation10 + $0x88] sm:$0xff]  }
 0x62c   : > { %16536 = vst [vmem:[#allocation49_spill] sm:$0xff] %v14894_v0  ;;  %v14896_v53 = vpop.f32.mrb[217].mxu0  ;;  %7922 = vmatprep.mubr.bf16.mxu1 %v4038_v13 }
 0x62d   : > { %16537 = vst [vmem:[#allocation50_spill] sm:$0xff] %v14896_v53  ;;  %v14898_v6 = vpop.f32.mrb[218].mxu0 }
 0x62e   : > { %16538 = vst [vmem:[#allocation51_spill] sm:$0xff] %v14898_v6  ;;  %v14900_v35 = vpop.f32.mrb[219].mxu0 }
 0x62f   : > { %16539 = vst [vmem:[#allocation52_spill] sm:$0xff] %v14900_v35 }
 0x633   : > { %v14902_v2 = vpop.f32.mrb[220].mxu0  ;;  %7923 = vmatmul.mubr.bf16.vlgmr.msra.gmra.mrb[144].mxu1 %v6275_v30  ;;  %v12327_v30 = vld [vmem:[#allocation10 + $0x98] sm:$0xff]  }
 0x634   : > { %16540 = vst [vmem:[#allocation53_spill] sm:$0xff] %v14902_v2  ;;  %v14904_v17 = vpop.f32.mrb[221].mxu0  ;;  %8116 = vmatpush1.bf16.msra.mxu1 %v12317_v52 }
 0x635   : > { %16541 = vst [vmem:[#allocation54_spill] sm:$0xff] %v14904_v17  ;;  %v14906_v39 = vpop.f32.mrb[222].mxu0  ;;  %8117 = vmatprep.subr.bf16.mxu1 %v16525_v41 }
 0x636   : > { %16542 = vst [vmem:[#allocation55_spill] sm:$0xff] %v14906_v39  ;;  %v14909_v13 = vpop.f32.mrb[223].mxu0  ;;  %v12328_v39 = vld [vmem:[#allocation10 + $0xa0] sm:$0xff]  }
 0x637   : > { %16543 = vst [vmem:[#allocation56_spill] sm:$0xff] %v14909_v13 }
 0x638   : > { %8118 = vmatpush1.bf16.msra.mxu1 %v12321_v31 }
 0x639   : > { %8119 = vmatprep.subr.bf16.mxu1 %v16525_v41 }
 0x63b   : > { %v14912_v6 = vpop.f32.mrb[224].mxu0 }
 0x63c   : > { %16544 = vst [vmem:[#allocation57_spill] sm:$0xff] %v14912_v6  ;;  %v14914_v19 = vpop.f32.mrb[225].mxu0  ;;  %8120 = vmatpush1.bf16.msra.mxu1 %v12325_v15  ;;  %v14927_v6 = vld [vmem:[%s16383_s4] ss:$0 sm:$0xff]  ;;  %v12329_v15 = vld [vmem:[#allocation10 + $0xa8] sm:$0xff]  }
 0x63d   : > { %16545 = vst [vmem:[#allocation58_spill] sm:$0xff] %v14914_v19  ;;  %v14916_v32 = vpop.f32.mrb[226].mxu0  ;;  %8121 = vmatprep.subr.bf16.mxu1 %v16525_v41 }
 0x63e   : > { %16546 = vst [vmem:[#allocation59_spill] sm:$0xff] %v14916_v32  ;;  %v14919_v52 = vpop.f32.mrb[227].mxu0  ;;  %v11155_v32 = vadd.f32 %v14927_v6, %v14721_v43 }
 0x63f   : > { %16547 = vst [vmem:[#allocation60_spill] sm:$0xff] %v14919_v52 }
 0x640   : > { %8122 = vmatpush1.bf16.msra.mxu1 %v12327_v30 }
 0x641   : > { %8123 = vmatprep.subr.bf16.mxu1 %v16525_v41 }
 0x643   : > { %v14922_v31 = vpop.f32.mrb[228].mxu0 }
 0x644   : > { %16548 = vst [vmem:[#allocation61_spill] sm:$0xff] %v14922_v31  ;;  %v14929_v19 = vpop.f32.mrb[229].mxu0  ;;  %8124 = vmatpush1.bf16.msra.mxu1 %v12328_v39  ;;  %v11157_v31 = vadd.f32 %v14927_v6, %v14723_v25  ;;  %v12331_v25 = vld [vmem:[#allocation10 + $0xb8] sm:$0xff]  }
 0x645   : > { %16549 = vst [vmem:[#allocation62_spill] sm:$0xff] %v14929_v19  ;;  %v14933_v2 = vpop.f32.mrb[230].mxu0  ;;  %8125 = vmatprep.subr.bf16.mxu1 %v16525_v41  ;;  %v12330_v19 = vld [vmem:[#allocation10 + $0xb0] sm:$0xff]  }
 0x646   : > { %16550 = vst [vmem:[#allocation63_spill] sm:$0xff] %v14933_v2  ;;  %v5667_v30 = vpop.f32.mrb[80].mxu1  ;;  %v14936_v52 = vpop.f32.mrb[231].mxu0 }
 0x647   : > { %16551 = vst [vmem:[#allocation64_spill] sm:$0xff] %v14936_v52  ;;  %v11156_v13 = vadd.f32 %v11155_v32, %v5667_v30  ;;  %v5669_v17 = vpop.f32.mrb[81].mxu1  ;;  %v12341_v32 = vld [vmem:[#allocation10 + $0x108] sm:$0xff]  }
 0x648   : > { %v5670_v0 = vpop.f32.mrb[82].mxu1  ;;  %8126 = vmatpush1.bf16.msra.mxu1 %v12329_v15  ;;  %v11159_v17 = vadd.f32 %v14927_v6, %v14729_v11 }
 0x649   : > { %v5893_v39 = vadd.f32 %v11156_v13, %v14836_v8  ;;  %v11158_v35 = vadd.f32 %v11157_v31, %v5670_v0  ;;  %v5672_v53 = vpop.f32.mrb[83].mxu1  ;;  %8127 = vmatprep.subr.bf16.mxu1 %v16525_v41 }
 0x64b   : > { %v6083_v43 = vmax.f32 %v5893_v39, 0.0  ;;  %v5896_v2 = vadd.f32 %v11158_v35, %v14840_v12  ;;  %v14943_v28 = vpop.f32.mrb[232].mxu0  ;;  %v11161_v12 = vadd.f32 %v14927_v6, %v14731_v7 }
 0x64c   : > { %16552 = vst [vmem:[#allocation65_spill] sm:$0xff] %v14943_v28  ;;  %v14945_v52 = vpop.f32.mrb[233].mxu0  ;;  %8128 = vmatpush1.bf16.msra.mxu1 %v12330_v19 }
 0x64d   : > { %v6131_v15 = vsel %vm3190_vm0, %v6083_v43, 0.0  ;;  %v6084_v8 = vmax.f32 %v5896_v2, 0.0  ;;  %v14951_v0 = vpop.f32.mrb[234].mxu0  ;;  %8129 = vmatprep.subr.bf16.mxu1 %v16525_v41  ;;  %v12495_v11 = vpack.c.bf16 %v6083_v43, %v14872_v14  ;;  %v12332_v2 = vld [vmem:[#allocation10 + $0xc0] sm:$0xff]  }
 0x64e   : > { %16554 = vst [vmem:[#allocation66_spill] sm:$0xff] %v14951_v0  ;;  %6179 = vst [vmem:[#allocation2 + $0x20] sm:$0xff] %v6131_v15  ;;  %v5675_v53 = vpop.f32.mrb[84].mxu1  ;;  %v14954_v35 = vpop.f32.mrb[235].mxu0 }
 0x64f   : > { %16555 = vst [vmem:[#allocation67_spill] sm:$0xff] %v14954_v35  ;;  %6180 = vst [vmem:[#allocation2 + $0x28] sm:$0xff] %v6084_v8  ;;  %v11160_v13 = vadd.f32 %v11159_v17, %v5675_v53  ;;  %v5677_v19 = vpop.f32.mrb[85].mxu1  ;;  %12496 = vmatprep.mubr.msk.bf16.mxu1 %vm14109_vm2, %v12495_v11  ;;  %v6229_v35 = vld [vmem:[#allocation2 + $0x17] sm:$0xff]  ;;  %v11163_v17 = vadd.f32 %v14927_v6, %v14737_v26 }
 0x650   : > { %v5678_v31 = vpop.f32.mrb[86].mxu1  ;;  %8130 = vmatpush1.bf16.msra.mxu1 %v12331_v25 }
 0x651   : > { %v5901_v39 = vadd.f32 %v11160_v13, %v14834_v16  ;;  %v11162_v15 = vadd.f32 %v11161_v12, %v5678_v31  ;;  %v5680_v0 = vpop.f32.mrb[87].mxu1  ;;  %8131 = vmatprep.subr.bf16.mxu1 %v16525_v41  ;;  %v12333_v16 = vld [vmem:[#allocation10 + $0xc8] sm:$0xff]   ;;  %v11165_v13 = vadd.f32 %v14927_v6, %v14739_v50 }
 0x653   : > { %v6085_v28 = vmax.f32 %v5901_v39, 0.0  ;;  %v5904_v7 = vadd.f32 %v11162_v15, %v14838_v4 }
 0x654   : > { %8132 = vmatpush1.bf16.msra.mxu1 %v12332_v2 }
 0x655   : > { %v6133_v43 = vsel %vm3195_vm3, %v6085_v28, 0.0  ;;  %v6086_v53 = vmax.f32 %v5904_v7, 0.0  ;;  %v6230_v25 = vld [vmem:[#allocation2 + $0x1f] sm:$0xff]  ;;  %8133 = vmatprep.subr.bf16.mxu1 %v16525_v41  ;;  %v12498_v39 = vpack.c.bf16 %v6085_v28, %v6084_v8 }
 0x656   : > { %6181 = vst [vmem:[#allocation2 + $0x30] sm:$0xff] %v6133_v43  ;;  %v5683_v0 = vpop.f32.mrb[88].mxu1  ;;  %v6276_v12 = vpack.c.bf16 %v6230_v25, %v6229_v35  ;;  %v12334_v35 = vld [vmem:[#allocation10 + $0xd0] sm:$0xff]   ;;  %v11167_v43 = vadd.f32 %v14927_v6, %v14745_v48 }
 0x657   : > { %v6134_v4 = vsel %vm3190_vm0, %v6086_v53, 0.0  ;;  %v11164_v19 = vadd.f32 %v11163_v17, %v5683_v0  ;;  %v5685_v31 = vpop.f32.mrb[89].mxu1  ;;  %v6231_v17 = vld [vmem:[#allocation2 + $0x27] sm:$0xff] }
 0x658   : > { %6182 = vst [vmem:[#allocation2 + $0x38] sm:$0xff] %v6134_v4  ;;  %v5686_v26 = vpop.f32.mrb[90].mxu1  ;;  %7931 = vmatmul.mubr.bf16.gmra.mrb[148].mxu1 %v6276_v12  ;;  %v14980_v0 = vld [vmem:[#allocation2 + $0x21] sm:$0xff]  ;;  %v12335_v12 = vld [vmem:[#allocation10 + $0xd8] sm:$0xff]  }
 0x659   : > { %v5909_v11 = vadd.f32 %v11164_v19, %v14846_v62  ;;  %v11166_v30 = vadd.f32 %v11165_v13, %v5686_v26  ;;  %v5688_v2 = vpop.f32.mrb[91].mxu1  ;;  %12499 = vmatprep.mubr.msk.bf16.mxu1 %vm14151_vm4, %v12498_v39  ;;  %8134 = vmatpush1.bf16.msra.mxu1 %v12333_v16  ;;  %16559 = vst [vmem:[#allocation20_spill] sm:$0xff] %v14980_v0 }
 0x65a   : > { %8135 = vmatprep.subr.bf16.mxu1 %v16525_v41  ;;  %v11169_v13 = vadd.f32 %v14927_v6, %v14747_v55 }
 0x65b   : > { %v6087_v50 = vmax.f32 %v5909_v11, 0.0  ;;  %v5912_v7 = vadd.f32 %v11166_v30, %v14850_v33 }
 0x65d   : > { %6183 = vst [vmem:[#allocation2 + $0x40] sm:$0xff] %v6087_v50  ;;  %v6088_v25 = vmax.f32 %v5912_v7, 0.0  ;;  %v6232_v62 = vld [vmem:[#allocation2 + $0x2f] sm:$0xff]  ;;  %8136 = vmatpush1.bf16.msra.mxu1 %v12334_v35  ;;  %v12501_v2 = vpack.c.bf16 %v6087_v50, %v6086_v53 }
 0x65e   : > { %v14982_v28 = vld [vmem:[#allocation2 + $0x29] sm:$0xff]  ;;  %v5691_v8 = vpop.f32.mrb[92].mxu1  ;;  %v6277_v16 = vpack.c.bf16 %v6232_v62, %v6231_v17  ;;  %8137 = vmatprep.subr.bf16.mxu1 %v16525_v41 }
 0x65f   : > { %16560 = vst [vmem:[#allocation19_spill] sm:$0xff] %v14982_v28  ;;  %v6136_v48 = vsel %vm3195_vm3, %v6088_v25, 0.0  ;;  %v11168_v4 = vadd.f32 %v11167_v43, %v5691_v8  ;;  %v5693_v19 = vpop.f32.mrb[93].mxu1  ;;  %v6233_v7 = vld [vmem:[#allocation2 + $0x37] sm:$0xff] }
 0x660   : > { %6184 = vst [vmem:[#allocation2 + $0x48] sm:$0xff] %v6136_v48  ;;  %v5694_v31 = vpop.f32.mrb[94].mxu1  ;;  %7939 = vmatmul.mubr.bf16.gmra.mrb[152].mxu1 %v6277_v16  ;;  %v14998_v43 = vld [vmem:[#allocation2 + $0x31] sm:$0xff]  ;;  %v11173_v48 = vadd.f32 %v14927_v6, %v14755_v45 }
 0x661   : > { %v5917_v26 = vadd.f32 %v11168_v4, %v14844_v63  ;;  %v11170_v11 = vadd.f32 %v11169_v13, %v5694_v31  ;;  %v5696_v30 = vpop.f32.mrb[95].mxu1  ;;  %12502 = vmatprep.mubr.msk.bf16.mxu1 %vm14171_vm5, %v12501_v2  ;;  %8138 = vmatpush1.bf16.msra.mxu1 %v12335_v12  ;;  %16562 = vst [vmem:[#allocation21_spill] sm:$0xff] %v14998_v43  ;;  %v15007_v16 = vld [vmem:[#allocation2 + $0x38] sm:$0xff]  ;;  %v12336_v2 = vld [vmem:[#allocation10 + $0xe0] sm:$0xff]  }
 0x662   : > { %8139 = vmatprep.subr.bf16.mxu1 %v16525_v41  ;;  %v11171_v63 = vadd.f32 %v14927_v6, %v14753_v21  ;;  %16564 = vst [vmem:[#allocation68_spill] sm:$0xff] %v15007_v16 }
 0x663   : > { %v6089_v55 = vmax.f32 %v5917_v26, 0.0  ;;  %v14996_v35 = vadd.f32 %v11170_v11, %v14848_v58 }
 0x664   : > { %v6234_v17 = vld [vmem:[#allocation2 + $0x3f] sm:$0xff] }
 0x665   : > { %v6137_v53 = vsel %vm3190_vm0, %v6089_v55, 0.0  ;;  %v6090_v50 = vmax.f32 %v14996_v35, 0.0  ;;  %v6278_v62 = vpack.c.bf16 %v6234_v17, %v6233_v7  ;;  %v15005_v8 = vld [vmem:[#allocation2 + $0x39] sm:$0xff]  ;;  %8140 = vmatpush1.bf16.msra.mxu1 %v12336_v2 }
 0x666   : > { %16563 = vst [vmem:[#allocation22_spill] sm:$0xff] %v15005_v8  ;;  %v15009_v12 = vld [vmem:[#allocation2 + $0x40] sm:$0xff]  ;;  %6185 = vst [vmem:[#allocation2 + $0x50] sm:$0xff] %v6137_v53  ;;  %v5699_v58 = vpop.f32.mrb[96].mxu1  ;;  %v12504_v53 = vpack.c.bf16 %v6089_v55, %v6088_v25  ;;  %8141 = vmatprep.subr.bf16.mxu1 %v16525_v41 }
 0x667   : > { %16565 = vst [vmem:[#allocation69_spill] sm:$0xff] %v15009_v12  ;;  %6186 = vst [vmem:[#allocation2 + $0x58] sm:$0xff] %v6090_v50  ;;  %v11172_v4 = vadd.f32 %v11171_v63, %v5699_v58  ;;  %v5701_v19 = vpop.f32.mrb[97].mxu1  ;;  %v6995_v31 = vld [vmem:[#allocation2 + $0x39] sm:$0xff]  ;;  %v6996_v26 = vld [vmem:[#allocation2 + $0x41] sm:$0xff] }
 0x668   : > { %v5702_v11 = vpop.f32.mrb[98].mxu1  ;;  %7947 = vmatmul.mubr.bf16.gmra.mrb[156].mxu1 %v6278_v62  ;;  %v7043_v30 = vpack.c.bf16 %v6996_v26, %v6995_v31  ;;  %v11175_v62 = vadd.f32 %v14927_v6, %v14761_v54  ;;  %v6235_v25 = vld [vmem:[#allocation2 + $0x47] sm:$0xff] }
 0x669   : > { %v5925_v35 = vadd.f32 %v11172_v4, %v14856_v29  ;;  %v11174_v7 = vadd.f32 %v11173_v48, %v5702_v11  ;;  %v5704_v17 = vpop.f32.mrb[99].mxu1  ;;  %12505 = vmatprep.mubr.msk.bf16.mxu1 %vm14199_vm6, %v12504_v53  ;;  %v15029_v26 = vld [vmem:[#allocation2 + $0x41] sm:$0xff] }
 0x66a   : > { %11027 = vmatprep.mubr.bf16.mxu0 %v7043_v30  ;;  %16567 = vst [vmem:[#allocation23_spill] sm:$0xff] %v15029_v26  ;;  %v16641_v26 = vld [vmem:[#allocation61_spill] sm:$0xff] }
 0x66b   : > { %v6091_v45 = vmax.f32 %v5925_v35, 0.0  ;;  %v15021_v63 = vadd.f32 %v11174_v7, %v14860_v10  ;;  %v11177_v10 = vadd.f32 %v14927_v6, %v14763_v20  ;;  %v15037_v7 = vld [vmem:[#allocation2 + $0x48] sm:$0xff] }
 0x66c   : > { %16569 = vst [vmem:[#allocation71_spill] sm:$0xff] %v15037_v7 }
 0x66d   : > { %v6139_v29 = vsel %vm3195_vm3, %v6091_v45, 0.0  ;;  %v6092_v58 = vmax.f32 %v15021_v63, 0.0  ;;  %v6236_v55 = vld [vmem:[#allocation2 + $0x4f] sm:$0xff] }
 0x66e   : > { %v6997_v48 = vld [vmem:[#allocation2 + $0x49] sm:$0xff]  ;;  %6187 = vst [vmem:[#allocation2 + $0x60] sm:$0xff] %v6139_v29  ;;  %v5707_v4 = vpop.f32.mrb[100].mxu1  ;;  %v6279_v19 = vpack.c.bf16 %v6236_v55, %v6235_v25  ;;  %v6998_v31 = vld [vmem:[#allocation2 + $0x51] sm:$0xff]  ;;  %v12507_v55 = vpack.c.bf16 %v6091_v45, %v6090_v50  ;;  %v11181_v50 = vadd.f32 %v14927_v6, %v14770_v56 }
 0x66f   : > { %v6140_v54 = vsel %vm3190_vm0, %v6092_v58, 0.0  ;;  %v11176_v11 = vadd.f32 %v11175_v62, %v5707_v4  ;;  %v5709_v30 = vpop.f32.mrb[101].mxu1  ;;  %v7044_v2 = vpack.c.bf16 %v6998_v31, %v6997_v48  ;;  %v15035_v35 = vld [vmem:[#allocation2 + $0x49] sm:$0xff]  ;;  %v11179_v31 = vadd.f32 %v14927_v6, %v14768_v5 }
 0x670   : > { %16568 = vst [vmem:[#allocation70_spill] sm:$0xff] %v15035_v35  ;;  %v15039_v17 = vld [vmem:[#allocation2 + $0x50] sm:$0xff]  ;;  %6188 = vst [vmem:[#allocation2 + $0x68] sm:$0xff] %v6140_v54  ;;  %v5710_v53 = vpop.f32.mrb[102].mxu1  ;;  %7955 = vmatmul.mubr.bf16.gmra.mrb[160].mxu1 %v6279_v19 }
 0x671   : > { %16570 = vst [vmem:[#allocation72_spill] sm:$0xff] %v15039_v17  ;;  %v5933_v29 = vadd.f32 %v11176_v11, %v14854_v3  ;;  %v11178_v62 = vadd.f32 %v11177_v10, %v5710_v53  ;;  %v5712_v25 = vpop.f32.mrb[103].mxu1  ;;  %11028 = vmatmul.mubr.bf16.vlgmr.msra.gmra.mrb[240].mxu0 %v7044_v2  ;;  %12508 = vmatprep.mubr.msk.bf16.mxu1 %vm14151_vm4, %v12507_v55  ;;  %v6237_v19 = vld [vmem:[#allocation2 + $0x57] sm:$0xff]  ;;  %v12337_v2 = vld [vmem:[#allocation10 + $0xe8] sm:$0xff]  }
 0x672   : > { %v15054_v3 = vld [vmem:[#allocation2 + $0x51] sm:$0xff]  ;;  %8142 = vmatpush1.bf16.msra.mxu1 %v12337_v2 }
 0x673   : > { %v6093_v48 = vmax.f32 %v5933_v29, 0.0  ;;  %v15049_v4 = vadd.f32 %v11178_v62, %v14858_v38  ;;  %16571 = vst [vmem:[#allocation73_spill] sm:$0xff] %v15054_v3  ;;  %v15056_v10 = vld [vmem:[#allocation2 + $0x58] sm:$0xff]  ;;  %8143 = vmatprep.subr.bf16.mxu1 %v16525_v41 }
 0x674   : > { %16572 = vst [vmem:[#allocation74_spill] sm:$0xff] %v15056_v10  ;;  %v12338_v10 = vld [vmem:[#allocation10 + $0xf0] sm:$0xff]  }
 0x675   : > { %6189 = vst [vmem:[#allocation2 + $0x70] sm:$0xff] %v6093_v48  ;;  %v6094_v54 = vmax.f32 %v15049_v4, 0.0  ;;  %v6238_v30 = vld [vmem:[#allocation2 + $0x5f] sm:$0xff]  ;;  %v15066_v4 = vpop.f32.mrb[236].mxu0 }
 0x676   : > { %v5715_v45 = vpop.f32.mrb[104].mxu1  ;;  %v6280_v11 = vpack.c.bf16 %v6238_v30, %v6237_v19  ;;  %v15060_v38 = vld [vmem:[#allocation2 + $0x59] sm:$0xff]  ;;  %v15072_v21 = vpop.f32.mrb[237].mxu0  ;;  %8144 = vmatpush1.bf16.msra.mxu1 %v12338_v10 }
 0x677   : > { %16573 = vst [vmem:[#allocation75_spill] sm:$0xff] %v15060_v38  ;;  %v15062_v53 = vld [vmem:[#allocation2 + $0x60] sm:$0xff]  ;;  %v6142_v5 = vsel %vm3195_vm3, %v6094_v54, 0.0  ;;  %v11180_v29 = vadd.f32 %v11179_v31, %v5715_v45  ;;  %v5717_v62 = vpop.f32.mrb[105].mxu1  ;;  %v15077_v20 = vpop.f32.mrb[238].mxu0  ;;  %8145 = vmatprep.subr.bf16.mxu1 %v16525_v41 }
 0x678   : > { %16574 = vst [vmem:[#allocation76_spill] sm:$0xff] %v15062_v53  ;;  %v6999_v25 = vld [vmem:[#allocation2 + $0x59] sm:$0xff]  ;;  %v7000_v55 = vld [vmem:[#allocation2 + $0x61] sm:$0xff]  ;;  %6190 = vst [vmem:[#allocation2 + $0x78] sm:$0xff] %v6142_v5  ;;  %v5718_v19 = vpop.f32.mrb[106].mxu1  ;;  %7963 = vmatmul.mubr.bf16.gmra.mrb[164].mxu1 %v6280_v11  ;;  %v12510_v62 = vpack.c.bf16 %v6093_v48, %v6092_v58  ;;  %v11183_v58 = vadd.f32 %v14927_v6, %v14775_v1 }
 0x679   : > { %v7045_v30 = vpack.c.bf16 %v7000_v55, %v6999_v25  ;;  %v5941_v63 = vadd.f32 %v11180_v29, %v14866_v36  ;;  %v11182_v31 = vadd.f32 %v11181_v50, %v5718_v19  ;;  %v5720_v45 = vpop.f32.mrb[107].mxu1  ;;  %v15083_v25 = vpop.f32.mrb[239].mxu0  ;;  %v6239_v55 = vld [vmem:[#allocation2 + $0x67] sm:$0xff] }
 0x67a   : > { %12511 = vmatprep.mubr.msk.bf16.mxu1 %vm14171_vm5, %v12510_v62  ;;  %v15085_v50 = vld [vmem:[#allocation2 + $0x61] sm:$0xff]  ;;  %v11185_v45 = vadd.f32 %v14927_v6, %v14777_v60 }
 0x67b   : > { %11031 = vmatprep.mubr.bf16.mxu0 %v7045_v30  ;;  %v6095_v5 = vmax.f32 %v5941_v63, 0.0  ;;  %v15081_v11 = vadd.f32 %v11182_v31, %v14870_v49  ;;  %16575 = vst [vmem:[#allocation77_spill] sm:$0xff] %v15085_v50  ;;  %v15094_v63 = vld [vmem:[#allocation2 + $0x68] sm:$0xff] }
 0x67c   : > { %v6240_v36 = vld [vmem:[#allocation2 + $0x6f] sm:$0xff]  ;;  %16577 = vst [vmem:[#allocation79_spill] sm:$0xff] %v15094_v63  ;;  %v16610_v63 = vld [vmem:[#allocation54_spill] sm:$0xff] }
 0x67d   : > { %v6143_v48 = vsel %vm3190_vm0, %v6095_v5, 0.0  ;;  %v6096_v2 = vmax.f32 %v15081_v11, 0.0  ;;  %v6281_v29 = vpack.c.bf16 %v6240_v36, %v6239_v55  ;;  %v15092_v19 = vld [vmem:[#allocation2 + $0x69] sm:$0xff]  ;;  %v12513_v31 = vpack.c.bf16 %v6095_v5, %v6094_v54 }
 0x67e   : > { %16576 = vst [vmem:[#allocation78_spill] sm:$0xff] %v15092_v19  ;;  %v15096_v49 = vld [vmem:[#allocation2 + $0x70] sm:$0xff]  ;;  %6191 = vst [vmem:[#allocation2 + $0x80] sm:$0xff] %v6143_v48  ;;  %v5723_v30 = vpop.f32.mrb[108].mxu1 }
 0x67f   : > { %16578 = vst [vmem:[#allocation80_spill] sm:$0xff] %v15096_v49  ;;  %6192 = vst [vmem:[#allocation2 + $0x88] sm:$0xff] %v6096_v2  ;;  %v11184_v62 = vadd.f32 %v11183_v58, %v5723_v30  ;;  %v5725_v11 = vpop.f32.mrb[109].mxu1  ;;  %v7001_v55 = vld [vmem:[#allocation2 + $0x69] sm:$0xff]  ;;  %v7002_v36 = vld [vmem:[#allocation2 + $0x71] sm:$0xff] }
 0x680   : > { %v5726_v56 = vpop.f32.mrb[110].mxu1  ;;  %7971 = vmatmul.mubr.bf16.gmra.mrb[168].mxu1 %v6281_v29  ;;  %v7046_v33 = vpack.c.bf16 %v7002_v36, %v7001_v55  ;;  %v11187_v29 = vadd.f32 %v14927_v6, %v14782_v57  ;;  %v6241_v54 = vld [vmem:[#allocation2 + $0x77] sm:$0xff] }
 0x681   : > { %v5949_v48 = vadd.f32 %v11184_v62, %v14864_v42  ;;  %v11186_v53 = vadd.f32 %v11185_v45, %v5726_v56  ;;  %v5728_v7 = vpop.f32.mrb[111].mxu1  ;;  %12514 = vmatprep.mubr.msk.bf16.mxu1 %vm14199_vm6, %v12513_v31  ;;  %v15122_v11 = vld [vmem:[#allocation2 + $0x71] sm:$0xff] }
 0x682   : > { %11032 = vmatmul.mubr.bf16.gmra.mrb[244].mxu0 %v7046_v33  ;;  %16580 = vst [vmem:[#allocation82_spill] sm:$0xff] %v15122_v11  ;;  %v15124_v55 = vld [vmem:[#allocation2 + $0x78] sm:$0xff] }
 0x683   : > { %v6097_v60 = vmax.f32 %v5949_v48, 0.0  ;;  %v15108_v58 = vadd.f32 %v11186_v53, %v14868_v34  ;;  %v11189_v34 = vadd.f32 %v14927_v6, %v14784_v37  ;;  %16581 = vst [vmem:[#allocation83_spill] sm:$0xff] %v15124_v55  ;;  %v16628_v11 = vld [vmem:[#allocation57_spill] sm:$0xff] }
 0x685   : > { %v6145_v42 = vsel %vm3195_vm3, %v6097_v60, 0.0  ;;  %v6098_v7 = vmax.f32 %v15108_v58, 0.0  ;;  %v6242_v56 = vld [vmem:[#allocation2 + $0x7f] sm:$0xff] }
 0x686   : > { %v7003_v5 = vld [vmem:[#allocation2 + $0x79] sm:$0xff]  ;;  %6193 = vst [vmem:[#allocation2 + $0x90] sm:$0xff] %v6145_v42  ;;  %v5731_v33 = vpop.f32.mrb[112].mxu1  ;;  %v6282_v10 = vpack.c.bf16 %v6242_v56, %v6241_v54  ;;  %v7004_v30 = vld [vmem:[#allocation2 + $0x81] sm:$0xff] }
 0x687   : > { %v15116_v31 = vld [vmem:[#allocation2 + $0x79] sm:$0xff]  ;;  %v6146_v57 = vsel %vm3190_vm0, %v6098_v7, 0.0  ;;  %v11188_v53 = vadd.f32 %v11187_v29, %v5731_v33  ;;  %v5733_v45 = vpop.f32.mrb[113].mxu1  ;;  %v7047_v62 = vpack.c.bf16 %v7004_v30, %v7003_v5  ;;  %v12516_v5 = vpack.c.bf16 %v6097_v60, %v6096_v2 }
 0x688   : > { %16579 = vst [vmem:[#allocation81_spill] sm:$0xff] %v15116_v31  ;;  %v15126_v36 = vld [vmem:[#allocation2 + $0x80] sm:$0xff]  ;;  %6194 = vst [vmem:[#allocation2 + $0x98] sm:$0xff] %v6146_v57  ;;  %v5734_v48 = vpop.f32.mrb[114].mxu1  ;;  %7979 = vmatmul.mubr.bf16.gmra.mrb[172].mxu1 %v6282_v10  ;;  %v12339_v58 = vld [vmem:[#allocation10 + $0xf8] sm:$0xff]   ;;  %v11191_v30 = vadd.f32 %v14927_v6, %v14788_v59  ;;  %v11193_v2 = vadd.f32 %v14927_v6, %v14790_v44  ;;  %v11195_v44 = vadd.f32 %v14927_v6, %v14794_v18 }
 0x689   : > { %16582 = vst [vmem:[#allocation84_spill] sm:$0xff] %v15126_v36  ;;  %v5957_v29 = vadd.f32 %v11188_v53, %v14878_v40  ;;  %v11190_v54 = vadd.f32 %v11189_v34, %v5734_v48  ;;  %v5736_v56 = vpop.f32.mrb[115].mxu1  ;;  %11035 = vmatprep.mubr.bf16.mxu0 %v7047_v62  ;;  %12517 = vmatprep.mubr.msk.bf16.mxu1 %vm14151_vm4, %v12516_v5  ;;  %v6243_v45 = vld [vmem:[#allocation2 + $0x87] sm:$0xff] }
 0x68a   : > { %8146 = vmatpush1.bf16.msra.mxu1 %v12339_v58  ;;  %v15139_v34 = vld [vmem:[#allocation2 + $0x81] sm:$0xff] }
 0x68b   : > { %v6099_v33 = vmax.f32 %v5957_v29, 0.0  ;;  %v5960_v10 = vadd.f32 %v11190_v54, %v14882_v24  ;;  %8340 = vmatprep.subr.bf16.mxu1 %v16525_v41  ;;  %16583 = vst [vmem:[#allocation85_spill] sm:$0xff] %v15139_v34  ;;  %v15145_v48 = vld [vmem:[#allocation2 + $0x88] sm:$0xff] }
 0x68c   : > { %16585 = vst [vmem:[#allocation87_spill] sm:$0xff] %v15145_v48 }
 0x68d   : > { %6195 = vst [vmem:[#allocation2 + $0xa0] sm:$0xff] %v6099_v33  ;;  %v6100_v57 = vmax.f32 %v5960_v10, 0.0  ;;  %v6244_v40 = vld [vmem:[#allocation2 + $0x8f] sm:$0xff]  ;;  %v12519_v42 = vpack.c.bf16 %v6099_v33, %v6098_v7 }
 0x68e   : > { %v5739_v60 = vpop.f32.mrb[116].mxu1  ;;  %v6283_v53 = vpack.c.bf16 %v6244_v40, %v6243_v45  ;;  %v15143_v62 = vld [vmem:[#allocation2 + $0x89] sm:$0xff] }
 0x68f   : > { %16584 = vst [vmem:[#allocation86_spill] sm:$0xff] %v15143_v62  ;;  %v15147_v24 = vld [vmem:[#allocation2 + $0x90] sm:$0xff]  ;;  %v6148_v59 = vsel %vm3195_vm3, %v6100_v57, 0.0  ;;  %v11192_v58 = vadd.f32 %v11191_v30, %v5739_v60  ;;  %v5741_v29 = vpop.f32.mrb[117].mxu1 }
 0x690   : > { %16586 = vst [vmem:[#allocation88_spill] sm:$0xff] %v15147_v24  ;;  %v7005_v54 = vld [vmem:[#allocation2 + $0x89] sm:$0xff]  ;;  %v7006_v56 = vld [vmem:[#allocation2 + $0x91] sm:$0xff]  ;;  %6196 = vst [vmem:[#allocation2 + $0xa8] sm:$0xff] %v6148_v59  ;;  %v5742_v10 = vpop.f32.mrb[118].mxu1  ;;  %7987 = vmatmul.mubr.bf16.gmra.mrb[176].mxu1 %v6283_v53 }
 0x691   : > { %v7048_v45 = vpack.c.bf16 %v7006_v56, %v7005_v54  ;;  %v5965_v40 = vadd.f32 %v11192_v58, %v14876_v23  ;;  %v11194_v37 = vadd.f32 %v11193_v2, %v5742_v10  ;;  %v5744_v1 = vpop.f32.mrb[119].mxu1  ;;  %12520 = vmatprep.mubr.msk.bf16.mxu1 %vm14171_vm5, %v12519_v42  ;;  %v6245_v29 = vld [vmem:[#allocation2 + $0x97] sm:$0xff]  ;;  %v11197_v2 = vadd.f32 %v14927_v6, %v14796_v9 }
 0x692   : > { %v15163_v53 = vld [vmem:[#allocation2 + $0x91] sm:$0xff] }
 0x693   : > { %11036 = vmatmul.mubr.bf16.gmra.mrb[248].mxu0 %v7048_v45  ;;  %v6101_v30 = vmax.f32 %v5965_v40, 0.0  ;;  %v5968_v60 = vadd.f32 %v11194_v37, %v14880_v22  ;;  %16587 = vst [vmem:[#allocation89_spill] sm:$0xff] %v15163_v53  ;;  %v15172_v22 = vld [vmem:[#allocation2 + $0x98] sm:$0xff] }
 0x694   : > { %v15161_v59 = vld [vmem:[#allocation2 + $0x9f] sm:$0xff]  ;;  %16589 = vst [vmem:[#allocation91_spill] sm:$0xff] %v15172_v22 }
 0x695   : > { %v15165_v54 = vld [vmem:[#allocation2 + $0x99] sm:$0xff]  ;;  %v6149_v23 = vsel %vm3190_vm0, %v6101_v30, 0.0  ;;  %v6102_v1 = vmax.f32 %v5968_v60, 0.0  ;;  %v6284_v7 = vpack.c.bf16 %v15161_v59, %v6245_v29  ;;  %v12522_v22 = vpack.c.bf16 %v6101_v30, %v6100_v57 }
 0x696   : > { %16588 = vst [vmem:[#allocation90_spill] sm:$0xff] %v15165_v54  ;;  %v15174_v37 = vld [vmem:[#allocation2 + $0xa0] sm:$0xff]  ;;  %6197 = vst [vmem:[#allocation2 + $0xb0] sm:$0xff] %v6149_v23  ;;  %v5747_v18 = vpop.f32.mrb[120].mxu1  ;;  %v11201_v57 = vadd.f32 %v14927_v6, %v14804_v27  ;;  %v16604_v24 = vld [vmem:[#allocation49_spill] sm:$0xff] }
 0x697   : > { %16590 = vst [vmem:[#allocation92_spill] sm:$0xff] %v15174_v37  ;;  %6198 = vst [vmem:[#allocation2 + $0xb8] sm:$0xff] %v6102_v1  ;;  %v11196_v58 = vadd.f32 %v11195_v44, %v5747_v18  ;;  %v5749_v56 = vpop.f32.mrb[121].mxu1  ;;  %v7007_v10 = vld [vmem:[#allocation2 + $0x99] sm:$0xff]  ;;  %v7008_v45 = vld [vmem:[#allocation2 + $0xa1] sm:$0xff]  ;;  %v11199_v18 = vadd.f32 %v14927_v6, %v14802_v51 }
 0x698   : > { %v15180_v40 = vld [vmem:[#allocation2 + $0xa7] sm:$0xff]  ;;  %v5750_v60 = vpop.f32.mrb[122].mxu1  ;;  %7995 = vmatmul.mubr.bf16.gmra.mrb[180].mxu1 %v6284_v7  ;;  %v7049_v29 = vpack.c.bf16 %v7008_v45, %v7007_v10 }
 0x699   : > { %v5973_v42 = vadd.f32 %v11196_v58, %v14888_v61  ;;  %v11198_v5 = vadd.f32 %v11197_v2, %v5750_v60  ;;  %v5752_v33 = vpop.f32.mrb[123].mxu1  ;;  %12523 = vmatprep.mubr.msk.bf16.mxu1 %vm14199_vm6, %v12522_v22  ;;  %v15206_v45 = vld [vmem:[#allocation2 + $0xa8] sm:$0xff]  ;;  %v16594_v58 = vld [vmem:[#allocation41_spill] sm:$0xff]  ;;  %v16622_v54 = vld [vmem:[#allocation58_spill] sm:$0xff] }
 0x69a   : > { %11039 = vmatprep.mubr.bf16.mxu0 %v7049_v29  ;;  %16591 = vst [vmem:[#allocation93_spill] sm:$0xff] %v15206_v45 }
 0x69b   : > { %v6103_v9 = vmax.f32 %v5973_v42, 0.0  ;;  %v5976_v44 = vadd.f32 %v11198_v5, %v14892_v46 }
 0x69d   : > { %v6151_v7 = vsel %vm3195_vm3, %v6103_v9, 0.0  ;;  %v6104_v56 = vmax.f32 %v5976_v44, 0.0  ;;  %v15192_v10 = vld [vmem:[#allocation2 + $0xaf] sm:$0xff] }
 0x69e   : > { %v7009_v61 = vld [vmem:[#allocation2 + $0xa9] sm:$0xff]  ;;  %6199 = vst [vmem:[#allocation2 + $0xc0] sm:$0xff] %v6151_v7  ;;  %v5755_v30 = vpop.f32.mrb[124].mxu1  ;;  %v6285_v42 = vpack.c.bf16 %v15192_v10, %v15180_v40  ;;  %v7010_v22 = vld [vmem:[#allocation2 + $0xb1] sm:$0xff] }
 0x69f   : > { %v15198_v46 = vld [vmem:[#allocation2 + $0xb7] sm:$0xff]  ;;  %v6152_v51 = vsel %vm3190_vm0, %v6104_v56, 0.0  ;;  %v11200_v5 = vadd.f32 %v11199_v18, %v5755_v30  ;;  %v5757_v33 = vpop.f32.mrb[125].mxu1  ;;  %v15202_v2 = vpack.c.bf16 %v7010_v22, %v7009_v61  ;;  %v12525_v61 = vpack.c.bf16 %v6103_v9, %v6102_v1  ;;  %v16593_v22 = vld [vmem:[#allocation30_spill] sm:$0xff] }
 0x6a0   : > { %v15208_v27 = vld [vmem:[#allocation2 + $0xb0] sm:$0xff]  ;;  %6200 = vst [vmem:[#allocation2 + $0xc8] sm:$0xff] %v6152_v51  ;;  %v5758_v60 = vpop.f32.mrb[126].mxu1  ;;  %8003 = vmatmul.mubr.bf16.gmra.mrb[184].mxu1 %v6285_v42  ;;  %v11203_v51 = vadd.f32 %v14927_v6, %v16594_v58  ;;  %v16597_v9 = vld [vmem:[#allocation42_spill] sm:$0xff] }
 0x6a1   : > { %16592 = vst [vmem:[#allocation94_spill] sm:$0xff] %v15208_v27  ;;  %v5981_v44 = vadd.f32 %v11200_v5, %v14886_v47  ;;  %v11202_v7 = vadd.f32 %v11201_v57, %v5758_v60  ;;  %v5760_v18 = vpop.f32.mrb[127].mxu1  ;;  %11040 = vmatmul.mubr.bf16.gmra.mrb[252].mxu0 %v15202_v2  ;;  %12526 = vmatprep.mubr.msk.bf16.mxu1 %vm14151_vm4, %v12525_v61  ;;  %v15223_v57 = vld [vmem:[#allocation2 + $0xb8] sm:$0xff]  ;;  %v16598_v27 = vld [vmem:[#allocation50_spill] sm:$0xff] }
 0x6a2   : > { %16595 = vst [vmem:[#allocation30_spill] sm:$0xff] %v15223_v57  ;;  %v11205_v5 = vadd.f32 %v14927_v6, %v16597_v9 }
 0x6a3   : > { %v6105_v30 = vmax.f32 %v5981_v44, 0.0  ;;  %v5984_v33 = vadd.f32 %v11202_v7, %v16593_v22  ;;  %v16599_v22 = vld [vmem:[#allocation52_spill] sm:$0xff] }
 0x6a5   : > { %6201 = vst [vmem:[#allocation2 + $0xd0] sm:$0xff] %v6105_v30  ;;  %v6106_v42 = vmax.f32 %v5984_v33, 0.0  ;;  %v15219_v23 = vld [vmem:[#allocation2 + $0xbf] sm:$0xff] }
 0x6a6   : > { %v5763_v29 = vpop.f32.mrb[128].mxu1  ;;  %v6286_v47 = vpack.c.bf16 %v15219_v23, %v15198_v46  ;;  %v15225_v1 = vld [vmem:[#allocation2 + $0xc0] sm:$0xff] }
 0x6a7   : > { %16596 = vst [vmem:[#allocation41_spill] sm:$0xff] %v15225_v1  ;;  %v6154_v60 = vsel %vm3195_vm3, %v6106_v42, 0.0  ;;  %v11204_v44 = vadd.f32 %v11203_v51, %v5763_v29  ;;  %v5765_v58 = vpop.f32.mrb[129].mxu1  ;;  %v7011_v7 = vld [vmem:[#allocation2 + $0xb9] sm:$0xff]  ;;  %v7012_v18 = vld [vmem:[#allocation2 + $0xc1] sm:$0xff]  ;;  %v12528_v51 = vpack.c.bf16 %v6105_v30, %v6104_v56 }
 0x6a8   : > { %v15231_v61 = vld [vmem:[#allocation2 + $0xc7] sm:$0xff]  ;;  %6202 = vst [vmem:[#allocation2 + $0xd8] sm:$0xff] %v6154_v60  ;;  %v5766_v33 = vpop.f32.mrb[130].mxu1  ;;  %8011 = vmatmul.mubr.bf16.gmra.mrb[188].mxu1 %v6286_v47  ;;  %v15235_v45 = vpack.c.bf16 %v7012_v18, %v7011_v7 }
 0x6a9   : > { %v5989_v37 = vadd.f32 %v11204_v44, %v16598_v27  ;;  %v11206_v48 = vadd.f32 %v11205_v5, %v5766_v33  ;;  %v5768_v29 = vpop.f32.mrb[131].mxu1  ;;  %12529 = vmatprep.mubr.msk.bf16.mxu1 %vm14171_vm5, %v12528_v51  ;;  %v16600_v47 = vld [vmem:[#allocation43_spill] sm:$0xff]  ;;  %v16603_v44 = vld [vmem:[#allocation44_spill] sm:$0xff] }
 0x6aa   : > { %11043 = vmatprep.mubr.bf16.mxu0 %v15235_v45  ;;  %v11207_v7 = vadd.f32 %v14927_v6, %v16600_v47  ;;  %v15252_v30 = vld [vmem:[#allocation2 + $0xc8] sm:$0xff] }
 0x6ab   : > { %v6107_v58 = vmax.f32 %v5989_v37, 0.0  ;;  %v5992_v60 = vadd.f32 %v11206_v48, %v16599_v22  ;;  %16601 = vst [vmem:[#allocation42_spill] sm:$0xff] %v15252_v30  ;;  %v11209_v22 = vadd.f32 %v14927_v6, %v16603_v44 }
 0x6ac   : > { %v15244_v57 = vld [vmem:[#allocation2 + $0xcf] sm:$0xff] }
 0x6ad   : > { %v6155_v18 = vsel %vm3190_vm0, %v6107_v58, 0.0  ;;  %v6108_v27 = vmax.f32 %v5992_v60, 0.0  ;;  %v6287_v56 = vpack.c.bf16 %v15244_v57, %v15231_v61  ;;  %v15254_v5 = vld [vmem:[#allocation2 + $0xd0] sm:$0xff] }
 0x6ae   : > { %16602 = vst [vmem:[#allocation50_spill] sm:$0xff] %v15254_v5  ;;  %6203 = vst [vmem:[#allocation2 + $0xe0] sm:$0xff] %v6155_v18  ;;  %v5771_v37 = vpop.f32.mrb[132].mxu1  ;;  %v7013_v51 = vld [vmem:[#allocation2 + $0xc9] sm:$0xff]  ;;  %v12531_v5 = vpack.c.bf16 %v6107_v58, %v6106_v42 }
 0x6af   : > { %6204 = vst [vmem:[#allocation2 + $0xe8] sm:$0xff] %v6108_v27  ;;  %v11208_v33 = vadd.f32 %v11207_v7, %v5771_v37  ;;  %v5773_v29 = vpop.f32.mrb[133].mxu1  ;;  %v7014_v60 = vld [vmem:[#allocation2 + $0xd1] sm:$0xff]  ;;  %v16605_v37 = vld [vmem:[#allocation51_spill] sm:$0xff] }
 0x6b0   : > { %v15260_v47 = vld [vmem:[#allocation2 + $0xd7] sm:$0xff]  ;;  %v5774_v9 = vpop.f32.mrb[134].mxu1  ;;  %8019 = vmatmul.mubr.bf16.gmra.mrb[192].mxu1 %v6287_v56  ;;  %v15262_v1 = vpack.c.bf16 %v7014_v60, %v7013_v51 }
 0x6b1   : > { %v5997_v55 = vadd.f32 %v11208_v33, %v16604_v24  ;;  %v11210_v48 = vadd.f32 %v11209_v22, %v5774_v9  ;;  %v5776_v30 = vpop.f32.mrb[135].mxu1  ;;  %12532 = vmatprep.mubr.msk.bf16.mxu1 %vm14199_vm6, %v12531_v5  ;;  %v16606_v29 = vld [vmem:[#allocation45_spill] sm:$0xff]  ;;  %v16607_v9 = vld [vmem:[#allocation46_spill] sm:$0xff] }
 0x6b2   : > { %11044 = vmatmul.mubr.bf16.gmra.mrb[0].mxu0 %v15262_v1  ;;  %v11211_v56 = vadd.f32 %v14927_v6, %v16606_v29  ;;  %v11213_v42 = vadd.f32 %v14927_v6, %v16607_v9  ;;  %v15289_v29 = vld [vmem:[#allocation2 + $0xd8] sm:$0xff] }
 0x6b3   : > { %v6109_v7 = vmax.f32 %v5997_v55, 0.0  ;;  %v6000_v44 = vadd.f32 %v11210_v48, %v16605_v37  ;;  %16608 = vst [vmem:[#allocation52_spill] sm:$0xff] %v15289_v29 }
 0x6b5   : > { %v6157_v51 = vsel %vm3195_vm3, %v6109_v7, 0.0  ;;  %v6110_v60 = vmax.f32 %v6000_v44, 0.0  ;;  %v15275_v18 = vld [vmem:[#allocation2 + $0xdf] sm:$0xff]  ;;  %v16612_v44 = vld [vmem:[#allocation47_spill] sm:$0xff] }
 0x6b6   : > { %v7015_v24 = vld [vmem:[#allocation2 + $0xd9] sm:$0xff]  ;;  %6205 = vst [vmem:[#allocation2 + $0xf0] sm:$0xff] %v6157_v51  ;;  %v5779_v58 = vpop.f32.mrb[136].mxu1  ;;  %v6288_v55 = vpack.c.bf16 %v15275_v18, %v15260_v47  ;;  %v7016_v30 = vld [vmem:[#allocation2 + $0xe1] sm:$0xff] }
 0x6b7   : > { %v15281_v5 = vld [vmem:[#allocation2 + $0xe7] sm:$0xff]  ;;  %v6158_v48 = vsel %vm3190_vm0, %v6110_v60, 0.0  ;;  %v11212_v22 = vadd.f32 %v11211_v56, %v5779_v58  ;;  %v5781_v33 = vpop.f32.mrb[137].mxu1  ;;  %v15285_v37 = vpack.c.bf16 %v7016_v30, %v7015_v24  ;;  %v12534_v24 = vpack.c.bf16 %v6109_v7, %v6108_v27  ;;  %v16611_v30 = vld [vmem:[#allocation56_spill] sm:$0xff] }
 0x6b8   : > { %v15291_v51 = vld [vmem:[#allocation2 + $0xe0] sm:$0xff]  ;;  %6206 = vst [vmem:[#allocation2 + $0xf8] sm:$0xff] %v6158_v48  ;;  %v5782_v9 = vpop.f32.mrb[138].mxu1  ;;  %8027 = vmatmul.mubr.bf16.gmra.mrb[196].mxu1 %v6288_v55  ;;  %v11215_v48 = vadd.f32 %v14927_v6, %v16612_v44  ;;  %v16615_v7 = vld [vmem:[#allocation48_spill] sm:$0xff] }
 0x6b9   : > { %16609 = vst [vmem:[#allocation43_spill] sm:$0xff] %v15291_v51  ;;  %v6005_v49 = vadd.f32 %v11212_v22, %v16610_v63  ;;  %v11214_v17 = vadd.f32 %v11213_v42, %v5782_v9  ;;  %v5784_v56 = vpop.f32.mrb[139].mxu1  ;;  %11047 = vmatprep.mubr.bf16.mxu0 %v15285_v37  ;;  %12535 = vmatprep.mubr.msk.bf16.mxu1 %vm14151_vm4, %v12534_v24  ;;  %v15306_v42 = vld [vmem:[#allocation2 + $0xe8] sm:$0xff]  ;;  %v16616_v51 = vld [vmem:[#allocation53_spill] sm:$0xff] }
 0x6ba   : > { %16613 = vst [vmem:[#allocation44_spill] sm:$0xff] %v15306_v42 }
 0x6bb   : > { %v6111_v58 = vmax.f32 %v6005_v49, 0.0  ;;  %v6008_v33 = vadd.f32 %v11214_v17, %v16611_v30  ;;  %v11217_v49 = vadd.f32 %v14927_v6, %v16615_v7  ;;  %v16617_v30 = vld [vmem:[#allocation55_spill] sm:$0xff] }
 0x6bd   : > { %6207 = vst [vmem:[#allocation2 + $0x100] sm:$0xff] %v6111_v58  ;;  %v6112_v55 = vmax.f32 %v6008_v33, 0.0  ;;  %v15302_v16 = vld [vmem:[#allocation2 + $0xef] sm:$0xff] }
 0x6be   : > { %v5787_v36 = vpop.f32.mrb[140].mxu1  ;;  %v6289_v63 = vpack.c.bf16 %v15302_v16, %v15281_v5  ;;  %v15308_v27 = vld [vmem:[#allocation2 + $0xf0] sm:$0xff] }
 0x6bf   : > { %16614 = vst [vmem:[#allocation49_spill] sm:$0xff] %v15308_v27  ;;  %v6160_v17 = vsel %vm3195_vm3, %v6112_v55, 0.0  ;;  %v11216_v22 = vadd.f32 %v11215_v48, %v5787_v36  ;;  %v5789_v44 = vpop.f32.mrb[141].mxu1  ;;  %v7017_v9 = vld [vmem:[#allocation2 + $0xe9] sm:$0xff]  ;;  %v7018_v56 = vld [vmem:[#allocation2 + $0xf1] sm:$0xff]  ;;  %v12537_v48 = vpack.c.bf16 %v6111_v58, %v6110_v60 }
 0x6c0   : > { %v15314_v24 = vld [vmem:[#allocation2 + $0xf7] sm:$0xff]  ;;  %6208 = vst [vmem:[#allocation2 + $0x108] sm:$0xff] %v6160_v17  ;;  %v5790_v33 = vpop.f32.mrb[142].mxu1  ;;  %8035 = vmatmul.mubr.bf16.gmra.mrb[200].mxu1 %v6289_v63  ;;  %v15318_v29 = vpack.c.bf16 %v7018_v56, %v7017_v9 }
 0x6c1   : > { %v6013_v12 = vadd.f32 %v11216_v22, %v16616_v51  ;;  %v11218_v53 = vadd.f32 %v11217_v49, %v5790_v33  ;;  %v5792_v36 = vpop.f32.mrb[143].mxu1  ;;  %12538 = vmatprep.mubr.msk.bf16.mxu1 %vm14171_vm5, %v12537_v48  ;;  %v16618_v63 = vld [vmem:[#allocation24_spill] sm:$0xff]  ;;  %v15335_v58 = vld [vmem:[#allocation2 + $0xf8] sm:$0xff] }
 0x6c2   : > { %11048 = vmatmul.mubr.bf16.gmra.mrb[4].mxu0 %v15318_v29  ;;  %v5121_v9 = vadd.f32 %v14927_v6, %v16618_v63  ;;  %16619 = vst [vmem:[#allocation51_spill] sm:$0xff] %v15335_v58  ;;  %v16621_v22 = vld [vmem:[#allocation25_spill] sm:$0xff] }
 0x6c3   : > { %v6113_v44 = vmax.f32 %v6013_v12, 0.0  ;;  %v6016_v17 = vadd.f32 %v11218_v53, %v16617_v30  ;;  %v5124_v30 = vadd.f32 %v14927_v6, %v16621_v22  ;;  %v16624_v22 = vld [vmem:[#allocation26_spill] sm:$0xff] }
 0x6c4   : > { %v15327_v42 = vld [vmem:[#allocation2 + $0xff] sm:$0xff] }
 0x6c5   : > { %v6161_v56 = vsel %vm3190_vm0, %v6113_v44, 0.0  ;;  %v6114_v51 = vmax.f32 %v6016_v17, 0.0  ;;  %v6290_v60 = vpack.c.bf16 %v15327_v42, %v15314_v24  ;;  %v15337_v49 = vld [vmem:[#allocation2 + $0x100] sm:$0xff] }
 0x6c6   : > { %16620 = vst [vmem:[#allocation45_spill] sm:$0xff] %v15337_v49  ;;  %6209 = vst [vmem:[#allocation2 + $0x110] sm:$0xff] %v6161_v56  ;;  %v5795_v12 = vpop.f32.mrb[48].mxu1  ;;  %v7019_v48 = vld [vmem:[#allocation2 + $0xf9] sm:$0xff]  ;;  %v12540_v49 = vpack.c.bf16 %v6113_v44, %v6112_v55 }
 0x6c7   : > { %6210 = vst [vmem:[#allocation2 + $0x118] sm:$0xff] %v6114_v51  ;;  %v11220_v33 = vadd.f32 %v5795_v12, %v5121_v9  ;;  %v5797_v36 = vpop.f32.mrb[49].mxu1  ;;  %v7020_v17 = vld [vmem:[#allocation2 + $0x101] sm:$0xff]  ;;  %v16623_v9 = vld [vmem:[#allocation60_spill] sm:$0xff] }
 0x6c8   : > { %v15343_v63 = vld [vmem:[#allocation2 + $0x107] sm:$0xff]  ;;  %v5798_v7 = vpop.f32.mrb[50].mxu1  ;;  %8043 = vmatmul.mubr.bf16.gmra.mrb[204].mxu1 %v6290_v60  ;;  %v15345_v27 = vpack.c.bf16 %v7020_v17, %v7019_v48  ;;  %v15357_v60 = vld [vmem:[%s16383_s4] ss:$0 sm:$0xff] }
 0x6c9   : > { %v6021_v34 = vadd.f32 %v11220_v33, %v16622_v54  ;;  %v11222_v53 = vadd.f32 %v5798_v7, %v5124_v30  ;;  %v5800_v58 = vpop.f32.mrb[51].mxu1  ;;  %12541 = vmatprep.mubr.msk.bf16.mxu1 %vm14199_vm6, %v12540_v49  ;;  %v5129_v36 = vadd.f32 %v15357_v60, %v16624_v22  ;;  %v15377_v56 = vld [vmem:[#allocation2 + $0x108] sm:$0xff]  ;;  %v16630_v22 = vld [vmem:[#allocation28_spill] sm:$0xff] }
 0x6ca   : > { %11051 = vmatprep.mubr.bf16.mxu0 %v15345_v27  ;;  %v16625_v58 = vld [vmem:[#allocation27_spill] sm:$0xff]  ;;  %16626 = vst [vmem:[#allocation46_spill] sm:$0xff] %v15377_v56  ;;  %v16634_v56 = vld [vmem:[#allocation62_spill] sm:$0xff] }
 0x6cb   : > { %v6115_v6 = vmax.f32 %v6021_v34, 0.0  ;;  %v6024_v12 = vadd.f32 %v11222_v53, %v16623_v9  ;;  %v5132_v34 = vadd.f32 %v15357_v60, %v16625_v58 }
 0x6cd   : > { %v6163_v54 = vsel %vm3195_vm3, %v6115_v6, 0.0  ;;  %v6116_v55 = vmax.f32 %v6024_v12, 0.0  ;;  %v15363_v7 = vld [vmem:[#allocation2 + $0x10f] sm:$0xff] }
 0x6ce   : > { %v7021_v44 = vld [vmem:[#allocation2 + $0x109] sm:$0xff]  ;;  %6211 = vst [vmem:[#allocation2 + $0x120] sm:$0xff] %v6163_v54  ;;  %v5803_v49 = vpop.f32.mrb[52].mxu1  ;;  %v6291_v53 = vpack.c.bf16 %v15363_v7, %v15343_v63  ;;  %v7022_v30 = vld [vmem:[#allocation2 + $0x111] sm:$0xff] }
 0x6cf   : > { %v15369_v33 = vld [vmem:[#allocation2 + $0x117] sm:$0xff]  ;;  %v6164_v48 = vsel %vm3190_vm0, %v6116_v55, 0.0  ;;  %v11224_v17 = vadd.f32 %v5803_v49, %v5129_v36  ;;  %v5805_v9 = vpop.f32.mrb[53].mxu1  ;;  %v15373_v12 = vpack.c.bf16 %v7022_v30, %v7021_v44  ;;  %v12543_v44 = vpack.c.bf16 %v6115_v6, %v6114_v51  ;;  %v16629_v30 = vld [vmem:[#allocation59_spill] sm:$0xff] }
 0x6d0   : > { %v15379_v54 = vld [vmem:[#allocation2 + $0x110] sm:$0xff]  ;;  %6212 = vst [vmem:[#allocation2 + $0x128] sm:$0xff] %v6164_v48  ;;  %v5806_v58 = vpop.f32.mrb[54].mxu1  ;;  %8051 = vmatmul.mubr.bf16.gmra.mrb[208].mxu1 %v6291_v53  ;;  %v5137_v48 = vadd.f32 %v15357_v60, %v16630_v22  ;;  %v16633_v6 = vld [vmem:[#allocation29_spill] sm:$0xff] }
 0x6d1   : > { %16627 = vst [vmem:[#allocation54_spill] sm:$0xff] %v15379_v54  ;;  %v6029_v31 = vadd.f32 %v11224_v17, %v16628_v11  ;;  %v11226_v50 = vadd.f32 %v5806_v58, %v5132_v34  ;;  %v5808_v36 = vpop.f32.mrb[55].mxu1  ;;  %11052 = vmatmul.mubr.bf16.gmra.mrb[8].mxu0 %v15373_v12  ;;  %12544 = vmatprep.mubr.msk.bf16.mxu1 %vm14151_vm4, %v12543_v44  ;;  %v15394_v34 = vld [vmem:[#allocation2 + $0x118] sm:$0xff] }
 0x6d2   : > { %16631 = vst [vmem:[#allocation56_spill] sm:$0xff] %v15394_v34 }
 0x6d3   : > { %v6117_v49 = vmax.f32 %v6029_v31, 0.0  ;;  %v6032_v9 = vadd.f32 %v11226_v50, %v16629_v30  ;;  %v5140_v31 = vadd.f32 %v15357_v60, %v16633_v6  ;;  %v16635_v30 = vld [vmem:[#allocation64_spill] sm:$0xff] }
 0x6d5   : > { %6213 = vst [vmem:[#allocation2 + $0x130] sm:$0xff] %v6117_v49  ;;  %v6118_v53 = vmax.f32 %v6032_v9, 0.0  ;;  %v15390_v19 = vld [vmem:[#allocation2 + $0x11f] sm:$0xff] }
 0x6d6   : > { %v5811_v62 = vpop.f32.mrb[56].mxu1  ;;  %v6292_v11 = vpack.c.bf16 %v15390_v19, %v15369_v33  ;;  %v15396_v51 = vld [vmem:[#allocation2 + $0x120] sm:$0xff] }
 0x6d7   : > { %16632 = vst [vmem:[#allocation47_spill] sm:$0xff] %v15396_v51  ;;  %v6166_v50 = vsel %vm3195_vm3, %v6118_v53, 0.0  ;;  %v11228_v17 = vadd.f32 %v5811_v62, %v5137_v48  ;;  %v5813_v22 = vpop.f32.mrb[57].mxu1  ;;  %v7023_v58 = vld [vmem:[#allocation2 + $0x119] sm:$0xff]  ;;  %v7024_v36 = vld [vmem:[#allocation2 + $0x121] sm:$0xff]  ;;  %v12546_v48 = vpack.c.bf16 %v6117_v49, %v6116_v55 }
 0x6d8   : > { %v15402_v44 = vld [vmem:[#allocation2 + $0x127] sm:$0xff]  ;;  %6214 = vst [vmem:[#allocation2 + $0x138] sm:$0xff] %v6166_v50  ;;  %v5814_v9 = vpop.f32.mrb[58].mxu1  ;;  %8059 = vmatmul.mubr.bf16.gmra.mrb[212].mxu1 %v6292_v11  ;;  %v15406_v54 = vpack.c.bf16 %v7024_v36, %v7023_v58 }
 0x6d9   : > { %v6037_v3 = vadd.f32 %v11228_v17, %v16634_v56  ;;  %v11230_v38 = vadd.f32 %v5814_v9, %v5140_v31  ;;  %v5816_v62 = vpop.f32.mrb[59].mxu1  ;;  %12547 = vmatprep.mubr.msk.bf16.mxu1 %vm14171_vm5, %v12546_v48  ;;  %v16636_v11 = vld [vmem:[#allocation31_spill] sm:$0xff]  ;;  %v16639_v17 = vld [vmem:[#allocation32_spill] sm:$0xff] }
 0x6da   : > { %11055 = vmatprep.mubr.bf16.mxu0 %v15406_v54  ;;  %v5145_v58 = vadd.f32 %v15357_v60, %v16636_v11  ;;  %v15423_v49 = vld [vmem:[#allocation2 + $0x128] sm:$0xff] }
 0x6db   : > { %v6119_v22 = vmax.f32 %v6037_v3, 0.0  ;;  %v6040_v50 = vadd.f32 %v11230_v38, %v16635_v30  ;;  %16637 = vst [vmem:[#allocation48_spill] sm:$0xff] %v15423_v49  ;;  %v5148_v30 = vadd.f32 %v15357_v60, %v16639_v17 }
 0x6dc   : > { %v15415_v51 = vld [vmem:[#allocation2 + $0x12f] sm:$0xff] }
 0x6dd   : > { %v6167_v36 = vsel %vm3190_vm0, %v6119_v22, 0.0  ;;  %v6120_v56 = vmax.f32 %v6040_v50, 0.0  ;;  %v6293_v55 = vpack.c.bf16 %v15415_v51, %v15402_v44  ;;  %v15425_v31 = vld [vmem:[#allocation2 + $0x130] sm:$0xff]  ;;  %v12549_v49 = vpack.c.bf16 %v6119_v22, %v6118_v53 }
 0x6de   : > { %16638 = vst [vmem:[#allocation53_spill] sm:$0xff] %v15425_v31  ;;  %6215 = vst [vmem:[#allocation2 + $0x140] sm:$0xff] %v6167_v36  ;;  %v5819_v3 = vpop.f32.mrb[60].mxu1  ;;  %v7025_v48 = vld [vmem:[#allocation2 + $0x129] sm:$0xff] }
 0x6df   : > { %6216 = vst [vmem:[#allocation2 + $0x148] sm:$0xff] %v6120_v56  ;;  %v11232_v9 = vadd.f32 %v5819_v3, %v5145_v58  ;;  %v5821_v62 = vpop.f32.mrb[61].mxu1  ;;  %v7026_v50 = vld [vmem:[#allocation2 + $0x131] sm:$0xff]  ;;  %v16642_v3 = vld [vmem:[#allocation63_spill] sm:$0xff] }
 0x6e0   : > { %v15431_v11 = vld [vmem:[#allocation2 + $0x137] sm:$0xff]  ;;  %v5822_v6 = vpop.f32.mrb[62].mxu1  ;;  %8067 = vmatmul.mubr.bf16.gmra.mrb[216].mxu1 %v6293_v55  ;;  %v15433_v34 = vpack.c.bf16 %v7026_v50, %v7025_v48 }
 0x6e1   : > { %v6045_v35 = vadd.f32 %v11232_v9, %v16641_v26  ;;  %v11234_v38 = vadd.f32 %v5822_v6, %v5148_v30  ;;  %v5824_v31 = vpop.f32.mrb[63].mxu1  ;;  %12550 = vmatprep.mubr.msk.bf16.mxu1 %vm14199_vm6, %v12549_v49  ;;  %v16643_v62 = vld [vmem:[#allocation33_spill] sm:$0xff]  ;;  %v16644_v6 = vld [vmem:[#allocation34_spill] sm:$0xff] }
 0x6e2   : > { %16640 = vst [vmem:[#allocation55_spill] sm:$0xff] %v15433_v34  ;;  %11056 = vmatmul.mubr.bf16.gmra.mrb[12].mxu0 %v15433_v34  ;;  %v5153_v55 = vadd.f32 %v15357_v60, %v16643_v62  ;;  %v5156_v53 = vadd.f32 %v15357_v60, %v16644_v6  ;;  %v15460_v62 = vld [vmem:[#allocation2 + $0x138] sm:$0xff] }
 0x6e3   : > { %v6121_v58 = vmax.f32 %v6045_v35, 0.0  ;;  %v6048_v17 = vadd.f32 %v11234_v38, %v16642_v3  ;;  %16646 = vst [vmem:[#allocation25_spill] sm:$0xff] %v15460_v62  ;;  %v16653_v62 = vld [vmem:[#allocation65_spill] sm:$0xff] }
 0x6e5   : > { %v6169_v48 = vsel %vm3195_vm3, %v6121_v58, 0.0  ;;  %v6122_v50 = vmax.f32 %v6048_v17, 0.0  ;;  %v15446_v36 = vld [vmem:[#allocation2 + $0x13f] sm:$0xff]  ;;  %v16649_v17 = vld [vmem:[#allocation35_spill] sm:$0xff] }
 0x6e6   : > { %v7027_v26 = vld [vmem:[#allocation2 + $0x139] sm:$0xff]  ;;  %6217 = vst [vmem:[#allocation2 + $0x150] sm:$0xff] %v6169_v48  ;;  %v5827_v22 = vpop.f32.mrb[64].mxu1  ;;  %v6294_v35 = vpack.c.bf16 %v15446_v36, %v15431_v11  ;;  %v7028_v49 = vld [vmem:[#allocation2 + $0x141] sm:$0xff] }
 0x6e7   : > { %v15452_v31 = vld [vmem:[#allocation2 + $0x147] sm:$0xff]  ;;  %v6170_v38 = vsel %vm3190_vm0, %v6122_v50, 0.0  ;;  %v11236_v30 = vadd.f32 %v5827_v22, %v5153_v55  ;;  %v5829_v9 = vpop.f32.mrb[65].mxu1  ;;  %v15456_v3 = vpack.c.bf16 %v7028_v49, %v7027_v26  ;;  %v12552_v26 = vpack.c.bf16 %v6121_v58, %v6120_v56  ;;  %v16652_v58 = vld [vmem:[#allocation36_spill] sm:$0xff] }
 0x6e8   : > { %v15462_v48 = vld [vmem:[#allocation2 + $0x140] sm:$0xff]  ;;  %6218 = vst [vmem:[#allocation2 + $0x158] sm:$0xff] %v6170_v38  ;;  %v5830_v6 = vpop.f32.mrb[66].mxu1  ;;  %8075 = vmatmul.mubr.bf16.gmra.mrb[220].mxu1 %v6294_v35  ;;  %v16648_v49 = vld [vmem:[#allocation67_spill] sm:$0xff]  ;;  %v5161_v38 = vadd.f32 %v15357_v60, %v16649_v17 }
 0x6e9   : > { %16645 = vst [vmem:[#allocation24_spill] sm:$0xff] %v15456_v3  ;;  %16647 = vst [vmem:[#allocation58_spill] sm:$0xff] %v15462_v48  ;;  %v6053_v8 = vadd.f32 %v11236_v30, %v14945_v52  ;;  %v11238_v0 = vadd.f32 %v5830_v6, %v5156_v53  ;;  %v5832_v55 = vpop.f32.mrb[67].mxu1  ;;  %11059 = vmatprep.mubr.bf16.mxu0 %v15456_v3  ;;  %12553 = vmatprep.mubr.msk.bf16.mxu1 %vm14151_vm4, %v12552_v26  ;;  %v15477_v53 = vld [vmem:[#allocation2 + $0x148] sm:$0xff] }
 0x6ea   : > { %16650 = vst [vmem:[#allocation60_spill] sm:$0xff] %v15477_v53 }
 0x6eb   : > { %v6123_v22 = vmax.f32 %v6053_v8, 0.0  ;;  %v6056_v9 = vadd.f32 %v11238_v0, %v16648_v49  ;;  %v5164_v8 = vadd.f32 %v15357_v60, %v16652_v58  ;;  %v16654_v49 = vld [vmem:[#allocation66_spill] sm:$0xff] }
 0x6ed   : > { %6219 = vst [vmem:[#allocation2 + $0x160] sm:$0xff] %v6123_v22  ;;  %v6124_v35 = vmax.f32 %v6056_v9, 0.0  ;;  %v15473_v28 = vld [vmem:[#allocation2 + $0x14f] sm:$0xff] }
 0x6ee   : > { %v5835_v43 = vpop.f32.mrb[68].mxu1  ;;  %v6295_v52 = vpack.c.bf16 %v15473_v28, %v15452_v31  ;;  %v15479_v56 = vld [vmem:[#allocation2 + $0x150] sm:$0xff] }
 0x6ef   : > { %16651 = vst [vmem:[#allocation26_spill] sm:$0xff] %v15479_v56  ;;  %v6172_v0 = vsel %vm3195_vm3, %v6124_v35, 0.0  ;;  %v11240_v30 = vadd.f32 %v5835_v43, %v5161_v38  ;;  %v5837_v17 = vpop.f32.mrb[69].mxu1  ;;  %v7029_v6 = vld [vmem:[#allocation2 + $0x149] sm:$0xff]  ;;  %v7030_v55 = vld [vmem:[#allocation2 + $0x151] sm:$0xff]  ;;  %v12555_v38 = vpack.c.bf16 %v6123_v22, %v6122_v50 }
 0x6f0   : > { %v15485_v26 = vld [vmem:[#allocation2 + $0x157] sm:$0xff]  ;;  %6220 = vst [vmem:[#allocation2 + $0x168] sm:$0xff] %v6172_v0  ;;  %v5838_v9 = vpop.f32.mrb[70].mxu1  ;;  %8083 = vmatmul.mubr.bf16.gmra.mrb[224].mxu1 %v6295_v52  ;;  %v15489_v48 = vpack.c.bf16 %v7030_v55, %v7029_v6 }
 0x6f1   : > { %v6061_v3 = vadd.f32 %v11240_v30, %v16653_v62  ;;  %v11242_v34 = vadd.f32 %v5838_v9, %v5164_v8  ;;  %v5840_v43 = vpop.f32.mrb[71].mxu1  ;;  %12556 = vmatprep.mubr.msk.bf16.mxu1 %vm14171_vm5, %v12555_v38  ;;  %v16655_v52 = vld [vmem:[#allocation37_spill] sm:$0xff]  ;;  %v16658_v8 = vld [vmem:[#allocation38_spill] sm:$0xff] }
 0x6f2   : > { %11060 = vmatmul.mubr.bf16.gmra.mrb[16].mxu0 %v15489_v48  ;;  %v5169_v6 = vadd.f32 %v15357_v60, %v16655_v52  ;;  %v15506_v22 = vld [vmem:[#allocation2 + $0x158] sm:$0xff]  ;;  %v5172_v30 = vadd.f32 %v15357_v60, %v16658_v8  ;;  %v16659_v8 = vld [vmem:[#allocation39_spill] sm:$0xff] }
 0x6f3   : > { %v6125_v17 = vmax.f32 %v6061_v3, 0.0  ;;  %v6064_v0 = vadd.f32 %v11242_v34, %v16654_v49  ;;  %16656 = vst [vmem:[#allocation27_spill] sm:$0xff] %v15506_v22 }
 0x6f4   : > { %v15498_v56 = vld [vmem:[#allocation2 + $0x15f] sm:$0xff] }
 0x6f5   : > { %v6173_v55 = vsel %vm3190_vm0, %v6125_v17, 0.0  ;;  %v6126_v62 = vmax.f32 %v6064_v0, 0.0  ;;  %v6296_v50 = vpack.c.bf16 %v15498_v56, %v15485_v26  ;;  %v15508_v39 = vld [vmem:[#allocation2 + $0x160] sm:$0xff]  ;;  %v12558_v22 = vpack.c.bf16 %v6125_v17, %v6124_v35 }
 0x6f6   : > { %16657 = vst [vmem:[#allocation57_spill] sm:$0xff] %v15508_v39  ;;  %6221 = vst [vmem:[#allocation2 + $0x170] sm:$0xff] %v6173_v55  ;;  %v5843_v3 = vpop.f32.mrb[72].mxu1  ;;  %v7031_v43 = vld [vmem:[#allocation2 + $0x159] sm:$0xff] }
 0x6f7   : > { %6222 = vst [vmem:[#allocation2 + $0x178] sm:$0xff] %v6126_v62  ;;  %v11244_v49 = vadd.f32 %v5843_v3, %v5169_v6  ;;  %v5845_v9 = vpop.f32.mrb[73].mxu1  ;;  %v7032_v38 = vld [vmem:[#allocation2 + $0x161] sm:$0xff] }
 0x6f8   : > { %v15514_v0 = vld [vmem:[#allocation2 + $0x167] sm:$0xff]  ;;  %v5846_v52 = vpop.f32.mrb[74].mxu1  ;;  %8091 = vmatmul.mubr.bf16.gmra.mrb[228].mxu1 %v6296_v50  ;;  %v15516_v58 = vpack.c.bf16 %v7032_v38, %v7031_v43  ;;  %v5177_v50 = vadd.f32 %v15357_v60, %v16659_v8 }
 0x6f9   : > { %v6069_v53 = vadd.f32 %v11244_v49, %v15072_v21  ;;  %v11246_v34 = vadd.f32 %v5846_v52, %v5172_v30  ;;  %v5848_v39 = vpop.f32.mrb[75].mxu1  ;;  %12559 = vmatprep.mubr.msk.bf16.mxu1 %vm14199_vm6, %v12558_v22 }
 0x6fa   : > { %11063 = vmatprep.mubr.bf16.mxu0 %v15516_v58  ;;  %v16660_v39 = vld [vmem:[#allocation40_spill] sm:$0xff] }
 0x6fb   : > { %v6127_v6 = vmax.f32 %v6069_v53, 0.0  ;;  %v6072_v3 = vadd.f32 %v11246_v34, %v15083_v25  ;;  %v5180_v35 = vadd.f32 %v15357_v60, %v16660_v39 }
 0x6fd   : > { %v6175_v9 = vsel %vm3195_vm3, %v6127_v6, 0.0  ;;  %v6128_v43 = vmax.f32 %v6072_v3, 0.0  ;;  %v15529_v38 = vld [vmem:[#allocation2 + $0x16f] sm:$0xff] }
 0x6fe   : > { %v7033_v21 = vld [vmem:[#allocation2 + $0x169] sm:$0xff]  ;;  %6223 = vst [vmem:[#allocation2 + $0x180] sm:$0xff] %v6175_v9  ;;  %v5851_v13 = vpop.f32.mrb[76].mxu1  ;;  %v6297_v53 = vpack.c.bf16 %v15529_v38, %v15514_v0  ;;  %v7034_v17 = vld [vmem:[#allocation2 + $0x171] sm:$0xff] }
 0x6ff   : > { %v15535_v25 = vld [vmem:[#allocation2 + $0x177] sm:$0xff]  ;;  %v6176_v22 = vsel %vm3190_vm0, %v6128_v43, 0.0  ;;  %v11248_v34 = vadd.f32 %v5851_v13, %v5177_v50  ;;  %v5853_v30 = vpop.f32.mrb[77].mxu1  ;;  %v15539_v49 = vpack.c.bf16 %v7034_v17, %v7033_v21  ;;  %v15543_v3 = vld [vmem:[#allocation2 + $0x168] sm:$0xff]  ;;  %v12561_v21 = vpack.c.bf16 %v6127_v6, %v6126_v62 }
 0x700   : > { %v15545_v60 = vld [vmem:[#allocation2 + $0x170] sm:$0xff]  ;;  %6224 = vst [vmem:[#allocation2 + $0x188] sm:$0xff] %v6176_v22  ;;  %v5854_v8 = vpop.f32.mrb[78].mxu1  ;;  %8099 = vmatmul.mubr.bf16.gmra.mrb[232].mxu1 %v6297_v53  ;;  %v6515_v30 = vld [vmem:[#allocation2 + $0x1f] sm:$0xff]  ;;  %v6516_v22 = vld [vmem:[#allocation2 + $0x27] sm:$0xff]  ;;  %vm10292_vm0 = vcmask 1045509  }
 0x701   : > { %16661 = vst [vmem:[#allocation59_spill] sm:$0xff] %v15545_v60  ;;  %v6077_v39 = vadd.f32 %v11248_v34, %v15066_v4  ;;  %v11250_v43 = vadd.f32 %v5854_v8, %v5180_v35  ;;  %v5856_v50 = vpop.f32.mrb[79].mxu1  ;;  %11064 = vmatmul.mubr.bf16.gmra.mrb[20].mxu0 %v15539_v49  ;;  %12562 = vmatprep.mubr.msk.bf16.mxu1 %vm14151_vm4, %v12561_v21  ;;  %v15558_v35 = vld [vmem:[#allocation2 + $0x178] sm:$0xff]  ;;  %v12378_v60 = vld [vmem:[#allocation2 + $0x21] sm:$0xff] }
 0x702   : > { %16662 = vst [vmem:[#allocation28_spill] sm:$0xff] %v15558_v35  ;;  %v6563_v62 = vpack.c.bf16 %v6516_v22, %v6515_v30  ;;  %v6420_v50 = vld [vmem:[#allocation2 + $0x11] sm:$0xff]  ;;  %v7040_v22 = vld [vmem:[#allocation2 + $0x1a1] sm:$0xff] }
 0x703   : > { %v6129_v13 = vmax.f32 %v6077_v39, 0.0  ;;  %v6080_v17 = vadd.f32 %v11250_v43, %v15077_v20  ;;  %v6419_v43 = vld [vmem:[#allocation2 + $0x9] sm:$0xff]  ;;  %v6518_v21 = vld [vmem:[#allocation2 + $0x37] sm:$0xff] }
 0x704   : > { %v12342_v35 = vld [vmem:[#allocation10 + $0x110] sm:$0xff]  }
 0x705   : > { %6225 = vst [vmem:[#allocation2 + $0x190] sm:$0xff] %v6129_v13  ;;  %v6130_v53 = vmax.f32 %v6080_v17, 0.0  ;;  %v15554_v52 = vld [vmem:[#allocation2 + $0x17f] sm:$0xff]  ;;  %v6467_v13 = vpack.c.bf16 %v6420_v50, %v6419_v43 }
 0x706   : > { %v6298_v4 = vpack.c.bf16 %v15554_v52, %v15535_v25  ;;  %v15560_v34 = vld [vmem:[#allocation2 + $0x180] sm:$0xff] }
 0x707   : > { %16663 = vst [vmem:[#allocation29_spill] sm:$0xff] %v15560_v34  ;;  %v6178_v15 = vsel %vm3195_vm3, %v6130_v53, 0.0  ;;  %v7035_v6 = vld [vmem:[#allocation2 + $0x179] sm:$0xff]  ;;  %v7036_v8 = vld [vmem:[#allocation2 + $0x181] sm:$0xff] }
 0x708   : > { %6226 = vst [vmem:[#allocation2 + $0x198] sm:$0xff] %v6178_v15  ;;  %8107 = vmatmul.mubr.bf16.gmra.mrb[236].mxu1 %v6298_v4  ;;  %v15566_v39 = vpack.c.bf16 %v7036_v8, %v7035_v6  ;;  %v12340_v17 = vld [vmem:[#allocation10 + $0x100] sm:$0xff]   ;;  %v15573_v53 = vld [vmem:[#allocation2 + $0x188] sm:$0xff] }
 0x709   : > { %8147 = vmatprep.mubr.bf16.mxu1 %v6563_v62  ;;  %v15569_v14 = vld [vmem:[#allocation2 + $0x187] sm:$0xff]  ;;  %v6517_v15 = vld [vmem:[#allocation2 + $0x2f] sm:$0xff]  ;;  %v6421_v34 = vld [vmem:[#allocation2 + $0x19] sm:$0xff] }
 0x70a   : > { %11067 = vmatprep.mubr.bf16.mxu0 %v15566_v39  ;;  %v6564_v6 = vpack.c.bf16 %v6518_v21, %v6517_v15  ;;  %v6520_v4 = vld [vmem:[#allocation2 + $0x47] sm:$0xff]  ;;  %v6468_v62 = vpack.c.bf16 %v12378_v60, %v6421_v34  ;;  %v6519_v21 = vld [vmem:[#allocation2 + $0x3f] sm:$0xff] }
 0x70b   : > { %v6565_v15 = vpack.c.bf16 %v6520_v4, %v6519_v21  ;;  %v12345_v34 = vld [vmem:[#allocation10 + $0x128] sm:$0xff]   ;;  %v12346_v4 = vld [vmem:[#allocation10 + $0x130] sm:$0xff]  }
 0x70c   : > { %v15571_v30 = vld [vmem:[#allocation2 + $0x18f] sm:$0xff] }
 0x70d   : > { %v15575_v20 = vld [vmem:[#allocation2 + $0x190] sm:$0xff] }
 0x70e   : > { %v7037_v8 = vld [vmem:[#allocation2 + $0x189] sm:$0xff] }
 0x70f   : > { %v7038_v43 = vld [vmem:[#allocation2 + $0x191] sm:$0xff]  ;;  %v7039_v50 = vld [vmem:[#allocation2 + $0x199] sm:$0xff] }
 0x710   : > { %8148 = vmatmul.mubr.bf16.vlgmr.msra.gmra.mrb[144].mxu1 %v6467_v13  ;;  %v7064_v9 = vpack.c.bf16 %v7038_v43, %v7037_v8  ;;  %v7065_v55 = vpack.c.bf16 %v7040_v22, %v7039_v50  ;;  %v12343_v13 = vld [vmem:[#allocation10 + $0x118] sm:$0xff]   ;;  %v12379_v22 = vld [vmem:[#allocation2 + $0x29] sm:$0xff]  ;;  %v12382_v8 = vld [vmem:[#allocation2 + $0x41] sm:$0xff] }
 0x711   : > { %8155 = vmatprep.mubr.bf16.mxu1 %v6564_v6  ;;  %8341 = vmatpush1.bf16.msra.mxu1 %v12340_v17  ;;  %v6522_v17 = vld [vmem:[#allocation2 + $0x57] sm:$0xff]  ;;  %v6523_v50 = vld [vmem:[#allocation2 + $0x5f] sm:$0xff] }
 0x712   : > { %11068 = vmatmul.mubr.bf16.gmra.mrb[24].mxu0 %v7064_v9  ;;  %8342 = vmatprep.subr.bf16.mxu1 %v16525_v41  ;;  %v6521_v9 = vld [vmem:[#allocation2 + $0x4f] sm:$0xff] }
 0x713   : > { %11071 = vmatprep.mubr.bf16.mxu0 %v7065_v55  ;;  %v12344_v55 = vld [vmem:[#allocation10 + $0x120] sm:$0xff]   ;;  %v12380_v6 = vld [vmem:[#allocation2 + $0x31] sm:$0xff]  ;;  %v6566_v60 = vpack.c.bf16 %v6522_v17, %v6521_v9  ;;  %v12383_v17 = vld [vmem:[#allocation2 + $0x49] sm:$0xff] }
 0x714   : > { %v12348_v9 = vld [vmem:[#allocation10 + $0x140] sm:$0xff]  }
 0x715   : > { %8343 = vmatpush1.bf16.msra.mxu1 %v12341_v32  ;;  %v6469_v32 = vpack.c.bf16 %v12380_v6, %v12379_v22  ;;  %v6525_v6 = vld [vmem:[#allocation2 + $0x6f] sm:$0xff] }
 0x716   : > { %8344 = vmatprep.subr.bf16.mxu1 %v16525_v41 }
 0x718   : > { %8156 = vmatmul.mubr.bf16.gmra.mrb[148].mxu1 %v6468_v62  ;;  %v12381_v62 = vld [vmem:[#allocation2 + $0x39] sm:$0xff] }
 0x719   : > { %8163 = vmatprep.mubr.bf16.mxu1 %v6565_v15  ;;  %8345 = vmatpush1.bf16.msra.mxu1 %v12342_v35  ;;  %v6524_v35 = vld [vmem:[#allocation2 + $0x67] sm:$0xff]  ;;  %v6470_v43 = vpack.c.bf16 %v12382_v8, %v12381_v62  ;;  %v12347_v15 = vld [vmem:[#allocation10 + $0x138] sm:$0xff]  }
 0x71a   : > { %8346 = vmatprep.subr.bf16.mxu1 %v16525_v41  ;;  %v6567_v21 = vpack.c.bf16 %v6524_v35, %v6523_v50  ;;  %v12350_v35 = vld [vmem:[#allocation10 + $0x150] sm:$0xff]   ;;  %v12386_v62 = vld [vmem:[#allocation2 + $0x61] sm:$0xff] }
 0x71d   : > { %8347 = vmatpush1.bf16.msra.mxu1 %v12343_v13  ;;  %v6526_v13 = vld [vmem:[#allocation2 + $0x77] sm:$0xff] }
 0x71e   : > { %8348 = vmatprep.subr.bf16.mxu1 %v16525_v41 }
 0x720   : > { %8164 = vmatmul.mubr.bf16.gmra.mrb[152].mxu1 %v6469_v32  ;;  %v6568_v32 = vpack.c.bf16 %v6526_v13, %v6525_v6  ;;  %v12388_v13 = vld [vmem:[#allocation2 + $0x69] sm:$0xff] }
 0x721   : > { %8171 = vmatprep.mubr.bf16.mxu1 %v6566_v60  ;;  %8349 = vmatpush1.bf16.msra.mxu1 %v12344_v55  ;;  %v12384_v55 = vld [vmem:[#allocation2 + $0x51] sm:$0xff]  ;;  %v12349_v60 = vld [vmem:[#allocation10 + $0x148] sm:$0xff]  }
 0x722   : > { %8350 = vmatprep.subr.bf16.mxu1 %v16525_v41  ;;  %v6471_v22 = vpack.c.bf16 %v12384_v55, %v12383_v17  ;;  %v6529_v55 = vld [vmem:[#allocation2 + $0x8f] sm:$0xff] }
 0x725   : > { %8351 = vmatpush1.bf16.msra.mxu1 %v12345_v34  ;;  %v6527_v34 = vld [vmem:[#allocation2 + $0x7f] sm:$0xff] }
 0x726   : > { %8352 = vmatprep.subr.bf16.mxu1 %v16525_v41 }
 0x728   : > { %8172 = vmatmul.mubr.bf16.gmra.mrb[156].mxu1 %v6470_v43  ;;  %v12387_v43 = vld [vmem:[#allocation2 + $0x87] sm:$0xff] }
 0x729   : > { %8179 = vmatprep.mubr.bf16.mxu1 %v6567_v21  ;;  %8353 = vmatpush1.bf16.msra.mxu1 %v12346_v4  ;;  %v12385_v4 = vld [vmem:[#allocation2 + $0x59] sm:$0xff]  ;;  %v6569_v50 = vpack.c.bf16 %v12387_v43, %v6527_v34 }
 0x72a   : > { %8354 = vmatprep.subr.bf16.mxu1 %v16525_v41  ;;  %v6472_v8 = vpack.c.bf16 %v12386_v62, %v12385_v4  ;;  %v12351_v21 = vld [vmem:[#allocation10 + $0x158] sm:$0xff]  }
 0x72b   : > { %v12391_v62 = vld [vmem:[#allocation2 + $0x79] sm:$0xff] }
 0x72d   : > { %8355 = vmatpush1.bf16.msra.mxu1 %v12347_v15  ;;  %v12352_v15 = vld [vmem:[#allocation10 + $0x160] sm:$0xff]  }
 0x72e   : > { %8356 = vmatprep.subr.bf16.mxu1 %v16525_v41 }
 0x730   : > { %8180 = vmatmul.mubr.bf16.gmra.mrb[160].mxu1 %v6471_v22  ;;  %v12390_v22 = vld [vmem:[#allocation2 + $0x97] sm:$0xff] }
 0x731   : > { %8187 = vmatprep.mubr.bf16.mxu1 %v6568_v32  ;;  %8357 = vmatpush1.bf16.msra.mxu1 %v12348_v9  ;;  %v12389_v9 = vld [vmem:[#allocation2 + $0x71] sm:$0xff]  ;;  %v6570_v6 = vpack.c.bf16 %v12390_v22, %v6529_v55  ;;  %v12353_v32 = vld [vmem:[#allocation10 + $0x168] sm:$0xff]   ;;  %v16665_v55 = vpack.c.bf16 %v15198_v46, %v15192_v10  ;;  %v16667_v10 = vpack.c.bf16 %v15260_v47, %v15244_v57 }
 0x732   : > { %8358 = vmatprep.subr.bf16.mxu1 %v16525_v41  ;;  %v6473_v17 = vpack.c.bf16 %v12389_v9, %v12388_v13  ;;  %v12393_v13 = vld [vmem:[#allocation2 + $0x89] sm:$0xff]  ;;  %v12394_v9 = vld [vmem:[#allocation2 + $0x91] sm:$0xff]  ;;  %v15611_v22 = vld [vmem:[#allocation2 + $0xa1] sm:$0xff] }
 0x735   : > { %8359 = vmatpush1.bf16.msra.mxu1 %v12349_v60 }
 0x736   : > { %8360 = vmatprep.subr.bf16.mxu1 %v16525_v41 }
 0x738   : > { %8188 = vmatmul.mubr.bf16.gmra.mrb[164].mxu1 %v6472_v8  ;;  %v12392_v8 = vld [vmem:[#allocation2 + $0x81] sm:$0xff] }
 0x739   : > { %8195 = vmatprep.mubr.bf16.mxu1 %v6569_v50  ;;  %8361 = vmatpush1.bf16.msra.mxu1 %v12350_v35  ;;  %v12354_v35 = vld [vmem:[#allocation10 + $0x170] sm:$0xff]   ;;  %v6474_v43 = vpack.c.bf16 %v12392_v8, %v12391_v62  ;;  %v16666_v8 = vpack.c.bf16 %v15231_v61, %v15219_v23  ;;  %v16668_v23 = vpack.c.bf16 %v15281_v5, %v15275_v18 }
 0x73a   : > { %8362 = vmatprep.subr.bf16.mxu1 %v16525_v41 }
 0x73d   : > { %8363 = vmatpush1.bf16.msra.mxu1 %v12351_v21  ;;  %v16664_v21 = vpack.c.bf16 %v15180_v40, %v15161_v59  ;;  %v12395_v40 = vld [vmem:[#allocation2 + $0x99] sm:$0xff] }
 0x73e   : > { %8364 = vmatprep.subr.bf16.mxu1 %v16525_v41 }
 0x740   : > { %8196 = vmatmul.mubr.bf16.gmra.mrb[168].mxu1 %v6473_v17  ;;  %v6475_v17 = vpack.c.bf16 %v12394_v9, %v12393_v13 }
 0x741   : > { %8203 = vmatprep.mubr.bf16.mxu1 %v6570_v6  ;;  %8365 = vmatpush1.bf16.msra.mxu1 %v12352_v15  ;;  %v12355_v15 = vld [vmem:[#allocation10 + $0x178] sm:$0xff]  }
 0x742   : > { %8366 = vmatprep.subr.bf16.mxu1 %v16525_v41 }
 0x744   : > { %v15594_v60 = vpop.f32.mrb[240].mxu0 }
 0x745   : > { %v15596_v34 = vpop.f32.mrb[241].mxu0  ;;  %8367 = vmatpush1.bf16.msra.mxu1 %v12353_v32  ;;  %v6476_v32 = vpack.c.bf16 %v15611_v22, %v12395_v40 }
 0x746   : > { %v15598_v4 = vpop.f32.mrb[242].mxu0  ;;  %8368 = vmatprep.subr.bf16.mxu1 %v16525_v41 }
 0x747   : > { %v15601_v50 = vpop.f32.mrb[243].mxu0 }
 0x748   : > { %8204 = vmatmul.mubr.bf16.gmra.mrb[172].mxu1 %v6474_v43 }
 0x749   : > { %8211 = vmatprep.mubr.bf16.mxu1 %v16664_v21  ;;  %8369 = vmatpush1.bf16.msra.mxu1 %v12354_v35 }
 0x74a   : > { %8370 = vmatprep.subr.bf16.mxu1 %v16525_v41 }
 0x74d   : > { %8371 = vmatpush1.bf16.msra.mxu1 %v12355_v15 }
 0x74e   : > { %8565 = vmatprep.subr.bf16.mxu1 %v16525_v41 }
 0x750   : > { %8212 = vmatmul.mubr.bf16.gmra.mrb[176].mxu1 %v6475_v17  ;;  %v16680_v17 = vld [vmem:[#allocation24_spill] sm:$0xff] }
 0x751   : > { %8219 = vmatprep.mubr.bf16.mxu1 %v16665_v55  ;;  %v6585_v55 = vpack.c.bf16 %v15569_v14, %v15554_v52 }
 0x755   : > { %v15613_v6 = vpop.f32.mrb[244].mxu0 }
 0x756   : > { %v15615_v59 = vpop.f32.mrb[245].mxu0 }
 0x757   : > { %v15618_v35 = vpop.f32.mrb[246].mxu0 }
 0x758   : > { %v15620_v62 = vpop.f32.mrb[247].mxu0  ;;  %8220 = vmatmul.mubr.bf16.gmra.mrb[180].mxu1 %v6476_v32  ;;  %v16692_v32 = vld [vmem:[#allocation20_spill] sm:$0xff] }
 0x759   : > { %8227 = vmatprep.mubr.bf16.mxu1 %v16666_v8 }
 0x760   : > { %8228 = vmatmul.mubr.bf16.gmra.mrb[184].mxu1 %v15202_v2  ;;  %v16669_v2 = vpack.c.bf16 %v15314_v24, %v15302_v16  ;;  %v16671_v16 = vpack.c.bf16 %v15369_v33, %v15363_v7 }
 0x761   : > { %8235 = vmatprep.mubr.bf16.mxu1 %v16667_v10  ;;  %v6611_v10 = vld [vmem:[#allocation2 + $0x20] sm:$0xff] }
 0x766   : > { %v15629_v46 = vpop.f32.mrb[248].mxu0 }
 0x767   : > { %v15631_v43 = vpop.f32.mrb[249].mxu0 }
 0x768   : > { %v15633_v21 = vpop.f32.mrb[250].mxu0  ;;  %8236 = vmatmul.mubr.bf16.gmra.mrb[188].mxu1 %v15235_v45  ;;  %v16670_v45 = vpack.c.bf16 %v15343_v63, %v15327_v42 }
 0x769   : > { %v15635_v15 = vpop.f32.mrb[251].mxu0  ;;  %8243 = vmatprep.mubr.bf16.mxu1 %v16668_v23  ;;  %v6612_v23 = vld [vmem:[#allocation2 + $0x28] sm:$0xff] }
 0x770   : > { %8244 = vmatmul.mubr.bf16.gmra.mrb[192].mxu1 %v15262_v1 }
 0x771   : > { %8251 = vmatprep.mubr.bf16.mxu1 %v16669_v2  ;;  %v12356_v2 = vld [vmem:[#allocation10 + $0x180] sm:$0xff]  }
 0x774   : > { %v15645_v57 = vpop.f32.mrb[252].mxu0 }
 0x775   : > { %v15647_v61 = vpop.f32.mrb[253].mxu0 }
 0x776   : > { %v15649_v47 = vpop.f32.mrb[254].mxu0 }
 0x777   : > { %v15651_v13 = vpop.f32.mrb[255].mxu0 }
 0x778   : > { %8252 = vmatmul.mubr.bf16.gmra.mrb[196].mxu1 %v15285_v37  ;;  %v16672_v37 = vpack.c.bf16 %v15402_v44, %v15390_v19  ;;  %v16674_v19 = vpack.c.bf16 %v15452_v31, %v15446_v36 }
 0x779   : > { %8259 = vmatprep.mubr.bf16.mxu1 %v16670_v45  ;;  %v6659_v45 = vpack.c.bf16 %v6612_v23, %v6611_v10  ;;  %v12360_v10 = vld [vmem:[#allocation10 + $0x1a0] sm:$0xff]  }
 0x77a   : > { %v12397_v23 = vld [vmem:[#allocation2 + $0x40] sm:$0xff] }
 0x780   : > { %8260 = vmatmul.mubr.bf16.gmra.mrb[200].mxu1 %v15318_v29  ;;  %v16673_v29 = vpack.c.bf16 %v15431_v11, %v15415_v51 }
 0x781   : > { %8267 = vmatprep.mubr.bf16.mxu1 %v16671_v16  ;;  %v16695_v16 = vld [vmem:[#allocation21_spill] sm:$0xff] }
 0x785   : > { %v15661_v1 = vpop.f32.mrb[0].mxu0 }
 0x786   : > { %v15663_v18 = vpop.f32.mrb[1].mxu0 }
 0x787   : > { %v15665_v5 = vpop.f32.mrb[2].mxu0 }
 0x788   : > { %v15667_v24 = vpop.f32.mrb[3].mxu0  ;;  %8268 = vmatmul.mubr.bf16.gmra.mrb[204].mxu1 %v15345_v27  ;;  %v16675_v27 = vld [vmem:[#allocation55_spill] sm:$0xff] }
 0x789   : > { %8275 = vmatprep.mubr.bf16.mxu1 %v16672_v37 }
 0x790   : > { %8276 = vmatmul.mubr.bf16.gmra.mrb[208].mxu1 %v15373_v12  ;;  %v16676_v12 = vpack.c.bf16 %v15485_v26, %v15473_v28  ;;  %v16682_v28 = vpack.c.bf16 %v15535_v25, %v15529_v38 }
 0x791   : > { %8283 = vmatprep.mubr.bf16.mxu1 %v16673_v29  ;;  %v12357_v29 = vld [vmem:[#allocation10 + $0x188] sm:$0xff]  }
 0x795   : > { %v15677_v42 = vpop.f32.mrb[4].mxu0 }
 0x796   : > { %v15679_v63 = vpop.f32.mrb[5].mxu0 }
 0x797   : > { %v15681_v7 = vpop.f32.mrb[6].mxu0 }
 0x798   : > { %v15683_v33 = vpop.f32.mrb[7].mxu0  ;;  %8284 = vmatmul.mubr.bf16.gmra.mrb[212].mxu1 %v15406_v54  ;;  %v16681_v54 = vpack.c.bf16 %v15514_v0, %v15498_v56  ;;  %v15720_v56 = vld [vmem:[#allocation2 + $0x197] sm:$0xff] }
 0x799   : > { %8291 = vmatprep.mubr.bf16.mxu1 %v16674_v19 }
 0x7a0   : > { %8292 = vmatmul.mubr.bf16.gmra.mrb[216].mxu1 %v16675_v27  ;;  %v6613_v27 = vld [vmem:[#allocation2 + $0x30] sm:$0xff] }
 0x7a1   : > { %8299 = vmatprep.mubr.bf16.mxu1 %v16676_v12  ;;  %v12358_v12 = vld [vmem:[#allocation10 + $0x190] sm:$0xff]  }
 0x7a4   : > { %v15693_v51 = vpop.f32.mrb[8].mxu0 }
 0x7a5   : > { %16677 = vst [vmem:[#allocation62_spill] sm:$0xff] %v15693_v51  ;;  %v15695_v44 = vpop.f32.mrb[9].mxu0  ;;  %v6807_v51 = vld [vmem:[#allocation2 + $0x57] sm:$0xff] }
 0x7a6   : > { %v15697_v11 = vpop.f32.mrb[10].mxu0 }
 0x7a7   : > { %16678 = vst [vmem:[#allocation64_spill] sm:$0xff] %v15697_v11  ;;  %v15699_v9 = vpop.f32.mrb[11].mxu0 }
 0x7a8   : > { %16679 = vst [vmem:[#allocation31_spill] sm:$0xff] %v15699_v9  ;;  %8300 = vmatmul.mubr.bf16.gmra.mrb[220].mxu1 %v16680_v17 }
 0x7a9   : > { %8307 = vmatprep.mubr.bf16.mxu1 %v16681_v54  ;;  %v12396_v54 = vld [vmem:[#allocation2 + $0x38] sm:$0xff] }
 0x7b0   : > { %8308 = vmatmul.mubr.bf16.gmra.mrb[224].mxu1 %v15489_v48  ;;  %v6586_v48 = vpack.c.bf16 %v15720_v56, %v15571_v30 }
 0x7b1   : > { %8315 = vmatprep.mubr.bf16.mxu1 %v16682_v28  ;;  %v6660_v28 = vpack.c.bf16 %v12396_v54, %v6613_v27 }
 0x7b5   : > { %v15709_v36 = vpop.f32.mrb[12].mxu0 }
 0x7b6   : > { %16683 = vst [vmem:[#allocation32_spill] sm:$0xff] %v15709_v36  ;;  %v15711_v31 = vpop.f32.mrb[13].mxu0  ;;  %v16741_v36 = vld [vmem:[#allocation71_spill] sm:$0xff] }
 0x7b7   : > { %16684 = vst [vmem:[#allocation61_spill] sm:$0xff] %v15711_v31  ;;  %v15713_v26 = vpop.f32.mrb[14].mxu0  ;;  %v16744_v31 = vld [vmem:[#allocation74_spill] sm:$0xff] }
 0x7b8   : > { %16685 = vst [vmem:[#allocation63_spill] sm:$0xff] %v15713_v26  ;;  %v15717_v40 = vpop.f32.mrb[15].mxu0  ;;  %8316 = vmatmul.mubr.bf16.gmra.mrb[228].mxu1 %v15516_v58  ;;  %v16691_v58 = vld [vmem:[#allocation19_spill] sm:$0xff]  ;;  %v15806_v26 = vld [vmem:[#allocation2 + $0x198] sm:$0xff] }
 0x7b9   : > { %16686 = vst [vmem:[#allocation33_spill] sm:$0xff] %v15717_v40  ;;  %8323 = vmatprep.mubr.bf16.mxu1 %v6585_v55  ;;  %v16693_v8 = vpack.c.bf16 %v16691_v58, %v16692_v32  ;;  %v16702_v58 = vld [vmem:[#allocation23_spill] sm:$0xff] }
 0x7c0   : > { %8324 = vmatmul.mubr.bf16.gmra.mrb[232].mxu1 %v15539_v49  ;;  %v16694_v49 = vld [vmem:[#allocation22_spill] sm:$0xff] }
 0x7c1   : > { %8331 = vmatprep.mubr.bf16.mxu1 %v6586_v48  ;;  %v16696_v37 = vpack.c.bf16 %v16694_v49, %v16695_v16  ;;  %v16701_v48 = vld [vmem:[#allocation70_spill] sm:$0xff]  ;;  %v16704_v49 = vld [vmem:[#allocation75_spill] sm:$0xff]  ;;  %v16705_v16 = vld [vmem:[#allocation73_spill] sm:$0xff] }
 0x7c2   : > { %v16703_v32 = vpack.c.bf16 %v16701_v48, %v16702_v58  ;;  %v12400_v48 = vld [vmem:[#allocation2 + $0x58] sm:$0xff] }
 0x7c5   : > { %v15725_v0 = vpop.f32.mrb[16].mxu0 }
 0x7c6   : > { %16687 = vst [vmem:[#allocation34_spill] sm:$0xff] %v15725_v0  ;;  %v15727_v38 = vpop.f32.mrb[17].mxu0  ;;  %v6752_v0 = vld [vmem:[#allocation2 + $0x189] sm:$0xff] }
 0x7c7   : > { %16688 = vst [vmem:[#allocation67_spill] sm:$0xff] %v15727_v38  ;;  %v15729_v25 = vpop.f32.mrb[18].mxu0  ;;  %v6753_v38 = vld [vmem:[#allocation2 + $0x191] sm:$0xff] }
 0x7c8   : > { %16689 = vst [vmem:[#allocation35_spill] sm:$0xff] %v15729_v25  ;;  %v15731_v52 = vpop.f32.mrb[19].mxu0  ;;  %8332 = vmatmul.mubr.bf16.gmra.mrb[236].mxu1 %v15566_v39  ;;  %v6750_v25 = vld [vmem:[#allocation2 + $0x179] sm:$0xff] }
 0x7c9   : > { %16690 = vst [vmem:[#allocation36_spill] sm:$0xff] %v15731_v52  ;;  %8372 = vmatprep.mubr.bf16.mxu1 %v16693_v8  ;;  %v12359_v8 = vld [vmem:[#allocation10 + $0x198] sm:$0xff]  }
 0x7d0   : > { %8373 = vmatmul.mubr.bf16.vlgmr.msra.gmra.mrb[144].mxu1 %v6659_v45 }
 0x7d1   : > { %8380 = vmatprep.mubr.bf16.mxu1 %v16696_v37  ;;  %8566 = vmatpush1.bf16.msra.mxu1 %v12356_v2  ;;  %v12398_v2 = vld [vmem:[#allocation2 + $0x48] sm:$0xff]  ;;  %v16706_v37 = vpack.c.bf16 %v16704_v49, %v16705_v16  ;;  %v12364_v49 = vld [vmem:[#allocation10 + $0x1c0] sm:$0xff]  }
 0x7d2   : > { %8567 = vmatprep.subr.bf16.mxu1 %v16525_v41  ;;  %v6661_v45 = vpack.c.bf16 %v12398_v2, %v12397_v23  ;;  %v16712_v23 = vld [vmem:[#allocation77_spill] sm:$0xff]  ;;  %v12401_v16 = vld [vmem:[#allocation2 + $0x60] sm:$0xff] }
 0x7d4   : > { %v15741_v19 = vpop.f32.mrb[20].mxu0 }
 0x7d5   : > { %16697 = vst [vmem:[#allocation65_spill] sm:$0xff] %v15741_v19  ;;  %v15743_v39 = vpop.f32.mrb[21].mxu0  ;;  %8568 = vmatpush1.bf16.msra.mxu1 %v12357_v29  ;;  %v12361_v29 = vld [vmem:[#allocation10 + $0x1a8] sm:$0xff]  }
 0x7d6   : > { %16698 = vst [vmem:[#allocation66_spill] sm:$0xff] %v15743_v39  ;;  %v15745_v17 = vpop.f32.mrb[22].mxu0  ;;  %8569 = vmatprep.subr.bf16.mxu1 %v16525_v41 }
 0x7d7   : > { %16699 = vst [vmem:[#allocation37_spill] sm:$0xff] %v15745_v17  ;;  %v15748_v55 = vpop.f32.mrb[23].mxu0 }
 0x7d8   : > { %16700 = vst [vmem:[#allocation38_spill] sm:$0xff] %v15748_v55  ;;  %8381 = vmatmul.mubr.bf16.gmra.mrb[148].mxu1 %v6660_v28  ;;  %v12399_v28 = vld [vmem:[#allocation2 + $0x50] sm:$0xff] }
 0x7d9   : > { %8388 = vmatprep.mubr.bf16.mxu1 %v16703_v32  ;;  %8570 = vmatpush1.bf16.msra.mxu1 %v12358_v12  ;;  %v12362_v12 = vld [vmem:[#allocation10 + $0x1b0] sm:$0xff]   ;;  %v6662_v58 = vpack.c.bf16 %v12400_v48, %v12399_v28  ;;  %v16714_v28 = vld [vmem:[#allocation81_spill] sm:$0xff]  ;;  %v16715_v48 = vld [vmem:[#allocation82_spill] sm:$0xff] }
 0x7da   : > { %8571 = vmatprep.subr.bf16.mxu1 %v16525_v41  ;;  %v6748_v55 = vld [vmem:[#allocation2 + $0x169] sm:$0xff] }
 0x7dd   : > { %8572 = vmatpush1.bf16.msra.mxu1 %v12359_v8 }
 0x7de   : > { %8573 = vmatprep.subr.bf16.mxu1 %v16525_v41 }
 0x7e0   : > { %8389 = vmatmul.mubr.bf16.gmra.mrb[152].mxu1 %v6661_v45  ;;  %v12363_v45 = vld [vmem:[#allocation10 + $0x1b8] sm:$0xff]  }
 0x7e1   : > { %8396 = vmatprep.mubr.bf16.mxu1 %v16706_v37  ;;  %8574 = vmatpush1.bf16.msra.mxu1 %v12360_v10  ;;  %v16711_v10 = vld [vmem:[#allocation78_spill] sm:$0xff]  ;;  %v12402_v37 = vld [vmem:[#allocation2 + $0x68] sm:$0xff] }
 0x7e2   : > { %8575 = vmatprep.subr.bf16.mxu1 %v16525_v41  ;;  %v16713_v2 = vpack.c.bf16 %v16711_v10, %v16712_v23  ;;  %v12403_v10 = vld [vmem:[#allocation2 + $0x70] sm:$0xff]  ;;  %v12404_v23 = vld [vmem:[#allocation2 + $0x78] sm:$0xff] }
 0x7e5   : > { %v15759_v27 = vpop.f32.mrb[24].mxu0  ;;  %8576 = vmatpush1.bf16.msra.mxu1 %v12361_v29  ;;  %v6663_v29 = vpack.c.bf16 %v12402_v37, %v12401_v16  ;;  %v16718_v16 = vld [vmem:[#allocation85_spill] sm:$0xff] }
 0x7e6   : > { %16707 = vst [vmem:[#allocation39_spill] sm:$0xff] %v15759_v27  ;;  %v15761_v54 = vpop.f32.mrb[25].mxu0  ;;  %8577 = vmatprep.subr.bf16.mxu1 %v16525_v41  ;;  %v12412_v27 = vld [vmem:[#allocation2 + $0xb8] sm:$0xff] }
 0x7e7   : > { %16708 = vst [vmem:[#allocation40_spill] sm:$0xff] %v15761_v54  ;;  %v15764_v32 = vpop.f32.mrb[26].mxu0 }
 0x7e8   : > { %16709 = vst [vmem:[#allocation55_spill] sm:$0xff] %v15764_v32  ;;  %v15766_v8 = vpop.f32.mrb[27].mxu0  ;;  %8397 = vmatmul.mubr.bf16.gmra.mrb[156].mxu1 %v6662_v58  ;;  %v16716_v32 = vpack.c.bf16 %v16714_v28, %v16715_v48  ;;  %v12365_v58 = vld [vmem:[#allocation10 + $0x1c8] sm:$0xff]  }
 0x7e9   : > { %16710 = vst [vmem:[#allocation24_spill] sm:$0xff] %v15766_v8  ;;  %8404 = vmatprep.mubr.bf16.mxu1 %v16713_v2  ;;  %8578 = vmatpush1.bf16.msra.mxu1 %v12362_v12  ;;  %v12366_v12 = vld [vmem:[#allocation10 + $0x1d0] sm:$0xff]   ;;  %v6664_v2 = vpack.c.bf16 %v12404_v23, %v12403_v10  ;;  %v12406_v28 = vld [vmem:[#allocation2 + $0x88] sm:$0xff]  ;;  %v16721_v10 = vld [vmem:[#allocation89_spill] sm:$0xff] }
 0x7ea   : > { %8579 = vmatprep.subr.bf16.mxu1 %v16525_v41 }
 0x7ed   : > { %8580 = vmatpush1.bf16.msra.mxu1 %v12363_v45  ;;  %v16717_v45 = vld [vmem:[#allocation86_spill] sm:$0xff] }
 0x7ee   : > { %8581 = vmatprep.subr.bf16.mxu1 %v16525_v41  ;;  %v16719_v37 = vpack.c.bf16 %v16717_v45, %v16718_v16  ;;  %v12370_v45 = vld [vmem:[#allocation10 + $0x1f0] sm:$0xff]  }
 0x7ef   : > { %v12407_v16 = vld [vmem:[#allocation2 + $0x90] sm:$0xff] }
 0x7f0   : > { %8405 = vmatmul.mubr.bf16.gmra.mrb[160].mxu1 %v6663_v29  ;;  %v12367_v29 = vld [vmem:[#allocation10 + $0x1d8] sm:$0xff]  }
 0x7f1   : > { %8412 = vmatprep.mubr.bf16.mxu1 %v16716_v32  ;;  %8582 = vmatpush1.bf16.msra.mxu1 %v12364_v49  ;;  %v12368_v32 = vld [vmem:[#allocation10 + $0x1e0] sm:$0xff]  }
 0x7f2   : > { %8583 = vmatprep.subr.bf16.mxu1 %v16525_v41  ;;  %v12405_v49 = vld [vmem:[#allocation2 + $0x80] sm:$0xff] }
 0x7f3   : > { %v6665_v48 = vpack.c.bf16 %v12406_v28, %v12405_v49  ;;  %v12371_v28 = vld [vmem:[#allocation10 + $0x1f8] sm:$0xff]  }
 0x7f5   : > { %8584 = vmatpush1.bf16.msra.mxu1 %v12365_v58  ;;  %v16720_v58 = vld [vmem:[#allocation90_spill] sm:$0xff] }
 0x7f6   : > { %8585 = vmatprep.subr.bf16.mxu1 %v16525_v41  ;;  %v16722_v23 = vpack.c.bf16 %v16720_v58, %v16721_v10  ;;  %v12410_v58 = vld [vmem:[#allocation2 + $0xa8] sm:$0xff] }
 0x7f8   : > { %8413 = vmatmul.mubr.bf16.gmra.mrb[164].mxu1 %v6664_v2  ;;  %v12369_v2 = vld [vmem:[#allocation10 + $0x1e8] sm:$0xff]  }
 0x7f9   : > { %8420 = vmatprep.mubr.bf16.mxu1 %v16719_v37  ;;  %8586 = vmatpush1.bf16.msra.mxu1 %v12366_v12  ;;  %v6724_v12 = vld [vmem:[#allocation2 + $0xa9] sm:$0xff]  ;;  %v12408_v37 = vld [vmem:[#allocation2 + $0x98] sm:$0xff] }
 0x7fa   : > { %8587 = vmatprep.subr.bf16.mxu1 %v16525_v41  ;;  %v6763_v49 = vpack.c.bf16 %v6724_v12, %v15611_v22  ;;  %v6727_v22 = vld [vmem:[#allocation2 + $0xc1] sm:$0xff] }
 0x7fd   : > { %8588 = vmatpush1.bf16.msra.mxu1 %v12367_v29  ;;  %v6666_v29 = vpack.c.bf16 %v12408_v37, %v12407_v16  ;;  %v6728_v16 = vld [vmem:[#allocation2 + $0xc9] sm:$0xff] }
 0x7fe   : > { %8589 = vmatprep.subr.bf16.mxu1 %v16525_v41  ;;  %v12411_v37 = vld [vmem:[#allocation2 + $0xb0] sm:$0xff]  ;;  %v6765_v12 = vpack.c.bf16 %v6728_v16, %v6727_v22  ;;  %v12417_v16 = vld [vmem:[#allocation2 + $0xe0] sm:$0xff] }
 0x7ff   : > { %v6668_v8 = vpack.c.bf16 %v12412_v27, %v12411_v37  ;;  %v6734_v27 = vld [vmem:[#allocation2 + $0xf9] sm:$0xff]  ;;  %v6733_v22 = vld [vmem:[#allocation2 + $0xf1] sm:$0xff] }
 0x800   : > { %8421 = vmatmul.mubr.bf16.gmra.mrb[168].mxu1 %v6665_v48  ;;  %v12409_v48 = vld [vmem:[#allocation2 + $0xa0] sm:$0xff] }
 0x801   : > { %8428 = vmatprep.mubr.bf16.mxu1 %v16722_v23  ;;  %8590 = vmatpush1.bf16.msra.mxu1 %v12368_v32  ;;  %v6726_v32 = vld [vmem:[#allocation2 + $0xb9] sm:$0xff]  ;;  %v6667_v10 = vpack.c.bf16 %v12410_v58, %v12409_v48  ;;  %v6725_v23 = vld [vmem:[#allocation2 + $0xb1] sm:$0xff]  ;;  %v6732_v48 = vld [vmem:[#allocation2 + $0xe9] sm:$0xff] }
 0x802   : > { %8591 = vmatprep.subr.bf16.mxu1 %v16525_v41  ;;  %v12416_v58 = vld [vmem:[#allocation2 + $0xd8] sm:$0xff] }
 0x805   : > { %8592 = vmatpush1.bf16.msra.mxu1 %v12369_v2  ;;  %v6764_v2 = vpack.c.bf16 %v6726_v32, %v6725_v23  ;;  %v12415_v32 = vld [vmem:[#allocation2 + $0xd0] sm:$0xff]  ;;  %v6731_v23 = vld [vmem:[#allocation2 + $0xe1] sm:$0xff] }
 0x806   : > { %8593 = vmatprep.subr.bf16.mxu1 %v16525_v41 }
 0x808   : > { %8429 = vmatmul.mubr.bf16.gmra.mrb[172].mxu1 %v6666_v29  ;;  %v12413_v29 = vld [vmem:[#allocation2 + $0xc0] sm:$0xff] }
 0x809   : > { %8436 = vmatprep.mubr.bf16.mxu1 %v6763_v49  ;;  %8594 = vmatpush1.bf16.msra.mxu1 %v12370_v45  ;;  %v6730_v45 = vld [vmem:[#allocation2 + $0xd9] sm:$0xff] }
 0x80a   : > { %8595 = vmatprep.subr.bf16.mxu1 %v16525_v41  ;;  %v12414_v41 = vld [vmem:[#allocation2 + $0xc8] sm:$0xff] }
 0x80b   : > { %v6669_v49 = vpack.c.bf16 %v12414_v41, %v12413_v29  ;;  %v6736_v29 = vld [vmem:[#allocation2 + $0x109] sm:$0xff]  ;;  %v12420_v41 = vld [vmem:[#allocation2 + $0xf8] sm:$0xff] }
 0x80d   : > { %8596 = vmatpush1.bf16.msra.mxu1 %v12371_v28  ;;  %v6729_v28 = vld [vmem:[#allocation2 + $0xd1] sm:$0xff] }
 0x80e   : > { %v6766_v54 = vpack.c.bf16 %v6730_v45, %v6729_v28  ;;  %v12419_v45 = vld [vmem:[#allocation2 + $0xf0] sm:$0xff] }
 0x810   : > { %8437 = vmatmul.mubr.bf16.gmra.mrb[176].mxu1 %v6667_v10  ;;  %v6670_v10 = vpack.c.bf16 %v12416_v58, %v12415_v32  ;;  %v6738_v32 = vld [vmem:[#allocation2 + $0x119] sm:$0xff] }
 0x811   : > { %8444 = vmatprep.mubr.bf16.mxu1 %v6764_v2  ;;  %v6767_v2 = vpack.c.bf16 %v6732_v48, %v6731_v23  ;;  %v12421_v48 = vld [vmem:[#allocation2 + $0x100] sm:$0xff]  ;;  %v6737_v23 = vld [vmem:[#allocation2 + $0x111] sm:$0xff] }
 0x812   : > { %v16723_v58 = vld [vmem:[#allocation46_spill] sm:$0xff] }
 0x818   : > { %8445 = vmatmul.mubr.bf16.gmra.mrb[180].mxu1 %v6668_v8  ;;  %v12418_v8 = vld [vmem:[#allocation2 + $0xe8] sm:$0xff] }
 0x819   : > { %8452 = vmatprep.mubr.bf16.mxu1 %v6765_v12  ;;  %v6671_v37 = vpack.c.bf16 %v12418_v8, %v12417_v16  ;;  %v6768_v12 = vpack.c.bf16 %v6734_v27, %v6733_v22  ;;  %v6740_v16 = vld [vmem:[#allocation2 + $0x129] sm:$0xff]  ;;  %v6739_v22 = vld [vmem:[#allocation2 + $0x121] sm:$0xff] }
 0x81a   : > { %v12422_v27 = vld [vmem:[#allocation2 + $0x110] sm:$0xff] }
 0x81b   : > { %v16724_v8 = vld [vmem:[#allocation56_spill] sm:$0xff] }
 0x820   : > { %8453 = vmatmul.mubr.bf16.gmra.mrb[184].mxu1 %v6669_v49  ;;  %v6735_v49 = vld [vmem:[#allocation2 + $0x101] sm:$0xff] }
 0x821   : > { %8460 = vmatprep.mubr.bf16.mxu1 %v6766_v54  ;;  %v6672_v54 = vpack.c.bf16 %v12420_v41, %v12419_v45  ;;  %v6769_v28 = vpack.c.bf16 %v6736_v29, %v6735_v49  ;;  %v6742_v45 = vld [vmem:[#allocation2 + $0x139] sm:$0xff]  ;;  %v16725_v29 = vld [vmem:[#allocation47_spill] sm:$0xff]  ;;  %v16726_v41 = vld [vmem:[#allocation48_spill] sm:$0xff] }
 0x822   : > { %v6741_v49 = vld [vmem:[#allocation2 + $0x131] sm:$0xff] }
 0x828   : > { %8461 = vmatmul.mubr.bf16.gmra.mrb[188].mxu1 %v6670_v10  ;;  %v6673_v10 = vpack.c.bf16 %v16723_v58, %v12421_v48  ;;  %v6744_v48 = vld [vmem:[#allocation2 + $0x149] sm:$0xff] }
 0x829   : > { %8468 = vmatprep.mubr.bf16.mxu1 %v6767_v2  ;;  %v6770_v2 = vpack.c.bf16 %v6738_v32, %v6737_v23  ;;  %v16727_v32 = vld [vmem:[#allocation53_spill] sm:$0xff] }
 0x830   : > { %8469 = vmatmul.mubr.bf16.gmra.mrb[192].mxu1 %v6671_v37  ;;  %v6674_v37 = vpack.c.bf16 %v16724_v8, %v12422_v27  ;;  %v6746_v27 = vld [vmem:[#allocation2 + $0x159] sm:$0xff] }
 0x831   : > { %8476 = vmatprep.mubr.bf16.mxu1 %v6768_v12  ;;  %v6771_v12 = vpack.c.bf16 %v6740_v16, %v6739_v22  ;;  %v16729_v16 = vld [vmem:[#allocation58_spill] sm:$0xff] }
 0x838   : > { %8477 = vmatmul.mubr.bf16.gmra.mrb[196].mxu1 %v6672_v54  ;;  %v6675_v54 = vpack.c.bf16 %v16726_v41, %v16725_v29 }
 0x839   : > { %8484 = vmatprep.mubr.bf16.mxu1 %v6769_v28  ;;  %v6772_v28 = vpack.c.bf16 %v6742_v45, %v6741_v49  ;;  %v16731_v45 = vld [vmem:[#allocation26_spill] sm:$0xff] }
 0x840   : > { %8485 = vmatmul.mubr.bf16.gmra.mrb[200].mxu1 %v6673_v10  ;;  %v16728_v10 = vld [vmem:[#allocation25_spill] sm:$0xff] }
 0x841   : > { %8492 = vmatprep.mubr.bf16.mxu1 %v6770_v2  ;;  %v6676_v23 = vpack.c.bf16 %v16728_v10, %v16727_v32  ;;  %v6743_v2 = vld [vmem:[#allocation2 + $0x141] sm:$0xff] }
 0x842   : > { %v6773_v17 = vpack.c.bf16 %v6744_v48, %v6743_v2  ;;  %v16733_v48 = vld [vmem:[#allocation57_spill] sm:$0xff] }
 0x848   : > { %8493 = vmatmul.mubr.bf16.gmra.mrb[204].mxu1 %v6674_v37  ;;  %v16730_v37 = vld [vmem:[#allocation60_spill] sm:$0xff] }
 0x849   : > { %8500 = vmatprep.mubr.bf16.mxu1 %v6771_v12  ;;  %v6677_v22 = vpack.c.bf16 %v16730_v37, %v16729_v16  ;;  %v6745_v12 = vld [vmem:[#allocation2 + $0x151] sm:$0xff] }
 0x84a   : > { %v6774_v19 = vpack.c.bf16 %v6746_v27, %v6745_v12  ;;  %v16734_v27 = vld [vmem:[#allocation59_spill] sm:$0xff] }
 0x84b   : > { %v6751_v12 = vld [vmem:[#allocation2 + $0x181] sm:$0xff] }
 0x84c   : > { %v6777_v52 = vpack.c.bf16 %v6752_v0, %v6751_v12  ;;  %v6804_v0 = vld [vmem:[#allocation2 + $0x3f] sm:$0xff]  ;;  %v16740_v12 = vld [vmem:[#allocation72_spill] sm:$0xff] }
 0x84d   : > { %v16742_v40 = vpack.c.bf16 %v16740_v12, %v16741_v36  ;;  %v16750_v12 = vld [vmem:[#allocation83_spill] sm:$0xff] }
 0x850   : > { %8501 = vmatmul.mubr.bf16.gmra.mrb[208].mxu1 %v6675_v54  ;;  %v16732_v54 = vld [vmem:[#allocation27_spill] sm:$0xff] }
 0x851   : > { %8508 = vmatprep.mubr.bf16.mxu1 %v6772_v28  ;;  %v6678_v49 = vpack.c.bf16 %v16732_v54, %v16731_v45  ;;  %v6747_v28 = vld [vmem:[#allocation2 + $0x161] sm:$0xff] }
 0x852   : > { %v6775_v39 = vpack.c.bf16 %v6748_v55, %v6747_v28  ;;  %v6754_v55 = vld [vmem:[#allocation2 + $0x199] sm:$0xff] }
 0x853   : > { %v6778_v28 = vpack.c.bf16 %v6754_v55, %v6753_v38  ;;  %v6806_v38 = vld [vmem:[#allocation2 + $0x4f] sm:$0xff]  ;;  %v6805_v55 = vld [vmem:[#allocation2 + $0x47] sm:$0xff] }
 0x858   : > { %8509 = vmatmul.mubr.bf16.gmra.mrb[212].mxu1 %v6676_v23  ;;  %v6749_v23 = vld [vmem:[#allocation2 + $0x171] sm:$0xff] }
 0x859   : > { %8516 = vmatprep.mubr.bf16.mxu1 %v6773_v17  ;;  %v6679_v17 = vpack.c.bf16 %v15543_v3, %v16733_v48  ;;  %v6776_v2 = vpack.c.bf16 %v6750_v25, %v6749_v23  ;;  %v6682_v25 = vpack.c.bf16 %v15806_v26, %v15575_v20  ;;  %v16738_v23 = vld [vmem:[#allocation68_spill] sm:$0xff] }
 0x860   : > { %8517 = vmatmul.mubr.bf16.gmra.mrb[216].mxu1 %v6677_v22  ;;  %v16735_v22 = vld [vmem:[#allocation28_spill] sm:$0xff] }
 0x861   : > { %8524 = vmatprep.mubr.bf16.mxu1 %v6774_v19  ;;  %v6680_v19 = vpack.c.bf16 %v16735_v22, %v16734_v27 }
 0x868   : > { %8525 = vmatmul.mubr.bf16.gmra.mrb[220].mxu1 %v6678_v49  ;;  %v16736_v49 = vld [vmem:[#allocation29_spill] sm:$0xff] }
 0x869   : > { %8532 = vmatprep.mubr.bf16.mxu1 %v6775_v39  ;;  %v6681_v39 = vpack.c.bf16 %v15573_v53, %v16736_v49 }
 0x870   : > { %8533 = vmatmul.mubr.bf16.gmra.mrb[224].mxu1 %v6679_v17  ;;  %v16737_v17 = vld [vmem:[#allocation69_spill] sm:$0xff] }
 0x871   : > { %8540 = vmatprep.mubr.bf16.mxu1 %v6776_v2  ;;  %v16739_v2 = vpack.c.bf16 %v16737_v17, %v16738_v23  ;;  %v16746_v23 = vld [vmem:[#allocation80_spill] sm:$0xff] }
 0x878   : > { %8541 = vmatmul.mubr.bf16.gmra.mrb[228].mxu1 %v6680_v19 }
 0x879   : > { %8548 = vmatprep.mubr.bf16.mxu1 %v6777_v52  ;;  %v6803_v52 = vld [vmem:[#allocation2 + $0x37] sm:$0xff] }
 0x87a   : > { %v6851_v19 = vpack.c.bf16 %v6804_v0, %v6803_v52  ;;  %v6810_v52 = vld [vmem:[#allocation2 + $0x6f] sm:$0xff] }
 0x880   : > { %8549 = vmatmul.mubr.bf16.gmra.mrb[232].mxu1 %v6681_v39  ;;  %v6852_v39 = vpack.c.bf16 %v6806_v38, %v6805_v55  ;;  %v6812_v55 = vld [vmem:[#allocation2 + $0x7f] sm:$0xff] }
 0x881   : > { %8556 = vmatprep.mubr.bf16.mxu1 %v6778_v28  ;;  %v16743_v28 = vld [vmem:[#allocation76_spill] sm:$0xff] }
 0x882   : > { %v16745_v11 = vpack.c.bf16 %v16743_v28, %v16744_v31  ;;  %v16753_v28 = vld [vmem:[#allocation87_spill] sm:$0xff] }
 0x888   : > { %8557 = vmatmul.mubr.bf16.gmra.mrb[236].mxu1 %v6682_v25  ;;  %v6808_v25 = vld [vmem:[#allocation2 + $0x5f] sm:$0xff] }
 0x889   : > { %8597 = vmatprep.mubr.bf16.mxu1 %v16739_v2  ;;  %v6853_v17 = vpack.c.bf16 %v6808_v25, %v6807_v51  ;;  %v16747_v2 = vld [vmem:[#allocation79_spill] sm:$0xff] }
 0x88a   : > { %v16748_v0 = vpack.c.bf16 %v16746_v23, %v16747_v2  ;;  %v6814_v25 = vld [vmem:[#allocation2 + $0x8f] sm:$0xff] }
 0x88b   : > { %v16755_v2 = vld [vmem:[#allocation92_spill] sm:$0xff] }
 0x890   : > { %8598 = vmatmul.mubr.bf16.vlgmr.msra.gmra.mrb[144].mxu1 %v6851_v19  ;;  %v6809_v19 = vld [vmem:[#allocation2 + $0x67] sm:$0xff] }
 0x891   : > { %8605 = vmatprep.mubr.bf16.mxu1 %v16742_v40  ;;  %v6854_v36 = vpack.c.bf16 %v6810_v52, %v6809_v19  ;;  %v16749_v40 = vld [vmem:[#allocation84_spill] sm:$0xff]  ;;  %v6816_v19 = vld [vmem:[#allocation2 + $0x9f] sm:$0xff] }
 0x892   : > { %v16751_v38 = vpack.c.bf16 %v16749_v40, %v16750_v12  ;;  %v7041_v12 = vld [vmem:[#allocation2 + $0x1a9] sm:$0xff] }
 0x898   : > { %8606 = vmatmul.mubr.bf16.gmra.mrb[148].mxu1 %v6852_v39  ;;  %v6811_v39 = vld [vmem:[#allocation2 + $0x77] sm:$0xff] }
 0x899   : > { %8613 = vmatprep.mubr.bf16.mxu1 %v16745_v11  ;;  %v6855_v31 = vpack.c.bf16 %v6812_v55, %v6811_v39  ;;  %v16752_v11 = vld [vmem:[#allocation88_spill] sm:$0xff]  ;;  %v16758_v55 = vld [vmem:[#allocation94_spill] sm:$0xff]  ;;  %v16759_v39 = vld [vmem:[#allocation93_spill] sm:$0xff] }
 0x89a   : > { %v16754_v51 = vpack.c.bf16 %v16752_v11, %v16753_v28  ;;  %v6818_v28 = vld [vmem:[#allocation2 + $0xaf] sm:$0xff] }
 0x8a0   : > { %8614 = vmatmul.mubr.bf16.gmra.mrb[152].mxu1 %v6853_v17  ;;  %v6813_v17 = vld [vmem:[#allocation2 + $0x87] sm:$0xff] }
 0x8a1   : > { %8621 = vmatprep.mubr.bf16.mxu1 %v16748_v0  ;;  %v6856_v23 = vpack.c.bf16 %v6814_v25, %v6813_v17  ;;  %v16756_v0 = vld [vmem:[#allocation91_spill] sm:$0xff]  ;;  %v16761_v17 = vld [vmem:[#allocation41_spill] sm:$0xff] }
 0x8a2   : > { %v16757_v52 = vpack.c.bf16 %v16755_v2, %v16756_v0  ;;  %v6820_v0 = vld [vmem:[#allocation2 + $0xbf] sm:$0xff] }
 0x8a8   : > { %8622 = vmatmul.mubr.bf16.gmra.mrb[156].mxu1 %v6854_v36  ;;  %v6815_v36 = vld [vmem:[#allocation2 + $0x97] sm:$0xff] }
 0x8a9   : > { %8629 = vmatprep.mubr.bf16.mxu1 %v16751_v38  ;;  %v6857_v40 = vpack.c.bf16 %v6816_v19, %v6815_v36  ;;  %v7042_v38 = vld [vmem:[#allocation2 + $0x1b1] sm:$0xff]  ;;  %v16764_v36 = vld [vmem:[#allocation50_spill] sm:$0xff] }
 0x8aa   : > { %v7066_v11 = vpack.c.bf16 %v7042_v38, %v7041_v12  ;;  %v16767_v38 = vld [vmem:[#allocation43_spill] sm:$0xff] }
 0x8ac   : > { %11072 = vmatmul.mubr.bf16.gmra.mrb[28].mxu0 %v7066_v11 }
 0x8b0   : > { %8630 = vmatmul.mubr.bf16.gmra.mrb[160].mxu1 %v6855_v31  ;;  %v16760_v31 = vpack.c.bf16 %v16758_v55, %v16759_v39  ;;  %v6822_v55 = vld [vmem:[#allocation2 + $0xcf] sm:$0xff]  ;;  %v6821_v39 = vld [vmem:[#allocation2 + $0xc7] sm:$0xff] }
 0x8b1   : > { %8637 = vmatprep.mubr.bf16.mxu1 %v16754_v51  ;;  %v6817_v51 = vld [vmem:[#allocation2 + $0xa7] sm:$0xff]  ;;  %v6860_v12 = vpack.c.bf16 %v6822_v55, %v6821_v39  ;;  %v6828_v55 = vld [vmem:[#allocation2 + $0xff] sm:$0xff]  ;;  %v6827_v39 = vld [vmem:[#allocation2 + $0xf7] sm:$0xff] }
 0x8b2   : > { %v6858_v25 = vpack.c.bf16 %v6818_v28, %v6817_v51  ;;  %v6824_v28 = vld [vmem:[#allocation2 + $0xdf] sm:$0xff]  ;;  %v6823_v51 = vld [vmem:[#allocation2 + $0xd7] sm:$0xff] }
 0x8b8   : > { %8638 = vmatmul.mubr.bf16.gmra.mrb[164].mxu1 %v6856_v23  ;;  %v16762_v23 = vld [vmem:[#allocation30_spill] sm:$0xff] }
 0x8b9   : > { %8645 = vmatprep.mubr.bf16.mxu1 %v16757_v52  ;;  %v16763_v2 = vpack.c.bf16 %v16761_v17, %v16762_v23  ;;  %v6819_v52 = vld [vmem:[#allocation2 + $0xb7] sm:$0xff] }
 0x8ba   : > { %v6859_v19 = vpack.c.bf16 %v6820_v0, %v6819_v52  ;;  %v16770_v17 = vld [vmem:[#allocation49_spill] sm:$0xff]  ;;  %v16771_v23 = vld [vmem:[#allocation44_spill] sm:$0xff]  ;;  %v6825_v52 = vld [vmem:[#allocation2 + $0xe7] sm:$0xff] }
 0x8bb   : > { %v6826_v0 = vld [vmem:[#allocation2 + $0xef] sm:$0xff] }
 0x8c0   : > { %8646 = vmatmul.mubr.bf16.gmra.mrb[168].mxu1 %v6857_v40  ;;  %v16765_v40 = vld [vmem:[#allocation42_spill] sm:$0xff] }
 0x8c1   : > { %8653 = vmatprep.mubr.bf16.mxu1 %v16760_v31  ;;  %v16766_v9 = vpack.c.bf16 %v16764_v36, %v16765_v40  ;;  %v16768_v31 = vld [vmem:[#allocation52_spill] sm:$0xff]  ;;  %v16774_v36 = vld [vmem:[#allocation51_spill] sm:$0xff] }
 0x8c2   : > { %v16769_v11 = vpack.c.bf16 %v16767_v38, %v16768_v31  ;;  %v16776_v38 = vld [vmem:[#allocation54_spill] sm:$0xff] }
 0x8c3   : > { %v16777_v31 = vpack.c.bf16 %v16776_v38, %v16723_v58  ;;  %v6839_v38 = vld [vmem:[#allocation2 + $0x157] sm:$0xff] }
 0x8c8   : > { %8654 = vmatmul.mubr.bf16.gmra.mrb[172].mxu1 %v6858_v25  ;;  %v6861_v25 = vpack.c.bf16 %v6824_v28, %v6823_v51  ;;  %v6829_v28 = vld [vmem:[#allocation2 + $0x107] sm:$0xff] }
 0x8c9   : > { %8661 = vmatprep.mubr.bf16.mxu1 %v16763_v2  ;;  %v16772_v2 = vpack.c.bf16 %v16770_v17, %v16771_v23  ;;  %v6832_v17 = vld [vmem:[#allocation2 + $0x11f] sm:$0xff]  ;;  %v6831_v23 = vld [vmem:[#allocation2 + $0x117] sm:$0xff] }
 0x8d0   : > { %8662 = vmatmul.mubr.bf16.gmra.mrb[176].mxu1 %v6859_v19  ;;  %v6862_v19 = vpack.c.bf16 %v6826_v0, %v6825_v52  ;;  %v16779_v0 = vpack.c.bf16 %v16727_v32, %v16726_v41  ;;  %v6834_v52 = vld [vmem:[#allocation2 + $0x12f] sm:$0xff]  ;;  %v16782_v32 = vpack.c.bf16 %v16733_v48, %v16732_v54  ;;  %v16785_v48 = vpack.c.bf16 %v15575_v20, %v15573_v53  ;;  %v15884_v20 = vld [vmem:[%s16385_s6] ss:$0 sm:$0xff] }
 0x8d1   : > { %8669 = vmatprep.mubr.bf16.mxu1 %v16766_v9  ;;  %v16773_v9 = vld [vmem:[#allocation45_spill] sm:$0xff] }
 0x8d2   : > { %v16775_v40 = vpack.c.bf16 %v16773_v9, %v16774_v36  ;;  %v16780_v9 = vpack.c.bf16 %v16729_v16, %v16728_v10  ;;  %v6836_v36 = vld [vmem:[#allocation2 + $0x13f] sm:$0xff]  ;;  %v16783_v16 = vpack.c.bf16 %v16734_v27, %v15543_v3  ;;  %v16786_v27 = vpack.c.bf16 %v15571_v30, %v15569_v14 }
 0x8d8   : > { %8670 = vmatmul.mubr.bf16.gmra.mrb[180].mxu1 %v6860_v12  ;;  %v6863_v12 = vpack.c.bf16 %v6828_v55, %v6827_v39  ;;  %v6838_v55 = vld [vmem:[#allocation2 + $0x14f] sm:$0xff]  ;;  %v6837_v39 = vld [vmem:[#allocation2 + $0x147] sm:$0xff] }
 0x8d9   : > { %8677 = vmatprep.mubr.bf16.mxu1 %v16769_v11  ;;  %v6830_v11 = vld [vmem:[#allocation2 + $0x10f] sm:$0xff]  ;;  %v6868_v41 = vpack.c.bf16 %v6838_v55, %v6837_v39 }
 0x8da   : > { %v6864_v51 = vpack.c.bf16 %v6830_v11, %v6829_v28  ;;  %v6841_v11 = vld [vmem:[#allocation2 + $0x167] sm:$0xff]  ;;  %v6844_v28 = vld [vmem:[#allocation2 + $0x17f] sm:$0xff] }
 0x8e0   : > { %8678 = vmatmul.mubr.bf16.gmra.mrb[184].mxu1 %v6861_v25  ;;  %v16778_v25 = vpack.c.bf16 %v16725_v29, %v16724_v8  ;;  %v16781_v29 = vpack.c.bf16 %v16731_v45, %v16730_v37  ;;  %v16784_v45 = vpack.c.bf16 %v16736_v49, %v16735_v22  ;;  %v6849_v49 = vld [vmem:[#allocation2 + $0x1a7] sm:$0xff] }
 0x8e1   : > { %8685 = vmatprep.mubr.bf16.mxu1 %v16772_v2  ;;  %v6865_v2 = vpack.c.bf16 %v6832_v17, %v6831_v23  ;;  %v6848_v17 = vld [vmem:[#allocation2 + $0x19f] sm:$0xff] }
 0x8e2   : > { %v6873_v22 = vpack.c.bf16 %v6848_v17, %v15720_v56 }
 0x8e8   : > { %8686 = vmatmul.mubr.bf16.gmra.mrb[188].mxu1 %v6862_v19  ;;  %v6833_v19 = vld [vmem:[#allocation2 + $0x127] sm:$0xff] }
 0x8e9   : > { %8693 = vmatprep.mubr.bf16.mxu1 %v16775_v40  ;;  %v6866_v58 = vpack.c.bf16 %v6834_v52, %v6833_v19  ;;  %v6835_v40 = vld [vmem:[#allocation2 + $0x137] sm:$0xff] }
 0x8ea   : > { %v6867_v8 = vpack.c.bf16 %v6836_v36, %v6835_v40 }
 0x8f0   : > { %8694 = vmatmul.mubr.bf16.gmra.mrb[192].mxu1 %v6863_v12  ;;  %v6840_v12 = vld [vmem:[#allocation2 + $0x15f] sm:$0xff] }
 0x8f1   : > { %8701 = vmatprep.mubr.bf16.mxu1 %v16777_v31  ;;  %v6869_v10 = vpack.c.bf16 %v6840_v12, %v6839_v38  ;;  %v6842_v31 = vld [vmem:[#allocation2 + $0x16f] sm:$0xff]  ;;  %v16787_v38 = vld [vmem:[#allocation18_spill] sm:$0xff] }
 0x8f2   : > { %v6870_v37 = vpack.c.bf16 %v6842_v31, %v6841_v11 }
 0x8f8   : > { %8702 = vmatmul.mubr.bf16.gmra.mrb[196].mxu1 %v6864_v51  ;;  %v6843_v51 = vld [vmem:[#allocation2 + $0x177] sm:$0xff] }
 0x8f9   : > { %8709 = vmatprep.mubr.bf16.mxu1 %v16778_v25  ;;  %v6871_v54 = vpack.c.bf16 %v6844_v28, %v6843_v51  ;;  %v12423_v25 = vld [vmem:[#allocation2 + $0x8] sm:$0xff] }
 0x8fa   : > { %v6969_v3 = vpack.c.bf16 %v12423_v25, %v15806_v26  ;;  %v6970_v23 = vpack.c.bf16 %v12423_v25, %v12423_v25 }
 0x900   : > { %8710 = vmatmul.mubr.bf16.gmra.mrb[200].mxu1 %v6865_v2  ;;  %v6850_v2 = vld [vmem:[#allocation2 + $0x1af] sm:$0xff] }
 0x901   : > { %8717 = vmatprep.mubr.bf16.mxu1 %v16779_v0  ;;  %v6874_v0 = vpack.c.bf16 %v6850_v2, %v6849_v49 }
 0x908   : > { %8718 = vmatmul.mubr.bf16.gmra.mrb[204].mxu1 %v6866_v58 }
 0x909   : > { %8725 = vmatprep.mubr.bf16.mxu1 %v16780_v9  ;;  %v12765_v9 = vmov 1983009808  }
 0x90a   : > { %v9113_v36 = vunpack.c.l.s4 %v12765_v9 }
 0x90c   : > { %v9114_v39 = vunpack.c.0.s8 %v9113_v36 }
 0x910   : > { %8726 = vmatmul.mubr.bf16.gmra.mrb[208].mxu1 %v6867_v8 }
 0x911   : > { %8733 = vmatprep.mubr.bf16.mxu1 %v16781_v29 }
 0x918   : > { %8734 = vmatmul.mubr.bf16.gmra.mrb[212].mxu1 %v6868_v41 }
 0x919   : > { %8741 = vmatprep.mubr.bf16.mxu1 %v16782_v32 }
 0x920   : > { %8742 = vmatmul.mubr.bf16.gmra.mrb[216].mxu1 %v6869_v10  ;;  %v15895_v10 = vsub.s32 %v9114_v39, %v16787_v38 }
 0x921   : > { %8749 = vmatprep.mubr.bf16.mxu1 %v16783_v16 }
 0x928   : > { %8750 = vmatmul.mubr.bf16.gmra.mrb[220].mxu1 %v6870_v37 }
 0x929   : > { %8757 = vmatprep.mubr.bf16.mxu1 %v16784_v45 }
 0x930   : > { %8758 = vmatmul.mubr.bf16.gmra.mrb[224].mxu1 %v6871_v54 }
 0x931   : > { %8765 = vmatprep.mubr.bf16.mxu1 %v16785_v48 }
 0x938   : > { %8766 = vmatmul.mubr.bf16.gmra.mrb[228].mxu1 %v16786_v27 }
 0x939   : > { %8773 = vmatprep.mubr.bf16.mxu1 %v6969_v3 }
 0x940   : > { %8774 = vmatmul.mubr.bf16.gmra.mrb[232].mxu1 %v6873_v22 }
 0x941   : > { %8781 = vmatprep.mubr.bf16.mxu1 %v6970_v23 }
 0x948   : > { %8782 = vmatmul.mubr.bf16.gmra.mrb[236].mxu1 %v6874_v0 }
 0x963   : > { %v8599_v53 = vpop.f32.mrb[144].mxu1 }
 0x964   : > { %v11251_v14 = vadd.f32 %v15884_v20, %v8599_v53  ;;  %v8601_v30 = vpop.f32.mrb[145].mxu1 }
 0x965   : > { %v8602_v26 = vpop.f32.mrb[146].mxu1 }
 0x966   : > { %v8825_v52 = vadd.f32 %v11251_v14, %v15596_v34  ;;  %v11252_v56 = vadd.f32 %v15884_v20, %v8602_v26  ;;  %v8604_v19 = vpop.f32.mrb[147].mxu1  ;;  %v15911_v14 = vsub.s32 0, %v16787_v38 }
 0x968   : > { %v8828_v58 = vadd.f32 %v11252_v56, %v15601_v50  ;;  %v9015_v50 = vmax.f32 %v8825_v52, 0.0 }
 0x96a   : > { %v9016_v25 = vmax.f32 %v8828_v58, 0.0 }
 0x96b   : > { %v8607_v40 = vpop.f32.mrb[148].mxu1 }
 0x96c   : > { %v11253_v8 = vadd.f32 %v15884_v20, %v8607_v40  ;;  %v8609_v29 = vpop.f32.mrb[149].mxu1 }
 0x96d   : > { %v8610_v55 = vpop.f32.mrb[150].mxu1 }
 0x96e   : > { %v8833_v41 = vadd.f32 %v11253_v8, %v15594_v60  ;;  %v11254_v32 = vadd.f32 %v15884_v20, %v8610_v55  ;;  %v8612_v12 = vpop.f32.mrb[151].mxu1 }
 0x970   : > { %v8836_v34 = vadd.f32 %v11254_v32, %v15598_v4  ;;  %v9017_v30 = vmax.f32 %v8833_v41, 0.0 }
 0x972   : > { %v9018_v16 = vmax.f32 %v8836_v34, 0.0 }
 0x973   : > { %v8615_v31 = vpop.f32.mrb[152].mxu1 }
 0x974   : > { %v9063_v11 = vmax.f32 %v9015_v50, %v9018_v16  ;;  %v11255_v37 = vadd.f32 %v15884_v20, %v8615_v31  ;;  %v8617_v60 = vpop.f32.mrb[153].mxu1 }
 0x975   : > { %v8618_v45 = vpop.f32.mrb[154].mxu1 }
 0x976   : > { %v9111_v28 = vcombine.high %v9063_v11, %v9063_v11  ;;  %v9118_v4 = vrot.slane %v9063_v11, %v15895_v10  ;;  %v8841_v51 = vadd.f32 %v11255_v37, %v15615_v59  ;;  %v11256_v54 = vadd.f32 %v15884_v20, %v8618_v45  ;;  %v8620_v48 = vpop.f32.mrb[155].mxu1 }
 0x978   : > { %v9125_v3 = vrot.slane %v9111_v28, %v15895_v10  ;;  %v9126_v27 = vcombine.high %v9118_v4, %v9118_v4  ;;  %v9019_v17 = vmax.f32 %v8841_v51, 0.0  ;;  %v10709_v22 = vrot.slane %v9118_v4, 9 }
 0x979   : > { %v8844_v49 = vadd.f32 %v11256_v54, %v15620_v62 }
 0x97a   : > { %v9127_v2 = vcombine.high %v9125_v3, %v9125_v3  ;;  %v9448_v0 = vrot.slane %v9126_v27, 7  ;;  %v9451_v53 = vrot.slane %v9125_v3, 7  ;;  %v9064_v59 = vmax.f32 %v9016_v25, %v9019_v17 }
 0x97b   : > { %v9020_v26 = vmax.f32 %v8844_v49, 0.0  ;;  %v8623_v52 = vpop.f32.mrb[156].mxu1 }
 0x97c   : > { %v9449_v56 = vsel %vm15905_vm13, %v10709_v22, %v9448_v0  ;;  %v9450_v19 = vrot.slane %v9448_v0, 2  ;;  %v9453_v58 = vrot.slane %v9451_v53, 2  ;;  %v9454_v9 = vrot.slane %v9127_v2, 7  ;;  %v8625_v36 = vpop.f32.mrb[157].mxu1 }
 0x97d   : > { %v10717_v40 = vrot.slane %v9449_v56, 9  ;;  %v9128_v62 = vcombine.high %v9064_v59, %v9064_v59  ;;  %v9135_v8 = vrot.slane %v9064_v59, %v15895_v10  ;;  %v9065_v29 = vmax.f32 %v9017_v30, %v9020_v26  ;;  %v8626_v55 = vpop.f32.mrb[158].mxu1 }
 0x97e   : > { %v9452_v39 = vsel %vm15905_vm13, %v9450_v19, %v9451_v53  ;;  %v9455_v41 = vsel %vm15905_vm13, %v9453_v58, %v9454_v9  ;;  %v9456_v32 = vrot.slane %v9454_v9, 2  ;;  %v11257_v12 = vadd.f32 %v15884_v20, %v8623_v52  ;;  %v8628_v34 = vpop.f32.mrb[159].mxu1 }
 0x97f   : > { %v10718_v38 = vrot.slane %v9452_v39, 9  ;;  %v10719_v50 = vrot.slane %v9455_v41, 9  ;;  %v9902_v16 = vmax.f32 %v9449_v56, %v10717_v40  ;;  %v9142_v31 = vrot.slane %v9128_v62, %v15895_v10 }
 0x980   : > { %v9143_v11 = vcombine.high %v9135_v8, %v9135_v8  ;;  %v9457_v37 = vrot.slane %v9135_v8, 7  ;;  %v9151_v60 = vrot.slane %v9065_v29, %v15895_v10  ;;  %v8849_v45 = vadd.f32 %v11257_v12, %v15613_v6 }
 0x981   : > { %v9903_v28 = vmax.f32 %v9452_v39, %v10718_v38  ;;  %v9904_v4 = vmax.f32 %v9455_v41, %v10719_v50  ;;  %v10033_v51 = vrot.slane %v9902_v16, %v15911_v14  ;;  %v9144_v54 = vcombine.high %v9142_v31, %v9142_v31 }
 0x982   : > { %v9458_v48 = vsel %vm15905_vm13, %v9456_v32, %v9457_v37  ;;  %v9459_v25 = vrot.slane %v9457_v37, 2  ;;  %v9460_v3 = vrot.slane %v9143_v11, 7  ;;  %v9463_v27 = vrot.slane %v9142_v31, 7 }
 0x983   : > { %v10037_v17 = vrot.slane %v9903_v28, %v15911_v14  ;;  %v10041_v22 = vrot.slane %v9904_v4, %v15911_v14  ;;  %v9466_v49 = vrot.slane %v9144_v54, 7  ;;  %v10720_v2 = vrot.slane %v9458_v48, 9  ;;  %v8631_v0 = vpop.f32.mrb[160].mxu1 }
 0x984   : > { %v9461_v6 = vsel %vm15905_vm13, %v9459_v25, %v9460_v3  ;;  %v9462_v53 = vrot.slane %v9460_v3, 2  ;;  %v9465_v59 = vrot.slane %v9463_v27, 2  ;;  %v8633_v30 = vpop.f32.mrb[161].mxu1  ;;  %v9469_v62 = vrot.slane %v9151_v60, 7 }
 0x985   : > { %v10287_v26 = vsel %vm10286_vm14, %v10037_v17, %v10033_v51  ;;  %v9468_v52 = vrot.slane %v9466_v49, 2  ;;  %v10721_v56 = vrot.slane %v9461_v6, 9  ;;  %v9905_v19 = vmax.f32 %v9458_v48, %v10720_v2  ;;  %v8634_v58 = vpop.f32.mrb[162].mxu1 }
 0x986   : > { %v9464_v9 = vsel %vm15905_vm13, %v9462_v53, %v9463_v27  ;;  %v9467_v36 = vsel %vm15905_vm13, %v9465_v59, %v9466_v49  ;;  %v10288_v40 = vsel %vm9440_vm8, %v10041_v22, %v10287_v26  ;;  %v8636_v8 = vpop.f32.mrb[163].mxu1  ;;  %v11258_v34 = vadd.f32 %v15884_v20, %v8626_v55 }
 0x987   : > { %v10722_v29 = vrot.slane %v9464_v9, 9  ;;  %v10723_v39 = vrot.slane %v9467_v36, 9  ;;  %v9906_v41 = vmax.f32 %v9461_v6, %v10721_v56  ;;  %v10045_v32 = vrot.slane %v9905_v19, %v15911_v14 }
 0x988   : > { %v9470_v12 = vsel %vm15905_vm13, %v9468_v52, %v9469_v62  ;;  %v11259_v38 = vadd.f32 %v15884_v20, %v8631_v0  ;;  %v11260_v50 = vadd.f32 %v15884_v20, %v8634_v58  ;;  %v8852_v28 = vadd.f32 %v11258_v34, %v15618_v35 }
 0x989   : > { %v9907_v16 = vmax.f32 %v9464_v9, %v10722_v29  ;;  %v9908_v31 = vmax.f32 %v9467_v36, %v10723_v39  ;;  %v10049_v11 = vrot.slane %v9906_v41, %v15911_v14  ;;  %v10290_v37 = vsel %vm10289_vm15, %v10045_v32, %v10288_v40 }
 0x98a   : > { %v10724_v60 = vrot.slane %v9470_v12, 9  ;;  %v8857_v4 = vadd.f32 %v11259_v38, %v15631_v43  ;;  %v8860_v51 = vadd.f32 %v11260_v50, %v15635_v15  ;;  %v9021_v27 = vmax.f32 %v8849_v45, 0.0 }
 0x98b   : > { %v10053_v54 = vrot.slane %v9907_v16, %v15911_v14  ;;  %v10057_v55 = vrot.slane %v9908_v31, %v15911_v14  ;;  %v10291_v48 = vsel %vm9442_vm10, %v10049_v11, %v10290_v37  ;;  %v8639_v25 = vpop.f32.mrb[164].mxu1  ;;  %v9022_v56 = vmax.f32 %v8852_v28, 0.0 }
 0x98c   : > { %v9909_v3 = vmax.f32 %v9470_v12, %v10724_v60  ;;  %v9024_v17 = vmax.f32 %v8860_v51, 0.0  ;;  %v8641_v22 = vpop.f32.mrb[165].mxu1  ;;  %v11261_v35 = vadd.f32 %v15884_v20, %v8639_v25  ;;  %v9023_v58 = vmax.f32 %v8857_v4, 0.0 }
 0x98d   : > { %v10293_v49 = vsel %vm10292_vm0, %v10053_v54, %v10291_v48  ;;  %v8642_v43 = vpop.f32.mrb[166].mxu1 }
 0x98e   : > { %v10061_v15 = vrot.slane %v9909_v3, %v15911_v14  ;;  %v10294_v2 = vsel %vm9444_vm11, %v10057_v55, %v10293_v49  ;;  %v9066_v0 = vmax.f32 %v9021_v27, %v9024_v17  ;;  %v11262_v6 = vadd.f32 %v15884_v20, %v8642_v43  ;;  %v8644_v53 = vpop.f32.mrb[167].mxu1 }
 0x98f   : > { %v8865_v59 = vadd.f32 %v11261_v35, %v15629_v46 }
 0x990   : > { %v10296_v45 = vsel %vm10295_vm1, %v10061_v15, %v10294_v2  ;;  %v9152_v30 = vcombine.high %v9066_v0, %v9066_v0  ;;  %v9159_v26 = vrot.slane %v9066_v0, %v15895_v10  ;;  %v8868_v52 = vadd.f32 %v11262_v6, %v15633_v21 }
 0x991   : > { %10354 = vst [vmem:[%s15961_s13] sm:$0xff] %v10296_v45  ;;  %v9025_v19 = vmax.f32 %v8865_v59, 0.0 }
 0x992   : > { %v9166_v9 = vrot.slane %v9152_v30, %v15895_v10  ;;  %v9167_v36 = vcombine.high %v9159_v26, %v9159_v26  ;;  %v9026_v40 = vmax.f32 %v8868_v52, 0.0  ;;  %v10710_v62 = vrot.slane %v9159_v26, 9 }
 0x993   : > { %v9067_v46 = vmax.f32 %v9022_v56, %v9025_v19  ;;  %v8647_v8 = vpop.f32.mrb[168].mxu1 }
 0x994   : > { %v9168_v29 = vcombine.high %v9166_v9, %v9166_v9  ;;  %v9473_v39 = vrot.slane %v9167_v36, 7  ;;  %v9476_v41 = vrot.slane %v9166_v9, 7  ;;  %v9068_v32 = vmax.f32 %v9023_v58, %v9026_v40  ;;  %v8649_v12 = vpop.f32.mrb[169].mxu1 }
 0x995   : > { %v9169_v21 = vcombine.high %v9067_v46, %v9067_v46  ;;  %v9176_v34 = vrot.slane %v9067_v46, %v15895_v10  ;;  %v11263_v38 = vadd.f32 %v15884_v20, %v8647_v8  ;;  %v8650_v50 = vpop.f32.mrb[170].mxu1 }
 0x996   : > { %v9474_v16 = vsel %vm15905_vm13, %v10710_v62, %v9473_v39  ;;  %v9475_v31 = vrot.slane %v9473_v39, 2  ;;  %v9478_v11 = vrot.slane %v9476_v41, 2  ;;  %v9479_v37 = vrot.slane %v9168_v29, 7  ;;  %v8652_v60 = vpop.f32.mrb[171].mxu1 }
 0x997   : > { %v10725_v28 = vrot.slane %v9474_v16, 9  ;;  %v9183_v4 = vrot.slane %v9169_v21, %v15895_v10  ;;  %v9184_v51 = vcombine.high %v9176_v34, %v9176_v34  ;;  %v9482_v54 = vrot.slane %v9176_v34, 7 }
 0x998   : > { %v9477_v55 = vsel %vm15905_vm13, %v9475_v31, %v9476_v41  ;;  %v9480_v48 = vsel %vm15905_vm13, %v9478_v11, %v9479_v37  ;;  %v9481_v25 = vrot.slane %v9479_v37, 2  ;;  %v9192_v3 = vrot.slane %v9068_v32, %v15895_v10 }
 0x999   : > { %v10726_v27 = vrot.slane %v9477_v55, 9  ;;  %v10727_v17 = vrot.slane %v9480_v48, 9  ;;  %v9910_v22 = vmax.f32 %v9474_v16, %v10725_v28  ;;  %v9185_v49 = vcombine.high %v9183_v4, %v9183_v4  ;;  %v15987_v16 = vpop.f32.mrb[28].mxu0 }
 0x99a   : > { %v9483_v35 = vsel %vm15905_vm13, %v9481_v25, %v9482_v54  ;;  %v9484_v43 = vrot.slane %v9482_v54, 2  ;;  %v9485_v15 = vrot.slane %v9184_v51, 7  ;;  %v9488_v2 = vrot.slane %v9183_v4, 7  ;;  %v15994_v28 = vpop.f32.mrb[29].mxu0 }
 0x99b   : > { %v9911_v0 = vmax.f32 %v9477_v55, %v10726_v27  ;;  %v9912_v6 = vmax.f32 %v9480_v48, %v10727_v17  ;;  %v10065_v53 = vrot.slane %v9910_v22, %v15911_v14  ;;  %v9491_v59 = vrot.slane %v9185_v49, 7  ;;  %v8655_v45 = vpop.f32.mrb[172].mxu1  ;;  %v15997_v48 = vpop.f32.mrb[30].mxu0 }
 0x99c   : > { %v9486_v30 = vsel %vm15905_vm13, %v9484_v43, %v9485_v15  ;;  %v9487_v26 = vrot.slane %v9485_v15, 2  ;;  %v9490_v52 = vrot.slane %v9488_v2, 2  ;;  %v10728_v56 = vrot.slane %v9483_v35, 9  ;;  %v8657_v19 = vpop.f32.mrb[173].mxu1  ;;  %v16002_v17 = vpop.f32.mrb[31].mxu0 }
 0x99d   : > { %v10069_v58 = vrot.slane %v9911_v0, %v15911_v14  ;;  %v10073_v9 = vrot.slane %v9912_v6, %v15911_v14  ;;  %v9493_v36 = vrot.slane %v9491_v59, 2  ;;  %v10729_v40 = vrot.slane %v9486_v30, 9  ;;  %v8658_v62 = vpop.f32.mrb[174].mxu1 }
 0x99e   : > { %v9489_v46 = vsel %vm15905_vm13, %v9487_v26, %v9488_v2  ;;  %v9492_v8 = vsel %vm15905_vm13, %v9490_v52, %v9491_v59  ;;  %v9913_v29 = vmax.f32 %v9483_v35, %v10728_v56  ;;  %v9494_v39 = vrot.slane %v9192_v3, 7  ;;  %v8660_v41 = vpop.f32.mrb[175].mxu1 }
 0x99f   : > { %v10297_v32 = vsel %vm10286_vm14, %v10069_v58, %v10065_v53  ;;  %v10730_v12 = vrot.slane %v9489_v46, 9  ;;  %v10731_v21 = vrot.slane %v9492_v8, 9  ;;  %v9914_v34 = vmax.f32 %v9486_v30, %v10729_v40 }
 0x9a0   : > { %v10077_v31 = vrot.slane %v9913_v29, %v15911_v14  ;;  %v10298_v11 = vsel %vm9440_vm8, %v10073_v9, %v10297_v32  ;;  %v9495_v37 = vsel %vm15905_vm13, %v9493_v36, %v9494_v39  ;;  %v8873_v60 = vadd.f32 %v11263_v38, %v15647_v61 }
 0x9a1   : > { %v9915_v4 = vmax.f32 %v9489_v46, %v10730_v12  ;;  %v9916_v51 = vmax.f32 %v9492_v8, %v10731_v21  ;;  %v10081_v54 = vrot.slane %v9914_v34, %v15911_v14  ;;  %v10732_v55 = vrot.slane %v9495_v37, 9 }
 0x9a2   : > { %v10299_v25 = vsel %vm10289_vm15, %v10077_v31, %v10298_v11  ;;  %v11264_v3 = vadd.f32 %v15884_v20, %v8650_v50  ;;  %v11265_v27 = vadd.f32 %v15884_v20, %v8655_v45  ;;  %v11266_v2 = vadd.f32 %v15884_v20, %v8658_v62 }
 0x9a3   : > { %v10085_v22 = vrot.slane %v9915_v4, %v15911_v14  ;;  %v10089_v61 = vrot.slane %v9916_v51, %v15911_v14  ;;  %v10300_v38 = vsel %vm9442_vm10, %v10081_v54, %v10299_v25  ;;  %v9917_v49 = vmax.f32 %v9495_v37, %v10732_v55  ;;  %v8663_v35 = vpop.f32.mrb[176].mxu1 }
 0x9a4   : > { %v8876_v43 = vadd.f32 %v11264_v3, %v15651_v13  ;;  %v8881_v15 = vadd.f32 %v11265_v27, %v15645_v57  ;;  %v11267_v50 = vadd.f32 %v15884_v20, %v8663_v35  ;;  %v8665_v0 = vpop.f32.mrb[177].mxu1  ;;  %v8884_v30 = vadd.f32 %v11266_v2, %v15649_v47 }
 0x9a5   : > { %v10301_v6 = vsel %vm10292_vm0, %v10085_v22, %v10300_v38  ;;  %v10093_v53 = vrot.slane %v9917_v49, %v15911_v14  ;;  %v8666_v59 = vpop.f32.mrb[178].mxu1  ;;  %v9027_v56 = vmax.f32 %v8873_v60, 0.0 }
 0x9a6   : > { %v10302_v45 = vsel %vm9444_vm11, %v10089_v61, %v10301_v6  ;;  %v8668_v26 = vpop.f32.mrb[179].mxu1  ;;  %v8889_v13 = vadd.f32 %v11267_v50, %v15663_v18  ;;  %v11268_v57 = vadd.f32 %v15884_v20, %v8666_v59  ;;  %v9030_v19 = vmax.f32 %v8884_v30, 0.0 }
 0x9a7   : > { %v10303_v52 = vsel %vm10295_vm1, %v10093_v53, %v10302_v45  ;;  %v9028_v58 = vmax.f32 %v8876_v43, 0.0  ;;  %v9029_v62 = vmax.f32 %v8881_v15, 0.0 }
 0x9a8   : > { %10355 = vst [vmem:[%s15961_s13 + $0x8] sm:$0xff] %v10303_v52  ;;  %v9031_v9 = vmax.f32 %v8889_v13, 0.0  ;;  %v8892_v36 = vadd.f32 %v11268_v57, %v15667_v24  ;;  %v9069_v40 = vmax.f32 %v9027_v56, %v9030_v19 }
 0x9aa   : > { %v9070_v46 = vmax.f32 %v9028_v58, %v9031_v9  ;;  %v9032_v8 = vmax.f32 %v8892_v36, 0.0  ;;  %v9193_v47 = vcombine.high %v9069_v40, %v9069_v40  ;;  %v9200_v39 = vrot.slane %v9069_v40, %v15895_v10 }
 0x9ab   : > { %v8671_v29 = vpop.f32.mrb[180].mxu1 }
 0x9ac   : > { %v11269_v41 = vadd.f32 %v15884_v20, %v8671_v29  ;;  %v8673_v18 = vpop.f32.mrb[181].mxu1  ;;  %v9210_v32 = vcombine.high %v9070_v46, %v9070_v46  ;;  %v9217_v12 = vrot.slane %v9070_v46, %v15895_v10  ;;  %v9071_v21 = vmax.f32 %v9029_v62, %v9032_v8 }
 0x9ad   : > { %v8674_v34 = vpop.f32.mrb[182].mxu1  ;;  %v9207_v31 = vrot.slane %v9193_v47, %v15895_v10  ;;  %v9208_v11 = vcombine.high %v9200_v39, %v9200_v39  ;;  %v10711_v60 = vrot.slane %v9200_v39, 9 }
 0x9ae   : > { %v16025_v24 = vadd.f32 %v11269_v41, %v15661_v1  ;;  %v8676_v37 = vpop.f32.mrb[183].mxu1  ;;  %v9224_v4 = vrot.slane %v9210_v32, %v15895_v10  ;;  %v9225_v51 = vcombine.high %v9217_v12, %v9217_v12  ;;  %v9507_v54 = vrot.slane %v9217_v12, 7 }
 0x9af   : > { %v9209_v55 = vcombine.high %v9207_v31, %v9207_v31  ;;  %v9498_v25 = vrot.slane %v9208_v11, 7  ;;  %v9501_v3 = vrot.slane %v9207_v31, 7  ;;  %v9233_v27 = vrot.slane %v9071_v21, %v15895_v10 }
 0x9b0   : > { %v9226_v22 = vcombine.high %v9224_v4, %v9224_v4  ;;  %v9509_v61 = vrot.slane %v9507_v54, 2  ;;  %v9510_v38 = vrot.slane %v9225_v51, 7  ;;  %v9513_v49 = vrot.slane %v9224_v4, 7 }
 0x9b1   : > { %v9499_v35 = vsel %vm15905_vm13, %v10711_v60, %v9498_v25  ;;  %v9500_v1 = vrot.slane %v9498_v25, 2  ;;  %v9503_v43 = vrot.slane %v9501_v3, 2  ;;  %v9504_v15 = vrot.slane %v9209_v55, 7 }
 0x9b2   : > { %v10733_v2 = vrot.slane %v9499_v35, 9  ;;  %v9511_v50 = vsel %vm15905_vm13, %v9509_v61, %v9510_v38  ;;  %v9512_v0 = vrot.slane %v9510_v38, 2  ;;  %v9515_v6 = vrot.slane %v9513_v49, 2 }
 0x9b3   : > { %v8679_v53 = vpop.f32.mrb[184].mxu1  ;;  %v9502_v59 = vsel %vm15905_vm13, %v9500_v1, %v9501_v3  ;;  %v9505_v45 = vsel %vm15905_vm13, %v9503_v43, %v9504_v15  ;;  %v9506_v30 = vrot.slane %v9504_v15, 2  ;;  %v9516_v26 = vrot.slane %v9226_v22, 7 }
 0x9b4   : > { %v8681_v52 = vpop.f32.mrb[185].mxu1  ;;  %v10734_v13 = vrot.slane %v9502_v59, 9  ;;  %v10735_v57 = vrot.slane %v9505_v45, 9  ;;  %v9918_v56 = vmax.f32 %v9499_v35, %v10733_v2  ;;  %v9514_v19 = vsel %vm15905_vm13, %v9512_v0, %v9513_v49 }
 0x9b5   : > { %v8682_v58 = vpop.f32.mrb[186].mxu1  ;;  %v9508_v9 = vsel %vm15905_vm13, %v9506_v30, %v9507_v54  ;;  %v9517_v36 = vsel %vm15905_vm13, %v9515_v6, %v9516_v26  ;;  %v9518_v40 = vrot.slane %v9516_v26, 2  ;;  %v10737_v62 = vrot.slane %v9511_v50, 9 }
 0x9b6   : > { %v8684_v46 = vpop.f32.mrb[187].mxu1  ;;  %v9919_v8 = vmax.f32 %v9502_v59, %v10734_v13  ;;  %v9920_v29 = vmax.f32 %v9505_v45, %v10735_v57  ;;  %v10097_v47 = vrot.slane %v9918_v56, %v15911_v14  ;;  %v10736_v39 = vrot.slane %v9508_v9, 9 }
 0x9b7   : > { %v10738_v41 = vrot.slane %v9514_v19, 9  ;;  %v10739_v18 = vrot.slane %v9517_v36, 9  ;;  %v9922_v32 = vmax.f32 %v9511_v50, %v10737_v62  ;;  %v9519_v12 = vrot.slane %v9233_v27, 7 }
 0x9b8   : > { %v10101_v21 = vrot.slane %v9919_v8, %v15911_v14  ;;  %v10105_v31 = vrot.slane %v9920_v29, %v15911_v14  ;;  %v9921_v11 = vmax.f32 %v9508_v9, %v10736_v39  ;;  %v11270_v37 = vadd.f32 %v15884_v20, %v8674_v34 }
 0x9b9   : > { %v9923_v60 = vmax.f32 %v9514_v19, %v10738_v41  ;;  %v9924_v4 = vmax.f32 %v9517_v36, %v10739_v18  ;;  %v10113_v51 = vrot.slane %v9922_v32, %v15911_v14  ;;  %v9520_v54 = vsel %vm15905_vm13, %v9518_v40, %v9519_v12 }
 0x9ba   : > { %v10304_v55 = vsel %vm10286_vm14, %v10101_v21, %v10097_v47  ;;  %v10109_v25 = vrot.slane %v9921_v11, %v15911_v14  ;;  %v10740_v3 = vrot.slane %v9520_v54, 9  ;;  %v8900_v27 = vadd.f32 %v11270_v37, %v15665_v5 }
 0x9bb   : > { %v8687_v22 = vpop.f32.mrb[188].mxu1  ;;  %v10117_v61 = vrot.slane %v9923_v60, %v15911_v14  ;;  %v10121_v38 = vrot.slane %v9924_v4, %v15911_v14  ;;  %v10305_v34 = vsel %vm9440_vm8, %v10105_v31, %v10304_v55  ;;  %v11271_v49 = vadd.f32 %v15884_v20, %v8679_v53 }
 0x9bc   : > { %v8689_v35 = vpop.f32.mrb[189].mxu1  ;;  %v10306_v1 = vsel %vm10289_vm15, %v10109_v25, %v10305_v34  ;;  %v9925_v43 = vmax.f32 %v9520_v54, %v10740_v3  ;;  %v11272_v15 = vadd.f32 %v15884_v20, %v8682_v58  ;;  %v11273_v0 = vadd.f32 %v15884_v20, %v8687_v22 }
 0x9bd   : > { %v8690_v2 = vpop.f32.mrb[190].mxu1  ;;  %v10307_v50 = vsel %vm9442_vm10, %v10113_v51, %v10306_v1  ;;  %v8905_v5 = vadd.f32 %v11271_v49, %v15679_v63  ;;  %v9033_v63 = vmax.f32 %v16025_v24, 0.0  ;;  %v9034_v19 = vmax.f32 %v8900_v27, 0.0 }
 0x9be   : > { %v11274_v6 = vadd.f32 %v15884_v20, %v8690_v2  ;;  %v8692_v59 = vpop.f32.mrb[191].mxu1  ;;  %v10308_v45 = vsel %vm10292_vm0, %v10117_v61, %v10307_v50  ;;  %v10125_v53 = vrot.slane %v9925_v43, %v15911_v14  ;;  %v8908_v30 = vadd.f32 %v11272_v15, %v15683_v33 }
 0x9bf   : > { %v10309_v26 = vsel %vm9444_vm11, %v10121_v38, %v10308_v45  ;;  %v8913_v52 = vadd.f32 %v11273_v0, %v15677_v42  ;;  %v9035_v58 = vmax.f32 %v8905_v5, 0.0 }
 0x9c0   : > { %v8916_v13 = vadd.f32 %v11274_v6, %v15681_v7  ;;  %v10310_v57 = vsel %vm10295_vm1, %v10125_v53, %v10309_v26  ;;  %v9036_v56 = vmax.f32 %v8908_v30, 0.0 }
 0x9c1   : > { %10356 = vst [vmem:[%s15961_s13 + $0x10] sm:$0xff] %v10310_v57  ;;  %v9037_v9 = vmax.f32 %v8913_v52, 0.0 }
 0x9c2   : > { %v9038_v36 = vmax.f32 %v8916_v13, 0.0  ;;  %v9072_v40 = vmax.f32 %v9033_v63, %v9036_v56 }
 0x9c3   : > { %v8695_v62 = vpop.f32.mrb[192].mxu1  ;;  %v9073_v46 = vmax.f32 %v9034_v19, %v9037_v9 }
 0x9c4   : > { %v9074_v33 = vmax.f32 %v9035_v58, %v9038_v36  ;;  %v11275_v8 = vadd.f32 %v15884_v20, %v8695_v62  ;;  %v8697_v29 = vpop.f32.mrb[193].mxu1  ;;  %v9234_v42 = vcombine.high %v9072_v40, %v9072_v40  ;;  %v9241_v7 = vrot.slane %v9072_v40, %v15895_v10 }
 0x9c5   : > { %v8698_v47 = vpop.f32.mrb[194].mxu1  ;;  %v9251_v39 = vcombine.high %v9073_v46, %v9073_v46  ;;  %v9258_v24 = vrot.slane %v9073_v46, %v15895_v10 }
 0x9c6   : > { %v9274_v41 = vrot.slane %v9074_v33, %v15895_v10  ;;  %v16077_v18 = vadd.f32 %v11275_v8, %v15695_v44  ;;  %v8700_v32 = vpop.f32.mrb[195].mxu1  ;;  %v9248_v12 = vrot.slane %v9234_v42, %v15895_v10  ;;  %v9249_v21 = vcombine.high %v9241_v7, %v9241_v7 }
 0x9c7   : > { %v10712_v31 = vrot.slane %v9241_v7, 9  ;;  %v9265_v11 = vrot.slane %v9251_v39, %v15895_v10  ;;  %v9266_v37 = vcombine.high %v9258_v24, %v9258_v24  ;;  %v9532_v60 = vrot.slane %v9258_v24, 7  ;;  %v16790_v32 = vld [vmem:[#allocation31_spill] sm:$0xff] }
 0x9c8   : > { %v11276_v4 = vadd.f32 %v15884_v20, %v8698_v47  ;;  %v9250_v51 = vcombine.high %v9248_v12, %v9248_v12  ;;  %v9523_v54 = vrot.slane %v9249_v21, 7  ;;  %v9526_v55 = vrot.slane %v9248_v12, 7 }
 0x9c9   : > { %v9544_v25 = vrot.slane %v9274_v41, 7  ;;  %v9267_v3 = vcombine.high %v9265_v11, %v9265_v11  ;;  %v9534_v27 = vrot.slane %v9532_v60, 2  ;;  %v9535_v22 = vrot.slane %v9266_v37, 7 }
 0x9ca   : > { %v9538_v44 = vrot.slane %v9265_v11, 7  ;;  %v9524_v61 = vsel %vm15905_vm13, %v10712_v31, %v9523_v54  ;;  %v9525_v38 = vrot.slane %v9523_v54, 2  ;;  %v9528_v34 = vrot.slane %v9526_v55, 2 }
 0x9cb   : > { %v9529_v49 = vrot.slane %v9250_v51, 7  ;;  %v8703_v35 = vpop.f32.mrb[196].mxu1  ;;  %v10741_v1 = vrot.slane %v9524_v61, 9  ;;  %v9536_v43 = vsel %vm15905_vm13, %v9534_v27, %v9535_v22  ;;  %v9537_v15 = vrot.slane %v9535_v22, 2  ;;  %v16791_v22 = vld [vmem:[#allocation62_spill] sm:$0xff] }
 0x9cc   : > { %v9540_v2 = vrot.slane %v9538_v44, 2  ;;  %v8705_v50 = vpop.f32.mrb[197].mxu1  ;;  %v9527_v5 = vsel %vm15905_vm13, %v9525_v38, %v9526_v55  ;;  %v9541_v59 = vrot.slane %v9267_v3, 7  ;;  %v10745_v19 = vrot.slane %v9536_v43, 9 }
 0x9cd   : > { %v9530_v0 = vsel %vm15905_vm13, %v9528_v34, %v9529_v49  ;;  %v9531_v6 = vrot.slane %v9529_v49, 2  ;;  %v8706_v45 = vpop.f32.mrb[198].mxu1  ;;  %v10742_v53 = vrot.slane %v9527_v5, 9  ;;  %v9926_v26 = vmax.f32 %v9524_v61, %v10741_v1  ;;  %v16793_v50 = vld [vmem:[#allocation61_spill] sm:$0xff] }
 0x9ce   : > { %v10743_v30 = vrot.slane %v9530_v0, 9  ;;  %v9539_v52 = vsel %vm15905_vm13, %v9537_v15, %v9538_v44  ;;  %v8708_v13 = vpop.f32.mrb[199].mxu1  ;;  %v9542_v63 = vsel %vm15905_vm13, %v9540_v2, %v9541_v59  ;;  %v9543_v56 = vrot.slane %v9541_v59, 2 }
 0x9cf   : > { %v9533_v57 = vsel %vm15905_vm13, %v9531_v6, %v9532_v60  ;;  %v9927_v58 = vmax.f32 %v9527_v5, %v10742_v53  ;;  %v10129_v36 = vrot.slane %v9926_v26, %v15911_v14  ;;  %v10746_v62 = vrot.slane %v9539_v52, 9 }
 0x9d0   : > { %v9928_v9 = vmax.f32 %v9530_v0, %v10743_v30  ;;  %v10744_v40 = vrot.slane %v9533_v57, 9  ;;  %v10747_v46 = vrot.slane %v9542_v63, 9  ;;  %v9930_v33 = vmax.f32 %v9536_v43, %v10745_v19  ;;  %v16792_v43 = vld [vmem:[#allocation64_spill] sm:$0xff]  ;;  %v16794_v0 = vld [vmem:[#allocation33_spill] sm:$0xff] }
 0x9d1   : > { %v9545_v8 = vsel %vm15905_vm13, %v9543_v56, %v9544_v25  ;;  %v10133_v29 = vrot.slane %v9927_v58, %v15911_v14  ;;  %v9931_v39 = vmax.f32 %v9539_v52, %v10746_v62  ;;  %v8924_v12 = vadd.f32 %v11276_v4, %v16790_v32 }
 0x9d2   : > { %v10137_v42 = vrot.slane %v9928_v9, %v15911_v14  ;;  %v9929_v7 = vmax.f32 %v9533_v57, %v10744_v40  ;;  %v10748_v47 = vrot.slane %v9545_v8, 9  ;;  %v9932_v24 = vmax.f32 %v9542_v63, %v10747_v46  ;;  %v16795_v46 = vld [vmem:[#allocation32_spill] sm:$0xff] }
 0x9d3   : > { %v10145_v41 = vrot.slane %v9930_v33, %v15911_v14  ;;  %v8711_v21 = vpop.f32.mrb[200].mxu1  ;;  %v10311_v31 = vsel %vm10286_vm14, %v10133_v29, %v10129_v36  ;;  %v11277_v60 = vadd.f32 %v15884_v20, %v8703_v35  ;;  %v10149_v54 = vrot.slane %v9931_v39, %v15911_v14 }
 0x9d4   : > { %v10141_v11 = vrot.slane %v9929_v7, %v15911_v14  ;;  %v9933_v37 = vmax.f32 %v9545_v8, %v10748_v47  ;;  %v8713_v51 = vpop.f32.mrb[201].mxu1  ;;  %v10153_v55 = vrot.slane %v9932_v24, %v15911_v14  ;;  %v10312_v25 = vsel %vm9440_vm8, %v10137_v42, %v10311_v31 }
 0x9d5   : > { %v8714_v3 = vpop.f32.mrb[202].mxu1  ;;  %v8929_v44 = vadd.f32 %v11277_v60, %v16791_v22  ;;  %v11278_v61 = vadd.f32 %v15884_v20, %v8706_v45  ;;  %v11279_v49 = vadd.f32 %v15884_v20, %v8711_v21  ;;  %v9039_v45 = vmax.f32 %v16077_v18, 0.0  ;;  %v16796_v60 = vld [vmem:[#allocation63_spill] sm:$0xff] }
 0x9d6   : > { %v10313_v27 = vsel %vm10289_vm15, %v10141_v11, %v10312_v25  ;;  %v10157_v4 = vrot.slane %v9933_v37, %v15911_v14  ;;  %v8716_v38 = vpop.f32.mrb[203].mxu1  ;;  %v11280_v35 = vadd.f32 %v15884_v20, %v8714_v3  ;;  %v9040_v30 = vmax.f32 %v8924_v12, 0.0 }
 0x9d7   : > { %v10314_v34 = vsel %vm9442_vm10, %v10145_v41, %v10313_v27  ;;  %v8932_v15 = vadd.f32 %v11278_v61, %v16792_v43  ;;  %v8937_v5 = vadd.f32 %v11279_v49, %v16793_v50  ;;  %v9041_v26 = vmax.f32 %v8929_v44, 0.0 }
 0x9d8   : > { %v10315_v1 = vsel %vm10292_vm0, %v10149_v54, %v10314_v34  ;;  %v8940_v6 = vadd.f32 %v11280_v35, %v16794_v0 }
 0x9d9   : > { %v10316_v2 = vsel %vm9444_vm11, %v10153_v55, %v10315_v1  ;;  %v9042_v53 = vmax.f32 %v8932_v15, 0.0  ;;  %v9043_v52 = vmax.f32 %v8937_v5, 0.0 }
 0x9da   : > { %v10317_v59 = vsel %vm10295_vm1, %v10157_v4, %v10316_v2  ;;  %v9044_v13 = vmax.f32 %v8940_v6, 0.0 }
 0x9db   : > { %10357 = vst [vmem:[%s15961_s13 + $0x18] sm:$0xff] %v10317_v59  ;;  %v8719_v57 = vpop.f32.mrb[204].mxu1  ;;  %v9075_v63 = vmax.f32 %v9039_v45, %v9042_v53  ;;  %v9076_v58 = vmax.f32 %v9040_v30, %v9043_v52 }
 0x9dc   : > { %v11281_v56 = vadd.f32 %v15884_v20, %v8719_v57  ;;  %v8721_v19 = vpop.f32.mrb[205].mxu1  ;;  %v9077_v9 = vmax.f32 %v9041_v26, %v9044_v13 }
 0x9dd   : > { %v8722_v36 = vpop.f32.mrb[206].mxu1  ;;  %v9275_v40 = vcombine.high %v9075_v63, %v9075_v63  ;;  %v9282_v62 = vrot.slane %v9075_v63, %v15895_v10  ;;  %v9292_v29 = vcombine.high %v9076_v58, %v9076_v58  ;;  %v9299_v42 = vrot.slane %v9076_v58, %v15895_v10 }
 0x9de   : > { %v16127_v33 = vadd.f32 %v11281_v56, %v16795_v46  ;;  %v11282_v18 = vadd.f32 %v15884_v20, %v8722_v36  ;;  %v8724_v8 = vpop.f32.mrb[207].mxu1  ;;  %v9315_v7 = vrot.slane %v9077_v9, %v15895_v10 }
 0x9df   : > { %v9289_v47 = vrot.slane %v9275_v40, %v15895_v10  ;;  %v9290_v39 = vcombine.high %v9282_v62, %v9282_v62  ;;  %v10713_v24 = vrot.slane %v9282_v62, 9  ;;  %v9306_v41 = vrot.slane %v9292_v29, %v15895_v10 }
 0x9e0   : > { %v9307_v32 = vcombine.high %v9299_v42, %v9299_v42  ;;  %v9557_v12 = vrot.slane %v9299_v42, 7  ;;  %v9569_v21 = vrot.slane %v9315_v7, 7  ;;  %v16135_v20 = vadd.f32 %v11282_v18, %v16796_v60 }
 0x9e1   : > { %v9291_v31 = vcombine.high %v9289_v47, %v9289_v47  ;;  %v9548_v11 = vrot.slane %v9290_v39, 7  ;;  %v9551_v37 = vrot.slane %v9289_v47, 7  ;;  %v9308_v51 = vcombine.high %v9306_v41, %v9306_v41 }
 0x9e2   : > { %v9559_v54 = vrot.slane %v9557_v12, 2  ;;  %v9560_v55 = vrot.slane %v9307_v32, 7  ;;  %v9563_v25 = vrot.slane %v9306_v41, 7  ;;  %v16162_v32 = vld [vmem:[%s16385_s6] ss:$0 sm:$0xff] }
 0x9e3   : > { %v8727_v3 = vpop.f32.mrb[208].mxu1  ;;  %v9549_v27 = vsel %vm15905_vm13, %v10713_v24, %v9548_v11  ;;  %v9550_v4 = vrot.slane %v9548_v11, 2  ;;  %v9553_v22 = vrot.slane %v9551_v37, 2  ;;  %v9554_v44 = vrot.slane %v9291_v31, 7 }
 0x9e4   : > { %v8729_v61 = vpop.f32.mrb[209].mxu1  ;;  %v10749_v38 = vrot.slane %v9549_v27, 9  ;;  %v9561_v34 = vsel %vm15905_vm13, %v9559_v54, %v9560_v55  ;;  %v9562_v49 = vrot.slane %v9560_v55, 2  ;;  %v9565_v35 = vrot.slane %v9563_v25, 2 }
 0x9e5   : > { %v8730_v1 = vpop.f32.mrb[210].mxu1  ;;  %v9552_v43 = vsel %vm15905_vm13, %v9550_v4, %v9551_v37  ;;  %v9555_v15 = vsel %vm15905_vm13, %v9553_v22, %v9554_v44  ;;  %v9556_v2 = vrot.slane %v9554_v44, 2  ;;  %v9566_v50 = vrot.slane %v9308_v51, 7  ;;  %v16798_v22 = vld [vmem:[#allocation36_spill] sm:$0xff] }
 0x9e6   : > { %v8732_v5 = vpop.f32.mrb[211].mxu1  ;;  %v10750_v0 = vrot.slane %v9552_v43, 9  ;;  %v10751_v6 = vrot.slane %v9555_v15, 9  ;;  %v9934_v59 = vmax.f32 %v9549_v27, %v10749_v38  ;;  %v9564_v45 = vsel %vm15905_vm13, %v9562_v49, %v9563_v25  ;;  %v16797_v25 = vld [vmem:[#allocation67_spill] sm:$0xff] }
 0x9e7   : > { %v9558_v53 = vsel %vm15905_vm13, %v9556_v2, %v9557_v12  ;;  %v9567_v30 = vsel %vm15905_vm13, %v9565_v35, %v9566_v50  ;;  %v9568_v26 = vrot.slane %v9566_v50, 2  ;;  %v10753_v52 = vrot.slane %v9561_v34, 9 }
 0x9e8   : > { %v9935_v13 = vmax.f32 %v9552_v43, %v10750_v0  ;;  %v9936_v57 = vmax.f32 %v9555_v15, %v10751_v6  ;;  %v10161_v63 = vrot.slane %v9934_v59, %v15911_v14  ;;  %v10752_v56 = vrot.slane %v9558_v53, 9  ;;  %v16800_v15 = vld [vmem:[#allocation35_spill] sm:$0xff] }
 0x9e9   : > { %v10754_v19 = vrot.slane %v9564_v45, 9  ;;  %v10755_v58 = vrot.slane %v9567_v30, 9  ;;  %v9938_v9 = vmax.f32 %v9561_v34, %v10753_v52  ;;  %v9570_v36 = vsel %vm15905_vm13, %v9568_v26, %v9569_v21  ;;  %v16799_v34 = vld [vmem:[#allocation34_spill] sm:$0xff] }
 0x9ea   : > { %v10165_v40 = vrot.slane %v9935_v13, %v15911_v14  ;;  %v10169_v62 = vrot.slane %v9936_v57, %v15911_v14  ;;  %v9937_v46 = vmax.f32 %v9558_v53, %v10752_v56  ;;  %v10756_v18 = vrot.slane %v9570_v36, 9  ;;  %v16801_v56 = vld [vmem:[#allocation66_spill] sm:$0xff] }
 0x9eb   : > { %v8735_v8 = vpop.f32.mrb[212].mxu1  ;;  %v9939_v29 = vmax.f32 %v9564_v45, %v10754_v19  ;;  %v9940_v42 = vmax.f32 %v9567_v30, %v10755_v58  ;;  %v10177_v7 = vrot.slane %v9938_v9, %v15911_v14  ;;  %v11283_v12 = vadd.f32 %v16162_v32, %v8727_v3 }
 0x9ec   : > { %v8737_v47 = vpop.f32.mrb[213].mxu1  ;;  %v10318_v39 = vsel %vm10286_vm14, %v10165_v40, %v10161_v63  ;;  %v10173_v24 = vrot.slane %v9937_v46, %v15911_v14  ;;  %v9941_v41 = vmax.f32 %v9570_v36, %v10756_v18  ;;  %v11284_v60 = vadd.f32 %v16162_v32, %v8730_v1 }
 0x9ed   : > { %v8738_v21 = vpop.f32.mrb[214].mxu1  ;;  %v10181_v31 = vrot.slane %v9939_v29, %v15911_v14  ;;  %v10185_v11 = vrot.slane %v9940_v42, %v15911_v14  ;;  %v10319_v37 = vsel %vm9440_vm8, %v10169_v62, %v10318_v39  ;;  %v8953_v27 = vadd.f32 %v11283_v12, %v16797_v25 }
 0x9ee   : > { %v8740_v51 = vpop.f32.mrb[215].mxu1  ;;  %v10320_v54 = vsel %vm10289_vm15, %v10173_v24, %v10319_v37  ;;  %v10189_v55 = vrot.slane %v9941_v41, %v15911_v14  ;;  %v11285_v4 = vadd.f32 %v16162_v32, %v8735_v8  ;;  %v8956_v44 = vadd.f32 %v11284_v60, %v16798_v22 }
 0x9ef   : > { %v10321_v3 = vsel %vm9442_vm10, %v10177_v7, %v10320_v54  ;;  %v11286_v61 = vadd.f32 %v16162_v32, %v8738_v21  ;;  %v9045_v1 = vmax.f32 %v16127_v33, 0.0  ;;  %v9046_v5 = vmax.f32 %v16135_v20, 0.0 }
 0x9f0   : > { %v10322_v38 = vsel %vm10292_vm0, %v10181_v31, %v10321_v3  ;;  %v8961_v49 = vadd.f32 %v11285_v4, %v16799_v34  ;;  %v9048_v43 = vmax.f32 %v8956_v44, 0.0  ;;  %v9047_v59 = vmax.f32 %v8953_v27, 0.0 }
 0x9f1   : > { %v10323_v35 = vsel %vm9444_vm11, %v10185_v11, %v10322_v38  ;;  %v8964_v2 = vadd.f32 %v11286_v61, %v16800_v15 }
 0x9f2   : > { %v10324_v50 = vsel %vm10295_vm1, %v10189_v55, %v10323_v35  ;;  %v9049_v0 = vmax.f32 %v8961_v49, 0.0  ;;  %v9078_v45 = vmax.f32 %v9045_v1, %v9048_v43 }
 0x9f3   : > { %v8743_v6 = vpop.f32.mrb[216].mxu1  ;;  %10358 = vst [vmem:[%s15961_s13 + $0x20] sm:$0xff] %v10324_v50  ;;  %v9050_v53 = vmax.f32 %v8964_v2, 0.0 }
 0x9f4   : > { %v11287_v30 = vadd.f32 %v16162_v32, %v8743_v6  ;;  %v8745_v26 = vpop.f32.mrb[217].mxu1  ;;  %v9079_v52 = vmax.f32 %v9046_v5, %v9049_v0  ;;  %v9316_v57 = vcombine.high %v9078_v45, %v9078_v45  ;;  %v9323_v33 = vrot.slane %v9078_v45, %v15895_v10 }
 0x9f5   : > { %v8746_v13 = vpop.f32.mrb[218].mxu1  ;;  %v9080_v63 = vmax.f32 %v9047_v59, %v9050_v53 }
 0x9f6   : > { %v16187_v19 = vadd.f32 %v11287_v30, %v16801_v56  ;;  %v8748_v58 = vpop.f32.mrb[219].mxu1  ;;  %v9333_v20 = vcombine.high %v9079_v52, %v9079_v52  ;;  %v9340_v9 = vrot.slane %v9079_v52, %v15895_v10  ;;  %v9330_v36 = vrot.slane %v9316_v57, %v15895_v10 }
 0x9f7   : > { %v9331_v40 = vcombine.high %v9323_v33, %v9323_v33  ;;  %v9356_v62 = vrot.slane %v9080_v63, %v15895_v10  ;;  %v11288_v46 = vadd.f32 %v16162_v32, %v8746_v13  ;;  %v10714_v18 = vrot.slane %v9323_v33, 9 }
 0x9f8   : > { %v9347_v8 = vrot.slane %v9333_v20, %v15895_v10  ;;  %v9348_v29 = vcombine.high %v9340_v9, %v9340_v9  ;;  %v9582_v42 = vrot.slane %v9340_v9, 7  ;;  %v9332_v7 = vcombine.high %v9330_v36, %v9330_v36 }
 0x9f9   : > { %v9573_v47 = vrot.slane %v9331_v40, 7  ;;  %v9576_v39 = vrot.slane %v9330_v36, 7  ;;  %v9594_v24 = vrot.slane %v9356_v62, 7  ;;  %v16802_v40 = vld [vmem:[#allocation38_spill] sm:$0xff] }
 0x9fa   : > { %v9349_v41 = vcombine.high %v9347_v8, %v9347_v8  ;;  %v9584_v12 = vrot.slane %v9582_v42, 2  ;;  %v9585_v21 = vrot.slane %v9348_v29, 7  ;;  %v9588_v31 = vrot.slane %v9347_v8, 7 }
 0x9fb   : > { %v8751_v11 = vpop.f32.mrb[220].mxu1  ;;  %v9574_v37 = vsel %vm15905_vm13, %v10714_v18, %v9573_v47  ;;  %v9575_v60 = vrot.slane %v9573_v47, 2  ;;  %v9578_v51 = vrot.slane %v9576_v39, 2  ;;  %v9579_v54 = vrot.slane %v9332_v7, 7 }
 0x9fc   : > { %v8753_v55 = vpop.f32.mrb[221].mxu1  ;;  %v10757_v25 = vrot.slane %v9574_v37, 9  ;;  %v9586_v27 = vsel %vm15905_vm13, %v9584_v12, %v9585_v21  ;;  %v9587_v4 = vrot.slane %v9585_v21, 2  ;;  %v9590_v3 = vrot.slane %v9588_v31, 2 }
 0x9fd   : > { %v8754_v22 = vpop.f32.mrb[222].mxu1  ;;  %v9577_v44 = vsel %vm15905_vm13, %v9575_v60, %v9576_v39  ;;  %v9580_v61 = vsel %vm15905_vm13, %v9578_v51, %v9579_v54  ;;  %v9581_v38 = vrot.slane %v9579_v54, 2  ;;  %v9591_v34 = vrot.slane %v9349_v41, 7 }
 0x9fe   : > { %v8756_v49 = vpop.f32.mrb[223].mxu1  ;;  %v10758_v35 = vrot.slane %v9577_v44, 9  ;;  %v10759_v1 = vrot.slane %v9580_v61, 9  ;;  %v9942_v43 = vmax.f32 %v9574_v37, %v10757_v25  ;;  %v9589_v15 = vsel %vm15905_vm13, %v9587_v4, %v9588_v31  ;;  %v16803_v31 = vld [vmem:[#allocation65_spill] sm:$0xff] }
 0x9ff   : > { %v9583_v2 = vsel %vm15905_vm13, %v9581_v38, %v9582_v42  ;;  %v9592_v50 = vsel %vm15905_vm13, %v9590_v3, %v9591_v34  ;;  %v9593_v5 = vrot.slane %v9591_v34, 2  ;;  %v10761_v0 = vrot.slane %v9586_v27, 9  ;;  %v16804_v25 = vld [vmem:[#allocation37_spill] sm:$0xff]  ;;  %v16805_v3 = vld [vmem:[#allocation40_spill] sm:$0xff] }
 0xa00   : > { %v9943_v6 = vmax.f32 %v9577_v44, %v10758_v35  ;;  %v9944_v59 = vmax.f32 %v9580_v61, %v10759_v1  ;;  %v10193_v45 = vrot.slane %v9942_v43, %v15911_v14  ;;  %v10760_v53 = vrot.slane %v9583_v2, 9  ;;  %v16806_v61 = vld [vmem:[#allocation24_spill] sm:$0xff] }
 0xa01   : > { %v10762_v30 = vrot.slane %v9589_v15, 9  ;;  %v10763_v26 = vrot.slane %v9592_v50, 9  ;;  %v9946_v52 = vmax.f32 %v9586_v27, %v10761_v0  ;;  %v9595_v13 = vsel %vm15905_vm13, %v9593_v5, %v9594_v24 }
 0xa02   : > { %v10197_v57 = vrot.slane %v9943_v6, %v15911_v14  ;;  %v10201_v33 = vrot.slane %v9944_v59, %v15911_v14  ;;  %v9945_v63 = vmax.f32 %v9583_v2, %v10760_v53  ;;  %v10764_v56 = vrot.slane %v9595_v13, 9  ;;  %v16807_v53 = vld [vmem:[#allocation39_spill] sm:$0xff] }
 0xa03   : > { %v8759_v58 = vpop.f32.mrb[224].mxu1  ;;  %v9947_v20 = vmax.f32 %v9589_v15, %v10762_v30  ;;  %v9948_v9 = vmax.f32 %v9592_v50, %v10763_v26  ;;  %v10209_v36 = vrot.slane %v9946_v52, %v15911_v14  ;;  %v8972_v62 = vadd.f32 %v11288_v46, %v16802_v40 }
 0xa04   : > { %v8761_v18 = vpop.f32.mrb[225].mxu1  ;;  %v10325_v8 = vsel %vm10286_vm14, %v10197_v57, %v10193_v45  ;;  %v10205_v29 = vrot.slane %v9945_v63, %v15911_v14  ;;  %v9949_v42 = vmax.f32 %v9595_v13, %v10764_v56  ;;  %v11289_v7 = vadd.f32 %v16162_v32, %v8751_v11 }
 0xa05   : > { %v8762_v47 = vpop.f32.mrb[226].mxu1  ;;  %v10213_v39 = vrot.slane %v9947_v20, %v15911_v14  ;;  %v10217_v24 = vrot.slane %v9948_v9, %v15911_v14  ;;  %v10326_v41 = vsel %vm9440_vm8, %v10201_v33, %v10325_v8  ;;  %v11290_v60 = vadd.f32 %v16162_v32, %v8754_v22  ;;  %v16808_v20 = vld [vmem:[#allocation55_spill] sm:$0xff] }
 0xa06   : > { %v8764_v12 = vpop.f32.mrb[227].mxu1  ;;  %v10327_v21 = vsel %vm10289_vm15, %v10205_v29, %v10326_v41  ;;  %v10221_v46 = vrot.slane %v9949_v42, %v15911_v14  ;;  %v8977_v37 = vadd.f32 %v11289_v7, %v16803_v31  ;;  %v11291_v11 = vadd.f32 %v16162_v32, %v8759_v58 }
 0xa07   : > { %v10328_v51 = vsel %vm9442_vm10, %v10209_v36, %v10327_v21  ;;  %v11292_v54 = vadd.f32 %v16162_v32, %v8762_v47  ;;  %v8980_v27 = vadd.f32 %v11290_v60, %v16804_v25  ;;  %v9051_v22 = vmax.f32 %v16187_v19, 0.0 }
 0xa08   : > { %v10329_v55 = vsel %vm10292_vm0, %v10213_v39, %v10328_v51  ;;  %v8985_v44 = vadd.f32 %v11291_v11, %v16805_v3  ;;  %v9052_v49 = vmax.f32 %v8972_v62, 0.0  ;;  %v9053_v43 = vmax.f32 %v8977_v37, 0.0 }
 0xa09   : > { %v10330_v4 = vsel %vm9444_vm11, %v10217_v24, %v10329_v55  ;;  %v8988_v38 = vadd.f32 %v11292_v54, %v16806_v61  ;;  %v9054_v35 = vmax.f32 %v8980_v27, 0.0 }
 0xa0a   : > { %v10331_v34 = vsel %vm10295_vm1, %v10221_v46, %v10330_v4  ;;  %v9055_v15 = vmax.f32 %v8985_v44, 0.0 }
 0xa0b   : > { %v8767_v1 = vpop.f32.mrb[228].mxu1  ;;  %10359 = vst [vmem:[%s15961_s13 + $0x28] sm:$0xff] %v10331_v34  ;;  %v9056_v2 = vmax.f32 %v8988_v38, 0.0  ;;  %v9081_v0 = vmax.f32 %v9051_v22, %v9054_v35 }
 0xa0c   : > { %v11293_v50 = vadd.f32 %v16162_v32, %v8767_v1  ;;  %v8769_v5 = vpop.f32.mrb[229].mxu1  ;;  %v9082_v59 = vmax.f32 %v9052_v49, %v9055_v15 }
 0xa0d   : > { %v8770_v6 = vpop.f32.mrb[230].mxu1  ;;  %v9083_v45 = vmax.f32 %v9053_v43, %v9056_v2  ;;  %v9357_v52 = vcombine.high %v9081_v0, %v9081_v0  ;;  %v9364_v13 = vrot.slane %v9081_v0, %v15895_v10 }
 0xa0e   : > { %v16238_v30 = vadd.f32 %v11293_v50, %v16807_v53  ;;  %v11294_v26 = vadd.f32 %v16162_v32, %v8770_v6  ;;  %v8772_v19 = vpop.f32.mrb[231].mxu1  ;;  %v9374_v57 = vcombine.high %v9082_v59, %v9082_v59  ;;  %v9381_v33 = vrot.slane %v9082_v59, %v15895_v10 }
 0xa0f   : > { %v9397_v63 = vrot.slane %v9083_v45, %v15895_v10  ;;  %v9371_v56 = vrot.slane %v9357_v52, %v15895_v10  ;;  %v9372_v58 = vcombine.high %v9364_v13, %v9364_v13  ;;  %v10715_v36 = vrot.slane %v9364_v13, 9 }
 0xa10   : > { %v16246_v9 = vadd.f32 %v11294_v26, %v16808_v20  ;;  %v9388_v40 = vrot.slane %v9374_v57, %v15895_v10  ;;  %v9389_v62 = vcombine.high %v9381_v33, %v9381_v33  ;;  %v9607_v18 = vrot.slane %v9381_v33, 7 }
 0xa11   : > { %v9373_v8 = vcombine.high %v9371_v56, %v9371_v56  ;;  %v9598_v29 = vrot.slane %v9372_v58, 7  ;;  %v9601_v42 = vrot.slane %v9371_v56, 7  ;;  %v9619_v7 = vrot.slane %v9397_v63, 7 }
 0xa12   : > { %v9390_v39 = vcombine.high %v9388_v40, %v9388_v40  ;;  %v9609_v24 = vrot.slane %v9607_v18, 2  ;;  %v9610_v41 = vrot.slane %v9389_v62, 7  ;;  %v9613_v12 = vrot.slane %v9388_v40, 7 }
 0xa13   : > { %v8775_v47 = vpop.f32.mrb[232].mxu1  ;;  %v9599_v46 = vsel %vm15905_vm13, %v10715_v36, %v9598_v29  ;;  %v9600_v31 = vrot.slane %v9598_v29, 2  ;;  %v9603_v37 = vrot.slane %v9601_v42, 2  ;;  %v9604_v60 = vrot.slane %v9373_v8, 7 }
 0xa14   : > { %v8777_v21 = vpop.f32.mrb[233].mxu1  ;;  %v10765_v11 = vrot.slane %v9599_v46, 9  ;;  %v9611_v54 = vsel %vm15905_vm13, %v9609_v24, %v9610_v41  ;;  %v9612_v55 = vrot.slane %v9610_v41, 2  ;;  %v9615_v25 = vrot.slane %v9613_v12, 2 }
 0xa15   : > { %v8778_v51 = vpop.f32.mrb[234].mxu1  ;;  %v9602_v4 = vsel %vm15905_vm13, %v9600_v31, %v9601_v42  ;;  %v9605_v3 = vsel %vm15905_vm13, %v9603_v37, %v9604_v60  ;;  %v9606_v44 = vrot.slane %v9604_v60, 2  ;;  %v9616_v61 = vrot.slane %v9390_v39, 7 }
 0xa16   : > { %v8780_v27 = vpop.f32.mrb[235].mxu1  ;;  %v10766_v38 = vrot.slane %v9602_v4, 9  ;;  %v10767_v34 = vrot.slane %v9605_v3, 9  ;;  %v9950_v22 = vmax.f32 %v9599_v46, %v10765_v11  ;;  %v9614_v49 = vsel %vm15905_vm13, %v9612_v55, %v9613_v12 }
 0xa17   : > { %v9608_v35 = vsel %vm15905_vm13, %v9606_v44, %v9607_v18  ;;  %v9617_v1 = vsel %vm15905_vm13, %v9615_v25, %v9616_v61  ;;  %v9618_v43 = vrot.slane %v9616_v61, 2  ;;  %v10769_v15 = vrot.slane %v9611_v54, 9 }
 0xa18   : > { %v9951_v2 = vmax.f32 %v9602_v4, %v10766_v38  ;;  %v9952_v50 = vmax.f32 %v9605_v3, %v10767_v34  ;;  %v10225_v5 = vrot.slane %v9950_v22, %v15911_v14  ;;  %v10768_v0 = vrot.slane %v9608_v35, 9 }
 0xa19   : > { %v10770_v6 = vrot.slane %v9614_v49, 9  ;;  %v10771_v59 = vrot.slane %v9617_v1, 9  ;;  %v9954_v45 = vmax.f32 %v9611_v54, %v10769_v15  ;;  %v9620_v53 = vsel %vm15905_vm13, %v9618_v43, %v9619_v7 }
 0xa1a   : > { %v10229_v19 = vrot.slane %v9951_v2, %v15911_v14  ;;  %v10233_v52 = vrot.slane %v9952_v50, %v15911_v14  ;;  %v9953_v13 = vmax.f32 %v9608_v35, %v10768_v0  ;;  %v10772_v57 = vrot.slane %v9620_v53, 9 }
 0xa1b   : > { %v8783_v26 = vpop.f32.mrb[236].mxu1  ;;  %v9955_v63 = vmax.f32 %v9614_v49, %v10770_v6  ;;  %v9956_v56 = vmax.f32 %v9617_v1, %v10771_v59  ;;  %v10241_v58 = vrot.slane %v9954_v45, %v15911_v14  ;;  %v11295_v20 = vadd.f32 %v16162_v32, %v8775_v47 }
 0xa1c   : > { %v8785_v33 = vpop.f32.mrb[237].mxu1  ;;  %v10332_v40 = vsel %vm10286_vm14, %v10229_v19, %v10225_v5  ;;  %v10237_v62 = vrot.slane %v9953_v13, %v15911_v14  ;;  %v9957_v18 = vmax.f32 %v9620_v53, %v10772_v57  ;;  %v11296_v8 = vadd.f32 %v16162_v32, %v8778_v51 }
 0xa1d   : > { %v8786_v36 = vpop.f32.mrb[238].mxu1  ;;  %v10245_v42 = vrot.slane %v9955_v63, %v15911_v14  ;;  %v10249_v7 = vrot.slane %v9956_v56, %v15911_v14  ;;  %v10333_v39 = vsel %vm9440_vm8, %v10233_v52, %v10332_v40  ;;  %v9001_v24 = vadd.f32 %v11295_v20, %v15994_v28 }
 0xa1e   : > { %v8788_v29 = vpop.f32.mrb[239].mxu1  ;;  %v10334_v41 = vsel %vm10289_vm15, %v10237_v62, %v10333_v39  ;;  %v10253_v47 = vrot.slane %v9957_v18, %v15911_v14  ;;  %v9004_v12 = vadd.f32 %v11296_v8, %v16002_v17  ;;  %v11297_v21 = vadd.f32 %v16162_v32, %v8783_v26 }
 0xa1f   : > { %v10335_v46 = vsel %vm9442_vm10, %v10241_v58, %v10334_v41  ;;  %v11298_v31 = vadd.f32 %v16162_v32, %v8786_v36  ;;  %v9057_v60 = vmax.f32 %v16238_v30, 0.0  ;;  %v9058_v17 = vmax.f32 %v16246_v9, 0.0 }
 0xa20   : > { %v10336_v37 = vsel %vm10292_vm0, %v10245_v42, %v10335_v46  ;;  %v9060_v51 = vmax.f32 %v9004_v12, 0.0  ;;  %v9009_v28 = vadd.f32 %v11297_v21, %v15987_v16  ;;  %v9059_v4 = vmax.f32 %v9001_v24, 0.0 }
 0xa21   : > { %v10337_v11 = vsel %vm9444_vm11, %v10249_v7, %v10336_v37  ;;  %v9012_v54 = vadd.f32 %v11298_v31, %v15997_v48 }
 0xa22   : > { %v10338_v55 = vsel %vm10295_vm1, %v10253_v47, %v10337_v11  ;;  %v9084_v25 = vmax.f32 %v9057_v60, %v9060_v51  ;;  %v9061_v27 = vmax.f32 %v9009_v28, 0.0 }
 0xa23   : > { %10360 = vst [vmem:[%s15961_s13 + $0x30] sm:$0xff] %v10338_v55  ;;  %v9062_v32 = vmax.f32 %v9012_v54, 0.0 }
 0xa24   : > { %v9398_v3 = vcombine.high %v9084_v25, %v9084_v25  ;;  %v9405_v44 = vrot.slane %v9084_v25, %v15895_v10  ;;  %v9085_v30 = vmax.f32 %v9058_v17, %v9061_v27 }
 0xa25   : > { %v9086_v61 = vmax.f32 %v9059_v4, %v9062_v32 }
 0xa26   : > { %v9412_v16 = vrot.slane %v9398_v3, %v15895_v10  ;;  %v9413_v38 = vcombine.high %v9405_v44, %v9405_v44  ;;  %v9415_v34 = vcombine.high %v9085_v30, %v9085_v30  ;;  %v10716_v22 = vrot.slane %v9405_v44, 9 }
 0xa27   : > { %v9422_v48 = vrot.slane %v9085_v30, %v15895_v10  ;;  %v9438_v49 = vrot.slane %v9086_v61, %v15895_v10 }
 0xa28   : > { %v9414_v9 = vcombine.high %v9412_v16, %v9412_v16  ;;  %v9623_v35 = vrot.slane %v9413_v38, 7  ;;  %v9626_v1 = vrot.slane %v9412_v16, 7  ;;  %v9429_v43 = vrot.slane %v9415_v34, %v15895_v10 }
 0xa29   : > { %v9430_v15 = vcombine.high %v9422_v48, %v9422_v48  ;;  %v9632_v2 = vrot.slane %v9422_v48, 7  ;;  %v9644_v50 = vrot.slane %v9438_v49, 7 }
 0xa2a   : > { %v9624_v5 = vsel %vm15905_vm13, %v10716_v22, %v9623_v35  ;;  %v9625_v0 = vrot.slane %v9623_v35, 2  ;;  %v9628_v6 = vrot.slane %v9626_v1, 2  ;;  %v9629_v59 = vrot.slane %v9414_v9, 7 }
 0xa2b   : > { %v10773_v45 = vrot.slane %v9624_v5, 9  ;;  %v9431_v53 = vcombine.high %v9429_v43, %v9429_v43  ;;  %v9634_v26 = vrot.slane %v9632_v2, 2  ;;  %v9635_v19 = vrot.slane %v9430_v15, 7 }
 0xa2c   : > { %v9627_v52 = vsel %vm15905_vm13, %v9625_v0, %v9626_v1  ;;  %v9630_v13 = vsel %vm15905_vm13, %v9628_v6, %v9629_v59  ;;  %v9631_v10 = vrot.slane %v9629_v59, 2  ;;  %v9638_v57 = vrot.slane %v9429_v43, 7 }
 0xa2d   : > { %v10774_v33 = vrot.slane %v9627_v52, 9  ;;  %v10775_v63 = vrot.slane %v9630_v13, 9  ;;  %v9958_v56 = vmax.f32 %v9624_v5, %v10773_v45  ;;  %v9636_v58 = vsel %vm15905_vm13, %v9634_v26, %v9635_v19 }
 0xa2e   : > { %v9633_v20 = vsel %vm15905_vm13, %v9631_v10, %v9632_v2  ;;  %v9637_v36 = vrot.slane %v9635_v19, 2  ;;  %v9640_v40 = vrot.slane %v9638_v57, 2  ;;  %v9641_v62 = vrot.slane %v9431_v53, 7 }
 0xa2f   : > { %v9959_v18 = vmax.f32 %v9627_v52, %v10774_v33  ;;  %v9960_v8 = vmax.f32 %v9630_v13, %v10775_v63  ;;  %v10257_v29 = vrot.slane %v9958_v56, %v15911_v14  ;;  %v10776_v42 = vrot.slane %v9633_v20, 9 }
 0xa30   : > { %v9639_v7 = vsel %vm15905_vm13, %v9637_v36, %v9638_v57  ;;  %v9642_v39 = vsel %vm15905_vm13, %v9640_v40, %v9641_v62  ;;  %v9643_v24 = vrot.slane %v9641_v62, 2  ;;  %v10777_v41 = vrot.slane %v9636_v58, 9 }
 0xa31   : > { %v10261_v47 = vrot.slane %v9959_v18, %v15911_v14  ;;  %v10265_v12 = vrot.slane %v9960_v8, %v15911_v14  ;;  %v10778_v21 = vrot.slane %v9639_v7, 9  ;;  %v10779_v46 = vrot.slane %v9642_v39, 9 }
 0xa32   : > { %v9961_v31 = vmax.f32 %v9633_v20, %v10776_v42  ;;  %v9962_v37 = vmax.f32 %v9636_v58, %v10777_v41  ;;  %v9645_v60 = vsel %vm15905_vm13, %v9643_v24, %v9644_v50 }
 0xa33   : > { %v10339_v51 = vsel %vm10286_vm14, %v10261_v47, %v10257_v29  ;;  %v9963_v28 = vmax.f32 %v9639_v7, %v10778_v21  ;;  %v9964_v11 = vmax.f32 %v9642_v39, %v10779_v46  ;;  %v10780_v54 = vrot.slane %v9645_v60, 9 }
 0xa34   : > { %v10340_v55 = vsel %vm9440_vm8, %v10265_v12, %v10339_v51  ;;  %v10269_v17 = vrot.slane %v9961_v31, %v15911_v14  ;;  %v10273_v25 = vrot.slane %v9962_v37, %v15911_v14 }
 0xa35   : > { %v10277_v27 = vrot.slane %v9963_v28, %v15911_v14  ;;  %v10281_v4 = vrot.slane %v9964_v11, %v15911_v14  ;;  %v9965_v23 = vmax.f32 %v9645_v60, %v10780_v54 }
 0xa36   : > { %v10341_v32 = vsel %vm10289_vm15, %v10269_v17, %v10340_v55 }
 0xa37   : > { %v10342_v3 = vsel %vm9442_vm10, %v10273_v25, %v10341_v32  ;;  %v10285_v44 = vrot.slane %v9965_v23, %v15911_v14 }
 0xa38   : > { %v10343_v30 = vsel %vm10292_vm0, %v10277_v27, %v10342_v3 }
 0xa39   : > { %v10344_v61 = vsel %vm9444_vm11, %v10281_v4, %v10343_v30 }
 0xa3a   : > { %v10345_v16 = vsel %vm10295_vm1, %v10285_v44, %v10344_v61 }
 0xa3b   : > { %10361 = vst [vmem:[%s15961_s13 + $0x38] sm:$0xff] %v10345_v16 }
 0xa3c   : > { %12690 = shalt.err (!%p12687_p4)
}
 0xa3d   : > { %s12691_s8 = scalar_lea.hbm %s16330_s11, 1024  ;;  %s12695_s15 = scalar_lea.hbm %s16386_s7, 2048 }
 0xa3e   : > { %p12692_p9 = scmp.ne.s32.totalorder %s16330_s11, %s12691_s8  ;;  %p12696_p8 = scmp.lt.u32.totalorder %s16330_s11, %s16386_s7 }
 0xa3f   : > { %p12697_p13 = scmp.lt.u32.totalorder %s12695_s15, %s12691_s8  ;;  %p12699_p10 = scmp.lt.u32.totalorder %s12691_s8, %s16330_s11 }
 0xa40   : > { %p12693_p0 = pnand %p12692_p9, %p12963_p5 }
 0xa41   : > { %p12698_p6 = por %p12697_p13, %p12696_p8 }
 0xa42   : > { %p12694_p11 = pneg %p12693_p0 }
 0xa43   : > { %p12700_p3 = por %p12699_p10, %p12698_p6 }
 0xa45   : > { %p12701_p7 = pnand %p12700_p3, %p12694_p11 }
 0xa47   : > { %12704 = shalt.err (!%p12701_p7)
}
 0xa48   : > { %s12767_s23 = smov 128   ;;  %s12768_s29 = smov 8  }
 0xa49   : > { %12084 = dma.vmem_to_hbm [thread:$0]  (%p12963_p5), %s16332_s9, 1024, %s16330_s11, %s10363_s28, %s12767_s23, %s12767_s23, %s12768_s29  }
 0xa4a PF: > { %s16809_s14 = sld [smem:[#allocation17_spill]]  ;;  %s10391_s16 = sand.u32 1, %s12739_s24  }
 0xa4b   : > { %p16811_p1 = scmp.ge.s32.totalorder %s12751_s27, 2  ;;  %s10392_s10 = scalar_lea.sflag [#allocation6], %s10391_s16 }
 0xa50   : > { %p16810_p12 = scmp.ne.s32.totalorder %s16809_s14, 0 }
 0xa52   : > { %p12101_p2 = pnand %p16811_p1, %p16810_p12 }
 0xa54   : > { %12734 = dma.done.wait (!%p12101_p2), %s10392_s10, 1024  }
 0xa55   : > { %12736 = vsyncadd (!%p12101_p2), %s10392_s10, 4294966272  ;;  %p22_p4 = scmp.ge.s32.totalorder %s12949_s22, 4   ;;  %s16812_s24 = smov %s12743_s25 }
 0xa56   : > { %s16813_s25 = smov %s12747_s26  ;;  %s16814_s26 = smov %s12959_s18 }
 0xa57   : > { %s16815_s27 = smov %s12949_s22  ;;  %24 = sbr.rel (!%p22_p4) target bundleno = 7 (0x7), region = 105 }
 0xa5e   :  { %10397 = vsyncpa [#allocation5], 1 }
 0xa5f   :  { %10399 = vsyncpa [#allocation5 + $0x1], 1 }
 0xa60   :  { %10400 = vsyncpa [#allocation8], 1 }
 0xa61   :  { %10401 = vsyncpa [#allocation11], 1 }
 0xa62   :  { %10402 = vsyncpa [#allocation6], 1 }
 0xa63   :  { %10404 = vsyncpa [#allocation6 + $0x1], 1 }

</bundles_post_ra>
